<compile_context>
chip_gen: v7x
topology: tpu7x:2x2x1
jax: 0.10.0
libtpu: 0.0.40
codegen_flags: <defaults>
</compile_context>

<pallas_src>
import functools

import jax
import jax.numpy as jnp
import numpy as np
from jax.experimental import pallas as pl
from jax.experimental.pallas import tpu as pltpu


def _round_up(x, m):
    return ((x + m - 1) // m) * m


# --------------------------------------------------------------------------
# Fused kernel: all LSTM layers + dense/sigmoid head in one grid
# --------------------------------------------------------------------------
def _make_fused_kernel(n_layers, t_tile, b_pad, h_pad):
    nw = 3 * n_layers  # (wih, whh, bias) per layer

    def kernel(x_ref, *args):
        # args: [wih_0, whh_0, b_0, ..., lens, wd, bd,  feats, scores,  h_sc, c_sc]
        w_refs = args[:nw]
        lens_ref = args[nw]
        wd_ref = args[nw + 1]
        bd_ref = args[nw + 2]
        feats_ref = args[nw + 3]
        scores_ref = args[nw + 4]
        h_sc = args[nw + 5]
        c_sc = args[nw + 6]

        t0 = pl.program_id(0) * t_tile

        @pl.when(pl.program_id(0) == 0)
        def _():
            h_sc[...] = jnp.zeros(h_sc.shape, h_sc.dtype)
            c_sc[...] = jnp.zeros(c_sc.shape, c_sc.dtype)

        # Hoisted packed-sequence offset: per-step validity is just (rel > i).
        rel = lens_ref[...] - t0                        # (B_pad, 1) int32

        layer_in = x_ref[...]                           # (t_tile*B_pad, d_in) bf16
        h_last = None
        for l in range(n_layers):
            wih = w_refs[3 * l][...]                    # (d_in, 4H_pad) bf16
            whh = w_refs[3 * l + 1][...]                # (H_pad, 4H_pad) bf16
            bias = w_refs[3 * l + 2][...]               # (1, 4H_pad) f32

            # Hoisted input projection for all t_tile steps of this tile
            # (one MXU-filling matmul, M = t_tile*B_pad).
            gx = jnp.dot(layer_in, wih,
                         preferred_element_type=jnp.float32) + bias

            # Recurrence: h/c carried as register values; scratch touched once.
            h = h_sc[l]
            c = c_sc[l]
            outs = []
            for i in range(t_tile):
                g = gx[i * b_pad:(i + 1) * b_pad, :] + jnp.dot(
                    h.astype(jnp.bfloat16), whh,
                    preferred_element_type=jnp.float32)
                # 128-lane-aligned gate slices (H_pad is a multiple of 128).
                i_g = jax.nn.sigmoid(g[:, 0 * h_pad:1 * h_pad])
                f_g = jax.nn.sigmoid(g[:, 1 * h_pad:2 * h_pad])
                g_g = jnp.tanh(g[:, 2 * h_pad:3 * h_pad])
                o_g = jax.nn.sigmoid(g[:, 3 * h_pad:4 * h_pad])
                c_new = f_g * c + i_g * g_g
                h_new = o_g * jnp.tanh(c_new)
                # packed-sequence semantics: freeze state once t >= seq_len[b]
                valid = rel > i                          # (B_pad, 1) bool
                h = jnp.where(valid, h_new, h)
                c = jnp.where(valid, c_new, c)
                outs.append(h)
            h_sc[l] = h
            c_sc[l] = c
            h_last = h
            if l + 1 < n_layers:
                # Next layer's input tile stays on-chip (no HBM round trip).
                layer_in = jnp.concatenate(outs, axis=0).astype(jnp.bfloat16)

        @pl.when(pl.program_id(0) == pl.num_programs(0) - 1)
        def _():
            feats_ref[...] = h_last
            logits = jnp.dot(h_last.astype(jnp.bfloat16), wd_ref[...],
                             preferred_element_type=jnp.float32) + bd_ref[...]
            scores_ref[...] = jax.nn.sigmoid(logits)

    return kernel


# --------------------------------------------------------------------------
# Weight padding helpers (gate blocks aligned to H_pad; zero padding is inert)
# --------------------------------------------------------------------------
def _pad_gate_matrix(w, h, h_pad, d, d_pad):
    """w: (4h, d) torch layout -> (d_pad, 4*h_pad) transposed bf16."""
    w4 = w.astype(jnp.float32).reshape(4, h, d)
    w4 = jnp.pad(w4, ((0, 0), (0, h_pad - h), (0, d_pad - d)))
    return jnp.transpose(w4.reshape(4 * h_pad, d_pad)).astype(jnp.bfloat16)


def _pad_gate_bias(b, h, h_pad):
    b4 = b.astype(jnp.float32).reshape(4, h)
    b4 = jnp.pad(b4, ((0, 0), (0, h_pad - h)))
    return b4.reshape(1, 4 * h_pad)


# --------------------------------------------------------------------------
# Full forward (mirrors LSTM_Medfuse.forward at inference)
# --------------------------------------------------------------------------
def lstm_medfuse_forward(params, x, seq_lengths, *, single_buffer_weights=True):
    """x: (B, T, input_dim) batch-first; seq_lengths: (B,) int.
    Returns (scores (B, num_classes), feats (B, hidden_dim))."""
    B, T, D = x.shape
    H = params["lstm_layers"][0]["w_hh"].shape[1]
    C = params["dense_w"].shape[0]
    n_layers = len(params["lstm_layers"])

    # lane/sublane-dense padded sizes
    B_pad = _round_up(B, 8)
    H_pad = _round_up(H, 128)
    C_pad = _round_up(C, 128)
    D_pad = _round_up(D, 128)

    # MXU-filling time tile: M = t_tile * B_pad >= 256 when T allows.
    t_tile = max(1, min(T, pl.cdiv(256, B_pad)))
    if (t_tile * B_pad) % 16 != 0 and t_tile > 1:   # keep bf16 sublane tiling clean
        t_tile = _round_up(t_tile, 2)
    T_pad = _round_up(T, t_tile)
    grid = (T_pad // t_tile,)

    # batch-first -> time-major, zero-padded, flattened to lane-dense 2D, bf16.
    x_tm = jnp.transpose(x, (1, 0, 2)).astype(jnp.float32)
    x_tm = jnp.pad(x_tm, ((0, T_pad - T), (0, B_pad - B), (0, D_pad - D)))
    x2 = x_tm.reshape(T_pad * B_pad, D_pad).astype(jnp.bfloat16)

    lens2 = jnp.pad(seq_lengths.astype(jnp.int32),
                    (0, B_pad - B)).reshape(B_pad, 1)

    def const_spec(shape):
        # Grid-invariant blocks: single-buffer them (no point double-buffering
        # constant weights; at realistic H double-buffered weights blow VMEM).
        if single_buffer_weights:
            return pl.BlockSpec(shape, lambda t: (0, 0),
                                pipeline_mode=pl.Buffered(buffer_count=1))
        return pl.BlockSpec(shape, lambda t: (0, 0))

    weight_args = []
    in_specs = [pl.BlockSpec((t_tile * B_pad, D_pad), lambda t: (t, 0))]  # x tile
    weight_bytes = 0
    d_in, d_in_pad = D, D_pad
    for lp in params["lstm_layers"]:
        wih_t = _pad_gate_matrix(lp["w_ih"], H, H_pad, d_in, d_in_pad)
        whh_t = _pad_gate_matrix(lp["w_hh"], H, H_pad, H, H_pad)
        bias = _pad_gate_bias(lp["b_ih"] + lp["b_hh"], H, H_pad)
        weight_args += [wih_t, whh_t, bias]
        in_specs += [const_spec((d_in_pad, 4 * H_pad)),
                     const_spec((H_pad, 4 * H_pad)),
                     const_spec((1, 4 * H_pad))]
        weight_bytes += wih_t.size * 2 + whh_t.size * 2 + bias.size * 4
        d_in, d_in_pad = H, H_pad

    wd_t = jnp.pad(jnp.transpose(params["dense_w"]).astype(jnp.float32),
                   ((0, H_pad - H), (0, C_pad - C))).astype(jnp.bfloat16)
    bd = jnp.pad(params["dense_b"].astype(jnp.float32),
                 (0, C_pad - C)).reshape(1, C_pad)
    weight_args += [lens2, wd_t, bd]
    in_specs += [const_spec((B_pad, 1)),          # seq lengths
                 const_spec((H_pad, C_pad)),      # dense W^T
                 const_spec((1, C_pad))]          # dense b
    weight_bytes += lens2.size * 4 + wd_t.size * 2 + bd.size * 4

    # Explicit scoped-VMEM budget: weights (single/double buffered) + x tile
    # (double-buffered) + h/c scratch + gate/inter-layer working set + outputs.
    wb_mult = 1 if single_buffer_weights else 2
    est = (wb_mult * weight_bytes
           + 2 * (t_tile * B_pad * D_pad) * 2
           + 2 * n_layers * B_pad * H_pad * 4
           + 3 * (t_tile * B_pad * 4 * H_pad) * 4
           + 2 * (B_pad * H_pad + B_pad * C_pad) * 4)
    vmem_limit = int(min(64 * 1024 * 1024, max(32 * 1024 * 1024, 2 * est)))

    kernel = _make_fused_kernel(n_layers, t_tile, B_pad, H_pad)

    feats_p, scores_p = pl.pallas_call(
        kernel,
        out_shape=(jax.ShapeDtypeStruct((B_pad, H_pad), jnp.float32),
                   jax.ShapeDtypeStruct((B_pad, C_pad), jnp.float32)),
        grid_spec=pltpu.PrefetchScalarGridSpec(
            num_scalar_prefetch=0,
            grid=grid,
            in_specs=in_specs,
            out_specs=(pl.BlockSpec((B_pad, H_pad), lambda t: (0, 0)),
                       pl.BlockSpec((B_pad, C_pad), lambda t: (0, 0))),
            scratch_shapes=[
                pltpu.VMEM((n_layers, B_pad, H_pad), jnp.float32),  # h state
                pltpu.VMEM((n_layers, B_pad, H_pad), jnp.float32),  # c state
            ],
        ),
        compiler_params=pltpu.CompilerParams(
            dimension_semantics=("arbitrary",),   # time recurrence is sequential
            vmem_limit_bytes=vmem_limit),
    )(x2, *weight_args)

    feats = feats_p[:B, :H]
    scores = scores_p[:B, :C]
    # self.do (nn.Dropout) is identity at inference.
    # TODO(synk): training-mode dropout (p=0.3) on feats not implemented.
    return scores, feats


# --------------------------------------------------------------------------
# Deterministic parameter construction (mirrors __init__/initialize_weights)
# --------------------------------------------------------------------------
def init_params(key, input_dim, hidden_dim, num_classes, layers):
    xavier = jax.nn.initializers.xavier_uniform()
    ortho = jax.nn.initializers.orthogonal()
    lstm_layers = []
    d_in = input_dim
    for _ in range(layers):
        key, k1, k2 = jax.random.split(key, 3)
        lstm_layers.append({
            "w_ih": xavier(k1, (4 * hidden_dim, d_in), jnp.float32),
            "w_hh": ortho(k2, (4 * hidden_dim, hidden_dim), jnp.float32),
            "b_ih": jnp.zeros((4 * hidden_dim,), jnp.float32),
            "b_hh": jnp.zeros((4 * hidden_dim,), jnp.float32),
        })
        d_in = hidden_dim
    key, kd = jax.random.split(key)
    return {
        "lstm_layers": lstm_layers,
        "dense_w": xavier(kd, (num_classes, hidden_dim), jnp.float32),
        "dense_b": jnp.zeros((num_classes,), jnp.float32),
    }


# --------------------------------------------------------------------------
# Pure-JAX reference (packed-sequence semantics via state freezing)
# --------------------------------------------------------------------------
def _reference_forward(params, x, seq_lengths):
    B, T, _ = x.shape
    H = params["lstm_layers"][0]["w_hh"].shape[1]
    lens = seq_lengths.astype(jnp.int32)
    h_seq = jnp.transpose(x, (1, 0, 2)).astype(jnp.float32)
    for lp in params["lstm_layers"]:
        wih, whh = lp["w_ih"], lp["w_hh"]
        b = lp["b_ih"] + lp["b_hh"]
        h = jnp.zeros((B, H), jnp.float32)
        c = jnp.zeros((B, H), jnp.float32)
        outs = []
        for t in range(T):
            g = h_seq[t] @ wih.T + h @ whh.T + b
            i_g = jax.nn.sigmoid(g[:, 0 * H:1 * H])
            f_g = jax.nn.sigmoid(g[:, 1 * H:2 * H])
            g_g = jnp.tanh(g[:, 2 * H:3 * H])
            o_g = jax.nn.sigmoid(g[:, 3 * H:4 * H])
            c_new = f_g * c + i_g * g_g
            h_new = o_g * jnp.tanh(c_new)
            valid = (lens > t)[:, None]
            h = jnp.where(valid, h_new, h)
            c = jnp.where(valid, c_new, c)
            outs.append(h)
        h_seq = jnp.stack(outs, axis=0)
    feats = h_seq[-1]
    scores = jax.nn.sigmoid(feats @ params["dense_w"].T + params["dense_b"])
    return scores, feats


# --------------------------------------------------------------------------
if __name__ == "__main__":
    B, T, INPUT_DIM, HIDDEN_DIM, NUM_CLASSES, LAYERS = 4, 8, 16, 32, 1, 2

    key = jax.random.PRNGKey(0)
    key, kx = jax.random.split(key)
    x = jax.random.normal(kx, (B, T, INPUT_DIM), dtype=jnp.float32)
    seq_lengths = jnp.array([8, 5, 3, 6], dtype=jnp.int32)

    params = init_params(key, INPUT_DIM, HIDDEN_DIM, NUM_CLASSES, LAYERS)

    try:
        scores, feats = jax.jit(lstm_medfuse_forward)(params, x, seq_lengths)
        jax.block_until_ready((scores, feats))
    except Exception:
        # Fallback for jax builds whose TPU pallas_call lowering does not accept
        # pipeline_mode=pl.Buffered: same fused kernel, default buffering.
        fwd = functools.partial(lstm_medfuse_forward, single_buffer_weights=False)
        scores, feats = jax.jit(fwd)(params, x, seq_lengths)
        jax.block_until_ready((scores, feats))

    assert scores.shape == (B, NUM_CLASSES)
    assert feats.shape == (B, HIDDEN_DIM)

    ref_scores, ref_feats = _reference_forward(params, x, seq_lengths)
    np.testing.assert_allclose(np.asarray(feats), np.asarray(ref_feats),
                               atol=2e-2, rtol=2e-2)
    np.testing.assert_allclose(np.asarray(scores), np.asarray(ref_scores),
                               atol=2e-2, rtol=2e-2)

    print("KERNEL_OK")
</pallas_src>

<mosaic_0001>
module attributes {stable_mosaic.version = 11 : i64} {
  func.func @kernel(%arg0: i32, %arg1: memref<64x128xbf16, #tpu.memory_space<vmem>>, %arg2: memref<128x512xbf16, #tpu.memory_space<vmem>>, %arg3: memref<128x512xbf16, #tpu.memory_space<vmem>>, %arg4: memref<1x512xf32, #tpu.memory_space<vmem>>, %arg5: memref<128x512xbf16, #tpu.memory_space<vmem>>, %arg6: memref<128x512xbf16, #tpu.memory_space<vmem>>, %arg7: memref<1x512xf32, #tpu.memory_space<vmem>>, %arg8: memref<8x1xi32, #tpu.memory_space<vmem>>, %arg9: memref<128x128xbf16, #tpu.memory_space<vmem>>, %arg10: memref<1x128xf32, #tpu.memory_space<vmem>>, %arg11: memref<8x128xf32, #tpu.memory_space<vmem>>, %arg12: memref<8x128xf32, #tpu.memory_space<vmem>>, %arg13: memref<2x8x128xf32, #tpu.memory_space<vmem>>, %arg14: memref<2x8x128xf32, #tpu.memory_space<vmem>>) attributes {dimension_semantics = [#tpu.dimension_semantics<arbitrary>], iteration_bounds = array<i64: 1>, scalar_prefetch = 0 : i64, scratch_operands = 2 : i64, tpu.core_type = #tpu.core_type<tc>, window_params = [{transform_indices = @transform_0, window_bounds = array<i64: 64, 128>}, {pipeline_mode = #tpu.pipeline_mode<synchronous>, transform_indices = @transform_1, window_bounds = array<i64: 128, 512>}, {pipeline_mode = #tpu.pipeline_mode<synchronous>, transform_indices = @transform_2, window_bounds = array<i64: 128, 512>}, {pipeline_mode = #tpu.pipeline_mode<synchronous>, transform_indices = @transform_3, window_bounds = array<i64: 1, 512>}, {pipeline_mode = #tpu.pipeline_mode<synchronous>, transform_indices = @transform_4, window_bounds = array<i64: 128, 512>}, {pipeline_mode = #tpu.pipeline_mode<synchronous>, transform_indices = @transform_5, window_bounds = array<i64: 128, 512>}, {pipeline_mode = #tpu.pipeline_mode<synchronous>, transform_indices = @transform_6, window_bounds = array<i64: 1, 512>}, {pipeline_mode = #tpu.pipeline_mode<synchronous>, transform_indices = @transform_7, window_bounds = array<i64: 8, 1>}, {pipeline_mode = #tpu.pipeline_mode<synchronous>, transform_indices = @transform_8, window_bounds = array<i64: 128, 128>}, {pipeline_mode = #tpu.pipeline_mode<synchronous>, transform_indices = @transform_9, window_bounds = array<i64: 1, 128>}, {pipeline_mode = #tpu.pipeline_mode<synchronous>, transform_indices = @transform_10, window_bounds = array<i64: 8, 128>}, {pipeline_mode = #tpu.pipeline_mode<synchronous>, transform_indices = @transform_11, window_bounds = array<i64: 8, 128>}]} {
    %c8_i32 = arith.constant 8 : i32
    %0 = arith.muli %arg0, %c8_i32 : i32
    %c0_i32 = arith.constant 0 : i32
    %1 = arith.cmpi eq, %arg0, %c0_i32 : i32
    %2 = arith.extui %1 : i1 to i32
    %c0_i32_0 = arith.constant 0 : i32
    %3 = arith.cmpi ne, %2, %c0_i32_0 : i32
    scf.if %3 {
      %cst_115 = arith.constant 0.000000e+00 : f32
      %637 = vector.broadcast %cst_115 : f32 to vector<2x8x128xf32>
      %c0_116 = arith.constant 0 : index
      %c0_117 = arith.constant 0 : index
      %c0_118 = arith.constant 0 : index
      %638 = vector.load %arg13[%c0_116, %c0_117, %c0_118] : memref<2x8x128xf32, #tpu.memory_space<vmem>>, vector<2x8x128xf32>
      tpu.vector_store %arg13[%c0_116, %c0_117, %c0_118], %637 {strides = array<i32>} : memref<2x8x128xf32, #tpu.memory_space<vmem>>, vector<2x8x128xf32>,
      %cst_119 = arith.constant 0.000000e+00 : f32
      %639 = vector.broadcast %cst_119 : f32 to vector<2x8x128xf32>
      %c0_120 = arith.constant 0 : index
      %c0_121 = arith.constant 0 : index
      %c0_122 = arith.constant 0 : index
      %640 = vector.load %arg14[%c0_120, %c0_121, %c0_122] : memref<2x8x128xf32, #tpu.memory_space<vmem>>, vector<2x8x128xf32>
      tpu.vector_store %arg14[%c0_120, %c0_121, %c0_122], %639 {strides = array<i32>} : memref<2x8x128xf32, #tpu.memory_space<vmem>>, vector<2x8x128xf32>,
    } else {
    }
    %c0 = arith.constant 0 : index
    %c0_1 = arith.constant 0 : index
    %4 = vector.load %arg8[%c0, %c0_1] : memref<8x1xi32, #tpu.memory_space<vmem>>, vector<8x1xi32>
    %5 = vector.broadcast %0 : i32 to vector<8x1xi32>
    %6 = arith.subi %4, %5 : vector<8x1xi32>
    %c0_2 = arith.constant 0 : index
    %c0_3 = arith.constant 0 : index
    %7 = vector.load %arg1[%c0_2, %c0_3] : memref<64x128xbf16, #tpu.memory_space<vmem>>, vector<64x128xbf16>
    %c0_4 = arith.constant 0 : index
    %c0_5 = arith.constant 0 : index
    %8 = vector.load %arg2[%c0_4, %c0_5] : memref<128x512xbf16, #tpu.memory_space<vmem>>, vector<128x512xbf16>
    %c0_6 = arith.constant 0 : index
    %c0_7 = arith.constant 0 : index
    %9 = vector.load %arg3[%c0_6, %c0_7] : memref<128x512xbf16, #tpu.memory_space<vmem>>, vector<128x512xbf16>
    %c0_8 = arith.constant 0 : index
    %c0_9 = arith.constant 0 : index
    %10 = vector.load %arg4[%c0_8, %c0_9] : memref<1x512xf32, #tpu.memory_space<vmem>>, vector<1x512xf32>
    %cst = arith.constant dense<0.000000e+00> : vector<64x512xf32>
    %11 = tpu.matmul %7, %8, %cst {dimension_numbers = #tpu.dot_dimension_numbers<[1], [0], [0], [1], [0, 0, 1, 1], [], []>} : vector<64x128xbf16>, vector<128x512xbf16>, vector<64x512xf32> -> vector<64x512xf32>
    %12 = vector.broadcast %10 : vector<1x512xf32> to vector<64x512xf32>
    %13 = arith.addf %11, %12 : vector<64x512xf32>
    %c0_10 = arith.constant 0 : index
    %c0_11 = arith.constant 0 : index
    %c0_12 = arith.constant 0 : index
    %14 = vector.load %arg13[%c0_10, %c0_11, %c0_12] : memref<2x8x128xf32, #tpu.memory_space<vmem>>, vector<1x8x128xf32>
    %15 = vector.shape_cast %14 : vector<1x8x128xf32> to vector<8x128xf32>
    %c0_13 = arith.constant 0 : index
    %c0_14 = arith.constant 0 : index
    %c0_15 = arith.constant 0 : index
    %16 = vector.load %arg14[%c0_13, %c0_14, %c0_15] : memref<2x8x128xf32, #tpu.memory_space<vmem>>, vector<1x8x128xf32>
    %17 = vector.shape_cast %16 : vector<1x8x128xf32> to vector<8x128xf32>
    %18 = vector.extract_strided_slice %13 {offsets = [0, 0], sizes = [8, 512], strides = [1, 1]} : vector<64x512xf32> to vector<8x512xf32>
    %19 = arith.truncf %15 : vector<8x128xf32> to vector<8x128xbf16>
    %cst_16 = arith.constant dense<0.000000e+00> : vector<8x512xf32>
    %20 = tpu.matmul %19, %9, %cst_16 {dimension_numbers = #tpu.dot_dimension_numbers<[1], [0], [0], [1], [0, 0, 1, 1], [], []>} : vector<8x128xbf16>, vector<128x512xbf16>, vector<8x512xf32> -> vector<8x512xf32>
    %21 = arith.addf %18, %20 : vector<8x512xf32>
    %22 = vector.extract_strided_slice %21 {offsets = [0, 0], sizes = [8, 128], strides = [1, 1]} : vector<8x512xf32> to vector<8x128xf32>
    %23 = arith.negf %22 : vector<8x128xf32>
    %24 = math.exp %23 : vector<8x128xf32>
    %cst_17 = arith.constant 1.000000e+00 : f32
    %25 = vector.broadcast %cst_17 : f32 to vector<8x128xf32>
    %26 = arith.addf %25, %24 : vector<8x128xf32>
    %27 = arith.divf %25, %26 : vector<8x128xf32>
    %28 = vector.extract_strided_slice %21 {offsets = [0, 128], sizes = [8, 128], strides = [1, 1]} : vector<8x512xf32> to vector<8x128xf32>
    %29 = arith.negf %28 : vector<8x128xf32>
    %30 = math.exp %29 : vector<8x128xf32>
    %cst_18 = arith.constant 1.000000e+00 : f32
    %31 = vector.broadcast %cst_18 : f32 to vector<8x128xf32>
    %32 = arith.addf %31, %30 : vector<8x128xf32>
    %33 = arith.divf %31, %32 : vector<8x128xf32>
    %34 = vector.extract_strided_slice %21 {offsets = [0, 256], sizes = [8, 128], strides = [1, 1]} : vector<8x512xf32> to vector<8x128xf32>
    %35 = math.tanh %34 : vector<8x128xf32>
    %36 = vector.extract_strided_slice %21 {offsets = [0, 384], sizes = [8, 128], strides = [1, 1]} : vector<8x512xf32> to vector<8x128xf32>
    %37 = arith.negf %36 : vector<8x128xf32>
    %38 = math.exp %37 : vector<8x128xf32>
    %cst_19 = arith.constant 1.000000e+00 : f32
    %39 = vector.broadcast %cst_19 : f32 to vector<8x128xf32>
    %40 = arith.addf %39, %38 : vector<8x128xf32>
    %41 = arith.divf %39, %40 : vector<8x128xf32>
    %42 = arith.mulf %33, %17 : vector<8x128xf32>
    %43 = arith.mulf %27, %35 : vector<8x128xf32>
    %44 = arith.addf %42, %43 : vector<8x128xf32>
    %45 = math.tanh %44 : vector<8x128xf32>
    %46 = arith.mulf %41, %45 : vector<8x128xf32>
    %c0_i32_20 = arith.constant 0 : i32
    %47 = vector.broadcast %c0_i32_20 : i32 to vector<8x1xi32>
    %48 = arith.cmpi sgt, %6, %47 : vector<8x1xi32>
    %49 = vector.shape_cast %48 : vector<8x1xi1> to vector<8x1xi1>
    %50 = vector.broadcast %49 : vector<8x1xi1> to vector<8x128xi1>
    %51 = arith.select %50, %46, %15 : vector<8x128xi1>, vector<8x128xf32>
    %52 = vector.shape_cast %48 : vector<8x1xi1> to vector<8x1xi1>
    %53 = vector.broadcast %52 : vector<8x1xi1> to vector<8x128xi1>
    %54 = arith.select %53, %44, %17 : vector<8x128xi1>, vector<8x128xf32>
    %55 = vector.extract_strided_slice %13 {offsets = [8, 0], sizes = [8, 512], strides = [1, 1]} : vector<64x512xf32> to vector<8x512xf32>
    %56 = arith.truncf %51 : vector<8x128xf32> to vector<8x128xbf16>
    %cst_21 = arith.constant dense<0.000000e+00> : vector<8x512xf32>
    %57 = tpu.matmul %56, %9, %cst_21 {dimension_numbers = #tpu.dot_dimension_numbers<[1], [0], [0], [1], [0, 0, 1, 1], [], []>} : vector<8x128xbf16>, vector<128x512xbf16>, vector<8x512xf32> -> vector<8x512xf32>
    %58 = arith.addf %55, %57 : vector<8x512xf32>
    %59 = vector.extract_strided_slice %58 {offsets = [0, 0], sizes = [8, 128], strides = [1, 1]} : vector<8x512xf32> to vector<8x128xf32>
    %60 = arith.negf %59 : vector<8x128xf32>
    %61 = math.exp %60 : vector<8x128xf32>
    %cst_22 = arith.constant 1.000000e+00 : f32
    %62 = vector.broadcast %cst_22 : f32 to vector<8x128xf32>
    %63 = arith.addf %62, %61 : vector<8x128xf32>
    %64 = arith.divf %62, %63 : vector<8x128xf32>
    %65 = vector.extract_strided_slice %58 {offsets = [0, 128], sizes = [8, 128], strides = [1, 1]} : vector<8x512xf32> to vector<8x128xf32>
    %66 = arith.negf %65 : vector<8x128xf32>
    %67 = math.exp %66 : vector<8x128xf32>
    %cst_23 = arith.constant 1.000000e+00 : f32
    %68 = vector.broadcast %cst_23 : f32 to vector<8x128xf32>
    %69 = arith.addf %68, %67 : vector<8x128xf32>
    %70 = arith.divf %68, %69 : vector<8x128xf32>
    %71 = vector.extract_strided_slice %58 {offsets = [0, 256], sizes = [8, 128], strides = [1, 1]} : vector<8x512xf32> to vector<8x128xf32>
    %72 = math.tanh %71 : vector<8x128xf32>
    %73 = vector.extract_strided_slice %58 {offsets = [0, 384], sizes = [8, 128], strides = [1, 1]} : vector<8x512xf32> to vector<8x128xf32>
    %74 = arith.negf %73 : vector<8x128xf32>
    %75 = math.exp %74 : vector<8x128xf32>
    %cst_24 = arith.constant 1.000000e+00 : f32
    %76 = vector.broadcast %cst_24 : f32 to vector<8x128xf32>
    %77 = arith.addf %76, %75 : vector<8x128xf32>
    %78 = arith.divf %76, %77 : vector<8x128xf32>
    %79 = arith.mulf %70, %54 : vector<8x128xf32>
    %80 = arith.mulf %64, %72 : vector<8x128xf32>
    %81 = arith.addf %79, %80 : vector<8x128xf32>
    %82 = math.tanh %81 : vector<8x128xf32>
    %83 = arith.mulf %78, %82 : vector<8x128xf32>
    %c1_i32 = arith.constant 1 : i32
    %84 = vector.broadcast %c1_i32 : i32 to vector<8x1xi32>
    %85 = arith.cmpi sgt, %6, %84 : vector<8x1xi32>
    %86 = vector.shape_cast %85 : vector<8x1xi1> to vector<8x1xi1>
    %87 = vector.broadcast %86 : vector<8x1xi1> to vector<8x128xi1>
    %88 = arith.select %87, %83, %51 : vector<8x128xi1>, vector<8x128xf32>
    %89 = vector.shape_cast %85 : vector<8x1xi1> to vector<8x1xi1>
    %90 = vector.broadcast %89 : vector<8x1xi1> to vector<8x128xi1>
    %91 = arith.select %90, %81, %54 : vector<8x128xi1>, vector<8x128xf32>
    %92 = vector.extract_strided_slice %13 {offsets = [16, 0], sizes = [8, 512], strides = [1, 1]} : vector<64x512xf32> to vector<8x512xf32>
    %93 = arith.truncf %88 : vector<8x128xf32> to vector<8x128xbf16>
    %cst_25 = arith.constant dense<0.000000e+00> : vector<8x512xf32>
    %94 = tpu.matmul %93, %9, %cst_25 {dimension_numbers = #tpu.dot_dimension_numbers<[1], [0], [0], [1], [0, 0, 1, 1], [], []>} : vector<8x128xbf16>, vector<128x512xbf16>, vector<8x512xf32> -> vector<8x512xf32>
    %95 = arith.addf %92, %94 : vector<8x512xf32>
    %96 = vector.extract_strided_slice %95 {offsets = [0, 0], sizes = [8, 128], strides = [1, 1]} : vector<8x512xf32> to vector<8x128xf32>
    %97 = arith.negf %96 : vector<8x128xf32>
    %98 = math.exp %97 : vector<8x128xf32>
    %cst_26 = arith.constant 1.000000e+00 : f32
    %99 = vector.broadcast %cst_26 : f32 to vector<8x128xf32>
    %100 = arith.addf %99, %98 : vector<8x128xf32>
    %101 = arith.divf %99, %100 : vector<8x128xf32>
    %102 = vector.extract_strided_slice %95 {offsets = [0, 128], sizes = [8, 128], strides = [1, 1]} : vector<8x512xf32> to vector<8x128xf32>
    %103 = arith.negf %102 : vector<8x128xf32>
    %104 = math.exp %103 : vector<8x128xf32>
    %cst_27 = arith.constant 1.000000e+00 : f32
    %105 = vector.broadcast %cst_27 : f32 to vector<8x128xf32>
    %106 = arith.addf %105, %104 : vector<8x128xf32>
    %107 = arith.divf %105, %106 : vector<8x128xf32>
    %108 = vector.extract_strided_slice %95 {offsets = [0, 256], sizes = [8, 128], strides = [1, 1]} : vector<8x512xf32> to vector<8x128xf32>
    %109 = math.tanh %108 : vector<8x128xf32>
    %110 = vector.extract_strided_slice %95 {offsets = [0, 384], sizes = [8, 128], strides = [1, 1]} : vector<8x512xf32> to vector<8x128xf32>
    %111 = arith.negf %110 : vector<8x128xf32>
    %112 = math.exp %111 : vector<8x128xf32>
    %cst_28 = arith.constant 1.000000e+00 : f32
    %113 = vector.broadcast %cst_28 : f32 to vector<8x128xf32>
    %114 = arith.addf %113, %112 : vector<8x128xf32>
    %115 = arith.divf %113, %114 : vector<8x128xf32>
    %116 = arith.mulf %107, %91 : vector<8x128xf32>
    %117 = arith.mulf %101, %109 : vector<8x128xf32>
    %118 = arith.addf %116, %117 : vector<8x128xf32>
    %119 = math.tanh %118 : vector<8x128xf32>
    %120 = arith.mulf %115, %119 : vector<8x128xf32>
    %c2_i32 = arith.constant 2 : i32
    %121 = vector.broadcast %c2_i32 : i32 to vector<8x1xi32>
    %122 = arith.cmpi sgt, %6, %121 : vector<8x1xi32>
    %123 = vector.shape_cast %122 : vector<8x1xi1> to vector<8x1xi1>
    %124 = vector.broadcast %123 : vector<8x1xi1> to vector<8x128xi1>
    %125 = arith.select %124, %120, %88 : vector<8x128xi1>, vector<8x128xf32>
    %126 = vector.shape_cast %122 : vector<8x1xi1> to vector<8x1xi1>
    %127 = vector.broadcast %126 : vector<8x1xi1> to vector<8x128xi1>
    %128 = arith.select %127, %118, %91 : vector<8x128xi1>, vector<8x128xf32>
    %129 = vector.extract_strided_slice %13 {offsets = [24, 0], sizes = [8, 512], strides = [1, 1]} : vector<64x512xf32> to vector<8x512xf32>
    %130 = arith.truncf %125 : vector<8x128xf32> to vector<8x128xbf16>
    %cst_29 = arith.constant dense<0.000000e+00> : vector<8x512xf32>
    %131 = tpu.matmul %130, %9, %cst_29 {dimension_numbers = #tpu.dot_dimension_numbers<[1], [0], [0], [1], [0, 0, 1, 1], [], []>} : vector<8x128xbf16>, vector<128x512xbf16>, vector<8x512xf32> -> vector<8x512xf32>
    %132 = arith.addf %129, %131 : vector<8x512xf32>
    %133 = vector.extract_strided_slice %132 {offsets = [0, 0], sizes = [8, 128], strides = [1, 1]} : vector<8x512xf32> to vector<8x128xf32>
    %134 = arith.negf %133 : vector<8x128xf32>
    %135 = math.exp %134 : vector<8x128xf32>
    %cst_30 = arith.constant 1.000000e+00 : f32
    %136 = vector.broadcast %cst_30 : f32 to vector<8x128xf32>
    %137 = arith.addf %136, %135 : vector<8x128xf32>
    %138 = arith.divf %136, %137 : vector<8x128xf32>
    %139 = vector.extract_strided_slice %132 {offsets = [0, 128], sizes = [8, 128], strides = [1, 1]} : vector<8x512xf32> to vector<8x128xf32>
    %140 = arith.negf %139 : vector<8x128xf32>
    %141 = math.exp %140 : vector<8x128xf32>
    %cst_31 = arith.constant 1.000000e+00 : f32
    %142 = vector.broadcast %cst_31 : f32 to vector<8x128xf32>
    %143 = arith.addf %142, %141 : vector<8x128xf32>
    %144 = arith.divf %142, %143 : vector<8x128xf32>
    %145 = vector.extract_strided_slice %132 {offsets = [0, 256], sizes = [8, 128], strides = [1, 1]} : vector<8x512xf32> to vector<8x128xf32>
    %146 = math.tanh %145 : vector<8x128xf32>
    %147 = vector.extract_strided_slice %132 {offsets = [0, 384], sizes = [8, 128], strides = [1, 1]} : vector<8x512xf32> to vector<8x128xf32>
    %148 = arith.negf %147 : vector<8x128xf32>
    %149 = math.exp %148 : vector<8x128xf32>
    %cst_32 = arith.constant 1.000000e+00 : f32
    %150 = vector.broadcast %cst_32 : f32 to vector<8x128xf32>
    %151 = arith.addf %150, %149 : vector<8x128xf32>
    %152 = arith.divf %150, %151 : vector<8x128xf32>
    %153 = arith.mulf %144, %128 : vector<8x128xf32>
    %154 = arith.mulf %138, %146 : vector<8x128xf32>
    %155 = arith.addf %153, %154 : vector<8x128xf32>
    %156 = math.tanh %155 : vector<8x128xf32>
    %157 = arith.mulf %152, %156 : vector<8x128xf32>
    %c3_i32 = arith.constant 3 : i32
    %158 = vector.broadcast %c3_i32 : i32 to vector<8x1xi32>
    %159 = arith.cmpi sgt, %6, %158 : vector<8x1xi32>
    %160 = vector.shape_cast %159 : vector<8x1xi1> to vector<8x1xi1>
    %161 = vector.broadcast %160 : vector<8x1xi1> to vector<8x128xi1>
    %162 = arith.select %161, %157, %125 : vector<8x128xi1>, vector<8x128xf32>
    %163 = vector.shape_cast %159 : vector<8x1xi1> to vector<8x1xi1>
    %164 = vector.broadcast %163 : vector<8x1xi1> to vector<8x128xi1>
    %165 = arith.select %164, %155, %128 : vector<8x128xi1>, vector<8x128xf32>
    %166 = vector.extract_strided_slice %13 {offsets = [32, 0], sizes = [8, 512], strides = [1, 1]} : vector<64x512xf32> to vector<8x512xf32>
    %167 = arith.truncf %162 : vector<8x128xf32> to vector<8x128xbf16>
    %cst_33 = arith.constant dense<0.000000e+00> : vector<8x512xf32>
    %168 = tpu.matmul %167, %9, %cst_33 {dimension_numbers = #tpu.dot_dimension_numbers<[1], [0], [0], [1], [0, 0, 1, 1], [], []>} : vector<8x128xbf16>, vector<128x512xbf16>, vector<8x512xf32> -> vector<8x512xf32>
    %169 = arith.addf %166, %168 : vector<8x512xf32>
    %170 = vector.extract_strided_slice %169 {offsets = [0, 0], sizes = [8, 128], strides = [1, 1]} : vector<8x512xf32> to vector<8x128xf32>
    %171 = arith.negf %170 : vector<8x128xf32>
    %172 = math.exp %171 : vector<8x128xf32>
    %cst_34 = arith.constant 1.000000e+00 : f32
    %173 = vector.broadcast %cst_34 : f32 to vector<8x128xf32>
    %174 = arith.addf %173, %172 : vector<8x128xf32>
    %175 = arith.divf %173, %174 : vector<8x128xf32>
    %176 = vector.extract_strided_slice %169 {offsets = [0, 128], sizes = [8, 128], strides = [1, 1]} : vector<8x512xf32> to vector<8x128xf32>
    %177 = arith.negf %176 : vector<8x128xf32>
    %178 = math.exp %177 : vector<8x128xf32>
    %cst_35 = arith.constant 1.000000e+00 : f32
    %179 = vector.broadcast %cst_35 : f32 to vector<8x128xf32>
    %180 = arith.addf %179, %178 : vector<8x128xf32>
    %181 = arith.divf %179, %180 : vector<8x128xf32>
    %182 = vector.extract_strided_slice %169 {offsets = [0, 256], sizes = [8, 128], strides = [1, 1]} : vector<8x512xf32> to vector<8x128xf32>
    %183 = math.tanh %182 : vector<8x128xf32>
    %184 = vector.extract_strided_slice %169 {offsets = [0, 384], sizes = [8, 128], strides = [1, 1]} : vector<8x512xf32> to vector<8x128xf32>
    %185 = arith.negf %184 : vector<8x128xf32>
    %186 = math.exp %185 : vector<8x128xf32>
    %cst_36 = arith.constant 1.000000e+00 : f32
    %187 = vector.broadcast %cst_36 : f32 to vector<8x128xf32>
    %188 = arith.addf %187, %186 : vector<8x128xf32>
    %189 = arith.divf %187, %188 : vector<8x128xf32>
    %190 = arith.mulf %181, %165 : vector<8x128xf32>
    %191 = arith.mulf %175, %183 : vector<8x128xf32>
    %192 = arith.addf %190, %191 : vector<8x128xf32>
    %193 = math.tanh %192 : vector<8x128xf32>
    %194 = arith.mulf %189, %193 : vector<8x128xf32>
    %c4_i32 = arith.constant 4 : i32
    %195 = vector.broadcast %c4_i32 : i32 to vector<8x1xi32>
    %196 = arith.cmpi sgt, %6, %195 : vector<8x1xi32>
    %197 = vector.shape_cast %196 : vector<8x1xi1> to vector<8x1xi1>
    %198 = vector.broadcast %197 : vector<8x1xi1> to vector<8x128xi1>
    %199 = arith.select %198, %194, %162 : vector<8x128xi1>, vector<8x128xf32>
    %200 = vector.shape_cast %196 : vector<8x1xi1> to vector<8x1xi1>
    %201 = vector.broadcast %200 : vector<8x1xi1> to vector<8x128xi1>
    %202 = arith.select %201, %192, %165 : vector<8x128xi1>, vector<8x128xf32>
    %203 = vector.extract_strided_slice %13 {offsets = [40, 0], sizes = [8, 512], strides = [1, 1]} : vector<64x512xf32> to vector<8x512xf32>
    %204 = arith.truncf %199 : vector<8x128xf32> to vector<8x128xbf16>
    %cst_37 = arith.constant dense<0.000000e+00> : vector<8x512xf32>
    %205 = tpu.matmul %204, %9, %cst_37 {dimension_numbers = #tpu.dot_dimension_numbers<[1], [0], [0], [1], [0, 0, 1, 1], [], []>} : vector<8x128xbf16>, vector<128x512xbf16>, vector<8x512xf32> -> vector<8x512xf32>
    %206 = arith.addf %203, %205 : vector<8x512xf32>
    %207 = vector.extract_strided_slice %206 {offsets = [0, 0], sizes = [8, 128], strides = [1, 1]} : vector<8x512xf32> to vector<8x128xf32>
    %208 = arith.negf %207 : vector<8x128xf32>
    %209 = math.exp %208 : vector<8x128xf32>
    %cst_38 = arith.constant 1.000000e+00 : f32
    %210 = vector.broadcast %cst_38 : f32 to vector<8x128xf32>
    %211 = arith.addf %210, %209 : vector<8x128xf32>
    %212 = arith.divf %210, %211 : vector<8x128xf32>
    %213 = vector.extract_strided_slice %206 {offsets = [0, 128], sizes = [8, 128], strides = [1, 1]} : vector<8x512xf32> to vector<8x128xf32>
    %214 = arith.negf %213 : vector<8x128xf32>
    %215 = math.exp %214 : vector<8x128xf32>
    %cst_39 = arith.constant 1.000000e+00 : f32
    %216 = vector.broadcast %cst_39 : f32 to vector<8x128xf32>
    %217 = arith.addf %216, %215 : vector<8x128xf32>
    %218 = arith.divf %216, %217 : vector<8x128xf32>
    %219 = vector.extract_strided_slice %206 {offsets = [0, 256], sizes = [8, 128], strides = [1, 1]} : vector<8x512xf32> to vector<8x128xf32>
    %220 = math.tanh %219 : vector<8x128xf32>
    %221 = vector.extract_strided_slice %206 {offsets = [0, 384], sizes = [8, 128], strides = [1, 1]} : vector<8x512xf32> to vector<8x128xf32>
    %222 = arith.negf %221 : vector<8x128xf32>
    %223 = math.exp %222 : vector<8x128xf32>
    %cst_40 = arith.constant 1.000000e+00 : f32
    %224 = vector.broadcast %cst_40 : f32 to vector<8x128xf32>
    %225 = arith.addf %224, %223 : vector<8x128xf32>
    %226 = arith.divf %224, %225 : vector<8x128xf32>
    %227 = arith.mulf %218, %202 : vector<8x128xf32>
    %228 = arith.mulf %212, %220 : vector<8x128xf32>
    %229 = arith.addf %227, %228 : vector<8x128xf32>
    %230 = math.tanh %229 : vector<8x128xf32>
    %231 = arith.mulf %226, %230 : vector<8x128xf32>
    %c5_i32 = arith.constant 5 : i32
    %232 = vector.broadcast %c5_i32 : i32 to vector<8x1xi32>
    %233 = arith.cmpi sgt, %6, %232 : vector<8x1xi32>
    %234 = vector.shape_cast %233 : vector<8x1xi1> to vector<8x1xi1>
    %235 = vector.broadcast %234 : vector<8x1xi1> to vector<8x128xi1>
    %236 = arith.select %235, %231, %199 : vector<8x128xi1>, vector<8x128xf32>
    %237 = vector.shape_cast %233 : vector<8x1xi1> to vector<8x1xi1>
    %238 = vector.broadcast %237 : vector<8x1xi1> to vector<8x128xi1>
    %239 = arith.select %238, %229, %202 : vector<8x128xi1>, vector<8x128xf32>
    %240 = vector.extract_strided_slice %13 {offsets = [48, 0], sizes = [8, 512], strides = [1, 1]} : vector<64x512xf32> to vector<8x512xf32>
    %241 = arith.truncf %236 : vector<8x128xf32> to vector<8x128xbf16>
    %cst_41 = arith.constant dense<0.000000e+00> : vector<8x512xf32>
    %242 = tpu.matmul %241, %9, %cst_41 {dimension_numbers = #tpu.dot_dimension_numbers<[1], [0], [0], [1], [0, 0, 1, 1], [], []>} : vector<8x128xbf16>, vector<128x512xbf16>, vector<8x512xf32> -> vector<8x512xf32>
    %243 = arith.addf %240, %242 : vector<8x512xf32>
    %244 = vector.extract_strided_slice %243 {offsets = [0, 0], sizes = [8, 128], strides = [1, 1]} : vector<8x512xf32> to vector<8x128xf32>
    %245 = arith.negf %244 : vector<8x128xf32>
    %246 = math.exp %245 : vector<8x128xf32>
    %cst_42 = arith.constant 1.000000e+00 : f32
    %247 = vector.broadcast %cst_42 : f32 to vector<8x128xf32>
    %248 = arith.addf %247, %246 : vector<8x128xf32>
    %249 = arith.divf %247, %248 : vector<8x128xf32>
    %250 = vector.extract_strided_slice %243 {offsets = [0, 128], sizes = [8, 128], strides = [1, 1]} : vector<8x512xf32> to vector<8x128xf32>
    %251 = arith.negf %250 : vector<8x128xf32>
    %252 = math.exp %251 : vector<8x128xf32>
    %cst_43 = arith.constant 1.000000e+00 : f32
    %253 = vector.broadcast %cst_43 : f32 to vector<8x128xf32>
    %254 = arith.addf %253, %252 : vector<8x128xf32>
    %255 = arith.divf %253, %254 : vector<8x128xf32>
    %256 = vector.extract_strided_slice %243 {offsets = [0, 256], sizes = [8, 128], strides = [1, 1]} : vector<8x512xf32> to vector<8x128xf32>
    %257 = math.tanh %256 : vector<8x128xf32>
    %258 = vector.extract_strided_slice %243 {offsets = [0, 384], sizes = [8, 128], strides = [1, 1]} : vector<8x512xf32> to vector<8x128xf32>
    %259 = arith.negf %258 : vector<8x128xf32>
    %260 = math.exp %259 : vector<8x128xf32>
    %cst_44 = arith.constant 1.000000e+00 : f32
    %261 = vector.broadcast %cst_44 : f32 to vector<8x128xf32>
    %262 = arith.addf %261, %260 : vector<8x128xf32>
    %263 = arith.divf %261, %262 : vector<8x128xf32>
    %264 = arith.mulf %255, %239 : vector<8x128xf32>
    %265 = arith.mulf %249, %257 : vector<8x128xf32>
    %266 = arith.addf %264, %265 : vector<8x128xf32>
    %267 = math.tanh %266 : vector<8x128xf32>
    %268 = arith.mulf %263, %267 : vector<8x128xf32>
    %c6_i32 = arith.constant 6 : i32
    %269 = vector.broadcast %c6_i32 : i32 to vector<8x1xi32>
    %270 = arith.cmpi sgt, %6, %269 : vector<8x1xi32>
    %271 = vector.shape_cast %270 : vector<8x1xi1> to vector<8x1xi1>
    %272 = vector.broadcast %271 : vector<8x1xi1> to vector<8x128xi1>
    %273 = arith.select %272, %268, %236 : vector<8x128xi1>, vector<8x128xf32>
    %274 = vector.shape_cast %270 : vector<8x1xi1> to vector<8x1xi1>
    %275 = vector.broadcast %274 : vector<8x1xi1> to vector<8x128xi1>
    %276 = arith.select %275, %266, %239 : vector<8x128xi1>, vector<8x128xf32>
    %277 = vector.extract_strided_slice %13 {offsets = [56, 0], sizes = [8, 512], strides = [1, 1]} : vector<64x512xf32> to vector<8x512xf32>
    %278 = arith.truncf %273 : vector<8x128xf32> to vector<8x128xbf16>
    %cst_45 = arith.constant dense<0.000000e+00> : vector<8x512xf32>
    %279 = tpu.matmul %278, %9, %cst_45 {dimension_numbers = #tpu.dot_dimension_numbers<[1], [0], [0], [1], [0, 0, 1, 1], [], []>} : vector<8x128xbf16>, vector<128x512xbf16>, vector<8x512xf32> -> vector<8x512xf32>
    %280 = arith.addf %277, %279 : vector<8x512xf32>
    %281 = vector.extract_strided_slice %280 {offsets = [0, 0], sizes = [8, 128], strides = [1, 1]} : vector<8x512xf32> to vector<8x128xf32>
    %282 = arith.negf %281 : vector<8x128xf32>
    %283 = math.exp %282 : vector<8x128xf32>
    %cst_46 = arith.constant 1.000000e+00 : f32
    %284 = vector.broadcast %cst_46 : f32 to vector<8x128xf32>
    %285 = arith.addf %284, %283 : vector<8x128xf32>
    %286 = arith.divf %284, %285 : vector<8x128xf32>
    %287 = vector.extract_strided_slice %280 {offsets = [0, 128], sizes = [8, 128], strides = [1, 1]} : vector<8x512xf32> to vector<8x128xf32>
    %288 = arith.negf %287 : vector<8x128xf32>
    %289 = math.exp %288 : vector<8x128xf32>
    %cst_47 = arith.constant 1.000000e+00 : f32
    %290 = vector.broadcast %cst_47 : f32 to vector<8x128xf32>
    %291 = arith.addf %290, %289 : vector<8x128xf32>
    %292 = arith.divf %290, %291 : vector<8x128xf32>
    %293 = vector.extract_strided_slice %280 {offsets = [0, 256], sizes = [8, 128], strides = [1, 1]} : vector<8x512xf32> to vector<8x128xf32>
    %294 = math.tanh %293 : vector<8x128xf32>
    %295 = vector.extract_strided_slice %280 {offsets = [0, 384], sizes = [8, 128], strides = [1, 1]} : vector<8x512xf32> to vector<8x128xf32>
    %296 = arith.negf %295 : vector<8x128xf32>
    %297 = math.exp %296 : vector<8x128xf32>
    %cst_48 = arith.constant 1.000000e+00 : f32
    %298 = vector.broadcast %cst_48 : f32 to vector<8x128xf32>
    %299 = arith.addf %298, %297 : vector<8x128xf32>
    %300 = arith.divf %298, %299 : vector<8x128xf32>
    %301 = arith.mulf %292, %276 : vector<8x128xf32>
    %302 = arith.mulf %286, %294 : vector<8x128xf32>
    %303 = arith.addf %301, %302 : vector<8x128xf32>
    %304 = math.tanh %303 : vector<8x128xf32>
    %305 = arith.mulf %300, %304 : vector<8x128xf32>
    %c7_i32 = arith.constant 7 : i32
    %306 = vector.broadcast %c7_i32 : i32 to vector<8x1xi32>
    %307 = arith.cmpi sgt, %6, %306 : vector<8x1xi32>
    %308 = vector.shape_cast %307 : vector<8x1xi1> to vector<8x1xi1>
    %309 = vector.broadcast %308 : vector<8x1xi1> to vector<8x128xi1>
    %310 = arith.select %309, %305, %273 : vector<8x128xi1>, vector<8x128xf32>
    %311 = vector.shape_cast %307 : vector<8x1xi1> to vector<8x1xi1>
    %312 = vector.broadcast %311 : vector<8x1xi1> to vector<8x128xi1>
    %313 = arith.select %312, %303, %276 : vector<8x128xi1>, vector<8x128xf32>
    %c0_49 = arith.constant 0 : index
    %c0_50 = arith.constant 0 : index
    %c0_51 = arith.constant 0 : index
    %314 = vector.load %arg13[%c0_49, %c0_50, %c0_51] : memref<2x8x128xf32, #tpu.memory_space<vmem>>, vector<1x8x128xf32>
    %315 = vector.shape_cast %314 : vector<1x8x128xf32> to vector<8x128xf32>
    %316 = vector.shape_cast %310 : vector<8x128xf32> to vector<1x8x128xf32>
    tpu.vector_store %arg13[%c0_49, %c0_50, %c0_51], %316 {strides = array<i32>} : memref<2x8x128xf32, #tpu.memory_space<vmem>>, vector<1x8x128xf32>,
    %c0_52 = arith.constant 0 : index
    %c0_53 = arith.constant 0 : index
    %c0_54 = arith.constant 0 : index
    %317 = vector.load %arg14[%c0_52, %c0_53, %c0_54] : memref<2x8x128xf32, #tpu.memory_space<vmem>>, vector<1x8x128xf32>
    %318 = vector.shape_cast %317 : vector<1x8x128xf32> to vector<8x128xf32>
    %319 = vector.shape_cast %313 : vector<8x128xf32> to vector<1x8x128xf32>
    tpu.vector_store %arg14[%c0_52, %c0_53, %c0_54], %319 {strides = array<i32>} : memref<2x8x128xf32, #tpu.memory_space<vmem>>, vector<1x8x128xf32>,
    %320 = tpu.concatenate %51, %88, %125, %162, %199, %236, %273, %310 in 0 : vector<8x128xf32>, vector<8x128xf32>, vector<8x128xf32>, vector<8x128xf32>, vector<8x128xf32>, vector<8x128xf32>, vector<8x128xf32>, vector<8x128xf32> -> vector<64x128xf32>
    %321 = arith.truncf %320 : vector<64x128xf32> to vector<64x128xbf16>
    %c0_55 = arith.constant 0 : index
    %c0_56 = arith.constant 0 : index
    %322 = vector.load %arg5[%c0_55, %c0_56] : memref<128x512xbf16, #tpu.memory_space<vmem>>, vector<128x512xbf16>
    %c0_57 = arith.constant 0 : index
    %c0_58 = arith.constant 0 : index
    %323 = vector.load %arg6[%c0_57, %c0_58] : memref<128x512xbf16, #tpu.memory_space<vmem>>, vector<128x512xbf16>
    %c0_59 = arith.constant 0 : index
    %c0_60 = arith.constant 0 : index
    %324 = vector.load %arg7[%c0_59, %c0_60] : memref<1x512xf32, #tpu.memory_space<vmem>>, vector<1x512xf32>
    %cst_61 = arith.constant dense<0.000000e+00> : vector<64x512xf32>
    %325 = tpu.matmul %321, %322, %cst_61 {dimension_numbers = #tpu.dot_dimension_numbers<[1], [0], [0], [1], [0, 0, 1, 1], [], []>} : vector<64x128xbf16>, vector<128x512xbf16>, vector<64x512xf32> -> vector<64x512xf32>
    %326 = vector.broadcast %324 : vector<1x512xf32> to vector<64x512xf32>
    %327 = arith.addf %325, %326 : vector<64x512xf32>
    %c1 = arith.constant 1 : index
    %c0_62 = arith.constant 0 : index
    %c0_63 = arith.constant 0 : index
    %328 = vector.load %arg13[%c1, %c0_62, %c0_63] : memref<2x8x128xf32, #tpu.memory_space<vmem>>, vector<1x8x128xf32>
    %329 = vector.shape_cast %328 : vector<1x8x128xf32> to vector<8x128xf32>
    %c1_64 = arith.constant 1 : index
    %c0_65 = arith.constant 0 : index
    %c0_66 = arith.constant 0 : index
    %330 = vector.load %arg14[%c1_64, %c0_65, %c0_66] : memref<2x8x128xf32, #tpu.memory_space<vmem>>, vector<1x8x128xf32>
    %331 = vector.shape_cast %330 : vector<1x8x128xf32> to vector<8x128xf32>
    %332 = vector.extract_strided_slice %327 {offsets = [0, 0], sizes = [8, 512], strides = [1, 1]} : vector<64x512xf32> to vector<8x512xf32>
    %333 = arith.truncf %329 : vector<8x128xf32> to vector<8x128xbf16>
    %cst_67 = arith.constant dense<0.000000e+00> : vector<8x512xf32>
    %334 = tpu.matmul %333, %323, %cst_67 {dimension_numbers = #tpu.dot_dimension_numbers<[1], [0], [0], [1], [0, 0, 1, 1], [], []>} : vector<8x128xbf16>, vector<128x512xbf16>, vector<8x512xf32> -> vector<8x512xf32>
    %335 = arith.addf %332, %334 : vector<8x512xf32>
    %336 = vector.extract_strided_slice %335 {offsets = [0, 0], sizes = [8, 128], strides = [1, 1]} : vector<8x512xf32> to vector<8x128xf32>
    %337 = arith.negf %336 : vector<8x128xf32>
    %338 = math.exp %337 : vector<8x128xf32>
    %cst_68 = arith.constant 1.000000e+00 : f32
    %339 = vector.broadcast %cst_68 : f32 to vector<8x128xf32>
    %340 = arith.addf %339, %338 : vector<8x128xf32>
    %341 = arith.divf %339, %340 : vector<8x128xf32>
    %342 = vector.extract_strided_slice %335 {offsets = [0, 128], sizes = [8, 128], strides = [1, 1]} : vector<8x512xf32> to vector<8x128xf32>
    %343 = arith.negf %342 : vector<8x128xf32>
    %344 = math.exp %343 : vector<8x128xf32>
    %cst_69 = arith.constant 1.000000e+00 : f32
    %345 = vector.broadcast %cst_69 : f32 to vector<8x128xf32>
    %346 = arith.addf %345, %344 : vector<8x128xf32>
    %347 = arith.divf %345, %346 : vector<8x128xf32>
    %348 = vector.extract_strided_slice %335 {offsets = [0, 256], sizes = [8, 128], strides = [1, 1]} : vector<8x512xf32> to vector<8x128xf32>
    %349 = math.tanh %348 : vector<8x128xf32>
    %350 = vector.extract_strided_slice %335 {offsets = [0, 384], sizes = [8, 128], strides = [1, 1]} : vector<8x512xf32> to vector<8x128xf32>
    %351 = arith.negf %350 : vector<8x128xf32>
    %352 = math.exp %351 : vector<8x128xf32>
    %cst_70 = arith.constant 1.000000e+00 : f32
    %353 = vector.broadcast %cst_70 : f32 to vector<8x128xf32>
    %354 = arith.addf %353, %352 : vector<8x128xf32>
    %355 = arith.divf %353, %354 : vector<8x128xf32>
    %356 = arith.mulf %347, %331 : vector<8x128xf32>
    %357 = arith.mulf %341, %349 : vector<8x128xf32>
    %358 = arith.addf %356, %357 : vector<8x128xf32>
    %359 = math.tanh %358 : vector<8x128xf32>
    %360 = arith.mulf %355, %359 : vector<8x128xf32>
    %c0_i32_71 = arith.constant 0 : i32
    %361 = vector.broadcast %c0_i32_71 : i32 to vector<8x1xi32>
    %362 = arith.cmpi sgt, %6, %361 : vector<8x1xi32>
    %363 = vector.shape_cast %362 : vector<8x1xi1> to vector<8x1xi1>
    %364 = vector.broadcast %363 : vector<8x1xi1> to vector<8x128xi1>
    %365 = arith.select %364, %360, %329 : vector<8x128xi1>, vector<8x128xf32>
    %366 = vector.shape_cast %362 : vector<8x1xi1> to vector<8x1xi1>
    %367 = vector.broadcast %366 : vector<8x1xi1> to vector<8x128xi1>
    %368 = arith.select %367, %358, %331 : vector<8x128xi1>, vector<8x128xf32>
    %369 = vector.extract_strided_slice %327 {offsets = [8, 0], sizes = [8, 512], strides = [1, 1]} : vector<64x512xf32> to vector<8x512xf32>
    %370 = arith.truncf %365 : vector<8x128xf32> to vector<8x128xbf16>
    %cst_72 = arith.constant dense<0.000000e+00> : vector<8x512xf32>
    %371 = tpu.matmul %370, %323, %cst_72 {dimension_numbers = #tpu.dot_dimension_numbers<[1], [0], [0], [1], [0, 0, 1, 1], [], []>} : vector<8x128xbf16>, vector<128x512xbf16>, vector<8x512xf32> -> vector<8x512xf32>
    %372 = arith.addf %369, %371 : vector<8x512xf32>
    %373 = vector.extract_strided_slice %372 {offsets = [0, 0], sizes = [8, 128], strides = [1, 1]} : vector<8x512xf32> to vector<8x128xf32>
    %374 = arith.negf %373 : vector<8x128xf32>
    %375 = math.exp %374 : vector<8x128xf32>
    %cst_73 = arith.constant 1.000000e+00 : f32
    %376 = vector.broadcast %cst_73 : f32 to vector<8x128xf32>
    %377 = arith.addf %376, %375 : vector<8x128xf32>
    %378 = arith.divf %376, %377 : vector<8x128xf32>
    %379 = vector.extract_strided_slice %372 {offsets = [0, 128], sizes = [8, 128], strides = [1, 1]} : vector<8x512xf32> to vector<8x128xf32>
    %380 = arith.negf %379 : vector<8x128xf32>
    %381 = math.exp %380 : vector<8x128xf32>
    %cst_74 = arith.constant 1.000000e+00 : f32
    %382 = vector.broadcast %cst_74 : f32 to vector<8x128xf32>
    %383 = arith.addf %382, %381 : vector<8x128xf32>
    %384 = arith.divf %382, %383 : vector<8x128xf32>
    %385 = vector.extract_strided_slice %372 {offsets = [0, 256], sizes = [8, 128], strides = [1, 1]} : vector<8x512xf32> to vector<8x128xf32>
    %386 = math.tanh %385 : vector<8x128xf32>
    %387 = vector.extract_strided_slice %372 {offsets = [0, 384], sizes = [8, 128], strides = [1, 1]} : vector<8x512xf32> to vector<8x128xf32>
    %388 = arith.negf %387 : vector<8x128xf32>
    %389 = math.exp %388 : vector<8x128xf32>
    %cst_75 = arith.constant 1.000000e+00 : f32
    %390 = vector.broadcast %cst_75 : f32 to vector<8x128xf32>
    %391 = arith.addf %390, %389 : vector<8x128xf32>
    %392 = arith.divf %390, %391 : vector<8x128xf32>
    %393 = arith.mulf %384, %368 : vector<8x128xf32>
    %394 = arith.mulf %378, %386 : vector<8x128xf32>
    %395 = arith.addf %393, %394 : vector<8x128xf32>
    %396 = math.tanh %395 : vector<8x128xf32>
    %397 = arith.mulf %392, %396 : vector<8x128xf32>
    %c1_i32_76 = arith.constant 1 : i32
    %398 = vector.broadcast %c1_i32_76 : i32 to vector<8x1xi32>
    %399 = arith.cmpi sgt, %6, %398 : vector<8x1xi32>
    %400 = vector.shape_cast %399 : vector<8x1xi1> to vector<8x1xi1>
    %401 = vector.broadcast %400 : vector<8x1xi1> to vector<8x128xi1>
    %402 = arith.select %401, %397, %365 : vector<8x128xi1>, vector<8x128xf32>
    %403 = vector.shape_cast %399 : vector<8x1xi1> to vector<8x1xi1>
    %404 = vector.broadcast %403 : vector<8x1xi1> to vector<8x128xi1>
    %405 = arith.select %404, %395, %368 : vector<8x128xi1>, vector<8x128xf32>
    %406 = vector.extract_strided_slice %327 {offsets = [16, 0], sizes = [8, 512], strides = [1, 1]} : vector<64x512xf32> to vector<8x512xf32>
    %407 = arith.truncf %402 : vector<8x128xf32> to vector<8x128xbf16>
    %cst_77 = arith.constant dense<0.000000e+00> : vector<8x512xf32>
    %408 = tpu.matmul %407, %323, %cst_77 {dimension_numbers = #tpu.dot_dimension_numbers<[1], [0], [0], [1], [0, 0, 1, 1], [], []>} : vector<8x128xbf16>, vector<128x512xbf16>, vector<8x512xf32> -> vector<8x512xf32>
    %409 = arith.addf %406, %408 : vector<8x512xf32>
    %410 = vector.extract_strided_slice %409 {offsets = [0, 0], sizes = [8, 128], strides = [1, 1]} : vector<8x512xf32> to vector<8x128xf32>
    %411 = arith.negf %410 : vector<8x128xf32>
    %412 = math.exp %411 : vector<8x128xf32>
    %cst_78 = arith.constant 1.000000e+00 : f32
    %413 = vector.broadcast %cst_78 : f32 to vector<8x128xf32>
    %414 = arith.addf %413, %412 : vector<8x128xf32>
    %415 = arith.divf %413, %414 : vector<8x128xf32>
    %416 = vector.extract_strided_slice %409 {offsets = [0, 128], sizes = [8, 128], strides = [1, 1]} : vector<8x512xf32> to vector<8x128xf32>
    %417 = arith.negf %416 : vector<8x128xf32>
    %418 = math.exp %417 : vector<8x128xf32>
    %cst_79 = arith.constant 1.000000e+00 : f32
    %419 = vector.broadcast %cst_79 : f32 to vector<8x128xf32>
    %420 = arith.addf %419, %418 : vector<8x128xf32>
    %421 = arith.divf %419, %420 : vector<8x128xf32>
    %422 = vector.extract_strided_slice %409 {offsets = [0, 256], sizes = [8, 128], strides = [1, 1]} : vector<8x512xf32> to vector<8x128xf32>
    %423 = math.tanh %422 : vector<8x128xf32>
    %424 = vector.extract_strided_slice %409 {offsets = [0, 384], sizes = [8, 128], strides = [1, 1]} : vector<8x512xf32> to vector<8x128xf32>
    %425 = arith.negf %424 : vector<8x128xf32>
    %426 = math.exp %425 : vector<8x128xf32>
    %cst_80 = arith.constant 1.000000e+00 : f32
    %427 = vector.broadcast %cst_80 : f32 to vector<8x128xf32>
    %428 = arith.addf %427, %426 : vector<8x128xf32>
    %429 = arith.divf %427, %428 : vector<8x128xf32>
    %430 = arith.mulf %421, %405 : vector<8x128xf32>
    %431 = arith.mulf %415, %423 : vector<8x128xf32>
    %432 = arith.addf %430, %431 : vector<8x128xf32>
    %433 = math.tanh %432 : vector<8x128xf32>
    %434 = arith.mulf %429, %433 : vector<8x128xf32>
    %c2_i32_81 = arith.constant 2 : i32
    %435 = vector.broadcast %c2_i32_81 : i32 to vector<8x1xi32>
    %436 = arith.cmpi sgt, %6, %435 : vector<8x1xi32>
    %437 = vector.shape_cast %436 : vector<8x1xi1> to vector<8x1xi1>
    %438 = vector.broadcast %437 : vector<8x1xi1> to vector<8x128xi1>
    %439 = arith.select %438, %434, %402 : vector<8x128xi1>, vector<8x128xf32>
    %440 = vector.shape_cast %436 : vector<8x1xi1> to vector<8x1xi1>
    %441 = vector.broadcast %440 : vector<8x1xi1> to vector<8x128xi1>
    %442 = arith.select %441, %432, %405 : vector<8x128xi1>, vector<8x128xf32>
    %443 = vector.extract_strided_slice %327 {offsets = [24, 0], sizes = [8, 512], strides = [1, 1]} : vector<64x512xf32> to vector<8x512xf32>
    %444 = arith.truncf %439 : vector<8x128xf32> to vector<8x128xbf16>
    %cst_82 = arith.constant dense<0.000000e+00> : vector<8x512xf32>
    %445 = tpu.matmul %444, %323, %cst_82 {dimension_numbers = #tpu.dot_dimension_numbers<[1], [0], [0], [1], [0, 0, 1, 1], [], []>} : vector<8x128xbf16>, vector<128x512xbf16>, vector<8x512xf32> -> vector<8x512xf32>
    %446 = arith.addf %443, %445 : vector<8x512xf32>
    %447 = vector.extract_strided_slice %446 {offsets = [0, 0], sizes = [8, 128], strides = [1, 1]} : vector<8x512xf32> to vector<8x128xf32>
    %448 = arith.negf %447 : vector<8x128xf32>
    %449 = math.exp %448 : vector<8x128xf32>
    %cst_83 = arith.constant 1.000000e+00 : f32
    %450 = vector.broadcast %cst_83 : f32 to vector<8x128xf32>
    %451 = arith.addf %450, %449 : vector<8x128xf32>
    %452 = arith.divf %450, %451 : vector<8x128xf32>
    %453 = vector.extract_strided_slice %446 {offsets = [0, 128], sizes = [8, 128], strides = [1, 1]} : vector<8x512xf32> to vector<8x128xf32>
    %454 = arith.negf %453 : vector<8x128xf32>
    %455 = math.exp %454 : vector<8x128xf32>
    %cst_84 = arith.constant 1.000000e+00 : f32
    %456 = vector.broadcast %cst_84 : f32 to vector<8x128xf32>
    %457 = arith.addf %456, %455 : vector<8x128xf32>
    %458 = arith.divf %456, %457 : vector<8x128xf32>
    %459 = vector.extract_strided_slice %446 {offsets = [0, 256], sizes = [8, 128], strides = [1, 1]} : vector<8x512xf32> to vector<8x128xf32>
    %460 = math.tanh %459 : vector<8x128xf32>
    %461 = vector.extract_strided_slice %446 {offsets = [0, 384], sizes = [8, 128], strides = [1, 1]} : vector<8x512xf32> to vector<8x128xf32>
    %462 = arith.negf %461 : vector<8x128xf32>
    %463 = math.exp %462 : vector<8x128xf32>
    %cst_85 = arith.constant 1.000000e+00 : f32
    %464 = vector.broadcast %cst_85 : f32 to vector<8x128xf32>
    %465 = arith.addf %464, %463 : vector<8x128xf32>
    %466 = arith.divf %464, %465 : vector<8x128xf32>
    %467 = arith.mulf %458, %442 : vector<8x128xf32>
    %468 = arith.mulf %452, %460 : vector<8x128xf32>
    %469 = arith.addf %467, %468 : vector<8x128xf32>
    %470 = math.tanh %469 : vector<8x128xf32>
    %471 = arith.mulf %466, %470 : vector<8x128xf32>
    %c3_i32_86 = arith.constant 3 : i32
    %472 = vector.broadcast %c3_i32_86 : i32 to vector<8x1xi32>
    %473 = arith.cmpi sgt, %6, %472 : vector<8x1xi32>
    %474 = vector.shape_cast %473 : vector<8x1xi1> to vector<8x1xi1>
    %475 = vector.broadcast %474 : vector<8x1xi1> to vector<8x128xi1>
    %476 = arith.select %475, %471, %439 : vector<8x128xi1>, vector<8x128xf32>
    %477 = vector.shape_cast %473 : vector<8x1xi1> to vector<8x1xi1>
    %478 = vector.broadcast %477 : vector<8x1xi1> to vector<8x128xi1>
    %479 = arith.select %478, %469, %442 : vector<8x128xi1>, vector<8x128xf32>
    %480 = vector.extract_strided_slice %327 {offsets = [32, 0], sizes = [8, 512], strides = [1, 1]} : vector<64x512xf32> to vector<8x512xf32>
    %481 = arith.truncf %476 : vector<8x128xf32> to vector<8x128xbf16>
    %cst_87 = arith.constant dense<0.000000e+00> : vector<8x512xf32>
    %482 = tpu.matmul %481, %323, %cst_87 {dimension_numbers = #tpu.dot_dimension_numbers<[1], [0], [0], [1], [0, 0, 1, 1], [], []>} : vector<8x128xbf16>, vector<128x512xbf16>, vector<8x512xf32> -> vector<8x512xf32>
    %483 = arith.addf %480, %482 : vector<8x512xf32>
    %484 = vector.extract_strided_slice %483 {offsets = [0, 0], sizes = [8, 128], strides = [1, 1]} : vector<8x512xf32> to vector<8x128xf32>
    %485 = arith.negf %484 : vector<8x128xf32>
    %486 = math.exp %485 : vector<8x128xf32>
    %cst_88 = arith.constant 1.000000e+00 : f32
    %487 = vector.broadcast %cst_88 : f32 to vector<8x128xf32>
    %488 = arith.addf %487, %486 : vector<8x128xf32>
    %489 = arith.divf %487, %488 : vector<8x128xf32>
    %490 = vector.extract_strided_slice %483 {offsets = [0, 128], sizes = [8, 128], strides = [1, 1]} : vector<8x512xf32> to vector<8x128xf32>
    %491 = arith.negf %490 : vector<8x128xf32>
    %492 = math.exp %491 : vector<8x128xf32>
    %cst_89 = arith.constant 1.000000e+00 : f32
    %493 = vector.broadcast %cst_89 : f32 to vector<8x128xf32>
    %494 = arith.addf %493, %492 : vector<8x128xf32>
    %495 = arith.divf %493, %494 : vector<8x128xf32>
    %496 = vector.extract_strided_slice %483 {offsets = [0, 256], sizes = [8, 128], strides = [1, 1]} : vector<8x512xf32> to vector<8x128xf32>
    %497 = math.tanh %496 : vector<8x128xf32>
    %498 = vector.extract_strided_slice %483 {offsets = [0, 384], sizes = [8, 128], strides = [1, 1]} : vector<8x512xf32> to vector<8x128xf32>
    %499 = arith.negf %498 : vector<8x128xf32>
    %500 = math.exp %499 : vector<8x128xf32>
    %cst_90 = arith.constant 1.000000e+00 : f32
    %501 = vector.broadcast %cst_90 : f32 to vector<8x128xf32>
    %502 = arith.addf %501, %500 : vector<8x128xf32>
    %503 = arith.divf %501, %502 : vector<8x128xf32>
    %504 = arith.mulf %495, %479 : vector<8x128xf32>
    %505 = arith.mulf %489, %497 : vector<8x128xf32>
    %506 = arith.addf %504, %505 : vector<8x128xf32>
    %507 = math.tanh %506 : vector<8x128xf32>
    %508 = arith.mulf %503, %507 : vector<8x128xf32>
    %c4_i32_91 = arith.constant 4 : i32
    %509 = vector.broadcast %c4_i32_91 : i32 to vector<8x1xi32>
    %510 = arith.cmpi sgt, %6, %509 : vector<8x1xi32>
    %511 = vector.shape_cast %510 : vector<8x1xi1> to vector<8x1xi1>
    %512 = vector.broadcast %511 : vector<8x1xi1> to vector<8x128xi1>
    %513 = arith.select %512, %508, %476 : vector<8x128xi1>, vector<8x128xf32>
    %514 = vector.shape_cast %510 : vector<8x1xi1> to vector<8x1xi1>
    %515 = vector.broadcast %514 : vector<8x1xi1> to vector<8x128xi1>
    %516 = arith.select %515, %506, %479 : vector<8x128xi1>, vector<8x128xf32>
    %517 = vector.extract_strided_slice %327 {offsets = [40, 0], sizes = [8, 512], strides = [1, 1]} : vector<64x512xf32> to vector<8x512xf32>
    %518 = arith.truncf %513 : vector<8x128xf32> to vector<8x128xbf16>
    %cst_92 = arith.constant dense<0.000000e+00> : vector<8x512xf32>
    %519 = tpu.matmul %518, %323, %cst_92 {dimension_numbers = #tpu.dot_dimension_numbers<[1], [0], [0], [1], [0, 0, 1, 1], [], []>} : vector<8x128xbf16>, vector<128x512xbf16>, vector<8x512xf32> -> vector<8x512xf32>
    %520 = arith.addf %517, %519 : vector<8x512xf32>
    %521 = vector.extract_strided_slice %520 {offsets = [0, 0], sizes = [8, 128], strides = [1, 1]} : vector<8x512xf32> to vector<8x128xf32>
    %522 = arith.negf %521 : vector<8x128xf32>
    %523 = math.exp %522 : vector<8x128xf32>
    %cst_93 = arith.constant 1.000000e+00 : f32
    %524 = vector.broadcast %cst_93 : f32 to vector<8x128xf32>
    %525 = arith.addf %524, %523 : vector<8x128xf32>
    %526 = arith.divf %524, %525 : vector<8x128xf32>
    %527 = vector.extract_strided_slice %520 {offsets = [0, 128], sizes = [8, 128], strides = [1, 1]} : vector<8x512xf32> to vector<8x128xf32>
    %528 = arith.negf %527 : vector<8x128xf32>
    %529 = math.exp %528 : vector<8x128xf32>
    %cst_94 = arith.constant 1.000000e+00 : f32
    %530 = vector.broadcast %cst_94 : f32 to vector<8x128xf32>
    %531 = arith.addf %530, %529 : vector<8x128xf32>
    %532 = arith.divf %530, %531 : vector<8x128xf32>
    %533 = vector.extract_strided_slice %520 {offsets = [0, 256], sizes = [8, 128], strides = [1, 1]} : vector<8x512xf32> to vector<8x128xf32>
    %534 = math.tanh %533 : vector<8x128xf32>
    %535 = vector.extract_strided_slice %520 {offsets = [0, 384], sizes = [8, 128], strides = [1, 1]} : vector<8x512xf32> to vector<8x128xf32>
    %536 = arith.negf %535 : vector<8x128xf32>
    %537 = math.exp %536 : vector<8x128xf32>
    %cst_95 = arith.constant 1.000000e+00 : f32
    %538 = vector.broadcast %cst_95 : f32 to vector<8x128xf32>
    %539 = arith.addf %538, %537 : vector<8x128xf32>
    %540 = arith.divf %538, %539 : vector<8x128xf32>
    %541 = arith.mulf %532, %516 : vector<8x128xf32>
    %542 = arith.mulf %526, %534 : vector<8x128xf32>
    %543 = arith.addf %541, %542 : vector<8x128xf32>
    %544 = math.tanh %543 : vector<8x128xf32>
    %545 = arith.mulf %540, %544 : vector<8x128xf32>
    %c5_i32_96 = arith.constant 5 : i32
    %546 = vector.broadcast %c5_i32_96 : i32 to vector<8x1xi32>
    %547 = arith.cmpi sgt, %6, %546 : vector<8x1xi32>
    %548 = vector.shape_cast %547 : vector<8x1xi1> to vector<8x1xi1>
    %549 = vector.broadcast %548 : vector<8x1xi1> to vector<8x128xi1>
    %550 = arith.select %549, %545, %513 : vector<8x128xi1>, vector<8x128xf32>
    %551 = vector.shape_cast %547 : vector<8x1xi1> to vector<8x1xi1>
    %552 = vector.broadcast %551 : vector<8x1xi1> to vector<8x128xi1>
    %553 = arith.select %552, %543, %516 : vector<8x128xi1>, vector<8x128xf32>
    %554 = vector.extract_strided_slice %327 {offsets = [48, 0], sizes = [8, 512], strides = [1, 1]} : vector<64x512xf32> to vector<8x512xf32>
    %555 = arith.truncf %550 : vector<8x128xf32> to vector<8x128xbf16>
    %cst_97 = arith.constant dense<0.000000e+00> : vector<8x512xf32>
    %556 = tpu.matmul %555, %323, %cst_97 {dimension_numbers = #tpu.dot_dimension_numbers<[1], [0], [0], [1], [0, 0, 1, 1], [], []>} : vector<8x128xbf16>, vector<128x512xbf16>, vector<8x512xf32> -> vector<8x512xf32>
    %557 = arith.addf %554, %556 : vector<8x512xf32>
    %558 = vector.extract_strided_slice %557 {offsets = [0, 0], sizes = [8, 128], strides = [1, 1]} : vector<8x512xf32> to vector<8x128xf32>
    %559 = arith.negf %558 : vector<8x128xf32>
    %560 = math.exp %559 : vector<8x128xf32>
    %cst_98 = arith.constant 1.000000e+00 : f32
    %561 = vector.broadcast %cst_98 : f32 to vector<8x128xf32>
    %562 = arith.addf %561, %560 : vector<8x128xf32>
    %563 = arith.divf %561, %562 : vector<8x128xf32>
    %564 = vector.extract_strided_slice %557 {offsets = [0, 128], sizes = [8, 128], strides = [1, 1]} : vector<8x512xf32> to vector<8x128xf32>
    %565 = arith.negf %564 : vector<8x128xf32>
    %566 = math.exp %565 : vector<8x128xf32>
    %cst_99 = arith.constant 1.000000e+00 : f32
    %567 = vector.broadcast %cst_99 : f32 to vector<8x128xf32>
    %568 = arith.addf %567, %566 : vector<8x128xf32>
    %569 = arith.divf %567, %568 : vector<8x128xf32>
    %570 = vector.extract_strided_slice %557 {offsets = [0, 256], sizes = [8, 128], strides = [1, 1]} : vector<8x512xf32> to vector<8x128xf32>
    %571 = math.tanh %570 : vector<8x128xf32>
    %572 = vector.extract_strided_slice %557 {offsets = [0, 384], sizes = [8, 128], strides = [1, 1]} : vector<8x512xf32> to vector<8x128xf32>
    %573 = arith.negf %572 : vector<8x128xf32>
    %574 = math.exp %573 : vector<8x128xf32>
    %cst_100 = arith.constant 1.000000e+00 : f32
    %575 = vector.broadcast %cst_100 : f32 to vector<8x128xf32>
    %576 = arith.addf %575, %574 : vector<8x128xf32>
    %577 = arith.divf %575, %576 : vector<8x128xf32>
    %578 = arith.mulf %569, %553 : vector<8x128xf32>
    %579 = arith.mulf %563, %571 : vector<8x128xf32>
    %580 = arith.addf %578, %579 : vector<8x128xf32>
    %581 = math.tanh %580 : vector<8x128xf32>
    %582 = arith.mulf %577, %581 : vector<8x128xf32>
    %c6_i32_101 = arith.constant 6 : i32
    %583 = vector.broadcast %c6_i32_101 : i32 to vector<8x1xi32>
    %584 = arith.cmpi sgt, %6, %583 : vector<8x1xi32>
    %585 = vector.shape_cast %584 : vector<8x1xi1> to vector<8x1xi1>
    %586 = vector.broadcast %585 : vector<8x1xi1> to vector<8x128xi1>
    %587 = arith.select %586, %582, %550 : vector<8x128xi1>, vector<8x128xf32>
    %588 = vector.shape_cast %584 : vector<8x1xi1> to vector<8x1xi1>
    %589 = vector.broadcast %588 : vector<8x1xi1> to vector<8x128xi1>
    %590 = arith.select %589, %580, %553 : vector<8x128xi1>, vector<8x128xf32>
    %591 = vector.extract_strided_slice %327 {offsets = [56, 0], sizes = [8, 512], strides = [1, 1]} : vector<64x512xf32> to vector<8x512xf32>
    %592 = arith.truncf %587 : vector<8x128xf32> to vector<8x128xbf16>
    %cst_102 = arith.constant dense<0.000000e+00> : vector<8x512xf32>
    %593 = tpu.matmul %592, %323, %cst_102 {dimension_numbers = #tpu.dot_dimension_numbers<[1], [0], [0], [1], [0, 0, 1, 1], [], []>} : vector<8x128xbf16>, vector<128x512xbf16>, vector<8x512xf32> -> vector<8x512xf32>
    %594 = arith.addf %591, %593 : vector<8x512xf32>
    %595 = vector.extract_strided_slice %594 {offsets = [0, 0], sizes = [8, 128], strides = [1, 1]} : vector<8x512xf32> to vector<8x128xf32>
    %596 = arith.negf %595 : vector<8x128xf32>
    %597 = math.exp %596 : vector<8x128xf32>
    %cst_103 = arith.constant 1.000000e+00 : f32
    %598 = vector.broadcast %cst_103 : f32 to vector<8x128xf32>
    %599 = arith.addf %598, %597 : vector<8x128xf32>
    %600 = arith.divf %598, %599 : vector<8x128xf32>
    %601 = vector.extract_strided_slice %594 {offsets = [0, 128], sizes = [8, 128], strides = [1, 1]} : vector<8x512xf32> to vector<8x128xf32>
    %602 = arith.negf %601 : vector<8x128xf32>
    %603 = math.exp %602 : vector<8x128xf32>
    %cst_104 = arith.constant 1.000000e+00 : f32
    %604 = vector.broadcast %cst_104 : f32 to vector<8x128xf32>
    %605 = arith.addf %604, %603 : vector<8x128xf32>
    %606 = arith.divf %604, %605 : vector<8x128xf32>
    %607 = vector.extract_strided_slice %594 {offsets = [0, 256], sizes = [8, 128], strides = [1, 1]} : vector<8x512xf32> to vector<8x128xf32>
    %608 = math.tanh %607 : vector<8x128xf32>
    %609 = vector.extract_strided_slice %594 {offsets = [0, 384], sizes = [8, 128], strides = [1, 1]} : vector<8x512xf32> to vector<8x128xf32>
    %610 = arith.negf %609 : vector<8x128xf32>
    %611 = math.exp %610 : vector<8x128xf32>
    %cst_105 = arith.constant 1.000000e+00 : f32
    %612 = vector.broadcast %cst_105 : f32 to vector<8x128xf32>
    %613 = arith.addf %612, %611 : vector<8x128xf32>
    %614 = arith.divf %612, %613 : vector<8x128xf32>
    %615 = arith.mulf %606, %590 : vector<8x128xf32>
    %616 = arith.mulf %600, %608 : vector<8x128xf32>
    %617 = arith.addf %615, %616 : vector<8x128xf32>
    %618 = math.tanh %617 : vector<8x128xf32>
    %619 = arith.mulf %614, %618 : vector<8x128xf32>
    %c7_i32_106 = arith.constant 7 : i32
    %620 = vector.broadcast %c7_i32_106 : i32 to vector<8x1xi32>
    %621 = arith.cmpi sgt, %6, %620 : vector<8x1xi32>
    %622 = vector.shape_cast %621 : vector<8x1xi1> to vector<8x1xi1>
    %623 = vector.broadcast %622 : vector<8x1xi1> to vector<8x128xi1>
    %624 = arith.select %623, %619, %587 : vector<8x128xi1>, vector<8x128xf32>
    %625 = vector.shape_cast %621 : vector<8x1xi1> to vector<8x1xi1>
    %626 = vector.broadcast %625 : vector<8x1xi1> to vector<8x128xi1>
    %627 = arith.select %626, %617, %590 : vector<8x128xi1>, vector<8x128xf32>
    %c1_107 = arith.constant 1 : index
    %c0_108 = arith.constant 0 : index
    %c0_109 = arith.constant 0 : index
    %628 = vector.load %arg13[%c1_107, %c0_108, %c0_109] : memref<2x8x128xf32, #tpu.memory_space<vmem>>, vector<1x8x128xf32>
    %629 = vector.shape_cast %628 : vector<1x8x128xf32> to vector<8x128xf32>
    %630 = vector.shape_cast %624 : vector<8x128xf32> to vector<1x8x128xf32>
    tpu.vector_store %arg13[%c1_107, %c0_108, %c0_109], %630 {strides = array<i32>} : memref<2x8x128xf32, #tpu.memory_space<vmem>>, vector<1x8x128xf32>,
    %c1_110 = arith.constant 1 : index
    %c0_111 = arith.constant 0 : index
    %c0_112 = arith.constant 0 : index
    %631 = vector.load %arg14[%c1_110, %c0_111, %c0_112] : memref<2x8x128xf32, #tpu.memory_space<vmem>>, vector<1x8x128xf32>
    %632 = vector.shape_cast %631 : vector<1x8x128xf32> to vector<8x128xf32>
    %633 = vector.shape_cast %627 : vector<8x128xf32> to vector<1x8x128xf32>
    tpu.vector_store %arg14[%c1_110, %c0_111, %c0_112], %633 {strides = array<i32>} : memref<2x8x128xf32, #tpu.memory_space<vmem>>, vector<1x8x128xf32>,
    %c0_i32_113 = arith.constant 0 : i32
    %634 = arith.cmpi eq, %arg0, %c0_i32_113 : i32
    %635 = arith.extui %634 : i1 to i32
    %c0_i32_114 = arith.constant 0 : i32
    %636 = arith.cmpi ne, %635, %c0_i32_114 : i32
    scf.if %636 {
      %c0_115 = arith.constant 0 : index
      %c0_116 = arith.constant 0 : index
      %637 = vector.load %arg11[%c0_115, %c0_116] : memref<8x128xf32, #tpu.memory_space<vmem>>, vector<8x128xf32>
      tpu.vector_store %arg11[%c0_115, %c0_116], %624 {strides = array<i32>} : memref<8x128xf32, #tpu.memory_space<vmem>>, vector<8x128xf32>,
      %638 = arith.truncf %624 : vector<8x128xf32> to vector<8x128xbf16>
      %c0_117 = arith.constant 0 : index
      %c0_118 = arith.constant 0 : index
      %639 = vector.load %arg9[%c0_117, %c0_118] : memref<128x128xbf16, #tpu.memory_space<vmem>>, vector<128x128xbf16>
      %cst_119 = arith.constant dense<0.000000e+00> : vector<8x128xf32>
      %640 = tpu.matmul %638, %639, %cst_119 {dimension_numbers = #tpu.dot_dimension_numbers<[1], [0], [0], [1], [0, 0, 1, 1], [], []>} : vector<8x128xbf16>, vector<128x128xbf16>, vector<8x128xf32> -> vector<8x128xf32>
      %c0_120 = arith.constant 0 : index
      %c0_121 = arith.constant 0 : index
      %641 = vector.load %arg10[%c0_120, %c0_121] : memref<1x128xf32, #tpu.memory_space<vmem>>, vector<1x128xf32>
      %642 = vector.broadcast %641 : vector<1x128xf32> to vector<8x128xf32>
      %643 = arith.addf %640, %642 : vector<8x128xf32>
      %644 = arith.negf %643 : vector<8x128xf32>
      %645 = math.exp %644 : vector<8x128xf32>
      %cst_122 = arith.constant 1.000000e+00 : f32
      %646 = vector.broadcast %cst_122 : f32 to vector<8x128xf32>
      %647 = arith.addf %646, %645 : vector<8x128xf32>
      %648 = arith.divf %646, %647 : vector<8x128xf32>
      %c0_123 = arith.constant 0 : index
      %c0_124 = arith.constant 0 : index
      %649 = vector.load %arg12[%c0_123, %c0_124] : memref<8x128xf32, #tpu.memory_space<vmem>>, vector<8x128xf32>
      tpu.vector_store %arg12[%c0_123, %c0_124], %648 {strides = array<i32>} : memref<8x128xf32, #tpu.memory_space<vmem>>, vector<8x128xf32>,
    } else {
    }
    return
  }
  func.func @transform_0(%arg0: i32) -> (i32, i32) {
    %c0_i32 = arith.constant 0 : i32
    %c0_i32_0 = arith.constant 0 : i32
    return %arg0, %c0_i32 : i32, i32
  }
  func.func @transform_1(%arg0: i32) -> (i32, i32) {
    %c0_i32 = arith.constant 0 : i32
    %c0_i32_0 = arith.constant 0 : i32
    %c0_i32_1 = arith.constant 0 : i32
    return %c0_i32, %c0_i32_0 : i32, i32
  }
  func.func @transform_2(%arg0: i32) -> (i32, i32) {
    %c0_i32 = arith.constant 0 : i32
    %c0_i32_0 = arith.constant 0 : i32
    %c0_i32_1 = arith.constant 0 : i32
    return %c0_i32, %c0_i32_0 : i32, i32
  }
  func.func @transform_3(%arg0: i32) -> (i32, i32) {
    %c0_i32 = arith.constant 0 : i32
    %c0_i32_0 = arith.constant 0 : i32
    %c0_i32_1 = arith.constant 0 : i32
    return %c0_i32, %c0_i32_0 : i32, i32
  }
  func.func @transform_4(%arg0: i32) -> (i32, i32) {
    %c0_i32 = arith.constant 0 : i32
    %c0_i32_0 = arith.constant 0 : i32
    %c0_i32_1 = arith.constant 0 : i32
    return %c0_i32, %c0_i32_0 : i32, i32
  }
  func.func @transform_5(%arg0: i32) -> (i32, i32) {
    %c0_i32 = arith.constant 0 : i32
    %c0_i32_0 = arith.constant 0 : i32
    %c0_i32_1 = arith.constant 0 : i32
    return %c0_i32, %c0_i32_0 : i32, i32
  }
  func.func @transform_6(%arg0: i32) -> (i32, i32) {
    %c0_i32 = arith.constant 0 : i32
    %c0_i32_0 = arith.constant 0 : i32
    %c0_i32_1 = arith.constant 0 : i32
    return %c0_i32, %c0_i32_0 : i32, i32
  }
  func.func @transform_7(%arg0: i32) -> (i32, i32) {
    %c0_i32 = arith.constant 0 : i32
    %c0_i32_0 = arith.constant 0 : i32
    %c0_i32_1 = arith.constant 0 : i32
    return %c0_i32, %c0_i32_0 : i32, i32
  }
  func.func @transform_8(%arg0: i32) -> (i32, i32) {
    %c0_i32 = arith.constant 0 : i32
    %c0_i32_0 = arith.constant 0 : i32
    %c0_i32_1 = arith.constant 0 : i32
    return %c0_i32, %c0_i32_0 : i32, i32
  }
  func.func @transform_9(%arg0: i32) -> (i32, i32) {
    %c0_i32 = arith.constant 0 : i32
    %c0_i32_0 = arith.constant 0 : i32
    %c0_i32_1 = arith.constant 0 : i32
    return %c0_i32, %c0_i32_0 : i32, i32
  }
  func.func @transform_10(%arg0: i32) -> (i32, i32) {
    %c0_i32 = arith.constant 0 : i32
    %c0_i32_0 = arith.constant 0 : i32
    %c0_i32_1 = arith.constant 0 : i32
    return %c0_i32, %c0_i32_0 : i32, i32
  }
  func.func @transform_11(%arg0: i32) -> (i32, i32) {
    %c0_i32 = arith.constant 0 : i32
    %c0_i32_0 = arith.constant 0 : i32
    %c0_i32_1 = arith.constant 0 : i32
    return %c0_i32, %c0_i32_0 : i32, i32
  }
}

module attributes {stable_mosaic.version = 11 : i64} {
  func.func @kernel(%arg0: i32, %arg1: memref<64x128xbf16, #tpu.memory_space<vmem>>, %arg2: memref<128x512xbf16, #tpu.memory_space<vmem>>, %arg3: memref<128x512xbf16, #tpu.memory_space<vmem>>, %arg4: memref<1x512xf32, #tpu.memory_space<vmem>>, %arg5: memref<128x512xbf16, #tpu.memory_space<vmem>>, %arg6: memref<128x512xbf16, #tpu.memory_space<vmem>>, %arg7: memref<1x512xf32, #tpu.memory_space<vmem>>, %arg8: memref<8x1xi32, #tpu.memory_space<vmem>>, %arg9: memref<128x128xbf16, #tpu.memory_space<vmem>>, %arg10: memref<1x128xf32, #tpu.memory_space<vmem>>, %arg11: memref<8x128xf32, #tpu.memory_space<vmem>>, %arg12: memref<8x128xf32, #tpu.memory_space<vmem>>, %arg13: memref<2x8x128xf32, #tpu.memory_space<vmem>>, %arg14: memref<2x8x128xf32, #tpu.memory_space<vmem>>) attributes {dimension_semantics = [#tpu.dimension_semantics<arbitrary>], iteration_bounds = array<i64: 1>, scalar_prefetch = 0 : i64, scratch_operands = 2 : i64, tpu.core_type = #tpu.core_type<tc>, window_params = [{transform_indices = @transform_0, window_bounds = array<i64: 64, 128>}, {pipeline_mode = #tpu.pipeline_mode<synchronous>, transform_indices = @transform_1, window_bounds = array<i64: 128, 512>}, {pipeline_mode = #tpu.pipeline_mode<synchronous>, transform_indices = @transform_2, window_bounds = array<i64: 128, 512>}, {pipeline_mode = #tpu.pipeline_mode<synchronous>, transform_indices = @transform_3, window_bounds = array<i64: 1, 512>}, {pipeline_mode = #tpu.pipeline_mode<synchronous>, transform_indices = @transform_4, window_bounds = array<i64: 128, 512>}, {pipeline_mode = #tpu.pipeline_mode<synchronous>, transform_indices = @transform_5, window_bounds = array<i64: 128, 512>}, {pipeline_mode = #tpu.pipeline_mode<synchronous>, transform_indices = @transform_6, window_bounds = array<i64: 1, 512>}, {pipeline_mode = #tpu.pipeline_mode<synchronous>, transform_indices = @transform_7, window_bounds = array<i64: 8, 1>}, {pipeline_mode = #tpu.pipeline_mode<synchronous>, transform_indices = @transform_8, window_bounds = array<i64: 128, 128>}, {pipeline_mode = #tpu.pipeline_mode<synchronous>, transform_indices = @transform_9, window_bounds = array<i64: 1, 128>}, {pipeline_mode = #tpu.pipeline_mode<synchronous>, transform_indices = @transform_10, window_bounds = array<i64: 8, 128>}, {pipeline_mode = #tpu.pipeline_mode<synchronous>, transform_indices = @transform_11, window_bounds = array<i64: 8, 128>}]} {
    %c8_i32 = arith.constant 8 : i32
    %0 = arith.muli %arg0, %c8_i32 : i32
    %c0_i32 = arith.constant 0 : i32
    %1 = arith.cmpi eq, %arg0, %c0_i32 : i32
    %2 = arith.extui %1 : i1 to i32
    %c0_i32_0 = arith.constant 0 : i32
    %3 = arith.cmpi ne, %2, %c0_i32_0 : i32
    scf.if %3 {
      %cst_115 = arith.constant 0.000000e+00 : f32
      %637 = vector.broadcast %cst_115 : f32 to vector<2x8x128xf32>
      %c0_116 = arith.constant 0 : index
      %c0_117 = arith.constant 0 : index
      %c0_118 = arith.constant 0 : index
      %638 = vector.load %arg13[%c0_116, %c0_117, %c0_118] : memref<2x8x128xf32, #tpu.memory_space<vmem>>, vector<2x8x128xf32>
      tpu.vector_store %arg13[%c0_116, %c0_117, %c0_118], %637 {strides = array<i32>} : memref<2x8x128xf32, #tpu.memory_space<vmem>>, vector<2x8x128xf32>,
      %cst_119 = arith.constant 0.000000e+00 : f32
      %639 = vector.broadcast %cst_119 : f32 to vector<2x8x128xf32>
      %c0_120 = arith.constant 0 : index
      %c0_121 = arith.constant 0 : index
      %c0_122 = arith.constant 0 : index
      %640 = vector.load %arg14[%c0_120, %c0_121, %c0_122] : memref<2x8x128xf32, #tpu.memory_space<vmem>>, vector<2x8x128xf32>
      tpu.vector_store %arg14[%c0_120, %c0_121, %c0_122], %639 {strides = array<i32>} : memref<2x8x128xf32, #tpu.memory_space<vmem>>, vector<2x8x128xf32>,
    } else {
    }
    %c0 = arith.constant 0 : index
    %c0_1 = arith.constant 0 : index
    %4 = vector.load %arg8[%c0, %c0_1] : memref<8x1xi32, #tpu.memory_space<vmem>>, vector<8x1xi32>
    %5 = vector.broadcast %0 : i32 to vector<8x1xi32>
    %6 = arith.subi %4, %5 : vector<8x1xi32>
    %c0_2 = arith.constant 0 : index
    %c0_3 = arith.constant 0 : index
    %7 = vector.load %arg1[%c0_2, %c0_3] : memref<64x128xbf16, #tpu.memory_space<vmem>>, vector<64x128xbf16>
    %c0_4 = arith.constant 0 : index
    %c0_5 = arith.constant 0 : index
    %8 = vector.load %arg2[%c0_4, %c0_5] : memref<128x512xbf16, #tpu.memory_space<vmem>>, vector<128x512xbf16>
    %c0_6 = arith.constant 0 : index
    %c0_7 = arith.constant 0 : index
    %9 = vector.load %arg3[%c0_6, %c0_7] : memref<128x512xbf16, #tpu.memory_space<vmem>>, vector<128x512xbf16>
    %c0_8 = arith.constant 0 : index
    %c0_9 = arith.constant 0 : index
    %10 = vector.load %arg4[%c0_8, %c0_9] : memref<1x512xf32, #tpu.memory_space<vmem>>, vector<1x512xf32>
    %cst = arith.constant dense<0.000000e+00> : vector<64x512xf32>
    %11 = tpu.matmul %7, %8, %cst {dimension_numbers = #tpu.dot_dimension_numbers<[1], [0], [0], [1], [0, 0, 1, 1], [], []>} : vector<64x128xbf16>, vector<128x512xbf16>, vector<64x512xf32> -> vector<64x512xf32>
    %12 = vector.broadcast %10 : vector<1x512xf32> to vector<64x512xf32>
    %13 = arith.addf %11, %12 : vector<64x512xf32>
    %c0_10 = arith.constant 0 : index
    %c0_11 = arith.constant 0 : index
    %c0_12 = arith.constant 0 : index
    %14 = vector.load %arg13[%c0_10, %c0_11, %c0_12] : memref<2x8x128xf32, #tpu.memory_space<vmem>>, vector<1x8x128xf32>
    %15 = vector.shape_cast %14 : vector<1x8x128xf32> to vector<8x128xf32>
    %c0_13 = arith.constant 0 : index
    %c0_14 = arith.constant 0 : index
    %c0_15 = arith.constant 0 : index
    %16 = vector.load %arg14[%c0_13, %c0_14, %c0_15] : memref<2x8x128xf32, #tpu.memory_space<vmem>>, vector<1x8x128xf32>
    %17 = vector.shape_cast %16 : vector<1x8x128xf32> to vector<8x128xf32>
    %18 = vector.extract_strided_slice %13 {offsets = [0, 0], sizes = [8, 512], strides = [1, 1]} : vector<64x512xf32> to vector<8x512xf32>
    %19 = arith.truncf %15 : vector<8x128xf32> to vector<8x128xbf16>
    %cst_16 = arith.constant dense<0.000000e+00> : vector<8x512xf32>
    %20 = tpu.matmul %19, %9, %cst_16 {dimension_numbers = #tpu.dot_dimension_numbers<[1], [0], [0], [1], [0, 0, 1, 1], [], []>} : vector<8x128xbf16>, vector<128x512xbf16>, vector<8x512xf32> -> vector<8x512xf32>
    %21 = arith.addf %18, %20 : vector<8x512xf32>
    %22 = vector.extract_strided_slice %21 {offsets = [0, 0], sizes = [8, 128], strides = [1, 1]} : vector<8x512xf32> to vector<8x128xf32>
    %23 = arith.negf %22 : vector<8x128xf32>
    %24 = math.exp %23 : vector<8x128xf32>
    %cst_17 = arith.constant 1.000000e+00 : f32
    %25 = vector.broadcast %cst_17 : f32 to vector<8x128xf32>
    %26 = arith.addf %25, %24 : vector<8x128xf32>
    %27 = arith.divf %25, %26 : vector<8x128xf32>
    %28 = vector.extract_strided_slice %21 {offsets = [0, 128], sizes = [8, 128], strides = [1, 1]} : vector<8x512xf32> to vector<8x128xf32>
    %29 = arith.negf %28 : vector<8x128xf32>
    %30 = math.exp %29 : vector<8x128xf32>
    %cst_18 = arith.constant 1.000000e+00 : f32
    %31 = vector.broadcast %cst_18 : f32 to vector<8x128xf32>
    %32 = arith.addf %31, %30 : vector<8x128xf32>
    %33 = arith.divf %31, %32 : vector<8x128xf32>
    %34 = vector.extract_strided_slice %21 {offsets = [0, 256], sizes = [8, 128], strides = [1, 1]} : vector<8x512xf32> to vector<8x128xf32>
    %35 = math.tanh %34 : vector<8x128xf32>
    %36 = vector.extract_strided_slice %21 {offsets = [0, 384], sizes = [8, 128], strides = [1, 1]} : vector<8x512xf32> to vector<8x128xf32>
    %37 = arith.negf %36 : vector<8x128xf32>
    %38 = math.exp %37 : vector<8x128xf32>
    %cst_19 = arith.constant 1.000000e+00 : f32
    %39 = vector.broadcast %cst_19 : f32 to vector<8x128xf32>
    %40 = arith.addf %39, %38 : vector<8x128xf32>
    %41 = arith.divf %39, %40 : vector<8x128xf32>
    %42 = arith.mulf %33, %17 : vector<8x128xf32>
    %43 = arith.mulf %27, %35 : vector<8x128xf32>
    %44 = arith.addf %42, %43 : vector<8x128xf32>
    %45 = math.tanh %44 : vector<8x128xf32>
    %46 = arith.mulf %41, %45 : vector<8x128xf32>
    %c0_i32_20 = arith.constant 0 : i32
    %47 = vector.broadcast %c0_i32_20 : i32 to vector<8x1xi32>
    %48 = arith.cmpi sgt, %6, %47 : vector<8x1xi32>
    %49 = vector.shape_cast %48 : vector<8x1xi1> to vector<8x1xi1>
    %50 = vector.broadcast %49 : vector<8x1xi1> to vector<8x128xi1>
    %51 = arith.select %50, %46, %15 : vector<8x128xi1>, vector<8x128xf32>
    %52 = vector.shape_cast %48 : vector<8x1xi1> to vector<8x1xi1>
    %53 = vector.broadcast %52 : vector<8x1xi1> to vector<8x128xi1>
    %54 = arith.select %53, %44, %17 : vector<8x128xi1>, vector<8x128xf32>
    %55 = vector.extract_strided_slice %13 {offsets = [8, 0], sizes = [8, 512], strides = [1, 1]} : vector<64x512xf32> to vector<8x512xf32>
    %56 = arith.truncf %51 : vector<8x128xf32> to vector<8x128xbf16>
    %cst_21 = arith.constant dense<0.000000e+00> : vector<8x512xf32>
    %57 = tpu.matmul %56, %9, %cst_21 {dimension_numbers = #tpu.dot_dimension_numbers<[1], [0], [0], [1], [0, 0, 1, 1], [], []>} : vector<8x128xbf16>, vector<128x512xbf16>, vector<8x512xf32> -> vector<8x512xf32>
    %58 = arith.addf %55, %57 : vector<8x512xf32>
    %59 = vector.extract_strided_slice %58 {offsets = [0, 0], sizes = [8, 128], strides = [1, 1]} : vector<8x512xf32> to vector<8x128xf32>
    %60 = arith.negf %59 : vector<8x128xf32>
    %61 = math.exp %60 : vector<8x128xf32>
    %cst_22 = arith.constant 1.000000e+00 : f32
    %62 = vector.broadcast %cst_22 : f32 to vector<8x128xf32>
    %63 = arith.addf %62, %61 : vector<8x128xf32>
    %64 = arith.divf %62, %63 : vector<8x128xf32>
    %65 = vector.extract_strided_slice %58 {offsets = [0, 128], sizes = [8, 128], strides = [1, 1]} : vector<8x512xf32> to vector<8x128xf32>
    %66 = arith.negf %65 : vector<8x128xf32>
    %67 = math.exp %66 : vector<8x128xf32>
    %cst_23 = arith.constant 1.000000e+00 : f32
    %68 = vector.broadcast %cst_23 : f32 to vector<8x128xf32>
    %69 = arith.addf %68, %67 : vector<8x128xf32>
    %70 = arith.divf %68, %69 : vector<8x128xf32>
    %71 = vector.extract_strided_slice %58 {offsets = [0, 256], sizes = [8, 128], strides = [1, 1]} : vector<8x512xf32> to vector<8x128xf32>
    %72 = math.tanh %71 : vector<8x128xf32>
    %73 = vector.extract_strided_slice %58 {offsets = [0, 384], sizes = [8, 128], strides = [1, 1]} : vector<8x512xf32> to vector<8x128xf32>
    %74 = arith.negf %73 : vector<8x128xf32>
    %75 = math.exp %74 : vector<8x128xf32>
    %cst_24 = arith.constant 1.000000e+00 : f32
    %76 = vector.broadcast %cst_24 : f32 to vector<8x128xf32>
    %77 = arith.addf %76, %75 : vector<8x128xf32>
    %78 = arith.divf %76, %77 : vector<8x128xf32>
    %79 = arith.mulf %70, %54 : vector<8x128xf32>
    %80 = arith.mulf %64, %72 : vector<8x128xf32>
    %81 = arith.addf %79, %80 : vector<8x128xf32>
    %82 = math.tanh %81 : vector<8x128xf32>
    %83 = arith.mulf %78, %82 : vector<8x128xf32>
    %c1_i32 = arith.constant 1 : i32
    %84 = vector.broadcast %c1_i32 : i32 to vector<8x1xi32>
    %85 = arith.cmpi sgt, %6, %84 : vector<8x1xi32>
    %86 = vector.shape_cast %85 : vector<8x1xi1> to vector<8x1xi1>
    %87 = vector.broadcast %86 : vector<8x1xi1> to vector<8x128xi1>
    %88 = arith.select %87, %83, %51 : vector<8x128xi1>, vector<8x128xf32>
    %89 = vector.shape_cast %85 : vector<8x1xi1> to vector<8x1xi1>
    %90 = vector.broadcast %89 : vector<8x1xi1> to vector<8x128xi1>
    %91 = arith.select %90, %81, %54 : vector<8x128xi1>, vector<8x128xf32>
    %92 = vector.extract_strided_slice %13 {offsets = [16, 0], sizes = [8, 512], strides = [1, 1]} : vector<64x512xf32> to vector<8x512xf32>
    %93 = arith.truncf %88 : vector<8x128xf32> to vector<8x128xbf16>
    %cst_25 = arith.constant dense<0.000000e+00> : vector<8x512xf32>
    %94 = tpu.matmul %93, %9, %cst_25 {dimension_numbers = #tpu.dot_dimension_numbers<[1], [0], [0], [1], [0, 0, 1, 1], [], []>} : vector<8x128xbf16>, vector<128x512xbf16>, vector<8x512xf32> -> vector<8x512xf32>
    %95 = arith.addf %92, %94 : vector<8x512xf32>
    %96 = vector.extract_strided_slice %95 {offsets = [0, 0], sizes = [8, 128], strides = [1, 1]} : vector<8x512xf32> to vector<8x128xf32>
    %97 = arith.negf %96 : vector<8x128xf32>
    %98 = math.exp %97 : vector<8x128xf32>
    %cst_26 = arith.constant 1.000000e+00 : f32
    %99 = vector.broadcast %cst_26 : f32 to vector<8x128xf32>
    %100 = arith.addf %99, %98 : vector<8x128xf32>
    %101 = arith.divf %99, %100 : vector<8x128xf32>
    %102 = vector.extract_strided_slice %95 {offsets = [0, 128], sizes = [8, 128], strides = [1, 1]} : vector<8x512xf32> to vector<8x128xf32>
    %103 = arith.negf %102 : vector<8x128xf32>
    %104 = math.exp %103 : vector<8x128xf32>
    %cst_27 = arith.constant 1.000000e+00 : f32
    %105 = vector.broadcast %cst_27 : f32 to vector<8x128xf32>
    %106 = arith.addf %105, %104 : vector<8x128xf32>
    %107 = arith.divf %105, %106 : vector<8x128xf32>
    %108 = vector.extract_strided_slice %95 {offsets = [0, 256], sizes = [8, 128], strides = [1, 1]} : vector<8x512xf32> to vector<8x128xf32>
    %109 = math.tanh %108 : vector<8x128xf32>
    %110 = vector.extract_strided_slice %95 {offsets = [0, 384], sizes = [8, 128], strides = [1, 1]} : vector<8x512xf32> to vector<8x128xf32>
    %111 = arith.negf %110 : vector<8x128xf32>
    %112 = math.exp %111 : vector<8x128xf32>
    %cst_28 = arith.constant 1.000000e+00 : f32
    %113 = vector.broadcast %cst_28 : f32 to vector<8x128xf32>
    %114 = arith.addf %113, %112 : vector<8x128xf32>
    %115 = arith.divf %113, %114 : vector<8x128xf32>
    %116 = arith.mulf %107, %91 : vector<8x128xf32>
    %117 = arith.mulf %101, %109 : vector<8x128xf32>
    %118 = arith.addf %116, %117 : vector<8x128xf32>
    %119 = math.tanh %118 : vector<8x128xf32>
    %120 = arith.mulf %115, %119 : vector<8x128xf32>
    %c2_i32 = arith.constant 2 : i32
    %121 = vector.broadcast %c2_i32 : i32 to vector<8x1xi32>
    %122 = arith.cmpi sgt, %6, %121 : vector<8x1xi32>
    %123 = vector.shape_cast %122 : vector<8x1xi1> to vector<8x1xi1>
    %124 = vector.broadcast %123 : vector<8x1xi1> to vector<8x128xi1>
    %125 = arith.select %124, %120, %88 : vector<8x128xi1>, vector<8x128xf32>
    %126 = vector.shape_cast %122 : vector<8x1xi1> to vector<8x1xi1>
    %127 = vector.broadcast %126 : vector<8x1xi1> to vector<8x128xi1>
    %128 = arith.select %127, %118, %91 : vector<8x128xi1>, vector<8x128xf32>
    %129 = vector.extract_strided_slice %13 {offsets = [24, 0], sizes = [8, 512], strides = [1, 1]} : vector<64x512xf32> to vector<8x512xf32>
    %130 = arith.truncf %125 : vector<8x128xf32> to vector<8x128xbf16>
    %cst_29 = arith.constant dense<0.000000e+00> : vector<8x512xf32>
    %131 = tpu.matmul %130, %9, %cst_29 {dimension_numbers = #tpu.dot_dimension_numbers<[1], [0], [0], [1], [0, 0, 1, 1], [], []>} : vector<8x128xbf16>, vector<128x512xbf16>, vector<8x512xf32> -> vector<8x512xf32>
    %132 = arith.addf %129, %131 : vector<8x512xf32>
    %133 = vector.extract_strided_slice %132 {offsets = [0, 0], sizes = [8, 128], strides = [1, 1]} : vector<8x512xf32> to vector<8x128xf32>
    %134 = arith.negf %133 : vector<8x128xf32>
    %135 = math.exp %134 : vector<8x128xf32>
    %cst_30 = arith.constant 1.000000e+00 : f32
    %136 = vector.broadcast %cst_30 : f32 to vector<8x128xf32>
    %137 = arith.addf %136, %135 : vector<8x128xf32>
    %138 = arith.divf %136, %137 : vector<8x128xf32>
    %139 = vector.extract_strided_slice %132 {offsets = [0, 128], sizes = [8, 128], strides = [1, 1]} : vector<8x512xf32> to vector<8x128xf32>
    %140 = arith.negf %139 : vector<8x128xf32>
    %141 = math.exp %140 : vector<8x128xf32>
    %cst_31 = arith.constant 1.000000e+00 : f32
    %142 = vector.broadcast %cst_31 : f32 to vector<8x128xf32>
    %143 = arith.addf %142, %141 : vector<8x128xf32>
    %144 = arith.divf %142, %143 : vector<8x128xf32>
    %145 = vector.extract_strided_slice %132 {offsets = [0, 256], sizes = [8, 128], strides = [1, 1]} : vector<8x512xf32> to vector<8x128xf32>
    %146 = math.tanh %145 : vector<8x128xf32>
    %147 = vector.extract_strided_slice %132 {offsets = [0, 384], sizes = [8, 128], strides = [1, 1]} : vector<8x512xf32> to vector<8x128xf32>
    %148 = arith.negf %147 : vector<8x128xf32>
    %149 = math.exp %148 : vector<8x128xf32>
    %cst_32 = arith.constant 1.000000e+00 : f32
    %150 = vector.broadcast %cst_32 : f32 to vector<8x128xf32>
    %151 = arith.addf %150, %149 : vector<8x128xf32>
    %152 = arith.divf %150, %151 : vector<8x128xf32>
    %153 = arith.mulf %144, %128 : vector<8x128xf32>
    %154 = arith.mulf %138, %146 : vector<8x128xf32>
    %155 = arith.addf %153, %154 : vector<8x128xf32>
    %156 = math.tanh %155 : vector<8x128xf32>
    %157 = arith.mulf %152, %156 : vector<8x128xf32>
    %c3_i32 = arith.constant 3 : i32
    %158 = vector.broadcast %c3_i32 : i32 to vector<8x1xi32>
    %159 = arith.cmpi sgt, %6, %158 : vector<8x1xi32>
    %160 = vector.shape_cast %159 : vector<8x1xi1> to vector<8x1xi1>
    %161 = vector.broadcast %160 : vector<8x1xi1> to vector<8x128xi1>
    %162 = arith.select %161, %157, %125 : vector<8x128xi1>, vector<8x128xf32>
    %163 = vector.shape_cast %159 : vector<8x1xi1> to vector<8x1xi1>
    %164 = vector.broadcast %163 : vector<8x1xi1> to vector<8x128xi1>
    %165 = arith.select %164, %155, %128 : vector<8x128xi1>, vector<8x128xf32>
    %166 = vector.extract_strided_slice %13 {offsets = [32, 0], sizes = [8, 512], strides = [1, 1]} : vector<64x512xf32> to vector<8x512xf32>
    %167 = arith.truncf %162 : vector<8x128xf32> to vector<8x128xbf16>
    %cst_33 = arith.constant dense<0.000000e+00> : vector<8x512xf32>
    %168 = tpu.matmul %167, %9, %cst_33 {dimension_numbers = #tpu.dot_dimension_numbers<[1], [0], [0], [1], [0, 0, 1, 1], [], []>} : vector<8x128xbf16>, vector<128x512xbf16>, vector<8x512xf32> -> vector<8x512xf32>
    %169 = arith.addf %166, %168 : vector<8x512xf32>
    %170 = vector.extract_strided_slice %169 {offsets = [0, 0], sizes = [8, 128], strides = [1, 1]} : vector<8x512xf32> to vector<8x128xf32>
    %171 = arith.negf %170 : vector<8x128xf32>
    %172 = math.exp %171 : vector<8x128xf32>
    %cst_34 = arith.constant 1.000000e+00 : f32
    %173 = vector.broadcast %cst_34 : f32 to vector<8x128xf32>
    %174 = arith.addf %173, %172 : vector<8x128xf32>
    %175 = arith.divf %173, %174 : vector<8x128xf32>
    %176 = vector.extract_strided_slice %169 {offsets = [0, 128], sizes = [8, 128], strides = [1, 1]} : vector<8x512xf32> to vector<8x128xf32>
    %177 = arith.negf %176 : vector<8x128xf32>
    %178 = math.exp %177 : vector<8x128xf32>
    %cst_35 = arith.constant 1.000000e+00 : f32
    %179 = vector.broadcast %cst_35 : f32 to vector<8x128xf32>
    %180 = arith.addf %179, %178 : vector<8x128xf32>
    %181 = arith.divf %179, %180 : vector<8x128xf32>
    %182 = vector.extract_strided_slice %169 {offsets = [0, 256], sizes = [8, 128], strides = [1, 1]} : vector<8x512xf32> to vector<8x128xf32>
    %183 = math.tanh %182 : vector<8x128xf32>
    %184 = vector.extract_strided_slice %169 {offsets = [0, 384], sizes = [8, 128], strides = [1, 1]} : vector<8x512xf32> to vector<8x128xf32>
    %185 = arith.negf %184 : vector<8x128xf32>
    %186 = math.exp %185 : vector<8x128xf32>
    %cst_36 = arith.constant 1.000000e+00 : f32
    %187 = vector.broadcast %cst_36 : f32 to vector<8x128xf32>
    %188 = arith.addf %187, %186 : vector<8x128xf32>
    %189 = arith.divf %187, %188 : vector<8x128xf32>
    %190 = arith.mulf %181, %165 : vector<8x128xf32>
    %191 = arith.mulf %175, %183 : vector<8x128xf32>
    %192 = arith.addf %190, %191 : vector<8x128xf32>
    %193 = math.tanh %192 : vector<8x128xf32>
    %194 = arith.mulf %189, %193 : vector<8x128xf32>
    %c4_i32 = arith.constant 4 : i32
    %195 = vector.broadcast %c4_i32 : i32 to vector<8x1xi32>
    %196 = arith.cmpi sgt, %6, %195 : vector<8x1xi32>
    %197 = vector.shape_cast %196 : vector<8x1xi1> to vector<8x1xi1>
    %198 = vector.broadcast %197 : vector<8x1xi1> to vector<8x128xi1>
    %199 = arith.select %198, %194, %162 : vector<8x128xi1>, vector<8x128xf32>
    %200 = vector.shape_cast %196 : vector<8x1xi1> to vector<8x1xi1>
    %201 = vector.broadcast %200 : vector<8x1xi1> to vector<8x128xi1>
    %202 = arith.select %201, %192, %165 : vector<8x128xi1>, vector<8x128xf32>
    %203 = vector.extract_strided_slice %13 {offsets = [40, 0], sizes = [8, 512], strides = [1, 1]} : vector<64x512xf32> to vector<8x512xf32>
    %204 = arith.truncf %199 : vector<8x128xf32> to vector<8x128xbf16>
    %cst_37 = arith.constant dense<0.000000e+00> : vector<8x512xf32>
    %205 = tpu.matmul %204, %9, %cst_37 {dimension_numbers = #tpu.dot_dimension_numbers<[1], [0], [0], [1], [0, 0, 1, 1], [], []>} : vector<8x128xbf16>, vector<128x512xbf16>, vector<8x512xf32> -> vector<8x512xf32>
    %206 = arith.addf %203, %205 : vector<8x512xf32>
    %207 = vector.extract_strided_slice %206 {offsets = [0, 0], sizes = [8, 128], strides = [1, 1]} : vector<8x512xf32> to vector<8x128xf32>
    %208 = arith.negf %207 : vector<8x128xf32>
    %209 = math.exp %208 : vector<8x128xf32>
    %cst_38 = arith.constant 1.000000e+00 : f32
    %210 = vector.broadcast %cst_38 : f32 to vector<8x128xf32>
    %211 = arith.addf %210, %209 : vector<8x128xf32>
    %212 = arith.divf %210, %211 : vector<8x128xf32>
    %213 = vector.extract_strided_slice %206 {offsets = [0, 128], sizes = [8, 128], strides = [1, 1]} : vector<8x512xf32> to vector<8x128xf32>
    %214 = arith.negf %213 : vector<8x128xf32>
    %215 = math.exp %214 : vector<8x128xf32>
    %cst_39 = arith.constant 1.000000e+00 : f32
    %216 = vector.broadcast %cst_39 : f32 to vector<8x128xf32>
    %217 = arith.addf %216, %215 : vector<8x128xf32>
    %218 = arith.divf %216, %217 : vector<8x128xf32>
    %219 = vector.extract_strided_slice %206 {offsets = [0, 256], sizes = [8, 128], strides = [1, 1]} : vector<8x512xf32> to vector<8x128xf32>
    %220 = math.tanh %219 : vector<8x128xf32>
    %221 = vector.extract_strided_slice %206 {offsets = [0, 384], sizes = [8, 128], strides = [1, 1]} : vector<8x512xf32> to vector<8x128xf32>
    %222 = arith.negf %221 : vector<8x128xf32>
    %223 = math.exp %222 : vector<8x128xf32>
    %cst_40 = arith.constant 1.000000e+00 : f32
    %224 = vector.broadcast %cst_40 : f32 to vector<8x128xf32>
    %225 = arith.addf %224, %223 : vector<8x128xf32>
    %226 = arith.divf %224, %225 : vector<8x128xf32>
    %227 = arith.mulf %218, %202 : vector<8x128xf32>
    %228 = arith.mulf %212, %220 : vector<8x128xf32>
    %229 = arith.addf %227, %228 : vector<8x128xf32>
    %230 = math.tanh %229 : vector<8x128xf32>
    %231 = arith.mulf %226, %230 : vector<8x128xf32>
    %c5_i32 = arith.constant 5 : i32
    %232 = vector.broadcast %c5_i32 : i32 to vector<8x1xi32>
    %233 = arith.cmpi sgt, %6, %232 : vector<8x1xi32>
    %234 = vector.shape_cast %233 : vector<8x1xi1> to vector<8x1xi1>
    %235 = vector.broadcast %234 : vector<8x1xi1> to vector<8x128xi1>
    %236 = arith.select %235, %231, %199 : vector<8x128xi1>, vector<8x128xf32>
    %237 = vector.shape_cast %233 : vector<8x1xi1> to vector<8x1xi1>
    %238 = vector.broadcast %237 : vector<8x1xi1> to vector<8x128xi1>
    %239 = arith.select %238, %229, %202 : vector<8x128xi1>, vector<8x128xf32>
    %240 = vector.extract_strided_slice %13 {offsets = [48, 0], sizes = [8, 512], strides = [1, 1]} : vector<64x512xf32> to vector<8x512xf32>
    %241 = arith.truncf %236 : vector<8x128xf32> to vector<8x128xbf16>
    %cst_41 = arith.constant dense<0.000000e+00> : vector<8x512xf32>
    %242 = tpu.matmul %241, %9, %cst_41 {dimension_numbers = #tpu.dot_dimension_numbers<[1], [0], [0], [1], [0, 0, 1, 1], [], []>} : vector<8x128xbf16>, vector<128x512xbf16>, vector<8x512xf32> -> vector<8x512xf32>
    %243 = arith.addf %240, %242 : vector<8x512xf32>
    %244 = vector.extract_strided_slice %243 {offsets = [0, 0], sizes = [8, 128], strides = [1, 1]} : vector<8x512xf32> to vector<8x128xf32>
    %245 = arith.negf %244 : vector<8x128xf32>
    %246 = math.exp %245 : vector<8x128xf32>
    %cst_42 = arith.constant 1.000000e+00 : f32
    %247 = vector.broadcast %cst_42 : f32 to vector<8x128xf32>
    %248 = arith.addf %247, %246 : vector<8x128xf32>
    %249 = arith.divf %247, %248 : vector<8x128xf32>
    %250 = vector.extract_strided_slice %243 {offsets = [0, 128], sizes = [8, 128], strides = [1, 1]} : vector<8x512xf32> to vector<8x128xf32>
    %251 = arith.negf %250 : vector<8x128xf32>
    %252 = math.exp %251 : vector<8x128xf32>
    %cst_43 = arith.constant 1.000000e+00 : f32
    %253 = vector.broadcast %cst_43 : f32 to vector<8x128xf32>
    %254 = arith.addf %253, %252 : vector<8x128xf32>
    %255 = arith.divf %253, %254 : vector<8x128xf32>
    %256 = vector.extract_strided_slice %243 {offsets = [0, 256], sizes = [8, 128], strides = [1, 1]} : vector<8x512xf32> to vector<8x128xf32>
    %257 = math.tanh %256 : vector<8x128xf32>
    %258 = vector.extract_strided_slice %243 {offsets = [0, 384], sizes = [8, 128], strides = [1, 1]} : vector<8x512xf32> to vector<8x128xf32>
    %259 = arith.negf %258 : vector<8x128xf32>
    %260 = math.exp %259 : vector<8x128xf32>
    %cst_44 = arith.constant 1.000000e+00 : f32
    %261 = vector.broadcast %cst_44 : f32 to vector<8x128xf32>
    %262 = arith.addf %261, %260 : vector<8x128xf32>
    %263 = arith.divf %261, %262 : vector<8x128xf32>
    %264 = arith.mulf %255, %239 : vector<8x128xf32>
    %265 = arith.mulf %249, %257 : vector<8x128xf32>
    %266 = arith.addf %264, %265 : vector<8x128xf32>
    %267 = math.tanh %266 : vector<8x128xf32>
    %268 = arith.mulf %263, %267 : vector<8x128xf32>
    %c6_i32 = arith.constant 6 : i32
    %269 = vector.broadcast %c6_i32 : i32 to vector<8x1xi32>
    %270 = arith.cmpi sgt, %6, %269 : vector<8x1xi32>
    %271 = vector.shape_cast %270 : vector<8x1xi1> to vector<8x1xi1>
    %272 = vector.broadcast %271 : vector<8x1xi1> to vector<8x128xi1>
    %273 = arith.select %272, %268, %236 : vector<8x128xi1>, vector<8x128xf32>
    %274 = vector.shape_cast %270 : vector<8x1xi1> to vector<8x1xi1>
    %275 = vector.broadcast %274 : vector<8x1xi1> to vector<8x128xi1>
    %276 = arith.select %275, %266, %239 : vector<8x128xi1>, vector<8x128xf32>
    %277 = vector.extract_strided_slice %13 {offsets = [56, 0], sizes = [8, 512], strides = [1, 1]} : vector<64x512xf32> to vector<8x512xf32>
    %278 = arith.truncf %273 : vector<8x128xf32> to vector<8x128xbf16>
    %cst_45 = arith.constant dense<0.000000e+00> : vector<8x512xf32>
    %279 = tpu.matmul %278, %9, %cst_45 {dimension_numbers = #tpu.dot_dimension_numbers<[1], [0], [0], [1], [0, 0, 1, 1], [], []>} : vector<8x128xbf16>, vector<128x512xbf16>, vector<8x512xf32> -> vector<8x512xf32>
    %280 = arith.addf %277, %279 : vector<8x512xf32>
    %281 = vector.extract_strided_slice %280 {offsets = [0, 0], sizes = [8, 128], strides = [1, 1]} : vector<8x512xf32> to vector<8x128xf32>
    %282 = arith.negf %281 : vector<8x128xf32>
    %283 = math.exp %282 : vector<8x128xf32>
    %cst_46 = arith.constant 1.000000e+00 : f32
    %284 = vector.broadcast %cst_46 : f32 to vector<8x128xf32>
    %285 = arith.addf %284, %283 : vector<8x128xf32>
    %286 = arith.divf %284, %285 : vector<8x128xf32>
    %287 = vector.extract_strided_slice %280 {offsets = [0, 128], sizes = [8, 128], strides = [1, 1]} : vector<8x512xf32> to vector<8x128xf32>
    %288 = arith.negf %287 : vector<8x128xf32>
    %289 = math.exp %288 : vector<8x128xf32>
    %cst_47 = arith.constant 1.000000e+00 : f32
    %290 = vector.broadcast %cst_47 : f32 to vector<8x128xf32>
    %291 = arith.addf %290, %289 : vector<8x128xf32>
    %292 = arith.divf %290, %291 : vector<8x128xf32>
    %293 = vector.extract_strided_slice %280 {offsets = [0, 256], sizes = [8, 128], strides = [1, 1]} : vector<8x512xf32> to vector<8x128xf32>
    %294 = math.tanh %293 : vector<8x128xf32>
    %295 = vector.extract_strided_slice %280 {offsets = [0, 384], sizes = [8, 128], strides = [1, 1]} : vector<8x512xf32> to vector<8x128xf32>
    %296 = arith.negf %295 : vector<8x128xf32>
    %297 = math.exp %296 : vector<8x128xf32>
    %cst_48 = arith.constant 1.000000e+00 : f32
    %298 = vector.broadcast %cst_48 : f32 to vector<8x128xf32>
    %299 = arith.addf %298, %297 : vector<8x128xf32>
    %300 = arith.divf %298, %299 : vector<8x128xf32>
    %301 = arith.mulf %292, %276 : vector<8x128xf32>
    %302 = arith.mulf %286, %294 : vector<8x128xf32>
    %303 = arith.addf %301, %302 : vector<8x128xf32>
    %304 = math.tanh %303 : vector<8x128xf32>
    %305 = arith.mulf %300, %304 : vector<8x128xf32>
    %c7_i32 = arith.constant 7 : i32
    %306 = vector.broadcast %c7_i32 : i32 to vector<8x1xi32>
    %307 = arith.cmpi sgt, %6, %306 : vector<8x1xi32>
    %308 = vector.shape_cast %307 : vector<8x1xi1> to vector<8x1xi1>
    %309 = vector.broadcast %308 : vector<8x1xi1> to vector<8x128xi1>
    %310 = arith.select %309, %305, %273 : vector<8x128xi1>, vector<8x128xf32>
    %311 = vector.shape_cast %307 : vector<8x1xi1> to vector<8x1xi1>
    %312 = vector.broadcast %311 : vector<8x1xi1> to vector<8x128xi1>
    %313 = arith.select %312, %303, %276 : vector<8x128xi1>, vector<8x128xf32>
    %c0_49 = arith.constant 0 : index
    %c0_50 = arith.constant 0 : index
    %c0_51 = arith.constant 0 : index
    %314 = vector.load %arg13[%c0_49, %c0_50, %c0_51] : memref<2x8x128xf32, #tpu.memory_space<vmem>>, vector<1x8x128xf32>
    %315 = vector.shape_cast %314 : vector<1x8x128xf32> to vector<8x128xf32>
    %316 = vector.shape_cast %310 : vector<8x128xf32> to vector<1x8x128xf32>
    tpu.vector_store %arg13[%c0_49, %c0_50, %c0_51], %316 {strides = array<i32>} : memref<2x8x128xf32, #tpu.memory_space<vmem>>, vector<1x8x128xf32>,
    %c0_52 = arith.constant 0 : index
    %c0_53 = arith.constant 0 : index
    %c0_54 = arith.constant 0 : index
    %317 = vector.load %arg14[%c0_52, %c0_53, %c0_54] : memref<2x8x128xf32, #tpu.memory_space<vmem>>, vector<1x8x128xf32>
    %318 = vector.shape_cast %317 : vector<1x8x128xf32> to vector<8x128xf32>
    %319 = vector.shape_cast %313 : vector<8x128xf32> to vector<1x8x128xf32>
    tpu.vector_store %arg14[%c0_52, %c0_53, %c0_54], %319 {strides = array<i32>} : memref<2x8x128xf32, #tpu.memory_space<vmem>>, vector<1x8x128xf32>,
    %320 = tpu.concatenate %51, %88, %125, %162, %199, %236, %273, %310 in 0 : vector<8x128xf32>, vector<8x128xf32>, vector<8x128xf32>, vector<8x128xf32>, vector<8x128xf32>, vector<8x128xf32>, vector<8x128xf32>, vector<8x128xf32> -> vector<64x128xf32>
    %321 = arith.truncf %320 : vector<64x128xf32> to vector<64x128xbf16>
    %c0_55 = arith.constant 0 : index
    %c0_56 = arith.constant 0 : index
    %322 = vector.load %arg5[%c0_55, %c0_56] : memref<128x512xbf16, #tpu.memory_space<vmem>>, vector<128x512xbf16>
    %c0_57 = arith.constant 0 : index
    %c0_58 = arith.constant 0 : index
    %323 = vector.load %arg6[%c0_57, %c0_58] : memref<128x512xbf16, #tpu.memory_space<vmem>>, vector<128x512xbf16>
    %c0_59 = arith.constant 0 : index
    %c0_60 = arith.constant 0 : index
    %324 = vector.load %arg7[%c0_59, %c0_60] : memref<1x512xf32, #tpu.memory_space<vmem>>, vector<1x512xf32>
    %cst_61 = arith.constant dense<0.000000e+00> : vector<64x512xf32>
    %325 = tpu.matmul %321, %322, %cst_61 {dimension_numbers = #tpu.dot_dimension_numbers<[1], [0], [0], [1], [0, 0, 1, 1], [], []>} : vector<64x128xbf16>, vector<128x512xbf16>, vector<64x512xf32> -> vector<64x512xf32>
    %326 = vector.broadcast %324 : vector<1x512xf32> to vector<64x512xf32>
    %327 = arith.addf %325, %326 : vector<64x512xf32>
    %c1 = arith.constant 1 : index
    %c0_62 = arith.constant 0 : index
    %c0_63 = arith.constant 0 : index
    %328 = vector.load %arg13[%c1, %c0_62, %c0_63] : memref<2x8x128xf32, #tpu.memory_space<vmem>>, vector<1x8x128xf32>
    %329 = vector.shape_cast %328 : vector<1x8x128xf32> to vector<8x128xf32>
    %c1_64 = arith.constant 1 : index
    %c0_65 = arith.constant 0 : index
    %c0_66 = arith.constant 0 : index
    %330 = vector.load %arg14[%c1_64, %c0_65, %c0_66] : memref<2x8x128xf32, #tpu.memory_space<vmem>>, vector<1x8x128xf32>
    %331 = vector.shape_cast %330 : vector<1x8x128xf32> to vector<8x128xf32>
    %332 = vector.extract_strided_slice %327 {offsets = [0, 0], sizes = [8, 512], strides = [1, 1]} : vector<64x512xf32> to vector<8x512xf32>
    %333 = arith.truncf %329 : vector<8x128xf32> to vector<8x128xbf16>
    %cst_67 = arith.constant dense<0.000000e+00> : vector<8x512xf32>
    %334 = tpu.matmul %333, %323, %cst_67 {dimension_numbers = #tpu.dot_dimension_numbers<[1], [0], [0], [1], [0, 0, 1, 1], [], []>} : vector<8x128xbf16>, vector<128x512xbf16>, vector<8x512xf32> -> vector<8x512xf32>
    %335 = arith.addf %332, %334 : vector<8x512xf32>
    %336 = vector.extract_strided_slice %335 {offsets = [0, 0], sizes = [8, 128], strides = [1, 1]} : vector<8x512xf32> to vector<8x128xf32>
    %337 = arith.negf %336 : vector<8x128xf32>
    %338 = math.exp %337 : vector<8x128xf32>
    %cst_68 = arith.constant 1.000000e+00 : f32
    %339 = vector.broadcast %cst_68 : f32 to vector<8x128xf32>
    %340 = arith.addf %339, %338 : vector<8x128xf32>
    %341 = arith.divf %339, %340 : vector<8x128xf32>
    %342 = vector.extract_strided_slice %335 {offsets = [0, 128], sizes = [8, 128], strides = [1, 1]} : vector<8x512xf32> to vector<8x128xf32>
    %343 = arith.negf %342 : vector<8x128xf32>
    %344 = math.exp %343 : vector<8x128xf32>
    %cst_69 = arith.constant 1.000000e+00 : f32
    %345 = vector.broadcast %cst_69 : f32 to vector<8x128xf32>
    %346 = arith.addf %345, %344 : vector<8x128xf32>
    %347 = arith.divf %345, %346 : vector<8x128xf32>
    %348 = vector.extract_strided_slice %335 {offsets = [0, 256], sizes = [8, 128], strides = [1, 1]} : vector<8x512xf32> to vector<8x128xf32>
    %349 = math.tanh %348 : vector<8x128xf32>
    %350 = vector.extract_strided_slice %335 {offsets = [0, 384], sizes = [8, 128], strides = [1, 1]} : vector<8x512xf32> to vector<8x128xf32>
    %351 = arith.negf %350 : vector<8x128xf32>
    %352 = math.exp %351 : vector<8x128xf32>
    %cst_70 = arith.constant 1.000000e+00 : f32
    %353 = vector.broadcast %cst_70 : f32 to vector<8x128xf32>
    %354 = arith.addf %353, %352 : vector<8x128xf32>
    %355 = arith.divf %353, %354 : vector<8x128xf32>
    %356 = arith.mulf %347, %331 : vector<8x128xf32>
    %357 = arith.mulf %341, %349 : vector<8x128xf32>
    %358 = arith.addf %356, %357 : vector<8x128xf32>
    %359 = math.tanh %358 : vector<8x128xf32>
    %360 = arith.mulf %355, %359 : vector<8x128xf32>
    %c0_i32_71 = arith.constant 0 : i32
    %361 = vector.broadcast %c0_i32_71 : i32 to vector<8x1xi32>
    %362 = arith.cmpi sgt, %6, %361 : vector<8x1xi32>
    %363 = vector.shape_cast %362 : vector<8x1xi1> to vector<8x1xi1>
    %364 = vector.broadcast %363 : vector<8x1xi1> to vector<8x128xi1>
    %365 = arith.select %364, %360, %329 : vector<8x128xi1>, vector<8x128xf32>
    %366 = vector.shape_cast %362 : vector<8x1xi1> to vector<8x1xi1>
    %367 = vector.broadcast %366 : vector<8x1xi1> to vector<8x128xi1>
    %368 = arith.select %367, %358, %331 : vector<8x128xi1>, vector<8x128xf32>
    %369 = vector.extract_strided_slice %327 {offsets = [8, 0], sizes = [8, 512], strides = [1, 1]} : vector<64x512xf32> to vector<8x512xf32>
    %370 = arith.truncf %365 : vector<8x128xf32> to vector<8x128xbf16>
    %cst_72 = arith.constant dense<0.000000e+00> : vector<8x512xf32>
    %371 = tpu.matmul %370, %323, %cst_72 {dimension_numbers = #tpu.dot_dimension_numbers<[1], [0], [0], [1], [0, 0, 1, 1], [], []>} : vector<8x128xbf16>, vector<128x512xbf16>, vector<8x512xf32> -> vector<8x512xf32>
    %372 = arith.addf %369, %371 : vector<8x512xf32>
    %373 = vector.extract_strided_slice %372 {offsets = [0, 0], sizes = [8, 128], strides = [1, 1]} : vector<8x512xf32> to vector<8x128xf32>
    %374 = arith.negf %373 : vector<8x128xf32>
    %375 = math.exp %374 : vector<8x128xf32>
    %cst_73 = arith.constant 1.000000e+00 : f32
    %376 = vector.broadcast %cst_73 : f32 to vector<8x128xf32>
    %377 = arith.addf %376, %375 : vector<8x128xf32>
    %378 = arith.divf %376, %377 : vector<8x128xf32>
    %379 = vector.extract_strided_slice %372 {offsets = [0, 128], sizes = [8, 128], strides = [1, 1]} : vector<8x512xf32> to vector<8x128xf32>
    %380 = arith.negf %379 : vector<8x128xf32>
    %381 = math.exp %380 : vector<8x128xf32>
    %cst_74 = arith.constant 1.000000e+00 : f32
    %382 = vector.broadcast %cst_74 : f32 to vector<8x128xf32>
    %383 = arith.addf %382, %381 : vector<8x128xf32>
    %384 = arith.divf %382, %383 : vector<8x128xf32>
    %385 = vector.extract_strided_slice %372 {offsets = [0, 256], sizes = [8, 128], strides = [1, 1]} : vector<8x512xf32> to vector<8x128xf32>
    %386 = math.tanh %385 : vector<8x128xf32>
    %387 = vector.extract_strided_slice %372 {offsets = [0, 384], sizes = [8, 128], strides = [1, 1]} : vector<8x512xf32> to vector<8x128xf32>
    %388 = arith.negf %387 : vector<8x128xf32>
    %389 = math.exp %388 : vector<8x128xf32>
    %cst_75 = arith.constant 1.000000e+00 : f32
    %390 = vector.broadcast %cst_75 : f32 to vector<8x128xf32>
    %391 = arith.addf %390, %389 : vector<8x128xf32>
    %392 = arith.divf %390, %391 : vector<8x128xf32>
    %393 = arith.mulf %384, %368 : vector<8x128xf32>
    %394 = arith.mulf %378, %386 : vector<8x128xf32>
    %395 = arith.addf %393, %394 : vector<8x128xf32>
    %396 = math.tanh %395 : vector<8x128xf32>
    %397 = arith.mulf %392, %396 : vector<8x128xf32>
    %c1_i32_76 = arith.constant 1 : i32
    %398 = vector.broadcast %c1_i32_76 : i32 to vector<8x1xi32>
    %399 = arith.cmpi sgt, %6, %398 : vector<8x1xi32>
    %400 = vector.shape_cast %399 : vector<8x1xi1> to vector<8x1xi1>
    %401 = vector.broadcast %400 : vector<8x1xi1> to vector<8x128xi1>
    %402 = arith.select %401, %397, %365 : vector<8x128xi1>, vector<8x128xf32>
    %403 = vector.shape_cast %399 : vector<8x1xi1> to vector<8x1xi1>
    %404 = vector.broadcast %403 : vector<8x1xi1> to vector<8x128xi1>
    %405 = arith.select %404, %395, %368 : vector<8x128xi1>, vector<8x128xf32>
    %406 = vector.extract_strided_slice %327 {offsets = [16, 0], sizes = [8, 512], strides = [1, 1]} : vector<64x512xf32> to vector<8x512xf32>
    %407 = arith.truncf %402 : vector<8x128xf32> to vector<8x128xbf16>
    %cst_77 = arith.constant dense<0.000000e+00> : vector<8x512xf32>
    %408 = tpu.matmul %407, %323, %cst_77 {dimension_numbers = #tpu.dot_dimension_numbers<[1], [0], [0], [1], [0, 0, 1, 1], [], []>} : vector<8x128xbf16>, vector<128x512xbf16>, vector<8x512xf32> -> vector<8x512xf32>
    %409 = arith.addf %406, %408 : vector<8x512xf32>
    %410 = vector.extract_strided_slice %409 {offsets = [0, 0], sizes = [8, 128], strides = [1, 1]} : vector<8x512xf32> to vector<8x128xf32>
    %411 = arith.negf %410 : vector<8x128xf32>
    %412 = math.exp %411 : vector<8x128xf32>
    %cst_78 = arith.constant 1.000000e+00 : f32
    %413 = vector.broadcast %cst_78 : f32 to vector<8x128xf32>
    %414 = arith.addf %413, %412 : vector<8x128xf32>
    %415 = arith.divf %413, %414 : vector<8x128xf32>
    %416 = vector.extract_strided_slice %409 {offsets = [0, 128], sizes = [8, 128], strides = [1, 1]} : vector<8x512xf32> to vector<8x128xf32>
    %417 = arith.negf %416 : vector<8x128xf32>
    %418 = math.exp %417 : vector<8x128xf32>
    %cst_79 = arith.constant 1.000000e+00 : f32
    %419 = vector.broadcast %cst_79 : f32 to vector<8x128xf32>
    %420 = arith.addf %419, %418 : vector<8x128xf32>
    %421 = arith.divf %419, %420 : vector<8x128xf32>
    %422 = vector.extract_strided_slice %409 {offsets = [0, 256], sizes = [8, 128], strides = [1, 1]} : vector<8x512xf32> to vector<8x128xf32>
    %423 = math.tanh %422 : vector<8x128xf32>
    %424 = vector.extract_strided_slice %409 {offsets = [0, 384], sizes = [8, 128], strides = [1, 1]} : vector<8x512xf32> to vector<8x128xf32>
    %425 = arith.negf %424 : vector<8x128xf32>
    %426 = math.exp %425 : vector<8x128xf32>
    %cst_80 = arith.constant 1.000000e+00 : f32
    %427 = vector.broadcast %cst_80 : f32 to vector<8x128xf32>
    %428 = arith.addf %427, %426 : vector<8x128xf32>
    %429 = arith.divf %427, %428 : vector<8x128xf32>
    %430 = arith.mulf %421, %405 : vector<8x128xf32>
    %431 = arith.mulf %415, %423 : vector<8x128xf32>
    %432 = arith.addf %430, %431 : vector<8x128xf32>
    %433 = math.tanh %432 : vector<8x128xf32>
    %434 = arith.mulf %429, %433 : vector<8x128xf32>
    %c2_i32_81 = arith.constant 2 : i32
    %435 = vector.broadcast %c2_i32_81 : i32 to vector<8x1xi32>
    %436 = arith.cmpi sgt, %6, %435 : vector<8x1xi32>
    %437 = vector.shape_cast %436 : vector<8x1xi1> to vector<8x1xi1>
    %438 = vector.broadcast %437 : vector<8x1xi1> to vector<8x128xi1>
    %439 = arith.select %438, %434, %402 : vector<8x128xi1>, vector<8x128xf32>
    %440 = vector.shape_cast %436 : vector<8x1xi1> to vector<8x1xi1>
    %441 = vector.broadcast %440 : vector<8x1xi1> to vector<8x128xi1>
    %442 = arith.select %441, %432, %405 : vector<8x128xi1>, vector<8x128xf32>
    %443 = vector.extract_strided_slice %327 {offsets = [24, 0], sizes = [8, 512], strides = [1, 1]} : vector<64x512xf32> to vector<8x512xf32>
    %444 = arith.truncf %439 : vector<8x128xf32> to vector<8x128xbf16>
    %cst_82 = arith.constant dense<0.000000e+00> : vector<8x512xf32>
    %445 = tpu.matmul %444, %323, %cst_82 {dimension_numbers = #tpu.dot_dimension_numbers<[1], [0], [0], [1], [0, 0, 1, 1], [], []>} : vector<8x128xbf16>, vector<128x512xbf16>, vector<8x512xf32> -> vector<8x512xf32>
    %446 = arith.addf %443, %445 : vector<8x512xf32>
    %447 = vector.extract_strided_slice %446 {offsets = [0, 0], sizes = [8, 128], strides = [1, 1]} : vector<8x512xf32> to vector<8x128xf32>
    %448 = arith.negf %447 : vector<8x128xf32>
    %449 = math.exp %448 : vector<8x128xf32>
    %cst_83 = arith.constant 1.000000e+00 : f32
    %450 = vector.broadcast %cst_83 : f32 to vector<8x128xf32>
    %451 = arith.addf %450, %449 : vector<8x128xf32>
    %452 = arith.divf %450, %451 : vector<8x128xf32>
    %453 = vector.extract_strided_slice %446 {offsets = [0, 128], sizes = [8, 128], strides = [1, 1]} : vector<8x512xf32> to vector<8x128xf32>
    %454 = arith.negf %453 : vector<8x128xf32>
    %455 = math.exp %454 : vector<8x128xf32>
    %cst_84 = arith.constant 1.000000e+00 : f32
    %456 = vector.broadcast %cst_84 : f32 to vector<8x128xf32>
    %457 = arith.addf %456, %455 : vector<8x128xf32>
    %458 = arith.divf %456, %457 : vector<8x128xf32>
    %459 = vector.extract_strided_slice %446 {offsets = [0, 256], sizes = [8, 128], strides = [1, 1]} : vector<8x512xf32> to vector<8x128xf32>
    %460 = math.tanh %459 : vector<8x128xf32>
    %461 = vector.extract_strided_slice %446 {offsets = [0, 384], sizes = [8, 128], strides = [1, 1]} : vector<8x512xf32> to vector<8x128xf32>
    %462 = arith.negf %461 : vector<8x128xf32>
    %463 = math.exp %462 : vector<8x128xf32>
    %cst_85 = arith.constant 1.000000e+00 : f32
    %464 = vector.broadcast %cst_85 : f32 to vector<8x128xf32>
    %465 = arith.addf %464, %463 : vector<8x128xf32>
    %466 = arith.divf %464, %465 : vector<8x128xf32>
    %467 = arith.mulf %458, %442 : vector<8x128xf32>
    %468 = arith.mulf %452, %460 : vector<8x128xf32>
    %469 = arith.addf %467, %468 : vector<8x128xf32>
    %470 = math.tanh %469 : vector<8x128xf32>
    %471 = arith.mulf %466, %470 : vector<8x128xf32>
    %c3_i32_86 = arith.constant 3 : i32
    %472 = vector.broadcast %c3_i32_86 : i32 to vector<8x1xi32>
    %473 = arith.cmpi sgt, %6, %472 : vector<8x1xi32>
    %474 = vector.shape_cast %473 : vector<8x1xi1> to vector<8x1xi1>
    %475 = vector.broadcast %474 : vector<8x1xi1> to vector<8x128xi1>
    %476 = arith.select %475, %471, %439 : vector<8x128xi1>, vector<8x128xf32>
    %477 = vector.shape_cast %473 : vector<8x1xi1> to vector<8x1xi1>
    %478 = vector.broadcast %477 : vector<8x1xi1> to vector<8x128xi1>
    %479 = arith.select %478, %469, %442 : vector<8x128xi1>, vector<8x128xf32>
    %480 = vector.extract_strided_slice %327 {offsets = [32, 0], sizes = [8, 512], strides = [1, 1]} : vector<64x512xf32> to vector<8x512xf32>
    %481 = arith.truncf %476 : vector<8x128xf32> to vector<8x128xbf16>
    %cst_87 = arith.constant dense<0.000000e+00> : vector<8x512xf32>
    %482 = tpu.matmul %481, %323, %cst_87 {dimension_numbers = #tpu.dot_dimension_numbers<[1], [0], [0], [1], [0, 0, 1, 1], [], []>} : vector<8x128xbf16>, vector<128x512xbf16>, vector<8x512xf32> -> vector<8x512xf32>
    %483 = arith.addf %480, %482 : vector<8x512xf32>
    %484 = vector.extract_strided_slice %483 {offsets = [0, 0], sizes = [8, 128], strides = [1, 1]} : vector<8x512xf32> to vector<8x128xf32>
    %485 = arith.negf %484 : vector<8x128xf32>
    %486 = math.exp %485 : vector<8x128xf32>
    %cst_88 = arith.constant 1.000000e+00 : f32
    %487 = vector.broadcast %cst_88 : f32 to vector<8x128xf32>
    %488 = arith.addf %487, %486 : vector<8x128xf32>
    %489 = arith.divf %487, %488 : vector<8x128xf32>
    %490 = vector.extract_strided_slice %483 {offsets = [0, 128], sizes = [8, 128], strides = [1, 1]} : vector<8x512xf32> to vector<8x128xf32>
    %491 = arith.negf %490 : vector<8x128xf32>
    %492 = math.exp %491 : vector<8x128xf32>
    %cst_89 = arith.constant 1.000000e+00 : f32
    %493 = vector.broadcast %cst_89 : f32 to vector<8x128xf32>
    %494 = arith.addf %493, %492 : vector<8x128xf32>
    %495 = arith.divf %493, %494 : vector<8x128xf32>
    %496 = vector.extract_strided_slice %483 {offsets = [0, 256], sizes = [8, 128], strides = [1, 1]} : vector<8x512xf32> to vector<8x128xf32>
    %497 = math.tanh %496 : vector<8x128xf32>
    %498 = vector.extract_strided_slice %483 {offsets = [0, 384], sizes = [8, 128], strides = [1, 1]} : vector<8x512xf32> to vector<8x128xf32>
    %499 = arith.negf %498 : vector<8x128xf32>
    %500 = math.exp %499 : vector<8x128xf32>
    %cst_90 = arith.constant 1.000000e+00 : f32
    %501 = vector.broadcast %cst_90 : f32 to vector<8x128xf32>
    %502 = arith.addf %501, %500 : vector<8x128xf32>
    %503 = arith.divf %501, %502 : vector<8x128xf32>
    %504 = arith.mulf %495, %479 : vector<8x128xf32>
    %505 = arith.mulf %489, %497 : vector<8x128xf32>
    %506 = arith.addf %504, %505 : vector<8x128xf32>
    %507 = math.tanh %506 : vector<8x128xf32>
    %508 = arith.mulf %503, %507 : vector<8x128xf32>
    %c4_i32_91 = arith.constant 4 : i32
    %509 = vector.broadcast %c4_i32_91 : i32 to vector<8x1xi32>
    %510 = arith.cmpi sgt, %6, %509 : vector<8x1xi32>
    %511 = vector.shape_cast %510 : vector<8x1xi1> to vector<8x1xi1>
    %512 = vector.broadcast %511 : vector<8x1xi1> to vector<8x128xi1>
    %513 = arith.select %512, %508, %476 : vector<8x128xi1>, vector<8x128xf32>
    %514 = vector.shape_cast %510 : vector<8x1xi1> to vector<8x1xi1>
    %515 = vector.broadcast %514 : vector<8x1xi1> to vector<8x128xi1>
    %516 = arith.select %515, %506, %479 : vector<8x128xi1>, vector<8x128xf32>
    %517 = vector.extract_strided_slice %327 {offsets = [40, 0], sizes = [8, 512], strides = [1, 1]} : vector<64x512xf32> to vector<8x512xf32>
    %518 = arith.truncf %513 : vector<8x128xf32> to vector<8x128xbf16>
    %cst_92 = arith.constant dense<0.000000e+00> : vector<8x512xf32>
    %519 = tpu.matmul %518, %323, %cst_92 {dimension_numbers = #tpu.dot_dimension_numbers<[1], [0], [0], [1], [0, 0, 1, 1], [], []>} : vector<8x128xbf16>, vector<128x512xbf16>, vector<8x512xf32> -> vector<8x512xf32>
    %520 = arith.addf %517, %519 : vector<8x512xf32>
    %521 = vector.extract_strided_slice %520 {offsets = [0, 0], sizes = [8, 128], strides = [1, 1]} : vector<8x512xf32> to vector<8x128xf32>
    %522 = arith.negf %521 : vector<8x128xf32>
    %523 = math.exp %522 : vector<8x128xf32>
    %cst_93 = arith.constant 1.000000e+00 : f32
    %524 = vector.broadcast %cst_93 : f32 to vector<8x128xf32>
    %525 = arith.addf %524, %523 : vector<8x128xf32>
    %526 = arith.divf %524, %525 : vector<8x128xf32>
    %527 = vector.extract_strided_slice %520 {offsets = [0, 128], sizes = [8, 128], strides = [1, 1]} : vector<8x512xf32> to vector<8x128xf32>
    %528 = arith.negf %527 : vector<8x128xf32>
    %529 = math.exp %528 : vector<8x128xf32>
    %cst_94 = arith.constant 1.000000e+00 : f32
    %530 = vector.broadcast %cst_94 : f32 to vector<8x128xf32>
    %531 = arith.addf %530, %529 : vector<8x128xf32>
    %532 = arith.divf %530, %531 : vector<8x128xf32>
    %533 = vector.extract_strided_slice %520 {offsets = [0, 256], sizes = [8, 128], strides = [1, 1]} : vector<8x512xf32> to vector<8x128xf32>
    %534 = math.tanh %533 : vector<8x128xf32>
    %535 = vector.extract_strided_slice %520 {offsets = [0, 384], sizes = [8, 128], strides = [1, 1]} : vector<8x512xf32> to vector<8x128xf32>
    %536 = arith.negf %535 : vector<8x128xf32>
    %537 = math.exp %536 : vector<8x128xf32>
    %cst_95 = arith.constant 1.000000e+00 : f32
    %538 = vector.broadcast %cst_95 : f32 to vector<8x128xf32>
    %539 = arith.addf %538, %537 : vector<8x128xf32>
    %540 = arith.divf %538, %539 : vector<8x128xf32>
    %541 = arith.mulf %532, %516 : vector<8x128xf32>
    %542 = arith.mulf %526, %534 : vector<8x128xf32>
    %543 = arith.addf %541, %542 : vector<8x128xf32>
    %544 = math.tanh %543 : vector<8x128xf32>
    %545 = arith.mulf %540, %544 : vector<8x128xf32>
    %c5_i32_96 = arith.constant 5 : i32
    %546 = vector.broadcast %c5_i32_96 : i32 to vector<8x1xi32>
    %547 = arith.cmpi sgt, %6, %546 : vector<8x1xi32>
    %548 = vector.shape_cast %547 : vector<8x1xi1> to vector<8x1xi1>
    %549 = vector.broadcast %548 : vector<8x1xi1> to vector<8x128xi1>
    %550 = arith.select %549, %545, %513 : vector<8x128xi1>, vector<8x128xf32>
    %551 = vector.shape_cast %547 : vector<8x1xi1> to vector<8x1xi1>
    %552 = vector.broadcast %551 : vector<8x1xi1> to vector<8x128xi1>
    %553 = arith.select %552, %543, %516 : vector<8x128xi1>, vector<8x128xf32>
    %554 = vector.extract_strided_slice %327 {offsets = [48, 0], sizes = [8, 512], strides = [1, 1]} : vector<64x512xf32> to vector<8x512xf32>
    %555 = arith.truncf %550 : vector<8x128xf32> to vector<8x128xbf16>
    %cst_97 = arith.constant dense<0.000000e+00> : vector<8x512xf32>
    %556 = tpu.matmul %555, %323, %cst_97 {dimension_numbers = #tpu.dot_dimension_numbers<[1], [0], [0], [1], [0, 0, 1, 1], [], []>} : vector<8x128xbf16>, vector<128x512xbf16>, vector<8x512xf32> -> vector<8x512xf32>
    %557 = arith.addf %554, %556 : vector<8x512xf32>
    %558 = vector.extract_strided_slice %557 {offsets = [0, 0], sizes = [8, 128], strides = [1, 1]} : vector<8x512xf32> to vector<8x128xf32>
    %559 = arith.negf %558 : vector<8x128xf32>
    %560 = math.exp %559 : vector<8x128xf32>
    %cst_98 = arith.constant 1.000000e+00 : f32
    %561 = vector.broadcast %cst_98 : f32 to vector<8x128xf32>
    %562 = arith.addf %561, %560 : vector<8x128xf32>
    %563 = arith.divf %561, %562 : vector<8x128xf32>
    %564 = vector.extract_strided_slice %557 {offsets = [0, 128], sizes = [8, 128], strides = [1, 1]} : vector<8x512xf32> to vector<8x128xf32>
    %565 = arith.negf %564 : vector<8x128xf32>
    %566 = math.exp %565 : vector<8x128xf32>
    %cst_99 = arith.constant 1.000000e+00 : f32
    %567 = vector.broadcast %cst_99 : f32 to vector<8x128xf32>
    %568 = arith.addf %567, %566 : vector<8x128xf32>
    %569 = arith.divf %567, %568 : vector<8x128xf32>
    %570 = vector.extract_strided_slice %557 {offsets = [0, 256], sizes = [8, 128], strides = [1, 1]} : vector<8x512xf32> to vector<8x128xf32>
    %571 = math.tanh %570 : vector<8x128xf32>
    %572 = vector.extract_strided_slice %557 {offsets = [0, 384], sizes = [8, 128], strides = [1, 1]} : vector<8x512xf32> to vector<8x128xf32>
    %573 = arith.negf %572 : vector<8x128xf32>
    %574 = math.exp %573 : vector<8x128xf32>
    %cst_100 = arith.constant 1.000000e+00 : f32
    %575 = vector.broadcast %cst_100 : f32 to vector<8x128xf32>
    %576 = arith.addf %575, %574 : vector<8x128xf32>
    %577 = arith.divf %575, %576 : vector<8x128xf32>
    %578 = arith.mulf %569, %553 : vector<8x128xf32>
    %579 = arith.mulf %563, %571 : vector<8x128xf32>
    %580 = arith.addf %578, %579 : vector<8x128xf32>
    %581 = math.tanh %580 : vector<8x128xf32>
    %582 = arith.mulf %577, %581 : vector<8x128xf32>
    %c6_i32_101 = arith.constant 6 : i32
    %583 = vector.broadcast %c6_i32_101 : i32 to vector<8x1xi32>
    %584 = arith.cmpi sgt, %6, %583 : vector<8x1xi32>
    %585 = vector.shape_cast %584 : vector<8x1xi1> to vector<8x1xi1>
    %586 = vector.broadcast %585 : vector<8x1xi1> to vector<8x128xi1>
    %587 = arith.select %586, %582, %550 : vector<8x128xi1>, vector<8x128xf32>
    %588 = vector.shape_cast %584 : vector<8x1xi1> to vector<8x1xi1>
    %589 = vector.broadcast %588 : vector<8x1xi1> to vector<8x128xi1>
    %590 = arith.select %589, %580, %553 : vector<8x128xi1>, vector<8x128xf32>
    %591 = vector.extract_strided_slice %327 {offsets = [56, 0], sizes = [8, 512], strides = [1, 1]} : vector<64x512xf32> to vector<8x512xf32>
    %592 = arith.truncf %587 : vector<8x128xf32> to vector<8x128xbf16>
    %cst_102 = arith.constant dense<0.000000e+00> : vector<8x512xf32>
    %593 = tpu.matmul %592, %323, %cst_102 {dimension_numbers = #tpu.dot_dimension_numbers<[1], [0], [0], [1], [0, 0, 1, 1], [], []>} : vector<8x128xbf16>, vector<128x512xbf16>, vector<8x512xf32> -> vector<8x512xf32>
    %594 = arith.addf %591, %593 : vector<8x512xf32>
    %595 = vector.extract_strided_slice %594 {offsets = [0, 0], sizes = [8, 128], strides = [1, 1]} : vector<8x512xf32> to vector<8x128xf32>
    %596 = arith.negf %595 : vector<8x128xf32>
    %597 = math.exp %596 : vector<8x128xf32>
    %cst_103 = arith.constant 1.000000e+00 : f32
    %598 = vector.broadcast %cst_103 : f32 to vector<8x128xf32>
    %599 = arith.addf %598, %597 : vector<8x128xf32>
    %600 = arith.divf %598, %599 : vector<8x128xf32>
    %601 = vector.extract_strided_slice %594 {offsets = [0, 128], sizes = [8, 128], strides = [1, 1]} : vector<8x512xf32> to vector<8x128xf32>
    %602 = arith.negf %601 : vector<8x128xf32>
    %603 = math.exp %602 : vector<8x128xf32>
    %cst_104 = arith.constant 1.000000e+00 : f32
    %604 = vector.broadcast %cst_104 : f32 to vector<8x128xf32>
    %605 = arith.addf %604, %603 : vector<8x128xf32>
    %606 = arith.divf %604, %605 : vector<8x128xf32>
    %607 = vector.extract_strided_slice %594 {offsets = [0, 256], sizes = [8, 128], strides = [1, 1]} : vector<8x512xf32> to vector<8x128xf32>
    %608 = math.tanh %607 : vector<8x128xf32>
    %609 = vector.extract_strided_slice %594 {offsets = [0, 384], sizes = [8, 128], strides = [1, 1]} : vector<8x512xf32> to vector<8x128xf32>
    %610 = arith.negf %609 : vector<8x128xf32>
    %611 = math.exp %610 : vector<8x128xf32>
    %cst_105 = arith.constant 1.000000e+00 : f32
    %612 = vector.broadcast %cst_105 : f32 to vector<8x128xf32>
    %613 = arith.addf %612, %611 : vector<8x128xf32>
    %614 = arith.divf %612, %613 : vector<8x128xf32>
    %615 = arith.mulf %606, %590 : vector<8x128xf32>
    %616 = arith.mulf %600, %608 : vector<8x128xf32>
    %617 = arith.addf %615, %616 : vector<8x128xf32>
    %618 = math.tanh %617 : vector<8x128xf32>
    %619 = arith.mulf %614, %618 : vector<8x128xf32>
    %c7_i32_106 = arith.constant 7 : i32
    %620 = vector.broadcast %c7_i32_106 : i32 to vector<8x1xi32>
    %621 = arith.cmpi sgt, %6, %620 : vector<8x1xi32>
    %622 = vector.shape_cast %621 : vector<8x1xi1> to vector<8x1xi1>
    %623 = vector.broadcast %622 : vector<8x1xi1> to vector<8x128xi1>
    %624 = arith.select %623, %619, %587 : vector<8x128xi1>, vector<8x128xf32>
    %625 = vector.shape_cast %621 : vector<8x1xi1> to vector<8x1xi1>
    %626 = vector.broadcast %625 : vector<8x1xi1> to vector<8x128xi1>
    %627 = arith.select %626, %617, %590 : vector<8x128xi1>, vector<8x128xf32>
    %c1_107 = arith.constant 1 : index
    %c0_108 = arith.constant 0 : index
    %c0_109 = arith.constant 0 : index
    %628 = vector.load %arg13[%c1_107, %c0_108, %c0_109] : memref<2x8x128xf32, #tpu.memory_space<vmem>>, vector<1x8x128xf32>
    %629 = vector.shape_cast %628 : vector<1x8x128xf32> to vector<8x128xf32>
    %630 = vector.shape_cast %624 : vector<8x128xf32> to vector<1x8x128xf32>
    tpu.vector_store %arg13[%c1_107, %c0_108, %c0_109], %630 {strides = array<i32>} : memref<2x8x128xf32, #tpu.memory_space<vmem>>, vector<1x8x128xf32>,
    %c1_110 = arith.constant 1 : index
    %c0_111 = arith.constant 0 : index
    %c0_112 = arith.constant 0 : index
    %631 = vector.load %arg14[%c1_110, %c0_111, %c0_112] : memref<2x8x128xf32, #tpu.memory_space<vmem>>, vector<1x8x128xf32>
    %632 = vector.shape_cast %631 : vector<1x8x128xf32> to vector<8x128xf32>
    %633 = vector.shape_cast %627 : vector<8x128xf32> to vector<1x8x128xf32>
    tpu.vector_store %arg14[%c1_110, %c0_111, %c0_112], %633 {strides = array<i32>} : memref<2x8x128xf32, #tpu.memory_space<vmem>>, vector<1x8x128xf32>,
    %c0_i32_113 = arith.constant 0 : i32
    %634 = arith.cmpi eq, %arg0, %c0_i32_113 : i32
    %635 = arith.extui %634 : i1 to i32
    %c0_i32_114 = arith.constant 0 : i32
    %636 = arith.cmpi ne, %635, %c0_i32_114 : i32
    scf.if %636 {
      %c0_115 = arith.constant 0 : index
      %c0_116 = arith.constant 0 : index
      %637 = vector.load %arg11[%c0_115, %c0_116] : memref<8x128xf32, #tpu.memory_space<vmem>>, vector<8x128xf32>
      tpu.vector_store %arg11[%c0_115, %c0_116], %624 {strides = array<i32>} : memref<8x128xf32, #tpu.memory_space<vmem>>, vector<8x128xf32>,
      %638 = arith.truncf %624 : vector<8x128xf32> to vector<8x128xbf16>
      %c0_117 = arith.constant 0 : index
      %c0_118 = arith.constant 0 : index
      %639 = vector.load %arg9[%c0_117, %c0_118] : memref<128x128xbf16, #tpu.memory_space<vmem>>, vector<128x128xbf16>
      %cst_119 = arith.constant dense<0.000000e+00> : vector<8x128xf32>
      %640 = tpu.matmul %638, %639, %cst_119 {dimension_numbers = #tpu.dot_dimension_numbers<[1], [0], [0], [1], [0, 0, 1, 1], [], []>} : vector<8x128xbf16>, vector<128x128xbf16>, vector<8x128xf32> -> vector<8x128xf32>
      %c0_120 = arith.constant 0 : index
      %c0_121 = arith.constant 0 : index
      %641 = vector.load %arg10[%c0_120, %c0_121] : memref<1x128xf32, #tpu.memory_space<vmem>>, vector<1x128xf32>
      %642 = vector.broadcast %641 : vector<1x128xf32> to vector<8x128xf32>
      %643 = arith.addf %640, %642 : vector<8x128xf32>
      %644 = arith.negf %643 : vector<8x128xf32>
      %645 = math.exp %644 : vector<8x128xf32>
      %cst_122 = arith.constant 1.000000e+00 : f32
      %646 = vector.broadcast %cst_122 : f32 to vector<8x128xf32>
      %647 = arith.addf %646, %645 : vector<8x128xf32>
      %648 = arith.divf %646, %647 : vector<8x128xf32>
      %c0_123 = arith.constant 0 : index
      %c0_124 = arith.constant 0 : index
      %649 = vector.load %arg12[%c0_123, %c0_124] : memref<8x128xf32, #tpu.memory_space<vmem>>, vector<8x128xf32>
      tpu.vector_store %arg12[%c0_123, %c0_124], %648 {strides = array<i32>} : memref<8x128xf32, #tpu.memory_space<vmem>>, vector<8x128xf32>,
    } else {
    }
    return
  }
  func.func @transform_0(%arg0: i32) -> (i32, i32) {
    %c0_i32 = arith.constant 0 : i32
    %c0_i32_0 = arith.constant 0 : i32
    return %arg0, %c0_i32 : i32, i32
  }
  func.func @transform_1(%arg0: i32) -> (i32, i32) {
    %c0_i32 = arith.constant 0 : i32
    %c0_i32_0 = arith.constant 0 : i32
    %c0_i32_1 = arith.constant 0 : i32
    return %c0_i32, %c0_i32_0 : i32, i32
  }
  func.func @transform_2(%arg0: i32) -> (i32, i32) {
    %c0_i32 = arith.constant 0 : i32
    %c0_i32_0 = arith.constant 0 : i32
    %c0_i32_1 = arith.constant 0 : i32
    return %c0_i32, %c0_i32_0 : i32, i32
  }
  func.func @transform_3(%arg0: i32) -> (i32, i32) {
    %c0_i32 = arith.constant 0 : i32
    %c0_i32_0 = arith.constant 0 : i32
    %c0_i32_1 = arith.constant 0 : i32
    return %c0_i32, %c0_i32_0 : i32, i32
  }
  func.func @transform_4(%arg0: i32) -> (i32, i32) {
    %c0_i32 = arith.constant 0 : i32
    %c0_i32_0 = arith.constant 0 : i32
    %c0_i32_1 = arith.constant 0 : i32
    return %c0_i32, %c0_i32_0 : i32, i32
  }
  func.func @transform_5(%arg0: i32) -> (i32, i32) {
    %c0_i32 = arith.constant 0 : i32
    %c0_i32_0 = arith.constant 0 : i32
    %c0_i32_1 = arith.constant 0 : i32
    return %c0_i32, %c0_i32_0 : i32, i32
  }
  func.func @transform_6(%arg0: i32) -> (i32, i32) {
    %c0_i32 = arith.constant 0 : i32
    %c0_i32_0 = arith.constant 0 : i32
    %c0_i32_1 = arith.constant 0 : i32
    return %c0_i32, %c0_i32_0 : i32, i32
  }
  func.func @transform_7(%arg0: i32) -> (i32, i32) {
    %c0_i32 = arith.constant 0 : i32
    %c0_i32_0 = arith.constant 0 : i32
    %c0_i32_1 = arith.constant 0 : i32
    return %c0_i32, %c0_i32_0 : i32, i32
  }
  func.func @transform_8(%arg0: i32) -> (i32, i32) {
    %c0_i32 = arith.constant 0 : i32
    %c0_i32_0 = arith.constant 0 : i32
    %c0_i32_1 = arith.constant 0 : i32
    return %c0_i32, %c0_i32_0 : i32, i32
  }
  func.func @transform_9(%arg0: i32) -> (i32, i32) {
    %c0_i32 = arith.constant 0 : i32
    %c0_i32_0 = arith.constant 0 : i32
    %c0_i32_1 = arith.constant 0 : i32
    return %c0_i32, %c0_i32_0 : i32, i32
  }
  func.func @transform_10(%arg0: i32) -> (i32, i32) {
    %c0_i32 = arith.constant 0 : i32
    %c0_i32_0 = arith.constant 0 : i32
    %c0_i32_1 = arith.constant 0 : i32
    return %c0_i32, %c0_i32_0 : i32, i32
  }
  func.func @transform_11(%arg0: i32) -> (i32, i32) {
    %c0_i32 = arith.constant 0 : i32
    %c0_i32_0 = arith.constant 0 : i32
    %c0_i32_1 = arith.constant 0 : i32
    return %c0_i32, %c0_i32_0 : i32, i32
  }
}

</mosaic_0001>

<bundles_post_ra>
// kernel: lstm_medfuse_forward.1
= control target key start
LH: loop header
LB: loop body
LE: loop exit
PB: predicated region body
PF: predicated region fallthrough
CT: control target
= control target key end

     0   :  { %v6012_v1 = vmov 0   ;;  %s5994_s1 = inlined_call_operand.vmem [shape: bf16[128,512], index: 1, kind: input, shape index: {}]   ;;  %s5995_s0 = inlined_call_operand.vmem [shape: bf16[64,128], index: 0, kind: input, shape index: {}]   ;;  %s5996_s2 = inlined_call_operand.vmem [shape: bf16[128,512], index: 2, kind: input, shape index: {}]   ;;  %s5997_s7 = inlined_call_operand.vmem [shape: s32[8,1], index: 7, kind: input, shape index: {}]   ;;  %s5998_s3 = inlined_call_operand.vmem [shape: f32[1,512], index: 3, kind: input, shape index: {}]   ;;  %s5999_s4 = inlined_call_operand.vmem [shape: bf16[128,512], index: 4, kind: input, shape index: {}]   ;;  %s6000_s5 = inlined_call_operand.vmem [shape: bf16[128,512], index: 5, kind: input, shape index: {}]   ;;  %s6001_s6 = inlined_call_operand.vmem [shape: f32[1,512], index: 6, kind: input, shape index: {}]   ;;  %s6002_s8 = inlined_call_operand.vmem [shape: bf16[128,128], index: 8, kind: input, shape index: {}]   ;;  %s6003_s10 = inlined_call_operand.vmem [shape: f32[8,128], index: 10, kind: output, shape index: {0}]   ;;  %s6004_s9 = inlined_call_operand.vmem [shape: f32[1,128], index: 9, kind: input, shape index: {}]   ;;  %s6005_s11 = inlined_call_operand.vmem [shape: f32[8,128], index: 11, kind: output, shape index: {1}]  }
   0x1   :  { %v3431_v0 = vld [vmem:[%s5994_s1 + $0x4] ss:$16 sps:$4 sm:$0xff]   ;;  %360 = vmatprep.mubr.bf16.mxu0 %v6012_v1  ;;  %433 = vmatprep.mubr.bf16.mxu1 %v6012_v1  ;;  %v3433_v2 = vld [vmem:[%s5994_s1 + $0xc] ss:$16 sps:$4 sm:$0xff]   ;;  %v3435_v3 = vld [vmem:[%s5994_s1] ss:$16 sps:$4 sm:$0xff]  }
   0x2   :  { %3429 = vset.pattern.permute.xlu0 %v6012_v1  ;;  %3430 = vset.pattern.permute.xlu1 %v6012_v1  ;;  %v3436_v4 = vld [vmem:[%s5994_s1 + $0x8] ss:$16 sps:$4 sm:$0xff]   ;;  %v3437_v5 = vld [vmem:[%s5994_s1 + $0x24] ss:$16 sps:$4 sm:$0xff]   ;;  %v3439_v6 = vld [vmem:[%s5994_s1 + $0x2c] ss:$16 sps:$4 sm:$0xff]  }
   0x3   :  { %328 = vmatprep.subr.bf16.mxu0 %v3431_v0  ;;  %401 = vmatprep.subr.bf16.mxu1 %v3433_v2  ;;  %v3441_v7 = vld [vmem:[%s5994_s1 + $0x20] ss:$16 sps:$4 sm:$0xff]   ;;  %v3442_v8 = vld [vmem:[%s5994_s1 + $0x28] ss:$16 sps:$4 sm:$0xff]   ;;  %v3443_v9 = vld [vmem:[%s5994_s1 + $0x44] ss:$16 sps:$4 sm:$0xff]  }
   0x4   :  { %329 = vmatpush1.bf16.msra.mxu0 %v3435_v3  ;;  %402 = vmatpush1.bf16.msra.mxu1 %v3436_v4  ;;  %v3445_v10 = vld [vmem:[%s5994_s1 + $0x4c] ss:$16 sps:$4 sm:$0xff]   ;;  %v3447_v11 = vld [vmem:[%s5994_s1 + $0x40] ss:$16 sps:$4 sm:$0xff]   ;;  %v3448_v12 = vld [vmem:[%s5994_s1 + $0x48] ss:$16 sps:$4 sm:$0xff]  }
   0x5   :  { %330 = vmatprep.subr.bf16.mxu0 %v3437_v5  ;;  %403 = vmatprep.subr.bf16.mxu1 %v3439_v6  ;;  %v3449_v13 = vld [vmem:[%s5994_s1 + $0x64] ss:$16 sps:$4 sm:$0xff]   ;;  %v3451_v14 = vld [vmem:[%s5994_s1 + $0x6c] ss:$16 sps:$4 sm:$0xff]   ;;  %v3453_v15 = vld [vmem:[%s5994_s1 + $0x60] ss:$16 sps:$4 sm:$0xff]  }
   0x6   :  { %v3454_v16 = vld [vmem:[%s5994_s1 + $0x68] ss:$16 sps:$4 sm:$0xff]   ;;  %v3455_v17 = vld [vmem:[%s5994_s1 + $0x84] ss:$16 sps:$4 sm:$0xff]   ;;  %v3457_v18 = vld [vmem:[%s5994_s1 + $0x8c] ss:$16 sps:$4 sm:$0xff]  }
   0x7   :  { %v3459_v19 = vld [vmem:[%s5994_s1 + $0x80] ss:$16 sps:$4 sm:$0xff]   ;;  %v3460_v20 = vld [vmem:[%s5994_s1 + $0x88] ss:$16 sps:$4 sm:$0xff]   ;;  %v3461_v21 = vld [vmem:[%s5994_s1 + $0xa4] ss:$16 sps:$4 sm:$0xff]  }
   0x8   :  { %331 = vmatpush1.bf16.msra.mxu0 %v3441_v7  ;;  %404 = vmatpush1.bf16.msra.mxu1 %v3442_v8  ;;  %v3463_v22 = vld [vmem:[%s5994_s1 + $0xac] ss:$16 sps:$4 sm:$0xff]   ;;  %v3465_v23 = vld [vmem:[%s5994_s1 + $0xa0] ss:$16 sps:$4 sm:$0xff]   ;;  %v3466_v24 = vld [vmem:[%s5994_s1 + $0xa8] ss:$16 sps:$4 sm:$0xff]  }
   0x9   :  { %332 = vmatprep.subr.bf16.mxu0 %v3443_v9  ;;  %405 = vmatprep.subr.bf16.mxu1 %v3445_v10  ;;  %v3467_v25 = vld [vmem:[%s5994_s1 + $0xc4] ss:$16 sps:$4 sm:$0xff]   ;;  %v3469_v26 = vld [vmem:[%s5994_s1 + $0xcc] ss:$16 sps:$4 sm:$0xff]   ;;  %v3471_v27 = vld [vmem:[%s5994_s1 + $0xc0] ss:$16 sps:$4 sm:$0xff]  }
   0xa   :  { %v3472_v28 = vld [vmem:[%s5994_s1 + $0xc8] ss:$16 sps:$4 sm:$0xff]   ;;  %v3473_v29 = vld [vmem:[%s5994_s1 + $0xe4] ss:$16 sps:$4 sm:$0xff]   ;;  %v3475_v30 = vld [vmem:[%s5994_s1 + $0xec] ss:$16 sps:$4 sm:$0xff]  }
   0xb   :  { %v3477_v31 = vld [vmem:[%s5994_s1 + $0xe0] ss:$16 sps:$4 sm:$0xff]   ;;  %v3478_v32 = vld [vmem:[%s5994_s1 + $0xe8] ss:$16 sps:$4 sm:$0xff]   ;;  %v4127_v33 = vld [vmem:[%s5996_s2 + $0x4] ss:$16 sps:$4 sm:$0xff]  }
   0xc   :  { %333 = vmatpush1.bf16.msra.mxu0 %v3447_v11  ;;  %406 = vmatpush1.bf16.msra.mxu1 %v3448_v12  ;;  %v4132_v34 = vld [vmem:[%s5996_s2 + $0xc] ss:$16 sps:$4 sm:$0xff]   ;;  %v3479_v35 = vld [vmem:[%s5995_s0] sm:$0xff]   ;;  %v4145_v37 = vld [vmem:[%s5996_s2 + $0x8] ss:$16 sps:$4 sm:$0xff]   ;;  %v6010_v11 = vmov 0.0|0.0   ;;  %v124_v12 = vlaneseq }
   0xd   :  { %334 = vmatprep.subr.bf16.mxu0 %v3449_v13  ;;  %407 = vmatprep.subr.bf16.mxu1 %v3451_v14  ;;  %v4140_v36 = vld [vmem:[%s5996_s2] ss:$16 sps:$4 sm:$0xff]   ;;  %v4152_v38 = vld [vmem:[%s5996_s2 + $0x24] ss:$16 sps:$4 sm:$0xff]   ;;  %v4157_v39 = vld [vmem:[%s5996_s2 + $0x2c] ss:$16 sps:$4 sm:$0xff]  }
   0xe   :  { %v4162_v40 = vld [vmem:[%s5996_s2 + $0x20] ss:$16 sps:$4 sm:$0xff]   ;;  %v4169_v41 = vld [vmem:[%s5996_s2 + $0x28] ss:$16 sps:$4 sm:$0xff]   ;;  %v4176_v42 = vld [vmem:[%s5996_s2 + $0x44] ss:$16 sps:$4 sm:$0xff]  }
   0xf   :  { %v4181_v43 = vld [vmem:[%s5996_s2 + $0x4c] ss:$16 sps:$4 sm:$0xff]   ;;  %v4191_v45 = vld [vmem:[%s5996_s2 + $0x40] ss:$16 sps:$4 sm:$0xff]   ;;  %v4196_v46 = vld [vmem:[%s5996_s2 + $0x48] ss:$16 sps:$4 sm:$0xff]  }
  0x10   :  { %335 = vmatpush1.bf16.msra.mxu0 %v3453_v15  ;;  %408 = vmatpush1.bf16.msra.mxu1 %v3454_v16  ;;  %v3492_v44 = vld [vmem:[%s5995_s0 + $0x8] sm:$0xff]   ;;  %v4203_v47 = vld [vmem:[%s5996_s2 + $0x64] ss:$16 sps:$4 sm:$0xff]   ;;  %v4215_v49 = vld [vmem:[%s5996_s2 + $0x60] ss:$16 sps:$4 sm:$0xff]   ;;  %v4387_v13 = vshrl.u32 %v124_v12, 7 }
  0x11   :  { %336 = vmatprep.subr.bf16.mxu0 %v3455_v17  ;;  %409 = vmatprep.subr.bf16.mxu1 %v3457_v18  ;;  %v4210_v48 = vld [vmem:[%s5996_s2 + $0x6c] ss:$16 sps:$4 sm:$0xff]   ;;  %v4220_v50 = vld [vmem:[%s5996_s2 + $0x68] ss:$16 sps:$4 sm:$0xff]   ;;  %v4227_v51 = vld [vmem:[%s5996_s2 + $0x84] ss:$16 sps:$4 sm:$0xff]  }
  0x12   :  { %v4234_v52 = vld [vmem:[%s5996_s2 + $0x8c] ss:$16 sps:$4 sm:$0xff]   ;;  %v4241_v53 = vld [vmem:[%s5997_s7] sm:$0xff]  ;;  %v3505_v54 = vld [vmem:[%s5995_s0 + $0x10] sm:$0xff]   ;;  %6031 = vst [vmem:[#allocation4_spill] sm:$0xff] %v4387_v13  ;;  %v6008_v14 = vsub.s32 2, %v4387_v13 }
  0x13   :  { %vm747_vm0 = vcmp.gt.s32.totalorder %v4241_v53, 0  ;;  %v4252_v55 = vld [vmem:[%s5996_s2 + $0x80] ss:$16 sps:$4 sm:$0xff]   ;;  %v4257_v56 = vld [vmem:[%s5996_s2 + $0x88] ss:$16 sps:$4 sm:$0xff]   ;;  %vm866_vm1 = vcmp.gt.s32.totalorder %v4241_v53, 1 }
  0x14   :  { %337 = vmatpush1.bf16.msra.mxu0 %v3459_v19  ;;  %410 = vmatpush1.bf16.msra.mxu1 %v3460_v20  ;;  %v748_v57 = vsel %vm747_vm0, 1, %v6012_v1  ;;  %v4265_v58 = vld [vmem:[%s5996_s2 + $0xa4] ss:$16 sps:$4 sm:$0xff]   ;;  %v4270_v59 = vld [vmem:[%s5996_s2 + $0xac] ss:$16 sps:$4 sm:$0xff]   ;;  %v867_v62 = vsel %vm866_vm1, 1, %v6012_v1 }
  0x15   :  { %338 = vmatprep.subr.bf16.mxu0 %v3461_v21  ;;  %411 = vmatprep.subr.bf16.mxu1 %v3463_v22  ;;  %v4278_v60 = vld [vmem:[%s5996_s2 + $0xa0] ss:$16 sps:$4 sm:$0xff]   ;;  %v4283_v61 = vld [vmem:[%s5996_s2 + $0xa8] ss:$16 sps:$4 sm:$0xff]   ;;  %v4291_v63 = vld [vmem:[%s5996_s2 + $0xc4] ss:$16 sps:$4 sm:$0xff]  }
  0x16   :  { %750 = vperm.xlu0 %3429, %v748_v57   ;;  %v4296_v0 = vld [vmem:[%s5996_s2 + $0xcc] ss:$16 sps:$4 sm:$0xff]   ;;  %v4308_v3 = vld [vmem:[%s5996_s2 + $0xc0] ss:$16 sps:$4 sm:$0xff]   ;;  %v4313_v4 = vld [vmem:[%s5996_s2 + $0xc8] ss:$16 sps:$4 sm:$0xff]  }
  0x17   :  { %v3518_v2 = vld [vmem:[%s5995_s0 + $0x18] sm:$0xff]   ;;  %v4320_v5 = vld [vmem:[%s5996_s2 + $0xe4] ss:$16 sps:$4 sm:$0xff]   ;;  %vm1223_vm2 = vcmp.gt.s32.totalorder %v4241_v53, 4  ;;  %v4333_v7 = vld [vmem:[%s5996_s2 + $0xe0] ss:$16 sps:$4 sm:$0xff]  }
  0x18   :  { %339 = vmatpush1.bf16.msra.mxu0 %v3465_v23  ;;  %412 = vmatpush1.bf16.msra.mxu1 %v3466_v24  ;;  %v4325_v6 = vld [vmem:[%s5996_s2 + $0xec] ss:$16 sps:$4 sm:$0xff]   ;;  %v4338_v8 = vld [vmem:[%s5996_s2 + $0xe8] ss:$16 sps:$4 sm:$0xff]   ;;  %v1224_v9 = vsel %vm1223_vm2, 1, %v6012_v1  ;;  %vm1461_vm3 = vcmp.gt.s32.totalorder %v4241_v53, 6 }
  0x19   :  { %340 = vmatprep.subr.bf16.mxu0 %v3467_v25  ;;  %413 = vmatprep.subr.bf16.mxu1 %v3469_v26  ;;  %v1462_v10 = vsel %vm1461_vm3, 1, %v6012_v1  ;;  %v6006_v15 = vsub.s32 3, %v4387_v13  ;;  %v6009_v16 = vsub.s32 0, %v4387_v13  ;;  %v122_v17 = vld [vmem:[%s5998_s3] sm:$0xf]  ;;  %v6007_v18 = vsub.s32 1, %v4387_v13 }
  0x1a   :  { %869 = vperm.xlu0 %3429, %v867_v62   ;;  %v4398_v19 = vrot.slane %v122_v17, %v6008_v14  ;;  %vm985_vm6 = vcmp.gt.s32.totalorder %v4241_v53, 2  ;;  %vm1104_vm7 = vcmp.gt.s32.totalorder %v4241_v53, 3  ;;  %vm1342_vm8 = vcmp.gt.s32.totalorder %v4241_v53, 5 }
  0x1b   :  { %v4406_v22 = vrot.slane %v122_v17, %v6006_v15  ;;  %v127_v23 = vrot.slane %v122_v17, %v6009_v16  ;;  %v131_v26 = vrot.slane %v122_v17, %v6007_v18  ;;  %vm1580_vm9 = vcmp.gt.s32.totalorder %v4241_v53, 7 }
  0x1c   :  { %341 = vmatpush1.bf16.msra.mxu0 %v3471_v27  ;;  %414 = vmatpush1.bf16.msra.mxu1 %v3472_v28  ;;  %vm3961_vm0 = vmmov 1   ;;  %vm3963_vm3 = vmmov 0  }
  0x1d   :  { %342 = vmatprep.subr.bf16.mxu0 %v3473_v29  ;;  %415 = vmatprep.subr.bf16.mxu1 %v3475_v30 }
  0x1e   :  { %1226 = vperm.xlu0 %3429, %v1224_v9  }
  0x20   :  { %343 = vmatpush1.bf16.msra.mxu0 %v3477_v31  ;;  %416 = vmatpush1.bf16.msra.mxu1 %v3478_v32 }
  0x21   :  { %637 = vmatprep.subr.bf16.mxu0 %v4127_v33  ;;  %678 = vmatprep.subr.bf16.mxu1 %v4132_v34 }
  0x22   :  { %1464 = vperm.xlu0 %3429, %v1462_v10  }
  0x23   :  { %361 = vmatmul.mubr.bf16.vlgmr.msra.gmra.mrb[0].mxu0 %v3479_v35  ;;  %434 = vmatmul.mubr.bf16.vlgmr.msra.gmra.mrb[0].mxu1 %v3479_v35 }
  0x24   :  { %638 = vmatpush1.bf16.msra.mxu0 %v4140_v36  ;;  %679 = vmatpush1.bf16.msra.mxu1 %v4145_v37 }
  0x25   :  { %639 = vmatprep.subr.bf16.mxu0 %v4152_v38  ;;  %680 = vmatprep.subr.bf16.mxu1 %v4157_v39 }
  0x26   :  { %370 = vmatprep.mubr.bf16.mxu0 %v6012_v1  ;;  %443 = vmatprep.mubr.bf16.mxu1 %v6012_v1 }
  0x28   :  { %640 = vmatpush1.bf16.msra.mxu0 %v4162_v40  ;;  %681 = vmatpush1.bf16.msra.mxu1 %v4169_v41 }
  0x29   :  { %641 = vmatprep.subr.bf16.mxu0 %v4176_v42  ;;  %682 = vmatprep.subr.bf16.mxu1 %v4181_v43 }
  0x2b   :  { %371 = vmatmul.mubr.bf16.gmra.mrb[4].mxu0 %v3492_v44  ;;  %444 = vmatmul.mubr.bf16.gmra.mrb[4].mxu1 %v3492_v44 }
  0x2c   :  { %642 = vmatpush1.bf16.msra.mxu0 %v4191_v45  ;;  %683 = vmatpush1.bf16.msra.mxu1 %v4196_v46 }
  0x2d   :  { %643 = vmatprep.subr.bf16.mxu0 %v4203_v47  ;;  %684 = vmatprep.subr.bf16.mxu1 %v4210_v48 }
  0x2e   :  { %380 = vmatprep.mubr.bf16.mxu0 %v6012_v1  ;;  %453 = vmatprep.mubr.bf16.mxu1 %v6012_v1 }
  0x30   :  { %644 = vmatpush1.bf16.msra.mxu0 %v4215_v49  ;;  %685 = vmatpush1.bf16.msra.mxu1 %v4220_v50 }
  0x31   :  { %645 = vmatprep.subr.bf16.mxu0 %v4227_v51  ;;  %686 = vmatprep.subr.bf16.mxu1 %v4234_v52 }
  0x33   :  { %381 = vmatmul.mubr.bf16.gmra.mrb[8].mxu0 %v3505_v54  ;;  %454 = vmatmul.mubr.bf16.gmra.mrb[8].mxu1 %v3505_v54 }
  0x34   :  { %646 = vmatpush1.bf16.msra.mxu0 %v4252_v55  ;;  %687 = vmatpush1.bf16.msra.mxu1 %v4257_v56 }
  0x35   :  { %647 = vmatprep.subr.bf16.mxu0 %v4265_v58  ;;  %688 = vmatprep.subr.bf16.mxu1 %v4270_v59 }
  0x36   :  { %390 = vmatprep.mubr.bf16.mxu0 %v6012_v1  ;;  %463 = vmatprep.mubr.bf16.mxu1 %v6012_v1 }
  0x38   :  { %648 = vmatpush1.bf16.msra.mxu0 %v4278_v60  ;;  %689 = vmatpush1.bf16.msra.mxu1 %v4283_v61 }
  0x39   :  { %649 = vmatprep.subr.bf16.mxu0 %v4291_v63  ;;  %690 = vmatprep.subr.bf16.mxu1 %v4296_v0 }
  0x3b   :  { %391 = vmatmul.mubr.bf16.gmra.mrb[12].mxu0 %v3518_v2  ;;  %464 = vmatmul.mubr.bf16.gmra.mrb[12].mxu1 %v3518_v2 }
  0x3c   :  { %650 = vmatpush1.bf16.msra.mxu0 %v4308_v3  ;;  %691 = vmatpush1.bf16.msra.mxu1 %v4313_v4 }
  0x3d   :  { %651 = vmatprep.subr.bf16.mxu0 %v4320_v5  ;;  %692 = vmatprep.subr.bf16.mxu1 %v4325_v6 }
  0x3e   :  { %669 = vmatprep.mubr.bf16.mxu0 %v6012_v1  ;;  %710 = vmatprep.mubr.bf16.mxu1 %v6012_v1 }
  0x40   :  { %652 = vmatpush1.bf16.msra.mxu0 %v4333_v7  ;;  %693 = vmatpush1.bf16.msra.mxu1 %v4338_v8 }
  0x41   :  { %756 = vmatprep.subr.bf16.mxu0 %v4127_v33  ;;  %797 = vmatprep.subr.bf16.mxu1 %v4132_v34 }
  0x43   :  { %670 = vmatmul.mubr.bf16.vlgmr.msra.gmra.mrb[16].mxu0 %v6010_v11  ;;  %711 = vmatmul.mubr.bf16.vlgmr.msra.gmra.mrb[16].mxu1 %v6010_v11 }
  0x44   :  { %757 = vmatpush1.bf16.msra.mxu0 %v4140_v36  ;;  %798 = vmatpush1.bf16.msra.mxu1 %v4145_v37 }
  0x45   :  { %758 = vmatprep.subr.bf16.mxu0 %v4152_v38  ;;  %799 = vmatprep.subr.bf16.mxu1 %v4157_v39 }
  0x46   :  { %788 = vmatprep.mubr.bf16.mxu0 %v6012_v1  ;;  %829 = vmatprep.mubr.bf16.mxu1 %v6012_v1 }
  0x48   :  { %759 = vmatpush1.bf16.msra.mxu0 %v4162_v40  ;;  %800 = vmatpush1.bf16.msra.mxu1 %v4169_v41 }
  0x49   :  { %760 = vmatprep.subr.bf16.mxu0 %v4176_v42  ;;  %801 = vmatprep.subr.bf16.mxu1 %v4181_v43 }
  0x4c   :  { %761 = vmatpush1.bf16.msra.mxu0 %v4191_v45  ;;  %802 = vmatpush1.bf16.msra.mxu1 %v4196_v46 }
  0x4d   :  { %762 = vmatprep.subr.bf16.mxu0 %v4203_v47  ;;  %803 = vmatprep.subr.bf16.mxu1 %v4210_v48 }
  0x50   :  { %763 = vmatpush1.bf16.msra.mxu0 %v4215_v49  ;;  %804 = vmatpush1.bf16.msra.mxu1 %v4220_v50 }
  0x51   :  { %764 = vmatprep.subr.bf16.mxu0 %v4227_v51  ;;  %805 = vmatprep.subr.bf16.mxu1 %v4234_v52 }
  0x54   :  { %765 = vmatpush1.bf16.msra.mxu0 %v4252_v55  ;;  %806 = vmatpush1.bf16.msra.mxu1 %v4257_v56 }
  0x55   :  { %766 = vmatprep.subr.bf16.mxu0 %v4265_v58  ;;  %807 = vmatprep.subr.bf16.mxu1 %v4270_v59 }
  0x58   :  { %767 = vmatpush1.bf16.msra.mxu0 %v4278_v60  ;;  %808 = vmatpush1.bf16.msra.mxu1 %v4283_v61 }
  0x59   :  { %768 = vmatprep.subr.bf16.mxu0 %v4291_v63  ;;  %809 = vmatprep.subr.bf16.mxu1 %v4296_v0 }
  0x5c   :  { %769 = vmatpush1.bf16.msra.mxu0 %v4308_v3  ;;  %810 = vmatpush1.bf16.msra.mxu1 %v4313_v4 }
  0x5d   :  { %770 = vmatprep.subr.bf16.mxu0 %v4320_v5  ;;  %811 = vmatprep.subr.bf16.mxu1 %v4325_v6 }
  0x60   :  { %771 = vmatpush1.bf16.msra.mxu0 %v4333_v7  ;;  %812 = vmatpush1.bf16.msra.mxu1 %v4338_v8 }
  0x61   :  { %875 = vmatprep.subr.bf16.mxu0 %v4127_v33  ;;  %916 = vmatprep.subr.bf16.mxu1 %v4132_v34 }
  0xf6   :  { %v4400_v20 = vpop.f32.mrb[0].mxu0  ;;  %v4402_v21 = vpop.f32.mrb[0].mxu1 }
  0xf7   :  { %v364_v24 = vpop.f32.mrb[1].mxu0  ;;  %v437_v25 = vpop.f32.mrb[1].mxu1 }
  0xf8   :  { %v366_v27 = vpop.f32.mrb[2].mxu0  ;;  %v439_v28 = vpop.f32.mrb[2].mxu1 }
  0xf9   :  { %v4412_v29 = vadd.f32 %v366_v27, %v127_v23  ;;  %v368_v30 = vpop.f32.mrb[3].mxu0  ;;  %v4415_v31 = vadd.f32 %v439_v28, %v4398_v19  ;;  %v441_v32 = vpop.f32.mrb[3].mxu1 }
  0xfa   :  { %v4417_v35 = vadd.f32 %v368_v30, %v131_v26  ;;  %v4420_v44 = vadd.f32 %v441_v32, %v4406_v22 }
  0xfe   :  { %v372_v54 = vpop.f32.mrb[4].mxu0  ;;  %v445_v57 = vpop.f32.mrb[4].mxu1 }
  0xff   :  { %v4422_v62 = vadd.f32 %v372_v54, %v127_v23  ;;  %v374_v2 = vpop.f32.mrb[5].mxu0  ;;  %v4425_v9 = vadd.f32 %v445_v57, %v4398_v19  ;;  %v447_v10 = vpop.f32.mrb[5].mxu1 }
 0x100   :  { %v4427_v12 = vadd.f32 %v374_v2, %v131_v26  ;;  %v376_v17 = vpop.f32.mrb[6].mxu0  ;;  %v4430_v27 = vadd.f32 %v447_v10, %v4406_v22  ;;  %v449_v28 = vpop.f32.mrb[6].mxu1 }
 0x101   :  { %v4432_v30 = vadd.f32 %v376_v17, %v127_v23  ;;  %v378_v32 = vpop.f32.mrb[7].mxu0  ;;  %v4435_v15 = vadd.f32 %v449_v28, %v4398_v19  ;;  %v451_v54 = vpop.f32.mrb[7].mxu1 }
 0x102   :  { %6032 = vst [vmem:[#allocation5_spill] sm:$0xff] %v4427_v12  ;;  %6033 = vst [vmem:[#allocation6_spill] sm:$0xff] %v4430_v27  ;;  %v4437_v18 = vadd.f32 %v378_v32, %v131_v26  ;;  %v4440_v57 = vadd.f32 %v451_v54, %v4406_v22 }
 0x103   :  { %6034 = vst [vmem:[#allocation7_spill] sm:$0xff] %v4432_v30  ;;  %6035 = vst [vmem:[#allocation8_spill] sm:$0xff] %v4435_v15 }
 0x104   :  { %6036 = vst [vmem:[#allocation9_spill] sm:$0xff] %v4437_v18  ;;  %6037 = vst [vmem:[#allocation10_spill] sm:$0xff] %v4440_v57 }
 0x106   :  { %v382_v14 = vpop.f32.mrb[8].mxu0  ;;  %v455_v2 = vpop.f32.mrb[8].mxu1 }
 0x107   :  { %v4442_v16 = vadd.f32 %v382_v14, %v127_v23  ;;  %v384_v11 = vpop.f32.mrb[9].mxu0  ;;  %v4445_v10 = vadd.f32 %v455_v2, %v4398_v19  ;;  %v457_v17 = vpop.f32.mrb[9].mxu1 }
 0x108   :  { %v4447_v1 = vadd.f32 %v384_v11, %v131_v26  ;;  %v386_v13 = vpop.f32.mrb[10].mxu0  ;;  %v4450_v28 = vadd.f32 %v457_v17, %v4406_v22  ;;  %v459_v32 = vpop.f32.mrb[10].mxu1 }
 0x109   :  { %6038 = vst [vmem:[#allocation11_spill] sm:$0xff] %v4442_v16  ;;  %6039 = vst [vmem:[#allocation12_spill] sm:$0xff] %v4445_v10  ;;  %v4452_v18 = vadd.f32 %v386_v13, %v127_v23  ;;  %v388_v54 = vpop.f32.mrb[11].mxu0  ;;  %v4455_v57 = vadd.f32 %v459_v32, %v4398_v19  ;;  %v461_v14 = vpop.f32.mrb[11].mxu1 }
 0x10a   :  { %6040 = vst [vmem:[#allocation13_spill] sm:$0xff] %v4447_v1  ;;  %6041 = vst [vmem:[#allocation14_spill] sm:$0xff] %v4450_v28  ;;  %v4457_v16 = vadd.f32 %v388_v54, %v131_v26  ;;  %v4460_v2 = vadd.f32 %v461_v14, %v4406_v22 }
 0x10b   :  { %6042 = vst [vmem:[#allocation15_spill] sm:$0xff] %v4452_v18  ;;  %6043 = vst [vmem:[#allocation16_spill] sm:$0xff] %v4455_v57 }
 0x10c   :  { %6044 = vst [vmem:[#allocation17_spill] sm:$0xff] %v4457_v16  ;;  %6045 = vst [vmem:[#allocation18_spill] sm:$0xff] %v4460_v2 }
 0x10e   :  { %v392_v10 = vpop.f32.mrb[12].mxu0  ;;  %v465_v11 = vpop.f32.mrb[12].mxu1 }
 0x10f   :  { %v4462_v1 = vadd.f32 %v392_v10, %v127_v23  ;;  %v394_v15 = vpop.f32.mrb[13].mxu0  ;;  %v4465_v17 = vadd.f32 %v465_v11, %v4398_v19  ;;  %v467_v13 = vpop.f32.mrb[13].mxu1 }
 0x110   :  { %v4467_v18 = vadd.f32 %v394_v15, %v131_v26  ;;  %v396_v28 = vpop.f32.mrb[14].mxu0  ;;  %v4470_v32 = vadd.f32 %v467_v13, %v4406_v22  ;;  %v469_v54 = vpop.f32.mrb[14].mxu1  ;;  %v363_v15 = vadd.f32 %v4400_v20, %v127_v23  ;;  %v365_v13 = vadd.f32 %v364_v24, %v131_v26 }
 0x111   :  { %6046 = vst [vmem:[#allocation19_spill] sm:$0xff] %v4462_v1  ;;  %6047 = vst [vmem:[#allocation20_spill] sm:$0xff] %v4465_v17  ;;  %v4472_v16 = vadd.f32 %v396_v28, %v127_v23  ;;  %v398_v14 = vpop.f32.mrb[15].mxu0  ;;  %v4475_v2 = vadd.f32 %v469_v54, %v4398_v19  ;;  %v471_v10 = vpop.f32.mrb[15].mxu1 }
 0x112   :  { %6048 = vst [vmem:[#allocation21_spill] sm:$0xff] %v4467_v18  ;;  %6049 = vst [vmem:[#allocation22_spill] sm:$0xff] %v4470_v32  ;;  %v4477_v1 = vadd.f32 %v398_v14, %v131_v26  ;;  %v4480_v11 = vadd.f32 %v471_v10, %v4406_v22  ;;  %v436_v18 = vadd.f32 %v4402_v21, %v4398_v19 }
 0x113   :  { %6050 = vst [vmem:[#allocation23_spill] sm:$0xff] %v4472_v16  ;;  %6051 = vst [vmem:[#allocation24_spill] sm:$0xff] %v4475_v2  ;;  %v438_v32 = vadd.f32 %v437_v25, %v4406_v22 }
 0x114   :  { %6052 = vst [vmem:[#allocation25_spill] sm:$0xff] %v4477_v1  ;;  %6053 = vst [vmem:[#allocation26_spill] sm:$0xff] %v4480_v11 }
 0x116   :  { %v671_v28 = vpop.f32.mrb[16].mxu0  ;;  %v712_v16 = vpop.f32.mrb[16].mxu1 }
 0x117   :  { %v719_v17 = vadd.f32 %v671_v28, %v363_v15  ;;  %v721_v57 = vadd.f32 %v712_v16, %v436_v18  ;;  %v673_v54 = vpop.f32.mrb[17].mxu0  ;;  %v714_v2 = vpop.f32.mrb[17].mxu1 }
 0x118   :  { %v720_v30 = vadd.f32 %v673_v54, %v365_v13  ;;  %v722_v14 = vadd.f32 %v714_v2, %v438_v32  ;;  %v675_v1 = vpop.f32.mrb[18].mxu0  ;;  %v716_v27 = vpop.f32.mrb[18].mxu1  ;;  %v6057_v13 = vmov 0  }
 0x119   :  { %v3255_v10 = vmul.f32 -1.442695, %v719_v17  ;;  %v676_v11 = vpop.f32.mrb[19].mxu0  ;;  %v717_v12 = vpop.f32.mrb[19].mxu1  ;;  %v986_v28 = vsel %vm985_vm6, 1, %v6057_v13  ;;  %v1105_v54 = vsel %vm1104_vm7, 1, %v6057_v13 }
 0x11a   :  { %v3256_v20 = vmul.f32 -1.442695, %v720_v30  ;;  %v3257_v19 = vmul.f32 -1.442695, %v722_v14  ;;  %v4489_v30 = vpop.permute.xlu0 %750  ;;  %988 = vperm.xlu1 %3430, %v986_v28   ;;  %v1343_v14 = vsel %vm1342_vm8, 1, %v6057_v13 }
 0x11b   :  { %3635 = vpow2.f32 %v3255_v10  ;;  %6054 = vst [vmem:[#allocation27_spill] sm:$0xff] %v4489_v30  ;;  %vm752_vm4 = vcmp.eq.s32.totalorder %v4489_v30, 1  ;;  %v1581_v10 = vsel %vm1580_vm9, 1, %v6057_v13 }
 0x11c   :  { %3637 = vpow2.f32 %v3256_v20  ;;  %vm4497_vm5 = vmpackc.low %vm752_vm4, %vm752_vm4 }
 0x11d   :  { %3639 = vpow2.f32 %v3257_v19  ;;  %vm3383_vm1 = vmpackc.low %vm3961_vm0, %vm752_vm4 }
 0x11e   :  { %3641 = vtanh.f32 %v721_v57  ;;  %1107 = vperm.xlu1 %3430, %v1105_v54  }
 0x122   :  { %1345 = vperm.xlu1 %3430, %v1343_v14  }
 0x125   :  { %v3636_v21 = vpop.eup %3635 }
 0x126   :  { %v3638_v23 = vpop.eup %3637  ;;  %v726_v22 = vadd.f32 1.0, %v3636_v21  ;;  %1583 = vperm.xlu1 %3430, %v1581_v10  }
 0x127   :  { %v732_v24 = vadd.f32 1.0, %v3638_v23  ;;  %v3640_v16 = vpop.eup %3639 }
 0x128   :  { %3643 = vrcp.f32 %v726_v22  ;;  %v3642_v18 = vpop.eup %3641  ;;  %v739_v27 = vadd.f32 1.0, %v3640_v16 }
 0x129   :  { %3645 = vrcp.f32 %v732_v24 }
 0x12a   :  { %3647 = vrcp.f32 %v739_v27 }
 0x132   :  { %v3644_v25 = vpop.eup %3643 }
 0x133   :  { %v3646_v1 = vpop.eup %3645  ;;  %v743_v26 = vmul.f32 %v3644_v25, %v3642_v18 }
 0x134   :  { %v742_v2 = vmul.f32 0.0, %v3646_v1  ;;  %v3648_v17 = vpop.eup %3647 }
 0x136   :  { %v4486_v12 = vadd.f32 %v743_v26, %v742_v2 }
 0x138   :  { %3649 = vtanh.f32 %v4486_v12  ;;  %v754_v14 = vsel %vm752_vm4, %v4486_v12, 0.0 }
 0x142   :  { %v3650_v32 = vpop.eup %3649 }
 0x143   :  { %v4491_v57 = vmul.f32 %v3650_v32, %v3648_v17 }
 0x145   :  { %v3378_v15 = vpack.c.bf16 %v4491_v57, %v4491_v57  ;;  %v753_v12 = vsel %vm752_vm4, %v4491_v57, 0.0 }
 0x147   :  { %3379 = vmatmul.mubr.msk.bf16.vlgmr.msra.gmra.mrb[20].mxu0 %vm4497_vm5, %v3378_v15  ;;  %3382 = vmatmul.mubr.msk.bf16.vlgmr.msra.gmra.mrb[20].mxu1 %vm4497_vm5, %v3378_v15 }
 0x148   :  { %876 = vmatpush1.bf16.msra.mxu0 %v4140_v36  ;;  %917 = vmatpush1.bf16.msra.mxu1 %v4145_v37 }
 0x149   :  { %877 = vmatprep.subr.bf16.mxu0 %v4152_v38  ;;  %918 = vmatprep.subr.bf16.mxu1 %v4157_v39 }
 0x14a   :  { %907 = vmatprep.mubr.bf16.mxu0 %v6057_v13  ;;  %948 = vmatprep.mubr.bf16.mxu1 %v6057_v13 }
 0x14c   :  { %878 = vmatpush1.bf16.msra.mxu0 %v4162_v40  ;;  %919 = vmatpush1.bf16.msra.mxu1 %v4169_v41 }
 0x14d   :  { %879 = vmatprep.subr.bf16.mxu0 %v4176_v42  ;;  %920 = vmatprep.subr.bf16.mxu1 %v4181_v43 }
 0x150   :  { %880 = vmatpush1.bf16.msra.mxu0 %v4191_v45  ;;  %921 = vmatpush1.bf16.msra.mxu1 %v4196_v46 }
 0x151   :  { %881 = vmatprep.subr.bf16.mxu0 %v4203_v47  ;;  %922 = vmatprep.subr.bf16.mxu1 %v4210_v48 }
 0x154   :  { %882 = vmatpush1.bf16.msra.mxu0 %v4215_v49  ;;  %923 = vmatpush1.bf16.msra.mxu1 %v4220_v50 }
 0x155   :  { %883 = vmatprep.subr.bf16.mxu0 %v4227_v51  ;;  %924 = vmatprep.subr.bf16.mxu1 %v4234_v52 }
 0x158   :  { %884 = vmatpush1.bf16.msra.mxu0 %v4252_v55  ;;  %925 = vmatpush1.bf16.msra.mxu1 %v4257_v56 }
 0x159   :  { %885 = vmatprep.subr.bf16.mxu0 %v4265_v58  ;;  %926 = vmatprep.subr.bf16.mxu1 %v4270_v59 }
 0x15c   :  { %886 = vmatpush1.bf16.msra.mxu0 %v4278_v60  ;;  %927 = vmatpush1.bf16.msra.mxu1 %v4283_v61 }
 0x15d   :  { %887 = vmatprep.subr.bf16.mxu0 %v4291_v63  ;;  %928 = vmatprep.subr.bf16.mxu1 %v4296_v0 }
 0x160   :  { %888 = vmatpush1.bf16.msra.mxu0 %v4308_v3  ;;  %929 = vmatpush1.bf16.msra.mxu1 %v4313_v4 }
 0x161   :  { %889 = vmatprep.subr.bf16.mxu0 %v4320_v5  ;;  %930 = vmatprep.subr.bf16.mxu1 %v4325_v6 }
 0x164   :  { %890 = vmatpush1.bf16.msra.mxu0 %v4333_v7  ;;  %931 = vmatpush1.bf16.msra.mxu1 %v4338_v8 }
 0x165   :  { %994 = vmatprep.subr.bf16.mxu0 %v4127_v33  ;;  %1035 = vmatprep.subr.bf16.mxu1 %v4132_v34 }
 0x21a   :  { %v790_v20 = vpop.f32.mrb[20].mxu0  ;;  %v831_v19 = vpop.f32.mrb[20].mxu1 }
 0x21b   :  { %v838_v21 = vadd.f32 %v790_v20, %v4412_v29  ;;  %v840_v23 = vadd.f32 %v831_v19, %v4415_v31  ;;  %v792_v22 = vpop.f32.mrb[21].mxu0  ;;  %v833_v24 = vpop.f32.mrb[21].mxu1 }
 0x21c   :  { %v839_v16 = vadd.f32 %v792_v22, %v4417_v35  ;;  %v841_v18 = vadd.f32 %v833_v24, %v4420_v44  ;;  %v794_v25 = vpop.f32.mrb[22].mxu0  ;;  %v835_v1 = vpop.f32.mrb[22].mxu1 }
 0x21d   :  { %v3258_v26 = vmul.f32 -1.442695, %v838_v21  ;;  %v795_v53 = vpop.f32.mrb[23].mxu0  ;;  %v836_v27 = vpop.f32.mrb[23].mxu1 }
 0x21e   :  { %v3259_v2 = vmul.f32 -1.442695, %v839_v16  ;;  %v3260_v17 = vmul.f32 -1.442695, %v841_v18  ;;  %v4556_v21 = vpop.permute.xlu0 %869 }
 0x21f   :  { %3651 = vpow2.f32 %v3258_v26  ;;  %6058 = vst [vmem:[#allocation28_spill] sm:$0xff] %v4556_v21  ;;  %vm871_vm10 = vcmp.eq.s32.totalorder %v4556_v21, 1 }
 0x220   :  { %3653 = vpow2.f32 %v3259_v2 }
 0x221   :  { %3655 = vpow2.f32 %v3260_v17 }
 0x222   :  { %3657 = vtanh.f32 %v840_v23 }
 0x229   :  { %v3652_v32 = vpop.eup %3651 }
 0x22a   :  { %v3654_v15 = vpop.eup %3653  ;;  %v845_v29 = vadd.f32 1.0, %v3652_v32 }
 0x22b   :  { %v851_v31 = vadd.f32 1.0, %v3654_v15  ;;  %v3656_v35 = vpop.eup %3655  ;;  %v6059_v15 = vld [vmem:[#allocation5_spill] sm:$0xff] }
 0x22c   :  { %3659 = vrcp.f32 %v845_v29  ;;  %v3658_v28 = vpop.eup %3657  ;;  %v858_v20 = vadd.f32 1.0, %v3656_v35 }
 0x22d   :  { %3661 = vrcp.f32 %v851_v31  ;;  %v6060_v31 = vld [vmem:[#allocation6_spill] sm:$0xff] }
 0x22e   :  { %3663 = vrcp.f32 %v858_v20 }
 0x236   :  { %v3660_v44 = vpop.eup %3659 }
 0x237   :  { %v3662_v54 = vpop.eup %3661  ;;  %v862_v10 = vmul.f32 %v3660_v44, %v3658_v28 }
 0x238   :  { %v861_v19 = vmul.f32 %v3662_v54, %v754_v14  ;;  %v3664_v24 = vpop.eup %3663 }
 0x23a   :  { %v863_v22 = vadd.f32 %v862_v10, %v861_v19 }
 0x23c   :  { %3665 = vtanh.f32 %v863_v22  ;;  %v4561_v23 = vsel %vm871_vm10, %v863_v22, %v754_v14 }
 0x246   :  { %v3666_v16 = vpop.eup %3665 }
 0x247   :  { %v865_v18 = vmul.f32 %v3666_v16, %v3664_v24 }
 0x249   :  { %v4568_v25 = vsel %vm871_vm10, %v865_v18, %v753_v12 }
 0x24a   :  { %v874_v1 = vpack.c.bf16 %v4568_v25, %v4568_v25 }
 0x24c   :  { %908 = vmatmul.mubr.bf16.vlgmr.msra.gmra.mrb[24].mxu0 %v874_v1  ;;  %949 = vmatmul.mubr.bf16.vlgmr.msra.gmra.mrb[24].mxu1 %v874_v1  ;;  %v4610_v1 = vpop.permute.xlu1 %988 }
 0x24d   :  { %995 = vmatpush1.bf16.msra.mxu0 %v4140_v36  ;;  %1036 = vmatpush1.bf16.msra.mxu1 %v4145_v37  ;;  %6061 = vst [vmem:[#allocation5_spill] sm:$0xff] %v4610_v1  ;;  %vm990_vm11 = vcmp.eq.s32.totalorder %v4610_v1, 1 }
 0x24e   :  { %996 = vmatprep.subr.bf16.mxu0 %v4152_v38  ;;  %1037 = vmatprep.subr.bf16.mxu1 %v4157_v39 }
 0x24f   :  { %1026 = vmatprep.mubr.bf16.mxu0 %v6057_v13  ;;  %1067 = vmatprep.mubr.bf16.mxu1 %v6057_v13 }
 0x251   :  { %997 = vmatpush1.bf16.msra.mxu0 %v4162_v40  ;;  %1038 = vmatpush1.bf16.msra.mxu1 %v4169_v41 }
 0x252   :  { %998 = vmatprep.subr.bf16.mxu0 %v4176_v42  ;;  %1039 = vmatprep.subr.bf16.mxu1 %v4181_v43 }
 0x255   :  { %999 = vmatpush1.bf16.msra.mxu0 %v4191_v45  ;;  %1040 = vmatpush1.bf16.msra.mxu1 %v4196_v46 }
 0x256   :  { %1000 = vmatprep.subr.bf16.mxu0 %v4203_v47  ;;  %1041 = vmatprep.subr.bf16.mxu1 %v4210_v48 }
 0x259   :  { %1001 = vmatpush1.bf16.msra.mxu0 %v4215_v49  ;;  %1042 = vmatpush1.bf16.msra.mxu1 %v4220_v50 }
 0x25a   :  { %1002 = vmatprep.subr.bf16.mxu0 %v4227_v51  ;;  %1043 = vmatprep.subr.bf16.mxu1 %v4234_v52 }
 0x25d   :  { %1003 = vmatpush1.bf16.msra.mxu0 %v4252_v55  ;;  %1044 = vmatpush1.bf16.msra.mxu1 %v4257_v56 }
 0x25e   :  { %1004 = vmatprep.subr.bf16.mxu0 %v4265_v58  ;;  %1045 = vmatprep.subr.bf16.mxu1 %v4270_v59 }
 0x261   :  { %1005 = vmatpush1.bf16.msra.mxu0 %v4278_v60  ;;  %1046 = vmatpush1.bf16.msra.mxu1 %v4283_v61 }
 0x262   :  { %1006 = vmatprep.subr.bf16.mxu0 %v4291_v63  ;;  %1047 = vmatprep.subr.bf16.mxu1 %v4296_v0 }
 0x265   :  { %1007 = vmatpush1.bf16.msra.mxu0 %v4308_v3  ;;  %1048 = vmatpush1.bf16.msra.mxu1 %v4313_v4 }
 0x266   :  { %1008 = vmatprep.subr.bf16.mxu0 %v4320_v5  ;;  %1049 = vmatprep.subr.bf16.mxu1 %v4325_v6 }
 0x269   :  { %1009 = vmatpush1.bf16.msra.mxu0 %v4333_v7  ;;  %1050 = vmatpush1.bf16.msra.mxu1 %v4338_v8 }
 0x26a   :  { %1113 = vmatprep.subr.bf16.mxu0 %v4127_v33  ;;  %1154 = vmatprep.subr.bf16.mxu1 %v4132_v34 }
 0x31f   :  { %v909_v26 = vpop.f32.mrb[24].mxu0  ;;  %v950_v53 = vpop.f32.mrb[24].mxu1 }
 0x320   :  { %v957_v27 = vadd.f32 %v909_v26, %v4422_v62  ;;  %v959_v2 = vadd.f32 %v950_v53, %v4425_v9  ;;  %v911_v17 = vpop.f32.mrb[25].mxu0  ;;  %v952_v32 = vpop.f32.mrb[25].mxu1 }
 0x321   :  { %v958_v29 = vadd.f32 %v911_v17, %v6059_v15  ;;  %v960_v35 = vadd.f32 %v952_v32, %v6060_v31  ;;  %v913_v28 = vpop.f32.mrb[26].mxu0  ;;  %v954_v44 = vpop.f32.mrb[26].mxu1 }
 0x322   :  { %v3261_v54 = vmul.f32 -1.442695, %v957_v27  ;;  %v914_v14 = vpop.f32.mrb[27].mxu0  ;;  %v955_v10 = vpop.f32.mrb[27].mxu1 }
 0x323   :  { %v3262_v20 = vmul.f32 -1.442695, %v958_v29  ;;  %v3263_v19 = vmul.f32 -1.442695, %v960_v35 }
 0x324   :  { %3667 = vpow2.f32 %v3261_v54  ;;  %v6065_v54 = vld [vmem:[#allocation10_spill] sm:$0xff] }
 0x325   :  { %3669 = vpow2.f32 %v3262_v20 }
 0x326   :  { %3671 = vpow2.f32 %v3263_v19 }
 0x327   :  { %3673 = vtanh.f32 %v959_v2 }
 0x32e   :  { %v3668_v22 = vpop.eup %3667 }
 0x32f   :  { %v3670_v24 = vpop.eup %3669  ;;  %v964_v62 = vadd.f32 1.0, %v3668_v22 }
 0x330   :  { %v970_v9 = vadd.f32 1.0, %v3670_v24  ;;  %v3672_v16 = vpop.eup %3671 }
 0x331   :  { %3675 = vrcp.f32 %v964_v62  ;;  %v3674_v18 = vpop.eup %3673  ;;  %v977_v53 = vadd.f32 1.0, %v3672_v16 }
 0x332   :  { %3677 = vrcp.f32 %v970_v9 }
 0x333   :  { %3679 = vrcp.f32 %v977_v53 }
 0x33b   :  { %v3676_v12 = vpop.eup %3675 }
 0x33c   :  { %v3678_v26 = vpop.eup %3677  ;;  %v981_v27 = vmul.f32 %v3676_v12, %v3674_v18 }
 0x33d   :  { %v980_v17 = vmul.f32 %v3678_v26, %v4561_v23  ;;  %v3680_v15 = vpop.eup %3679 }
 0x33f   :  { %v982_v32 = vadd.f32 %v981_v27, %v980_v17 }
 0x341   :  { %3681 = vtanh.f32 %v982_v32  ;;  %v4617_v2 = vsel %vm990_vm11, %v982_v32, %v4561_v23  ;;  %v6064_v23 = vld [vmem:[#allocation9_spill] sm:$0xff] }
 0x34b   :  { %v3682_v29 = vpop.eup %3681 }
 0x34c   :  { %v984_v31 = vmul.f32 %v3682_v29, %v3680_v15  ;;  %v4665_v29 = vpop.permute.xlu1 %1107 }
 0x34d   :  { %6066 = vst [vmem:[#allocation6_spill] sm:$0xff] %v4665_v29  ;;  %vm1109_vm12 = vcmp.eq.s32.totalorder %v4665_v29, 1 }
 0x34e   :  { %v4622_v35 = vsel %vm990_vm11, %v984_v31, %v4568_v25 }
 0x34f   :  { %v993_v28 = vpack.c.bf16 %v4622_v35, %v4622_v35 }
 0x351   :  { %1027 = vmatmul.mubr.bf16.vlgmr.msra.gmra.mrb[28].mxu0 %v993_v28  ;;  %1068 = vmatmul.mubr.bf16.vlgmr.msra.gmra.mrb[28].mxu1 %v993_v28 }
 0x352   :  { %1114 = vmatpush1.bf16.msra.mxu0 %v4140_v36  ;;  %1155 = vmatpush1.bf16.msra.mxu1 %v4145_v37 }
 0x353   :  { %1115 = vmatprep.subr.bf16.mxu0 %v4152_v38  ;;  %1156 = vmatprep.subr.bf16.mxu1 %v4157_v39  ;;  %v6062_v38 = vld [vmem:[#allocation7_spill] sm:$0xff] }
 0x354   :  { %1145 = vmatprep.mubr.bf16.mxu0 %v6057_v13  ;;  %1186 = vmatprep.mubr.bf16.mxu1 %v6057_v13 }
 0x356   :  { %1116 = vmatpush1.bf16.msra.mxu0 %v4162_v40  ;;  %1157 = vmatpush1.bf16.msra.mxu1 %v4169_v41  ;;  %v6063_v40 = vld [vmem:[#allocation8_spill] sm:$0xff] }
 0x357   :  { %1117 = vmatprep.subr.bf16.mxu0 %v4176_v42  ;;  %1158 = vmatprep.subr.bf16.mxu1 %v4181_v43 }
 0x35a   :  { %1118 = vmatpush1.bf16.msra.mxu0 %v4191_v45  ;;  %1159 = vmatpush1.bf16.msra.mxu1 %v4196_v46 }
 0x35b   :  { %1119 = vmatprep.subr.bf16.mxu0 %v4203_v47  ;;  %1160 = vmatprep.subr.bf16.mxu1 %v4210_v48 }
 0x35e   :  { %1120 = vmatpush1.bf16.msra.mxu0 %v4215_v49  ;;  %1161 = vmatpush1.bf16.msra.mxu1 %v4220_v50 }
 0x35f   :  { %1121 = vmatprep.subr.bf16.mxu0 %v4227_v51  ;;  %1162 = vmatprep.subr.bf16.mxu1 %v4234_v52 }
 0x362   :  { %1122 = vmatpush1.bf16.msra.mxu0 %v4252_v55  ;;  %1163 = vmatpush1.bf16.msra.mxu1 %v4257_v56 }
 0x363   :  { %1123 = vmatprep.subr.bf16.mxu0 %v4265_v58  ;;  %1164 = vmatprep.subr.bf16.mxu1 %v4270_v59 }
 0x366   :  { %1124 = vmatpush1.bf16.msra.mxu0 %v4278_v60  ;;  %1165 = vmatpush1.bf16.msra.mxu1 %v4283_v61 }
 0x367   :  { %1125 = vmatprep.subr.bf16.mxu0 %v4291_v63  ;;  %1166 = vmatprep.subr.bf16.mxu1 %v4296_v0 }
 0x36a   :  { %1126 = vmatpush1.bf16.msra.mxu0 %v4308_v3  ;;  %1167 = vmatpush1.bf16.msra.mxu1 %v4313_v4 }
 0x36b   :  { %1127 = vmatprep.subr.bf16.mxu0 %v4320_v5  ;;  %1168 = vmatprep.subr.bf16.mxu1 %v4325_v6 }
 0x36e   :  { %1128 = vmatpush1.bf16.msra.mxu0 %v4333_v7  ;;  %1169 = vmatpush1.bf16.msra.mxu1 %v4338_v8 }
 0x36f   :  { %1232 = vmatprep.subr.bf16.mxu0 %v4127_v33  ;;  %1273 = vmatprep.subr.bf16.mxu1 %v4132_v34 }
 0x424   :  { %v1028_v36 = vpop.f32.mrb[28].mxu0  ;;  %v1069_v37 = vpop.f32.mrb[28].mxu1 }
 0x425   :  { %v1076_v39 = vadd.f32 %v1028_v36, %v6062_v38  ;;  %v1078_v41 = vadd.f32 %v1069_v37, %v6063_v40  ;;  %v1030_v42 = vpop.f32.mrb[29].mxu0  ;;  %v1071_v43 = vpop.f32.mrb[29].mxu1 }
 0x426   :  { %v1077_v44 = vadd.f32 %v1030_v42, %v6064_v23  ;;  %v1079_v14 = vadd.f32 %v1071_v43, %v6065_v54  ;;  %v1032_v10 = vpop.f32.mrb[30].mxu0  ;;  %v1073_v20 = vpop.f32.mrb[30].mxu1  ;;  %v4695_v42 = vld [vmem:[%s5996_s2 + $0x24] ss:$16 sps:$4 sm:$0xff]   ;;  %v4701_v43 = vld [vmem:[%s5996_s2 + $0x2c] ss:$16 sps:$4 sm:$0xff]  }
 0x427   :  { %v3264_v19 = vmul.f32 -1.442695, %v1076_v39  ;;  %v1033_v22 = vpop.f32.mrb[31].mxu0  ;;  %v1074_v24 = vpop.f32.mrb[31].mxu1  ;;  %v4709_v23 = vld [vmem:[%s5996_s2 + $0x20] ss:$16 sps:$4 sm:$0xff]  }
 0x428   :  { %v3265_v33 = vmul.f32 -1.442695, %v1077_v44  ;;  %v3266_v34 = vmul.f32 -1.442695, %v1079_v14  ;;  %v4715_v44 = vld [vmem:[%s5996_s2 + $0x28] ss:$16 sps:$4 sm:$0xff]  }
 0x429   :  { %3683 = vpow2.f32 %v3264_v19  ;;  %v4721_v54 = vld [vmem:[%s5996_s2 + $0x44] ss:$16 sps:$4 sm:$0xff]   ;;  %v4727_v14 = vld [vmem:[%s5996_s2 + $0x4c] ss:$16 sps:$4 sm:$0xff]  }
 0x42a   :  { %3685 = vpow2.f32 %v3265_v33 }
 0x42b   :  { %3687 = vpow2.f32 %v3266_v34 }
 0x42c   :  { %3689 = vtanh.f32 %v1078_v41  ;;  %v4683_v41 = vld [vmem:[%s5996_s2] ss:$16 sps:$4 sm:$0xff]  }
 0x433   :  { %v3684_v62 = vpop.eup %3683 }
 0x434   :  { %v3686_v9 = vpop.eup %3685  ;;  %v1083_v16 = vadd.f32 1.0, %v3684_v62 }
 0x435   :  { %v1089_v18 = vadd.f32 1.0, %v3686_v9  ;;  %v3688_v12 = vpop.eup %3687 }
 0x436   :  { %3691 = vrcp.f32 %v1083_v16  ;;  %v3690_v26 = vpop.eup %3689  ;;  %v1096_v32 = vadd.f32 1.0, %v3688_v12 }
 0x437   :  { %3693 = vrcp.f32 %v1089_v18  ;;  %v4769_v18 = vpop.permute.xlu0 %1226 }
 0x438   :  { %3695 = vrcp.f32 %v1096_v32  ;;  %6071 = vst [vmem:[#allocation7_spill] sm:$0xff] %v4769_v18  ;;  %vm1228_vm13 = vcmp.eq.s32.totalorder %v4769_v18, 1 }
 0x440   :  { %v3692_v53 = vpop.eup %3691 }
 0x441   :  { %v3694_v27 = vpop.eup %3693  ;;  %v1100_v17 = vmul.f32 %v3692_v53, %v3690_v26 }
 0x442   :  { %v1099_v15 = vmul.f32 %v3694_v27, %v4617_v2  ;;  %v3696_v36 = vpop.eup %3695 }
 0x444   :  { %v1101_v31 = vadd.f32 %v1100_v17, %v1099_v15 }
 0x446   :  { %3697 = vtanh.f32 %v1101_v31  ;;  %v4671_v28 = vsel %vm1109_vm12, %v1101_v31, %v4617_v2  ;;  %v4689_v2 = vld [vmem:[%s5996_s2 + $0x8] ss:$16 sps:$4 sm:$0xff]   ;;  %v4797_v31 = vld [vmem:[%s5996_s2 + $0x40] ss:$16 sps:$4 sm:$0xff]  }
 0x450   :  { %v3698_v37 = vpop.eup %3697 }
 0x451   :  { %v1103_v38 = vmul.f32 %v3698_v37, %v3696_v36  ;;  %v4809_v36 = vld [vmem:[%s5996_s2 + $0x64] ss:$16 sps:$4 sm:$0xff]   ;;  %v4815_v37 = vld [vmem:[%s5996_s2 + $0x6c] ss:$16 sps:$4 sm:$0xff]  }
 0x453   :  { %v4676_v39 = vsel %vm1109_vm12, %v1103_v38, %v4622_v35  ;;  %v4821_v38 = vld [vmem:[%s5996_s2 + $0x60] ss:$16 sps:$4 sm:$0xff]  }
 0x454   :  { %v1112_v40 = vpack.c.bf16 %v4676_v39, %v4676_v39 }
 0x456   :  { %1146 = vmatmul.mubr.bf16.vlgmr.msra.gmra.mrb[32].mxu0 %v1112_v40  ;;  %1187 = vmatmul.mubr.bf16.vlgmr.msra.gmra.mrb[32].mxu1 %v1112_v40  ;;  %v4827_v40 = vld [vmem:[%s5996_s2 + $0x68] ss:$16 sps:$4 sm:$0xff]  }
 0x457   :  { %1233 = vmatpush1.bf16.msra.mxu0 %v4683_v41  ;;  %1274 = vmatpush1.bf16.msra.mxu1 %v4689_v2 }
 0x458   :  { %1234 = vmatprep.subr.bf16.mxu0 %v4695_v42  ;;  %1275 = vmatprep.subr.bf16.mxu1 %v4701_v43 }
 0x459   :  { %1264 = vmatprep.mubr.bf16.mxu0 %v6057_v13  ;;  %1305 = vmatprep.mubr.bf16.mxu1 %v6057_v13 }
 0x45b   :  { %1235 = vmatpush1.bf16.msra.mxu0 %v4709_v23  ;;  %1276 = vmatpush1.bf16.msra.mxu1 %v4715_v44 }
 0x45c   :  { %1236 = vmatprep.subr.bf16.mxu0 %v4721_v54  ;;  %1277 = vmatprep.subr.bf16.mxu1 %v4727_v14 }
 0x45f   :  { %1237 = vmatpush1.bf16.msra.mxu0 %v4191_v45  ;;  %1278 = vmatpush1.bf16.msra.mxu1 %v4196_v46  ;;  %v4755_v45 = vld [vmem:[%s5996_s2 + $0x4] ss:$16 sps:$4 sm:$0xff]   ;;  %v4761_v46 = vld [vmem:[%s5996_s2 + $0xc] ss:$16 sps:$4 sm:$0xff]  }
 0x460   :  { %1238 = vmatprep.subr.bf16.mxu0 %v4203_v47  ;;  %1279 = vmatprep.subr.bf16.mxu1 %v4210_v48 }
 0x463   :  { %1239 = vmatpush1.bf16.msra.mxu0 %v4215_v49  ;;  %1280 = vmatpush1.bf16.msra.mxu1 %v4220_v50  ;;  %v6067_v49 = vld [vmem:[#allocation11_spill] sm:$0xff] }
 0x464   :  { %1240 = vmatprep.subr.bf16.mxu0 %v4227_v51  ;;  %1281 = vmatprep.subr.bf16.mxu1 %v4234_v52  ;;  %v6068_v51 = vld [vmem:[#allocation12_spill] sm:$0xff] }
 0x467   :  { %1241 = vmatpush1.bf16.msra.mxu0 %v4252_v55  ;;  %1282 = vmatpush1.bf16.msra.mxu1 %v4257_v56 }
 0x468   :  { %1242 = vmatprep.subr.bf16.mxu0 %v4265_v58  ;;  %1283 = vmatprep.subr.bf16.mxu1 %v4270_v59  ;;  %v6069_v58 = vld [vmem:[#allocation13_spill] sm:$0xff] }
 0x46b   :  { %1243 = vmatpush1.bf16.msra.mxu0 %v4278_v60  ;;  %1284 = vmatpush1.bf16.msra.mxu1 %v4283_v61  ;;  %v6070_v60 = vld [vmem:[#allocation14_spill] sm:$0xff] }
 0x46c   :  { %1244 = vmatprep.subr.bf16.mxu0 %v4291_v63  ;;  %1285 = vmatprep.subr.bf16.mxu1 %v4296_v0 }
 0x46f   :  { %1245 = vmatpush1.bf16.msra.mxu0 %v4308_v3  ;;  %1286 = vmatpush1.bf16.msra.mxu1 %v4313_v4 }
 0x470   :  { %1246 = vmatprep.subr.bf16.mxu0 %v4320_v5  ;;  %1287 = vmatprep.subr.bf16.mxu1 %v4325_v6 }
 0x473   :  { %1247 = vmatpush1.bf16.msra.mxu0 %v4333_v7  ;;  %1288 = vmatpush1.bf16.msra.mxu1 %v4338_v8 }
 0x474   :  { %1351 = vmatprep.subr.bf16.mxu0 %v4755_v45  ;;  %1392 = vmatprep.subr.bf16.mxu1 %v4761_v46 }
 0x529   :  { %v1147_v47 = vpop.f32.mrb[32].mxu0  ;;  %v1188_v48 = vpop.f32.mrb[32].mxu1 }
 0x52a   :  { %v1195_v50 = vadd.f32 %v1147_v47, %v6067_v49  ;;  %v1197_v52 = vadd.f32 %v1188_v48, %v6068_v51  ;;  %v1149_v55 = vpop.f32.mrb[33].mxu0  ;;  %v1190_v56 = vpop.f32.mrb[33].mxu1  ;;  %v4833_v47 = vld [vmem:[%s5996_s2 + $0x84] ss:$16 sps:$4 sm:$0xff]   ;;  %v4839_v48 = vld [vmem:[%s5996_s2 + $0x8c] ss:$16 sps:$4 sm:$0xff]  }
 0x52b   :  { %v1196_v59 = vadd.f32 %v1149_v55, %v6069_v58  ;;  %v1198_v61 = vadd.f32 %v1190_v56, %v6070_v60  ;;  %v1151_v63 = vpop.f32.mrb[34].mxu0  ;;  %v1192_v0 = vpop.f32.mrb[34].mxu1  ;;  %v4845_v49 = vld [vmem:[%s5996_s2 + $0x80] ss:$16 sps:$4 sm:$0xff]   ;;  %v4857_v51 = vld [vmem:[%s5996_s2 + $0xa4] ss:$16 sps:$4 sm:$0xff]  }
 0x52c   :  { %v3267_v3 = vmul.f32 -1.442695, %v1195_v50  ;;  %v1152_v4 = vpop.f32.mrb[35].mxu0  ;;  %v1193_v5 = vpop.f32.mrb[35].mxu1  ;;  %v4851_v50 = vld [vmem:[%s5996_s2 + $0x88] ss:$16 sps:$4 sm:$0xff]  }
 0x52d   :  { %v3268_v6 = vmul.f32 -1.442695, %v1196_v59  ;;  %v3269_v7 = vmul.f32 -1.442695, %v1198_v61  ;;  %v4869_v55 = vld [vmem:[%s5996_s2 + $0xa0] ss:$16 sps:$4 sm:$0xff]  }
 0x52e   :  { %3699 = vpow2.f32 %v3267_v3  ;;  %v4875_v56 = vld [vmem:[%s5996_s2 + $0xa8] ss:$16 sps:$4 sm:$0xff]   ;;  %v4881_v58 = vld [vmem:[%s5996_s2 + $0xc4] ss:$16 sps:$4 sm:$0xff]   ;;  %v4887_v59 = vld [vmem:[%s5996_s2 + $0xcc] ss:$16 sps:$4 sm:$0xff]  }
 0x52f   :  { %3701 = vpow2.f32 %v3268_v6  ;;  %v4893_v60 = vld [vmem:[%s5996_s2 + $0xc0] ss:$16 sps:$4 sm:$0xff]   ;;  %v4899_v61 = vld [vmem:[%s5996_s2 + $0xc8] ss:$16 sps:$4 sm:$0xff]   ;;  %v4905_v63 = vld [vmem:[%s5996_s2 + $0xe4] ss:$16 sps:$4 sm:$0xff]  }
 0x530   :  { %3703 = vpow2.f32 %v3269_v7  ;;  %v4911_v0 = vld [vmem:[%s5996_s2 + $0xec] ss:$16 sps:$4 sm:$0xff]   ;;  %v4917_v3 = vld [vmem:[%s5996_s2 + $0xe0] ss:$16 sps:$4 sm:$0xff]   ;;  %v4923_v4 = vld [vmem:[%s5996_s2 + $0xe8] ss:$16 sps:$4 sm:$0xff]  }
 0x531   :  { %3705 = vtanh.f32 %v1197_v52  ;;  %v4863_v52 = vld [vmem:[%s5996_s2 + $0xac] ss:$16 sps:$4 sm:$0xff]  }
 0x532   :  { %v6072_v7 = vld [vmem:[#allocation15_spill] sm:$0xff] }
 0x538   :  { %v3700_v8 = vpop.eup %3699 }
 0x539   :  { %v3702_v10 = vpop.eup %3701  ;;  %v1202_v20 = vadd.f32 1.0, %v3700_v8 }
 0x53a   :  { %v1208_v19 = vadd.f32 1.0, %v3702_v10  ;;  %v3704_v22 = vpop.eup %3703  ;;  %v6073_v10 = vld [vmem:[#allocation16_spill] sm:$0xff] }
 0x53b   :  { %3707 = vrcp.f32 %v1202_v20  ;;  %v3706_v24 = vpop.eup %3705  ;;  %v1215_v9 = vadd.f32 1.0, %v3704_v22 }
 0x53c   :  { %3709 = vrcp.f32 %v1208_v19 }
 0x53d   :  { %3711 = vrcp.f32 %v1215_v9 }
 0x545   :  { %v3708_v33 = vpop.eup %3707 }
 0x546   :  { %v3710_v34 = vpop.eup %3709  ;;  %v1219_v62 = vmul.f32 %v3708_v33, %v3706_v24  ;;  %v6074_v24 = vld [vmem:[#allocation17_spill] sm:$0xff] }
 0x547   :  { %v1218_v16 = vmul.f32 %v3710_v34, %v4671_v28  ;;  %v3712_v53 = vpop.eup %3711  ;;  %v6075_v34 = vld [vmem:[#allocation18_spill] sm:$0xff] }
 0x549   :  { %v1220_v12 = vadd.f32 %v1219_v62, %v1218_v16 }
 0x54b   :  { %3713 = vtanh.f32 %v1220_v12  ;;  %v4775_v26 = vsel %vm1228_vm13, %v1220_v12, %v4671_v28  ;;  %v4803_v28 = vld [vmem:[%s5996_s2 + $0x48] ss:$16 sps:$4 sm:$0xff]  }
 0x555   :  { %v3714_v27 = vpop.eup %3713 }
 0x556   :  { %v1222_v17 = vmul.f32 %v3714_v27, %v3712_v53 }
 0x558   :  { %v4780_v32 = vsel %vm1228_vm13, %v1222_v17, %v4676_v39 }
 0x559   :  { %v1231_v15 = vpack.c.bf16 %v4780_v32, %v4780_v32 }
 0x55b   :  { %1265 = vmatmul.mubr.bf16.vlgmr.msra.gmra.mrb[36].mxu0 %v1231_v15  ;;  %1306 = vmatmul.mubr.bf16.vlgmr.msra.gmra.mrb[36].mxu1 %v1231_v15 }
 0x55c   :  { %1352 = vmatpush1.bf16.msra.mxu0 %v4683_v41  ;;  %1393 = vmatpush1.bf16.msra.mxu1 %v4689_v2 }
 0x55d   :  { %1353 = vmatprep.subr.bf16.mxu0 %v4695_v42  ;;  %1394 = vmatprep.subr.bf16.mxu1 %v4701_v43 }
 0x55e   :  { %1383 = vmatprep.mubr.bf16.mxu0 %v6057_v13  ;;  %1424 = vmatprep.mubr.bf16.mxu1 %v6057_v13 }
 0x560   :  { %1354 = vmatpush1.bf16.msra.mxu0 %v4709_v23  ;;  %1395 = vmatpush1.bf16.msra.mxu1 %v4715_v44 }
 0x561   :  { %1355 = vmatprep.subr.bf16.mxu0 %v4721_v54  ;;  %1396 = vmatprep.subr.bf16.mxu1 %v4727_v14 }
 0x564   :  { %1356 = vmatpush1.bf16.msra.mxu0 %v4797_v31  ;;  %1397 = vmatpush1.bf16.msra.mxu1 %v4803_v28 }
 0x565   :  { %1357 = vmatprep.subr.bf16.mxu0 %v4809_v36  ;;  %1398 = vmatprep.subr.bf16.mxu1 %v4815_v37 }
 0x568   :  { %1358 = vmatpush1.bf16.msra.mxu0 %v4821_v38  ;;  %1399 = vmatpush1.bf16.msra.mxu1 %v4827_v40 }
 0x569   :  { %1359 = vmatprep.subr.bf16.mxu0 %v4833_v47  ;;  %1400 = vmatprep.subr.bf16.mxu1 %v4839_v48 }
 0x56c   :  { %1360 = vmatpush1.bf16.msra.mxu0 %v4845_v49  ;;  %1401 = vmatpush1.bf16.msra.mxu1 %v4851_v50 }
 0x56d   :  { %1361 = vmatprep.subr.bf16.mxu0 %v4857_v51  ;;  %1402 = vmatprep.subr.bf16.mxu1 %v4863_v52 }
 0x570   :  { %1362 = vmatpush1.bf16.msra.mxu0 %v4869_v55  ;;  %1403 = vmatpush1.bf16.msra.mxu1 %v4875_v56 }
 0x571   :  { %1363 = vmatprep.subr.bf16.mxu0 %v4881_v58  ;;  %1404 = vmatprep.subr.bf16.mxu1 %v4887_v59 }
 0x574   :  { %1364 = vmatpush1.bf16.msra.mxu0 %v4893_v60  ;;  %1405 = vmatpush1.bf16.msra.mxu1 %v4899_v61 }
 0x575   :  { %1365 = vmatprep.subr.bf16.mxu0 %v4905_v63  ;;  %1406 = vmatprep.subr.bf16.mxu1 %v4911_v0 }
 0x578   :  { %1366 = vmatpush1.bf16.msra.mxu0 %v4917_v3  ;;  %1407 = vmatpush1.bf16.msra.mxu1 %v4923_v4 }
 0x579   :  { %1470 = vmatprep.subr.bf16.mxu0 %v4755_v45  ;;  %1511 = vmatprep.subr.bf16.mxu1 %v4761_v46 }
 0x62e   :  { %v1266_v5 = vpop.f32.mrb[36].mxu0  ;;  %v1307_v6 = vpop.f32.mrb[36].mxu1 }
 0x62f   :  { %v1314_v8 = vadd.f32 %v1266_v5, %v6072_v7  ;;  %v1316_v20 = vadd.f32 %v1307_v6, %v6073_v10  ;;  %v1268_v19 = vpop.f32.mrb[37].mxu0  ;;  %v1309_v22 = vpop.f32.mrb[37].mxu1 }
 0x630   :  { %v1315_v33 = vadd.f32 %v1268_v19, %v6074_v24  ;;  %v1317_v62 = vadd.f32 %v1309_v22, %v6075_v34  ;;  %v1270_v9 = vpop.f32.mrb[38].mxu0  ;;  %v1311_v16 = vpop.f32.mrb[38].mxu1 }
 0x631   :  { %v3270_v12 = vmul.f32 -1.442695, %v1314_v8  ;;  %v1271_v53 = vpop.f32.mrb[39].mxu0  ;;  %v1312_v27 = vpop.f32.mrb[39].mxu1 }
 0x632   :  { %v3271_v45 = vmul.f32 -1.442695, %v1315_v33  ;;  %v3272_v46 = vmul.f32 -1.442695, %v1317_v62  ;;  %v4933_v33 = vpop.permute.xlu1 %1345 }
 0x633   :  { %3715 = vpow2.f32 %v3270_v12  ;;  %6076 = vst [vmem:[#allocation8_spill] sm:$0xff] %v4933_v33  ;;  %vm1347_vm14 = vcmp.eq.s32.totalorder %v4933_v33, 1 }
 0x634   :  { %3717 = vpow2.f32 %v3271_v45  ;;  %v4990_v45 = vpop.permute.xlu0 %1464 }
 0x635   :  { %3719 = vpow2.f32 %v3272_v46  ;;  %6081 = vst [vmem:[#allocation9_spill] sm:$0xff] %v4990_v45  ;;  %vm1466_vm15 = vcmp.eq.s32.totalorder %v4990_v45, 1 }
 0x636   :  { %3721 = vtanh.f32 %v1316_v20 }
 0x63d   :  { %v3716_v17 = vpop.eup %3715 }
 0x63e   :  { %v3718_v15 = vpop.eup %3717  ;;  %v1321_v5 = vadd.f32 1.0, %v3716_v17 }
 0x63f   :  { %v1327_v6 = vadd.f32 1.0, %v3718_v15  ;;  %v3720_v7 = vpop.eup %3719 }
 0x640   :  { %3723 = vrcp.f32 %v1321_v5  ;;  %v3722_v10 = vpop.eup %3721  ;;  %v1334_v8 = vadd.f32 1.0, %v3720_v7 }
 0x641   :  { %3725 = vrcp.f32 %v1327_v6 }
 0x642   :  { %3727 = vrcp.f32 %v1334_v8  ;;  %v3539_v8 = vld [vmem:[%s5999_s4 + $0x24] ss:$16 sps:$4 sm:$0xff]  }
 0x64a   :  { %v3724_v19 = vpop.eup %3723 }
 0x64b   :  { %v3726_v22 = vpop.eup %3725  ;;  %v1338_v24 = vmul.f32 %v3724_v19, %v3722_v10  ;;  %v3531_v10 = vld [vmem:[%s5999_s4] ss:$16 sps:$4 sm:$0xff]   ;;  %v3534_v19 = vld [vmem:[%s5999_s4 + $0x8] ss:$16 sps:$4 sm:$0xff]  }
 0x64c   :  { %v1337_v34 = vmul.f32 %v3726_v22, %v4775_v26  ;;  %v3728_v62 = vpop.eup %3727 }
 0x64e   :  { %v1339_v9 = vadd.f32 %v1338_v24, %v1337_v34  ;;  %v3542_v34 = vld [vmem:[%s5999_s4 + $0x2c] ss:$16 sps:$4 sm:$0xff]  }
 0x650   :  { %3729 = vtanh.f32 %v1339_v9  ;;  %v4939_v20 = vsel %vm1347_vm14, %v1339_v9, %v4775_v26  ;;  %v3537_v9 = vld [vmem:[%s5999_s4 + $0x20] ss:$16 sps:$4 sm:$0xff]  }
 0x65a   :  { %v3730_v16 = vpop.eup %3729 }
 0x65b   :  { %v1341_v12 = vmul.f32 %v3730_v16, %v3728_v62  ;;  %v3545_v62 = vld [vmem:[%s5999_s4 + $0x44] ss:$16 sps:$4 sm:$0xff]   ;;  %v3548_v16 = vld [vmem:[%s5999_s4 + $0x4c] ss:$16 sps:$4 sm:$0xff]  }
 0x65d   :  { %v4944_v53 = vsel %vm1347_vm14, %v1341_v12, %v4780_v32  ;;  %v3543_v12 = vld [vmem:[%s5999_s4 + $0x40] ss:$16 sps:$4 sm:$0xff]  }
 0x65e   :  { %v1350_v27 = vpack.c.bf16 %v4944_v53, %v4944_v53 }
 0x660   :  { %1384 = vmatmul.mubr.bf16.vlgmr.msra.gmra.mrb[40].mxu0 %v1350_v27  ;;  %1425 = vmatmul.mubr.bf16.vlgmr.msra.gmra.mrb[40].mxu1 %v1350_v27  ;;  %v3546_v27 = vld [vmem:[%s5999_s4 + $0x48] ss:$16 sps:$4 sm:$0xff]  }
 0x661   :  { %1471 = vmatpush1.bf16.msra.mxu0 %v4683_v41  ;;  %1512 = vmatpush1.bf16.msra.mxu1 %v4689_v2  ;;  %v3533_v41 = vld [vmem:[%s5999_s4 + $0x4] ss:$16 sps:$4 sm:$0xff]   ;;  %v3536_v2 = vld [vmem:[%s5999_s4 + $0xc] ss:$16 sps:$4 sm:$0xff]  }
 0x662   :  { %1472 = vmatprep.subr.bf16.mxu0 %v4695_v42  ;;  %1513 = vmatprep.subr.bf16.mxu1 %v4701_v43 }
 0x663   :  { %1502 = vmatprep.mubr.bf16.mxu0 %v6057_v13  ;;  %1543 = vmatprep.mubr.bf16.mxu1 %v6057_v13 }
 0x665   :  { %1473 = vmatpush1.bf16.msra.mxu0 %v4709_v23  ;;  %1514 = vmatpush1.bf16.msra.mxu1 %v4715_v44  ;;  %v6077_v23 = vld [vmem:[#allocation19_spill] sm:$0xff] }
 0x666   :  { %1474 = vmatprep.subr.bf16.mxu0 %v4721_v54  ;;  %1515 = vmatprep.subr.bf16.mxu1 %v4727_v14  ;;  %v6078_v54 = vld [vmem:[#allocation20_spill] sm:$0xff] }
 0x669   :  { %1475 = vmatpush1.bf16.msra.mxu0 %v4797_v31  ;;  %1516 = vmatpush1.bf16.msra.mxu1 %v4803_v28  ;;  %v6079_v28 = vld [vmem:[#allocation21_spill] sm:$0xff] }
 0x66a   :  { %1476 = vmatprep.subr.bf16.mxu0 %v4809_v36  ;;  %1517 = vmatprep.subr.bf16.mxu1 %v4815_v37  ;;  %v6080_v37 = vld [vmem:[#allocation22_spill] sm:$0xff] }
 0x66d   :  { %1477 = vmatpush1.bf16.msra.mxu0 %v4821_v38  ;;  %1518 = vmatpush1.bf16.msra.mxu1 %v4827_v40 }
 0x66e   :  { %1478 = vmatprep.subr.bf16.mxu0 %v4833_v47  ;;  %1519 = vmatprep.subr.bf16.mxu1 %v4839_v48 }
 0x671   :  { %1479 = vmatpush1.bf16.msra.mxu0 %v4845_v49  ;;  %1520 = vmatpush1.bf16.msra.mxu1 %v4851_v50 }
 0x672   :  { %1480 = vmatprep.subr.bf16.mxu0 %v4857_v51  ;;  %1521 = vmatprep.subr.bf16.mxu1 %v4863_v52 }
 0x675   :  { %1481 = vmatpush1.bf16.msra.mxu0 %v4869_v55  ;;  %1522 = vmatpush1.bf16.msra.mxu1 %v4875_v56 }
 0x676   :  { %1482 = vmatprep.subr.bf16.mxu0 %v4881_v58  ;;  %1523 = vmatprep.subr.bf16.mxu1 %v4887_v59 }
 0x679   :  { %1483 = vmatpush1.bf16.msra.mxu0 %v4893_v60  ;;  %1524 = vmatpush1.bf16.msra.mxu1 %v4899_v61 }
 0x67a   :  { %1484 = vmatprep.subr.bf16.mxu0 %v4905_v63  ;;  %1525 = vmatprep.subr.bf16.mxu1 %v4911_v0 }
 0x67d   :  { %1485 = vmatpush1.bf16.msra.mxu0 %v4917_v3  ;;  %1526 = vmatpush1.bf16.msra.mxu1 %v4923_v4 }
 0x67e   :  { %1840 = vmatprep.subr.bf16.mxu0 %v3533_v41  ;;  %1913 = vmatprep.subr.bf16.mxu1 %v3536_v2  ;;  %v3551_v41 = vld [vmem:[%s5999_s4 + $0x64] ss:$16 sps:$4 sm:$0xff]   ;;  %v3554_v2 = vld [vmem:[%s5999_s4 + $0x6c] ss:$16 sps:$4 sm:$0xff]  }
 0x733   :  { %v1385_v42 = vpop.f32.mrb[40].mxu0  ;;  %v1426_v43 = vpop.f32.mrb[40].mxu1 }
 0x734   :  { %v1433_v44 = vadd.f32 %v1385_v42, %v6077_v23  ;;  %v1435_v14 = vadd.f32 %v1426_v43, %v6078_v54  ;;  %v1387_v26 = vpop.f32.mrb[41].mxu0  ;;  %v1428_v31 = vpop.f32.mrb[41].mxu1  ;;  %v3549_v42 = vld [vmem:[%s5999_s4 + $0x60] ss:$16 sps:$4 sm:$0xff]   ;;  %v3552_v43 = vld [vmem:[%s5999_s4 + $0x68] ss:$16 sps:$4 sm:$0xff]  }
 0x735   :  { %v1434_v36 = vadd.f32 %v1387_v26, %v6079_v28  ;;  %v1436_v38 = vadd.f32 %v1428_v31, %v6080_v37  ;;  %v1389_v40 = vpop.f32.mrb[42].mxu0  ;;  %v1430_v47 = vpop.f32.mrb[42].mxu1  ;;  %v3557_v23 = vld [vmem:[%s5999_s4 + $0x84] ss:$16 sps:$4 sm:$0xff]   ;;  %v3555_v54 = vld [vmem:[%s5999_s4 + $0x80] ss:$16 sps:$4 sm:$0xff]  }
 0x736   :  { %v3273_v48 = vmul.f32 -1.442695, %v1433_v44  ;;  %v1390_v49 = vpop.f32.mrb[43].mxu0  ;;  %v1431_v50 = vpop.f32.mrb[43].mxu1  ;;  %v3560_v44 = vld [vmem:[%s5999_s4 + $0x8c] ss:$16 sps:$4 sm:$0xff]  }
 0x737   :  { %v3274_v51 = vmul.f32 -1.442695, %v1434_v36  ;;  %v3275_v52 = vmul.f32 -1.442695, %v1436_v38  ;;  %v3563_v26 = vld [vmem:[%s5999_s4 + $0xa4] ss:$16 sps:$4 sm:$0xff]  }
 0x738   :  { %3731 = vpow2.f32 %v3273_v48  ;;  %v3566_v31 = vld [vmem:[%s5999_s4 + $0xac] ss:$16 sps:$4 sm:$0xff]   ;;  %v3561_v28 = vld [vmem:[%s5999_s4 + $0xa0] ss:$16 sps:$4 sm:$0xff]   ;;  %v3564_v36 = vld [vmem:[%s5999_s4 + $0xa8] ss:$16 sps:$4 sm:$0xff]  }
 0x739   :  { %3733 = vpow2.f32 %v3274_v51  ;;  %v3569_v37 = vld [vmem:[%s5999_s4 + $0xc4] ss:$16 sps:$4 sm:$0xff]   ;;  %v3572_v38 = vld [vmem:[%s5999_s4 + $0xcc] ss:$16 sps:$4 sm:$0xff]   ;;  %v3567_v40 = vld [vmem:[%s5999_s4 + $0xc0] ss:$16 sps:$4 sm:$0xff]  }
 0x73a   :  { %3735 = vpow2.f32 %v3275_v52  ;;  %v3570_v47 = vld [vmem:[%s5999_s4 + $0xc8] ss:$16 sps:$4 sm:$0xff]   ;;  %v3575_v48 = vld [vmem:[%s5999_s4 + $0xe4] ss:$16 sps:$4 sm:$0xff]   ;;  %v3578_v49 = vld [vmem:[%s5999_s4 + $0xec] ss:$16 sps:$4 sm:$0xff]   ;;  %v3384_v52 = vpack.c.bf16 %v4568_v25, %v4491_v57  ;;  %v1592_v57 = vpack.c.bf16 %v4944_v53, %v4780_v32 }
 0x73b   :  { %3737 = vtanh.f32 %v1435_v14  ;;  %v3558_v14 = vld [vmem:[%s5999_s4 + $0x88] ss:$16 sps:$4 sm:$0xff]   ;;  %v3573_v50 = vld [vmem:[%s5999_s4 + $0xe0] ss:$16 sps:$4 sm:$0xff]   ;;  %v5115_v25 = vld [vmem:[%s6000_s5 + $0x4] ss:$16 sps:$4 sm:$0xff]  }
 0x73c   :  { %v3576_v51 = vld [vmem:[%s5999_s4 + $0xe8] ss:$16 sps:$4 sm:$0xff]  }
 0x73d   :  { %v5131_v32 = vld [vmem:[%s6000_s5 + $0x8] ss:$16 sps:$4 sm:$0xff]  }
 0x742   :  { %v3732_v55 = vpop.eup %3731 }
 0x743   :  { %v3734_v56 = vpop.eup %3733  ;;  %v1440_v58 = vadd.f32 1.0, %v3732_v55  ;;  %v1591_v55 = vpack.c.bf16 %v4676_v39, %v4622_v35  ;;  %v5120_v35 = vld [vmem:[%s6000_s5 + $0xc] ss:$16 sps:$4 sm:$0xff]   ;;  %v5126_v39 = vld [vmem:[%s6000_s5] ss:$16 sps:$4 sm:$0xff]  }
 0x744   :  { %v1446_v59 = vadd.f32 1.0, %v3734_v56  ;;  %v3736_v60 = vpop.eup %3735  ;;  %v5144_v56 = vld [vmem:[%s6000_s5 + $0x2c] ss:$16 sps:$4 sm:$0xff]  }
 0x745   :  { %3739 = vrcp.f32 %v1440_v58  ;;  %v3738_v61 = vpop.eup %3737  ;;  %v1453_v4 = vadd.f32 1.0, %v3736_v60  ;;  %v5149_v58 = vld [vmem:[%s6000_s5 + $0x20] ss:$16 sps:$4 sm:$0xff]   ;;  %v5163_v60 = vld [vmem:[%s6000_s5 + $0x44] ss:$16 sps:$4 sm:$0xff]  }
 0x746   :  { %3741 = vrcp.f32 %v1446_v59  ;;  %v5154_v59 = vld [vmem:[%s6000_s5 + $0x28] ss:$16 sps:$4 sm:$0xff]  }
 0x747   :  { %3743 = vrcp.f32 %v1453_v4  ;;  %v5190_v4 = vld [vmem:[%s6000_s5 + $0x6c] ss:$16 sps:$4 sm:$0xff]  }
 0x74f   :  { %v3740_v63 = vpop.eup %3739 }
 0x750   :  { %v3742_v0 = vpop.eup %3741  ;;  %v1457_v3 = vmul.f32 %v3740_v63, %v3738_v61  ;;  %v5168_v61 = vld [vmem:[%s6000_s5 + $0x4c] ss:$16 sps:$4 sm:$0xff]   ;;  %v5173_v63 = vld [vmem:[%s6000_s5 + $0x40] ss:$16 sps:$4 sm:$0xff]  }
 0x751   :  { %v1456_v46 = vmul.f32 %v3742_v0, %v4939_v20  ;;  %v3744_v5 = vpop.eup %3743  ;;  %v5178_v0 = vld [vmem:[%s6000_s5 + $0x48] ss:$16 sps:$4 sm:$0xff]  }
 0x753   :  { %v1458_v17 = vadd.f32 %v1457_v3, %v1456_v46  ;;  %v5185_v3 = vld [vmem:[%s6000_s5 + $0x64] ss:$16 sps:$4 sm:$0xff]   ;;  %v5199_v46 = vld [vmem:[%s6000_s5 + $0x60] ss:$16 sps:$4 sm:$0xff]  }
 0x755   :  { %3745 = vtanh.f32 %v1458_v17  ;;  %v4997_v15 = vsel %vm1466_vm15, %v1458_v17, %v4939_v20  ;;  %v3540_v20 = vld [vmem:[%s5999_s4 + $0x28] ss:$16 sps:$4 sm:$0xff]  }
 0x756   :  { %v5204_v17 = vld [vmem:[%s6000_s5 + $0x68] ss:$16 sps:$4 sm:$0xff]  }
 0x75f   :  { %v3746_v6 = vpop.eup %3745 }
 0x760   :  { %v1460_v7 = vmul.f32 %v3746_v6, %v3744_v5  ;;  %v5211_v5 = vld [vmem:[%s6000_s5 + $0x84] ss:$16 sps:$4 sm:$0xff]   ;;  %v5216_v6 = vld [vmem:[%s6000_s5 + $0x8c] ss:$16 sps:$4 sm:$0xff]  }
 0x762   :  { %v5008_v22 = vsel %vm1466_vm15, %v1460_v7, %v4944_v53  ;;  %v5139_v53 = vld [vmem:[%s6000_s5 + $0x24] ss:$16 sps:$4 sm:$0xff]   ;;  %v5221_v7 = vld [vmem:[%s6000_s5 + $0x80] ss:$16 sps:$4 sm:$0xff]  }
 0x763   :  { %v1469_v24 = vpack.c.bf16 %v5008_v22, %v5008_v22 }
 0x765   :  { %1503 = vmatmul.mubr.bf16.vlgmr.msra.gmra.mrb[44].mxu0 %v1469_v24  ;;  %1544 = vmatmul.mubr.bf16.vlgmr.msra.gmra.mrb[44].mxu1 %v1469_v24  ;;  %v5238_v24 = vld [vmem:[%s6000_s5 + $0xac] ss:$16 sps:$4 sm:$0xff]  }
 0x766   :  { %1841 = vmatpush1.bf16.msra.mxu0 %v3531_v10  ;;  %1914 = vmatpush1.bf16.msra.mxu1 %v3534_v19  ;;  %v5226_v10 = vld [vmem:[%s6000_s5 + $0x88] ss:$16 sps:$4 sm:$0xff]   ;;  %v5233_v19 = vld [vmem:[%s6000_s5 + $0xa4] ss:$16 sps:$4 sm:$0xff]  }
 0x767   :  { %1842 = vmatprep.subr.bf16.mxu0 %v3539_v8  ;;  %1915 = vmatprep.subr.bf16.mxu1 %v3542_v34  ;;  %v5247_v8 = vld [vmem:[%s6000_s5 + $0xa0] ss:$16 sps:$4 sm:$0xff]   ;;  %v5252_v34 = vld [vmem:[%s6000_s5 + $0xa8] ss:$16 sps:$4 sm:$0xff]  }
 0x768   :  { %1872 = vmatprep.mubr.bf16.mxu0 %v6057_v13  ;;  %1945 = vmatprep.mubr.bf16.mxu1 %v6057_v13 }
 0x76a   :  { %1843 = vmatpush1.bf16.msra.mxu0 %v3537_v9  ;;  %1916 = vmatpush1.bf16.msra.mxu1 %v3540_v20  ;;  %v5259_v9 = vld [vmem:[%s6000_s5 + $0xc4] ss:$16 sps:$4 sm:$0xff]   ;;  %v5264_v20 = vld [vmem:[%s6000_s5 + $0xcc] ss:$16 sps:$4 sm:$0xff]  }
 0x76b   :  { %1844 = vmatprep.subr.bf16.mxu0 %v3545_v62  ;;  %1917 = vmatprep.subr.bf16.mxu1 %v3548_v16  ;;  %v5269_v62 = vld [vmem:[%s6000_s5 + $0xc0] ss:$16 sps:$4 sm:$0xff]   ;;  %v5274_v16 = vld [vmem:[%s6000_s5 + $0xc8] ss:$16 sps:$4 sm:$0xff]  }
 0x76e   :  { %1845 = vmatpush1.bf16.msra.mxu0 %v3543_v12  ;;  %1918 = vmatpush1.bf16.msra.mxu1 %v3546_v27  ;;  %v5281_v12 = vld [vmem:[%s6000_s5 + $0xe4] ss:$16 sps:$4 sm:$0xff]   ;;  %v5286_v27 = vld [vmem:[%s6000_s5 + $0xec] ss:$16 sps:$4 sm:$0xff]  }
 0x76f   :  { %1846 = vmatprep.subr.bf16.mxu0 %v3551_v41  ;;  %1919 = vmatprep.subr.bf16.mxu1 %v3554_v2  ;;  %v5293_v41 = vld [vmem:[%s6000_s5 + $0xe0] ss:$16 sps:$4 sm:$0xff]   ;;  %v5298_v2 = vld [vmem:[%s6000_s5 + $0xe8] ss:$16 sps:$4 sm:$0xff]  }
 0x772   :  { %1847 = vmatpush1.bf16.msra.mxu0 %v3549_v42  ;;  %1920 = vmatpush1.bf16.msra.mxu1 %v3552_v43 }
 0x773   :  { %1848 = vmatprep.subr.bf16.mxu0 %v3557_v23  ;;  %1921 = vmatprep.subr.bf16.mxu1 %v3560_v44  ;;  %v6082_v23 = vld [vmem:[#allocation23_spill] sm:$0xff] }
 0x776   :  { %1849 = vmatpush1.bf16.msra.mxu0 %v3555_v54  ;;  %1922 = vmatpush1.bf16.msra.mxu1 %v3558_v14  ;;  %v6083_v54 = vld [vmem:[#allocation24_spill] sm:$0xff] }
 0x777   :  { %1850 = vmatprep.subr.bf16.mxu0 %v3563_v26  ;;  %1923 = vmatprep.subr.bf16.mxu1 %v3566_v31 }
 0x77a   :  { %1851 = vmatpush1.bf16.msra.mxu0 %v3561_v28  ;;  %1924 = vmatpush1.bf16.msra.mxu1 %v3564_v36  ;;  %v6084_v28 = vld [vmem:[#allocation25_spill] sm:$0xff] }
 0x77b   :  { %1852 = vmatprep.subr.bf16.mxu0 %v3569_v37  ;;  %1925 = vmatprep.subr.bf16.mxu1 %v3572_v38  ;;  %v6085_v37 = vld [vmem:[#allocation26_spill] sm:$0xff] }
 0x77e   :  { %1853 = vmatpush1.bf16.msra.mxu0 %v3567_v40  ;;  %1926 = vmatpush1.bf16.msra.mxu1 %v3570_v47 }
 0x77f   :  { %1854 = vmatprep.subr.bf16.mxu0 %v3575_v48  ;;  %1927 = vmatprep.subr.bf16.mxu1 %v3578_v49 }
 0x782   :  { %1855 = vmatpush1.bf16.msra.mxu0 %v3573_v50  ;;  %1928 = vmatpush1.bf16.msra.mxu1 %v3576_v51 }
 0x783   :  { %2151 = vmatprep.subr.bf16.mxu0 %v5115_v25  ;;  %2192 = vmatprep.subr.bf16.mxu1 %v5120_v35 }
 0x785   :  { %3385 = vmatmul.mubr.msk.bf16.vlgmr.msra.gmra.mrb[48].mxu0 %vm3383_vm1, %v3384_v52  ;;  %3388 = vmatmul.mubr.msk.bf16.vlgmr.msra.gmra.mrb[48].mxu1 %vm3383_vm1, %v3384_v52 }
 0x786   :  { %1882 = vmatprep.mubr.bf16.mxu0 %v6057_v13  ;;  %1955 = vmatprep.mubr.bf16.mxu1 %v6057_v13 }
 0x787   :  { %2152 = vmatpush1.bf16.msra.mxu0 %v5126_v39  ;;  %2193 = vmatpush1.bf16.msra.mxu1 %v5131_v32 }
 0x788   :  { %2153 = vmatprep.subr.bf16.mxu0 %v5139_v53  ;;  %2194 = vmatprep.subr.bf16.mxu1 %v5144_v56 }
 0x78b   :  { %2154 = vmatpush1.bf16.msra.mxu0 %v5149_v58  ;;  %2195 = vmatpush1.bf16.msra.mxu1 %v5154_v59 }
 0x78c   :  { %2155 = vmatprep.subr.bf16.mxu0 %v5163_v60  ;;  %2196 = vmatprep.subr.bf16.mxu1 %v5168_v61 }
 0x78d   :  { %1883 = vmatmul.mubr.bf16.gmra.mrb[52].mxu0 %v1591_v55  ;;  %1956 = vmatmul.mubr.bf16.gmra.mrb[52].mxu1 %v1591_v55 }
 0x78e   :  { %1892 = vmatprep.mubr.bf16.mxu0 %v6057_v13  ;;  %1965 = vmatprep.mubr.bf16.mxu1 %v6057_v13 }
 0x78f   :  { %2156 = vmatpush1.bf16.msra.mxu0 %v5173_v63  ;;  %2197 = vmatpush1.bf16.msra.mxu1 %v5178_v0 }
 0x790   :  { %2157 = vmatprep.subr.bf16.mxu0 %v5185_v3  ;;  %2198 = vmatprep.subr.bf16.mxu1 %v5190_v4 }
 0x793   :  { %2158 = vmatpush1.bf16.msra.mxu0 %v5199_v46  ;;  %2199 = vmatpush1.bf16.msra.mxu1 %v5204_v17 }
 0x794   :  { %2159 = vmatprep.subr.bf16.mxu0 %v5211_v5  ;;  %2200 = vmatprep.subr.bf16.mxu1 %v5216_v6 }
 0x795   :  { %1893 = vmatmul.mubr.bf16.gmra.mrb[56].mxu0 %v1592_v57  ;;  %1966 = vmatmul.mubr.bf16.gmra.mrb[56].mxu1 %v1592_v57 }
 0x796   :  { %1902 = vmatprep.mubr.bf16.mxu0 %v6057_v13  ;;  %1975 = vmatprep.mubr.bf16.mxu1 %v6057_v13 }
 0x797   :  { %2160 = vmatpush1.bf16.msra.mxu0 %v5221_v7  ;;  %2201 = vmatpush1.bf16.msra.mxu1 %v5226_v10 }
 0x798   :  { %2161 = vmatprep.subr.bf16.mxu0 %v5233_v19  ;;  %2202 = vmatprep.subr.bf16.mxu1 %v5238_v24 }
 0x79b   :  { %2162 = vmatpush1.bf16.msra.mxu0 %v5247_v8  ;;  %2203 = vmatpush1.bf16.msra.mxu1 %v5252_v34 }
 0x79c   :  { %2163 = vmatprep.subr.bf16.mxu0 %v5259_v9  ;;  %2204 = vmatprep.subr.bf16.mxu1 %v5264_v20 }
 0x79f   :  { %2164 = vmatpush1.bf16.msra.mxu0 %v5269_v62  ;;  %2205 = vmatpush1.bf16.msra.mxu1 %v5274_v16 }
 0x7a0   :  { %2165 = vmatprep.subr.bf16.mxu0 %v5281_v12  ;;  %2206 = vmatprep.subr.bf16.mxu1 %v5286_v27 }
 0x7a3   :  { %2166 = vmatpush1.bf16.msra.mxu0 %v5293_v41  ;;  %2207 = vmatpush1.bf16.msra.mxu1 %v5298_v2 }
 0x7a4   :  { %2264 = vmatprep.subr.bf16.mxu0 %v5115_v25  ;;  %2305 = vmatprep.subr.bf16.mxu1 %v5120_v35 }
 0x838   :  { %v1504_v42 = vpop.f32.mrb[44].mxu0  ;;  %v1545_v43 = vpop.f32.mrb[44].mxu1 }
 0x839   :  { %v1552_v44 = vadd.f32 %v1504_v42, %v6082_v23  ;;  %v1554_v14 = vadd.f32 %v1545_v43, %v6083_v54  ;;  %v1506_v26 = vpop.f32.mrb[45].mxu0  ;;  %v1547_v31 = vpop.f32.mrb[45].mxu1 }
 0x83a   :  { %v1553_v36 = vadd.f32 %v1506_v26, %v6084_v28  ;;  %v1555_v38 = vadd.f32 %v1547_v31, %v6085_v37  ;;  %v1508_v40 = vpop.f32.mrb[46].mxu0  ;;  %v1549_v47 = vpop.f32.mrb[46].mxu1 }
 0x83b   :  { %v3276_v48 = vmul.f32 -1.442695, %v1552_v44  ;;  %v1509_v49 = vpop.f32.mrb[47].mxu0  ;;  %v1550_v50 = vpop.f32.mrb[47].mxu1 }
 0x83c   :  { %v3277_v51 = vmul.f32 -1.442695, %v1553_v36  ;;  %v3278_v52 = vmul.f32 -1.442695, %v1555_v38 }
 0x83d   :  { %3747 = vpow2.f32 %v3276_v48 }
 0x83e   :  { %3749 = vpow2.f32 %v3277_v51 }
 0x83f   :  { %3751 = vpow2.f32 %v3278_v52 }
 0x840   :  { %3753 = vtanh.f32 %v1554_v14 }
 0x847   :  { %v3748_v55 = vpop.eup %3747 }
 0x848   :  { %v3750_v57 = vpop.eup %3749  ;;  %v1559_v42 = vadd.f32 1.0, %v3748_v55 }
 0x849   :  { %v1565_v43 = vadd.f32 1.0, %v3750_v57  ;;  %v3752_v23 = vpop.eup %3751 }
 0x84a   :  { %3755 = vrcp.f32 %v1559_v42  ;;  %v3754_v54 = vpop.eup %3753  ;;  %v1572_v44 = vadd.f32 1.0, %v3752_v23 }
 0x84b   :  { %3757 = vrcp.f32 %v1565_v43 }
 0x84c   :  { %3759 = vrcp.f32 %v1572_v44 }
 0x854   :  { %v3756_v26 = vpop.eup %3755 }
 0x855   :  { %v3758_v31 = vpop.eup %3757  ;;  %v1576_v28 = vmul.f32 %v3756_v26, %v3754_v54 }
 0x856   :  { %v1575_v37 = vmul.f32 %v3758_v31, %v4997_v15  ;;  %v5327_v15 = vpop.permute.xlu1 %1583  ;;  %v3760_v54 = vpop.eup %3759 }
 0x857   :  { %6086 = vst [vmem:[#allocation10_spill] sm:$0xff] %v5327_v15  ;;  %vm1585_vm2 = vcmp.eq.s32.totalorder %v5327_v15, 1 }
 0x858   :  { %v1577_v36 = vadd.f32 %v1576_v28, %v1575_v37  ;;  %v5311_v40 = vpop.f32.mrb[48].mxu0  ;;  %v5313_v38 = vpop.f32.mrb[48].mxu1 }
 0x859   :  { %v5315_v47 = vpop.f32.mrb[49].mxu0  ;;  %v5317_v14 = vpop.f32.mrb[49].mxu1 }
 0x85a   :  { %3761 = vtanh.f32 %v1577_v36  ;;  %v5319_v48 = vpop.f32.mrb[50].mxu0  ;;  %v5321_v49 = vpop.f32.mrb[50].mxu1 }
 0x85b   :  { %v5323_v50 = vpop.f32.mrb[51].mxu0  ;;  %v5325_v51 = vpop.f32.mrb[51].mxu1 }
 0x860   :  { %v5329_v52 = vpop.f32.mrb[52].mxu0  ;;  %v5331_v55 = vpop.f32.mrb[52].mxu1 }
 0x861   :  { %6087 = vst [vmem:[#allocation11_spill] sm:$0xff] %v5329_v52  ;;  %6088 = vst [vmem:[#allocation12_spill] sm:$0xff] %v5331_v55  ;;  %v5333_v57 = vpop.f32.mrb[53].mxu0  ;;  %v5335_v42 = vpop.f32.mrb[53].mxu1 }
 0x862   :  { %6089 = vst [vmem:[#allocation13_spill] sm:$0xff] %v5333_v57  ;;  %6090 = vst [vmem:[#allocation14_spill] sm:$0xff] %v5335_v42  ;;  %v5337_v43 = vpop.f32.mrb[54].mxu0  ;;  %v5339_v23 = vpop.f32.mrb[54].mxu1 }
 0x863   :  { %6091 = vst [vmem:[#allocation15_spill] sm:$0xff] %v5337_v43  ;;  %6092 = vst [vmem:[#allocation16_spill] sm:$0xff] %v5339_v23  ;;  %v5341_v26 = vpop.f32.mrb[55].mxu0  ;;  %v5343_v31 = vpop.f32.mrb[55].mxu1 }
 0x864   :  { %6093 = vst [vmem:[#allocation17_spill] sm:$0xff] %v5341_v26  ;;  %6094 = vst [vmem:[#allocation18_spill] sm:$0xff] %v5343_v31  ;;  %v3762_v28 = vpop.eup %3761 }
 0x865   :  { %v1579_v44 = vmul.f32 %v3762_v28, %v3760_v54 }
 0x867   :  { %v1586_v37 = vsel %vm1585_vm2, %v1579_v44, %v5008_v22  ;;  %v6103_v44 = vmov 0.0|0.0  }
 0x868   :  { %v5349_v36 = vpop.f32.mrb[56].mxu0  ;;  %v5351_v45 = vpop.f32.mrb[56].mxu1  ;;  %v1593_v33 = vpack.c.bf16 %v1586_v37, %v5008_v22 }
 0x869   :  { %6095 = vst [vmem:[#allocation19_spill] sm:$0xff] %v5349_v36  ;;  %6096 = vst [vmem:[#allocation20_spill] sm:$0xff] %v5351_v45  ;;  %v5354_v18 = vpop.f32.mrb[57].mxu0  ;;  %v5356_v29 = vpop.f32.mrb[57].mxu1 }
 0x86a   :  { %6097 = vst [vmem:[#allocation21_spill] sm:$0xff] %v5354_v18  ;;  %6098 = vst [vmem:[#allocation22_spill] sm:$0xff] %v5356_v29  ;;  %v5358_v26 = vpop.f32.mrb[58].mxu0  ;;  %v5360_v31 = vpop.f32.mrb[58].mxu1  ;;  %1903 = vmatmul.mubr.bf16.gmra.mrb[60].mxu0 %v1593_v33  ;;  %1976 = vmatmul.mubr.bf16.gmra.mrb[60].mxu1 %v1593_v33  ;;  %v1658_v33 = vld [vmem:[%s6001_s6] sm:$0xf] }
 0x86b   :  { %6099 = vst [vmem:[#allocation23_spill] sm:$0xff] %v5358_v26  ;;  %6100 = vst [vmem:[#allocation24_spill] sm:$0xff] %v5360_v31  ;;  %v5362_v54 = vpop.f32.mrb[59].mxu0  ;;  %v5364_v28 = vpop.f32.mrb[59].mxu1  ;;  %2183 = vmatprep.mubr.bf16.mxu0 %v6057_v13  ;;  %2224 = vmatprep.mubr.bf16.mxu1 %v6057_v13  ;;  %v6110_v31 = vld [vmem:[#allocation4_spill] sm:$0xff] }
 0x86c   :  { %6101 = vst [vmem:[#allocation25_spill] sm:$0xff] %v5362_v54  ;;  %6102 = vst [vmem:[#allocation26_spill] sm:$0xff] %v5364_v28  ;;  %v6111_v26 = vsub.s32 0, %v6110_v31  ;;  %v6112_v18 = vsub.s32 2, %v6110_v31 }
 0x86e   :  { %v5421_v29 = vrot.slane %v1658_v33, %v6111_v26  ;;  %v5425_v45 = vrot.slane %v1658_v33, %v6112_v18 }
 0x870   :  { %v1875_v26 = vadd.f32 %v5311_v40, %v5421_v29  ;;  %v1879_v11 = vadd.f32 %v5319_v48, %v5421_v29 }
 0x872   :  { %2184 = vmatmul.mubr.bf16.vlgmr.msra.gmra.mrb[64].mxu0 %v6103_v44  ;;  %2225 = vmatmul.mubr.bf16.vlgmr.msra.gmra.mrb[64].mxu1 %v6103_v44 }
 0x873   :  { %2265 = vmatpush1.bf16.msra.mxu0 %v5126_v39  ;;  %2306 = vmatpush1.bf16.msra.mxu1 %v5131_v32 }
 0x874   :  { %2266 = vmatprep.subr.bf16.mxu0 %v5139_v53  ;;  %2307 = vmatprep.subr.bf16.mxu1 %v5144_v56 }
 0x875   :  { %2296 = vmatprep.mubr.bf16.mxu0 %v6057_v13  ;;  %2337 = vmatprep.mubr.bf16.mxu1 %v6057_v13 }
 0x877   :  { %2267 = vmatpush1.bf16.msra.mxu0 %v5149_v58  ;;  %2308 = vmatpush1.bf16.msra.mxu1 %v5154_v59 }
 0x878   :  { %2268 = vmatprep.subr.bf16.mxu0 %v5163_v60  ;;  %2309 = vmatprep.subr.bf16.mxu1 %v5168_v61 }
 0x87b   :  { %2269 = vmatpush1.bf16.msra.mxu0 %v5173_v63  ;;  %2310 = vmatpush1.bf16.msra.mxu1 %v5178_v0 }
 0x87c   :  { %2270 = vmatprep.subr.bf16.mxu0 %v5185_v3  ;;  %2311 = vmatprep.subr.bf16.mxu1 %v5190_v4 }
 0x87f   :  { %2271 = vmatpush1.bf16.msra.mxu0 %v5199_v46  ;;  %2312 = vmatpush1.bf16.msra.mxu1 %v5204_v17 }
 0x880   :  { %2272 = vmatprep.subr.bf16.mxu0 %v5211_v5  ;;  %2313 = vmatprep.subr.bf16.mxu1 %v5216_v6 }
 0x883   :  { %2273 = vmatpush1.bf16.msra.mxu0 %v5221_v7  ;;  %2314 = vmatpush1.bf16.msra.mxu1 %v5226_v10 }
 0x884   :  { %2274 = vmatprep.subr.bf16.mxu0 %v5233_v19  ;;  %2315 = vmatprep.subr.bf16.mxu1 %v5238_v24 }
 0x887   :  { %2275 = vmatpush1.bf16.msra.mxu0 %v5247_v8  ;;  %2316 = vmatpush1.bf16.msra.mxu1 %v5252_v34 }
 0x888   :  { %2276 = vmatprep.subr.bf16.mxu0 %v5259_v9  ;;  %2317 = vmatprep.subr.bf16.mxu1 %v5264_v20 }
 0x88b   :  { %2277 = vmatpush1.bf16.msra.mxu0 %v5269_v62  ;;  %2318 = vmatpush1.bf16.msra.mxu1 %v5274_v16 }
 0x88c   :  { %2278 = vmatprep.subr.bf16.mxu0 %v5281_v12  ;;  %2319 = vmatprep.subr.bf16.mxu1 %v5286_v27 }
 0x88f   :  { %2279 = vmatpush1.bf16.msra.mxu0 %v5293_v41  ;;  %2320 = vmatpush1.bf16.msra.mxu1 %v5298_v2 }
 0x890   :  { %2377 = vmatprep.subr.bf16.mxu0 %v5115_v25  ;;  %2418 = vmatprep.subr.bf16.mxu1 %v5120_v35 }
 0x93d   :  { %v5407_v22 = vpop.f32.mrb[60].mxu0  ;;  %v5409_v37 = vpop.f32.mrb[60].mxu1 }
 0x93e   :  { %6104 = vst [vmem:[#allocation29_spill] sm:$0xff] %v5407_v22  ;;  %6105 = vst [vmem:[#allocation30_spill] sm:$0xff] %v5409_v37  ;;  %v5411_v44 = vpop.f32.mrb[61].mxu0  ;;  %v5413_v15 = vpop.f32.mrb[61].mxu1 }
 0x93f   :  { %6106 = vst [vmem:[#allocation31_spill] sm:$0xff] %v5411_v44  ;;  %6107 = vst [vmem:[#allocation32_spill] sm:$0xff] %v5413_v15  ;;  %v5415_v28 = vpop.f32.mrb[62].mxu0  ;;  %v5417_v54 = vpop.f32.mrb[62].mxu1  ;;  %v6115_v44 = vsub.s32 1, %v6110_v31 }
 0x940   :  { %6108 = vst [vmem:[#allocation33_spill] sm:$0xff] %v5415_v28  ;;  %6109 = vst [vmem:[#allocation34_spill] sm:$0xff] %v5417_v54  ;;  %v5427_v36 = vpop.f32.mrb[63].mxu0  ;;  %v5429_v22 = vpop.f32.mrb[63].mxu1  ;;  %v6116_v28 = vsub.s32 3, %v6110_v31  ;;  %v1948_v54 = vadd.f32 %v5313_v38, %v5425_v45 }
 0x941   :  { %6113 = vst [vmem:[#allocation4_spill] sm:$0xff] %v5427_v36  ;;  %6114 = vst [vmem:[#allocation35_spill] sm:$0xff] %v5429_v22  ;;  %v5433_v37 = vrot.slane %v1658_v33, %v6115_v44 }
 0x942   :  { %v5437_v15 = vrot.slane %v1658_v33, %v6116_v28 }
 0x943   :  { %v1877_v18 = vadd.f32 %v5315_v47, %v5433_v37 }
 0x944   :  { %v1950_v22 = vadd.f32 %v5317_v14, %v5437_v15 }
 0x945   :  { %v2185_v36 = vpop.f32.mrb[64].mxu0  ;;  %v2226_v23 = vpop.f32.mrb[64].mxu1 }
 0x946   :  { %v2233_v44 = vadd.f32 %v2185_v36, %v1875_v26  ;;  %v2235_v43 = vadd.f32 %v2226_v23, %v1948_v54  ;;  %v2187_v1 = vpop.f32.mrb[65].mxu0  ;;  %v2228_v31 = vpop.f32.mrb[65].mxu1 }
 0x947   :  { %v2234_v28 = vadd.f32 %v2187_v1, %v1877_v18  ;;  %v2236_v33 = vadd.f32 %v2228_v31, %v1950_v22  ;;  %v2189_v42 = vpop.f32.mrb[66].mxu0  ;;  %v2230_v57 = vpop.f32.mrb[66].mxu1  ;;  %v1954_v31 = vadd.f32 %v5325_v51, %v5437_v15 }
 0x948   :  { %v3343_v40 = vmul.f32 -1.442695, %v2233_v44  ;;  %v2190_v55 = vpop.f32.mrb[67].mxu0  ;;  %v2231_v52 = vpop.f32.mrb[67].mxu1  ;;  %v1881_v44 = vadd.f32 %v5323_v50, %v5433_v37 }
 0x949   :  { %v3344_v38 = vmul.f32 -1.442695, %v2234_v28  ;;  %v3345_v47 = vmul.f32 -1.442695, %v2236_v33 }
 0x94a   :  { %3763 = vpow2.f32 %v3343_v40 }
 0x94b   :  { %3765 = vpow2.f32 %v3344_v38 }
 0x94c   :  { %3767 = vpow2.f32 %v3345_v47 }
 0x94d   :  { %3769 = vtanh.f32 %v2235_v43  ;;  %v1952_v43 = vadd.f32 %v5321_v49, %v5425_v45 }
 0x954   :  { %v3764_v21 = vpop.eup %3763 }
 0x955   :  { %v3766_v30 = vpop.eup %3765  ;;  %v2240_v14 = vadd.f32 1.0, %v3764_v21 }
 0x956   :  { %v2246_v36 = vadd.f32 1.0, %v3766_v30  ;;  %v3768_v23 = vpop.eup %3767 }
 0x957   :  { %3771 = vrcp.f32 %v2240_v14  ;;  %v3770_v1 = vpop.eup %3769  ;;  %v2253_v22 = vadd.f32 1.0, %v3768_v23 }
 0x958   :  { %3773 = vrcp.f32 %v2246_v36 }
 0x959   :  { %3775 = vrcp.f32 %v2253_v22 }
 0x961   :  { %v3772_v54 = vpop.eup %3771 }
 0x962   :  { %v3774_v42 = vpop.eup %3773  ;;  %v2257_v57 = vmul.f32 %v3772_v54, %v3770_v1 }
 0x963   :  { %v2256_v55 = vmul.f32 0.0, %v3774_v42  ;;  %v3776_v26 = vpop.eup %3775 }
 0x965   :  { %v5447_v52 = vadd.f32 %v2257_v57, %v2256_v55 }
 0x967   :  { %3777 = vtanh.f32 %v5447_v52 }
 0x971   :  { %v3778_v18 = vpop.eup %3777 }
 0x972   :  { %v5450_v21 = vmul.f32 %v3778_v18, %v3776_v26 }
 0x974   :  { %v3390_v30 = vpack.c.bf16 %v5450_v21, %v5450_v21 }
 0x976   :  { %3391 = vmatmul.mubr.msk.bf16.vlgmr.msra.gmra.mrb[68].mxu0 %vm4497_vm5, %v3390_v30  ;;  %3394 = vmatmul.mubr.msk.bf16.vlgmr.msra.gmra.mrb[68].mxu1 %vm4497_vm5, %v3390_v30 }
 0x977   :  { %2378 = vmatpush1.bf16.msra.mxu0 %v5126_v39  ;;  %2419 = vmatpush1.bf16.msra.mxu1 %v5131_v32 }
 0x978   :  { %2379 = vmatprep.subr.bf16.mxu0 %v5139_v53  ;;  %2420 = vmatprep.subr.bf16.mxu1 %v5144_v56 }
 0x979   :  { %2409 = vmatprep.mubr.bf16.mxu0 %v6057_v13  ;;  %2450 = vmatprep.mubr.bf16.mxu1 %v6057_v13 }
 0x97b   :  { %2380 = vmatpush1.bf16.msra.mxu0 %v5149_v58  ;;  %2421 = vmatpush1.bf16.msra.mxu1 %v5154_v59 }
 0x97c   :  { %2381 = vmatprep.subr.bf16.mxu0 %v5163_v60  ;;  %2422 = vmatprep.subr.bf16.mxu1 %v5168_v61 }
 0x97f   :  { %2382 = vmatpush1.bf16.msra.mxu0 %v5173_v63  ;;  %2423 = vmatpush1.bf16.msra.mxu1 %v5178_v0 }
 0x980   :  { %2383 = vmatprep.subr.bf16.mxu0 %v5185_v3  ;;  %2424 = vmatprep.subr.bf16.mxu1 %v5190_v4 }
 0x983   :  { %2384 = vmatpush1.bf16.msra.mxu0 %v5199_v46  ;;  %2425 = vmatpush1.bf16.msra.mxu1 %v5204_v17 }
 0x984   :  { %2385 = vmatprep.subr.bf16.mxu0 %v5211_v5  ;;  %2426 = vmatprep.subr.bf16.mxu1 %v5216_v6 }
 0x987   :  { %2386 = vmatpush1.bf16.msra.mxu0 %v5221_v7  ;;  %2427 = vmatpush1.bf16.msra.mxu1 %v5226_v10 }
 0x988   :  { %2387 = vmatprep.subr.bf16.mxu0 %v5233_v19  ;;  %2428 = vmatprep.subr.bf16.mxu1 %v5238_v24 }
 0x98b   :  { %2388 = vmatpush1.bf16.msra.mxu0 %v5247_v8  ;;  %2429 = vmatpush1.bf16.msra.mxu1 %v5252_v34 }
 0x98c   :  { %2389 = vmatprep.subr.bf16.mxu0 %v5259_v9  ;;  %2430 = vmatprep.subr.bf16.mxu1 %v5264_v20 }
 0x98f   :  { %2390 = vmatpush1.bf16.msra.mxu0 %v5269_v62  ;;  %2431 = vmatpush1.bf16.msra.mxu1 %v5274_v16 }
 0x990   :  { %2391 = vmatprep.subr.bf16.mxu0 %v5281_v12  ;;  %2432 = vmatprep.subr.bf16.mxu1 %v5286_v27 }
 0x993   :  { %2392 = vmatpush1.bf16.msra.mxu0 %v5293_v41  ;;  %2433 = vmatpush1.bf16.msra.mxu1 %v5298_v2 }
 0x994   :  { %2490 = vmatprep.subr.bf16.mxu0 %v5115_v25  ;;  %2531 = vmatprep.subr.bf16.mxu1 %v5120_v35 }
 0xa49   :  { %v2298_v28 = vpop.f32.mrb[68].mxu0  ;;  %v2339_v33 = vpop.f32.mrb[68].mxu1 }
 0xa4a   :  { %v2346_v40 = vadd.f32 %v2298_v28, %v1879_v11  ;;  %v2348_v38 = vadd.f32 %v2339_v33, %v1952_v43  ;;  %v2300_v47 = vpop.f32.mrb[69].mxu0  ;;  %v2341_v14 = vpop.f32.mrb[69].mxu1 }
 0xa4b   :  { %v2347_v36 = vadd.f32 %v2300_v47, %v1881_v44  ;;  %v2349_v23 = vadd.f32 %v2341_v14, %v1954_v31  ;;  %v2302_v1 = vpop.f32.mrb[70].mxu0  ;;  %v2343_v54 = vpop.f32.mrb[70].mxu1  ;;  %v2262_v31 = vsel %vm752_vm4, %v5447_v52, 0.0 }
 0xa4c   :  { %v3346_v48 = vmul.f32 -1.442695, %v2346_v40  ;;  %v2303_v42 = vpop.f32.mrb[71].mxu0  ;;  %v2344_v57 = vpop.f32.mrb[71].mxu1  ;;  %v2261_v54 = vsel %vm752_vm4, %v5450_v21, 0.0  ;;  %v6119_v21 = vld [vmem:[#allocation11_spill] sm:$0xff] }
 0xa4d   :  { %v3347_v49 = vmul.f32 -1.442695, %v2347_v36  ;;  %v3348_v50 = vmul.f32 -1.442695, %v2349_v23  ;;  %v1885_v42 = vadd.f32 %v6119_v21, %v5421_v29  ;;  %v6120_v57 = vld [vmem:[#allocation12_spill] sm:$0xff] }
 0xa4e   :  { %3779 = vpow2.f32 %v3346_v48 }
 0xa4f   :  { %3781 = vpow2.f32 %v3347_v49  ;;  %v1958_v49 = vadd.f32 %v6120_v57, %v5425_v45 }
 0xa50   :  { %3783 = vpow2.f32 %v3348_v50  ;;  %v6121_v50 = vld [vmem:[#allocation13_spill] sm:$0xff] }
 0xa51   :  { %3785 = vtanh.f32 %v2348_v38 }
 0xa58   :  { %v3780_v22 = vpop.eup %3779 }
 0xa59   :  { %v3782_v55 = vpop.eup %3781  ;;  %v2353_v51 = vadd.f32 1.0, %v3780_v22  ;;  %v1887_v22 = vadd.f32 %v6121_v50, %v5433_v37 }
 0xa5a   :  { %v2359_v26 = vadd.f32 1.0, %v3782_v55  ;;  %v3784_v18 = vpop.eup %3783  ;;  %v6122_v55 = vld [vmem:[#allocation14_spill] sm:$0xff] }
 0xa5b   :  { %3787 = vrcp.f32 %v2353_v51  ;;  %v3786_v30 = vpop.eup %3785  ;;  %v2366_v33 = vadd.f32 1.0, %v3784_v18  ;;  %v1960_v51 = vadd.f32 %v6122_v55, %v5437_v15 }
 0xa5c   :  { %3789 = vrcp.f32 %v2359_v26 }
 0xa5d   :  { %3791 = vrcp.f32 %v2366_v33 }
 0xa65   :  { %v3788_v11 = vpop.eup %3787 }
 0xa66   :  { %v3790_v43 = vpop.eup %3789  ;;  %v2370_v28 = vmul.f32 %v3788_v11, %v3786_v30 }
 0xa67   :  { %v2369_v40 = vmul.f32 %v3790_v43, %v2262_v31  ;;  %v3792_v36 = vpop.eup %3791 }
 0xa69   :  { %v2371_v47 = vadd.f32 %v2370_v28, %v2369_v40 }
 0xa6b   :  { %3793 = vtanh.f32 %v2371_v47  ;;  %v5505_v38 = vsel %vm871_vm10, %v2371_v47, %v2262_v31 }
 0xa75   :  { %v3794_v23 = vpop.eup %3793 }
 0xa76   :  { %v2373_v1 = vmul.f32 %v3794_v23, %v3792_v36 }
 0xa78   :  { %v5512_v52 = vsel %vm871_vm10, %v2373_v1, %v2261_v54 }
 0xa79   :  { %v2376_v48 = vpack.c.bf16 %v5512_v52, %v5512_v52 }
 0xa7b   :  { %2410 = vmatmul.mubr.bf16.vlgmr.msra.gmra.mrb[72].mxu0 %v2376_v48  ;;  %2451 = vmatmul.mubr.bf16.vlgmr.msra.gmra.mrb[72].mxu1 %v2376_v48 }
 0xa7c   :  { %2491 = vmatpush1.bf16.msra.mxu0 %v5126_v39  ;;  %2532 = vmatpush1.bf16.msra.mxu1 %v5131_v32 }
 0xa7d   :  { %2492 = vmatprep.subr.bf16.mxu0 %v5139_v53  ;;  %2533 = vmatprep.subr.bf16.mxu1 %v5144_v56 }
 0xa7e   :  { %2522 = vmatprep.mubr.bf16.mxu0 %v6057_v13  ;;  %2563 = vmatprep.mubr.bf16.mxu1 %v6057_v13 }
 0xa80   :  { %2493 = vmatpush1.bf16.msra.mxu0 %v5149_v58  ;;  %2534 = vmatpush1.bf16.msra.mxu1 %v5154_v59 }
 0xa81   :  { %2494 = vmatprep.subr.bf16.mxu0 %v5163_v60  ;;  %2535 = vmatprep.subr.bf16.mxu1 %v5168_v61 }
 0xa84   :  { %2495 = vmatpush1.bf16.msra.mxu0 %v5173_v63  ;;  %2536 = vmatpush1.bf16.msra.mxu1 %v5178_v0 }
 0xa85   :  { %2496 = vmatprep.subr.bf16.mxu0 %v5185_v3  ;;  %2537 = vmatprep.subr.bf16.mxu1 %v5190_v4 }
 0xa88   :  { %2497 = vmatpush1.bf16.msra.mxu0 %v5199_v46  ;;  %2538 = vmatpush1.bf16.msra.mxu1 %v5204_v17 }
 0xa89   :  { %2498 = vmatprep.subr.bf16.mxu0 %v5211_v5  ;;  %2539 = vmatprep.subr.bf16.mxu1 %v5216_v6 }
 0xa8c   :  { %2499 = vmatpush1.bf16.msra.mxu0 %v5221_v7  ;;  %2540 = vmatpush1.bf16.msra.mxu1 %v5226_v10 }
 0xa8d   :  { %2500 = vmatprep.subr.bf16.mxu0 %v5233_v19  ;;  %2541 = vmatprep.subr.bf16.mxu1 %v5238_v24 }
 0xa90   :  { %2501 = vmatpush1.bf16.msra.mxu0 %v5247_v8  ;;  %2542 = vmatpush1.bf16.msra.mxu1 %v5252_v34 }
 0xa91   :  { %2502 = vmatprep.subr.bf16.mxu0 %v5259_v9  ;;  %2543 = vmatprep.subr.bf16.mxu1 %v5264_v20 }
 0xa94   :  { %2503 = vmatpush1.bf16.msra.mxu0 %v5269_v62  ;;  %2544 = vmatpush1.bf16.msra.mxu1 %v5274_v16 }
 0xa95   :  { %2504 = vmatprep.subr.bf16.mxu0 %v5281_v12  ;;  %2545 = vmatprep.subr.bf16.mxu1 %v5286_v27 }
 0xa98   :  { %2505 = vmatpush1.bf16.msra.mxu0 %v5293_v41  ;;  %2546 = vmatpush1.bf16.msra.mxu1 %v5298_v2 }
 0xa99   :  { %2603 = vmatprep.subr.bf16.mxu0 %v5115_v25  ;;  %2644 = vmatprep.subr.bf16.mxu1 %v5120_v35 }
 0xb4e   :  { %v2411_v26 = vpop.f32.mrb[72].mxu0  ;;  %v2452_v18 = vpop.f32.mrb[72].mxu1 }
 0xb4f   :  { %v2459_v30 = vadd.f32 %v2411_v26, %v1885_v42  ;;  %v2461_v11 = vadd.f32 %v2452_v18, %v1958_v49  ;;  %v2413_v43 = vpop.f32.mrb[73].mxu0  ;;  %v2454_v44 = vpop.f32.mrb[73].mxu1 }
 0xb50   :  { %v2460_v31 = vadd.f32 %v2413_v43, %v1887_v22  ;;  %v2462_v28 = vadd.f32 %v2454_v44, %v1960_v51  ;;  %v2415_v33 = vpop.f32.mrb[74].mxu0  ;;  %v2456_v40 = vpop.f32.mrb[74].mxu1 }
 0xb51   :  { %v3349_v47 = vmul.f32 -1.442695, %v2459_v30  ;;  %v2416_v14 = vpop.f32.mrb[75].mxu0  ;;  %v2457_v36 = vpop.f32.mrb[75].mxu1  ;;  %v6125_v40 = vld [vmem:[#allocation16_spill] sm:$0xff] }
 0xb52   :  { %v3350_v23 = vmul.f32 -1.442695, %v2460_v31  ;;  %v3351_v1 = vmul.f32 -1.442695, %v2462_v28  ;;  %v6126_v14 = vld [vmem:[#allocation17_spill] sm:$0xff] }
 0xb53   :  { %3795 = vpow2.f32 %v3349_v47  ;;  %v1962_v47 = vadd.f32 %v6125_v40, %v5425_v45  ;;  %v1891_v36 = vadd.f32 %v6126_v14, %v5433_v37 }
 0xb54   :  { %3797 = vpow2.f32 %v3350_v23  ;;  %v6127_v23 = vld [vmem:[#allocation18_spill] sm:$0xff] }
 0xb55   :  { %3799 = vpow2.f32 %v3351_v1  ;;  %v1964_v1 = vadd.f32 %v6127_v23, %v5437_v15 }
 0xb56   :  { %3801 = vtanh.f32 %v2461_v11 }
 0xb5d   :  { %v3796_v54 = vpop.eup %3795 }
 0xb5e   :  { %v3798_v48 = vpop.eup %3797  ;;  %v2466_v21 = vadd.f32 1.0, %v3796_v54 }
 0xb5f   :  { %v2472_v42 = vadd.f32 1.0, %v3798_v48  ;;  %v3800_v57 = vpop.eup %3799 }
 0xb60   :  { %3803 = vrcp.f32 %v2466_v21  ;;  %v3802_v49 = vpop.eup %3801  ;;  %v2479_v51 = vadd.f32 1.0, %v3800_v57 }
 0xb61   :  { %3805 = vrcp.f32 %v2472_v42 }
 0xb62   :  { %3807 = vrcp.f32 %v2479_v51 }
 0xb6a   :  { %v3804_v50 = vpop.eup %3803 }
 0xb6b   :  { %v3806_v22 = vpop.eup %3805  ;;  %v2483_v55 = vmul.f32 %v3804_v50, %v3802_v49 }
 0xb6c   :  { %v2482_v26 = vmul.f32 %v3806_v22, %v5505_v38  ;;  %v3808_v11 = vpop.eup %3807 }
 0xb6e   :  { %v2484_v18 = vadd.f32 %v2483_v55, %v2482_v26 }
 0xb70   :  { %3809 = vtanh.f32 %v2484_v18  ;;  %v5562_v43 = vsel %vm990_vm11, %v2484_v18, %v5505_v38  ;;  %v6124_v38 = vld [vmem:[#allocation15_spill] sm:$0xff] }
 0xb7a   :  { %v3810_v44 = vpop.eup %3809 }
 0xb7b   :  { %v2486_v31 = vmul.f32 %v3810_v44, %v3808_v11 }
 0xb7d   :  { %v5567_v28 = vsel %vm990_vm11, %v2486_v31, %v5512_v52  ;;  %v1889_v52 = vadd.f32 %v6124_v38, %v5421_v29 }
 0xb7e   :  { %v2489_v33 = vpack.c.bf16 %v5567_v28, %v5567_v28 }
 0xb80   :  { %2523 = vmatmul.mubr.bf16.vlgmr.msra.gmra.mrb[76].mxu0 %v2489_v33  ;;  %2564 = vmatmul.mubr.bf16.vlgmr.msra.gmra.mrb[76].mxu1 %v2489_v33 }
 0xb81   :  { %2604 = vmatpush1.bf16.msra.mxu0 %v5126_v39  ;;  %2645 = vmatpush1.bf16.msra.mxu1 %v5131_v32 }
 0xb82   :  { %2605 = vmatprep.subr.bf16.mxu0 %v5139_v53  ;;  %2646 = vmatprep.subr.bf16.mxu1 %v5144_v56 }
 0xb83   :  { %2635 = vmatprep.mubr.bf16.mxu0 %v6057_v13  ;;  %2676 = vmatprep.mubr.bf16.mxu1 %v6057_v13 }
 0xb85   :  { %2606 = vmatpush1.bf16.msra.mxu0 %v5149_v58  ;;  %2647 = vmatpush1.bf16.msra.mxu1 %v5154_v59 }
 0xb86   :  { %2607 = vmatprep.subr.bf16.mxu0 %v5163_v60  ;;  %2648 = vmatprep.subr.bf16.mxu1 %v5168_v61 }
 0xb89   :  { %2608 = vmatpush1.bf16.msra.mxu0 %v5173_v63  ;;  %2649 = vmatpush1.bf16.msra.mxu1 %v5178_v0 }
 0xb8a   :  { %2609 = vmatprep.subr.bf16.mxu0 %v5185_v3  ;;  %2650 = vmatprep.subr.bf16.mxu1 %v5190_v4 }
 0xb8d   :  { %2610 = vmatpush1.bf16.msra.mxu0 %v5199_v46  ;;  %2651 = vmatpush1.bf16.msra.mxu1 %v5204_v17 }
 0xb8e   :  { %2611 = vmatprep.subr.bf16.mxu0 %v5211_v5  ;;  %2652 = vmatprep.subr.bf16.mxu1 %v5216_v6 }
 0xb91   :  { %2612 = vmatpush1.bf16.msra.mxu0 %v5221_v7  ;;  %2653 = vmatpush1.bf16.msra.mxu1 %v5226_v10 }
 0xb92   :  { %2613 = vmatprep.subr.bf16.mxu0 %v5233_v19  ;;  %2654 = vmatprep.subr.bf16.mxu1 %v5238_v24 }
 0xb95   :  { %2614 = vmatpush1.bf16.msra.mxu0 %v5247_v8  ;;  %2655 = vmatpush1.bf16.msra.mxu1 %v5252_v34 }
 0xb96   :  { %2615 = vmatprep.subr.bf16.mxu0 %v5259_v9  ;;  %2656 = vmatprep.subr.bf16.mxu1 %v5264_v20 }
 0xb99   :  { %2616 = vmatpush1.bf16.msra.mxu0 %v5269_v62  ;;  %2657 = vmatpush1.bf16.msra.mxu1 %v5274_v16 }
 0xb9a   :  { %2617 = vmatprep.subr.bf16.mxu0 %v5281_v12  ;;  %2658 = vmatprep.subr.bf16.mxu1 %v5286_v27 }
 0xb9d   :  { %2618 = vmatpush1.bf16.msra.mxu0 %v5293_v41  ;;  %2659 = vmatpush1.bf16.msra.mxu1 %v5298_v2 }
 0xb9e   :  { %2716 = vmatprep.subr.bf16.mxu0 %v5115_v25  ;;  %2757 = vmatprep.subr.bf16.mxu1 %v5120_v35 }
 0xc53   :  { %v2524_v54 = vpop.f32.mrb[76].mxu0  ;;  %v2565_v48 = vpop.f32.mrb[76].mxu1 }
 0xc54   :  { %v2572_v21 = vadd.f32 %v2524_v54, %v1889_v52  ;;  %v2574_v42 = vadd.f32 %v2565_v48, %v1962_v47  ;;  %v2526_v57 = vpop.f32.mrb[77].mxu0  ;;  %v2567_v25 = vpop.f32.mrb[77].mxu1  ;;  %v5744_v54 = vld [vmem:[%s6000_s5 + $0x40] ss:$16 sps:$4 sm:$0xff]  }
 0xc55   :  { %v2573_v49 = vadd.f32 %v2526_v57, %v1891_v36  ;;  %v2575_v35 = vadd.f32 %v2567_v25, %v1964_v1  ;;  %v2528_v50 = vpop.f32.mrb[78].mxu0  ;;  %v2569_v22 = vpop.f32.mrb[78].mxu1 }
 0xc56   :  { %v3352_v55 = vmul.f32 -1.442695, %v2572_v21  ;;  %v2529_v51 = vpop.f32.mrb[79].mxu0  ;;  %v2570_v26 = vpop.f32.mrb[79].mxu1 }
 0xc57   :  { %v3353_v18 = vmul.f32 -1.442695, %v2573_v49  ;;  %v3354_v30 = vmul.f32 -1.442695, %v2575_v35 }
 0xc58   :  { %3811 = vpow2.f32 %v3352_v55 }
 0xc59   :  { %3813 = vpow2.f32 %v3353_v18 }
 0xc5a   :  { %3815 = vpow2.f32 %v3354_v30 }
 0xc5b   :  { %3817 = vtanh.f32 %v2574_v42 }
 0xc62   :  { %v3812_v11 = vpop.eup %3811 }
 0xc63   :  { %v3814_v44 = vpop.eup %3813  ;;  %v2579_v31 = vadd.f32 1.0, %v3812_v11 }
 0xc64   :  { %v2585_v33 = vadd.f32 1.0, %v3814_v44  ;;  %v3816_v38 = vpop.eup %3815 }
 0xc65   :  { %3819 = vrcp.f32 %v2579_v31  ;;  %v3818_v52 = vpop.eup %3817  ;;  %v2592_v36 = vadd.f32 1.0, %v3816_v38  ;;  %v5694_v38 = vld [vmem:[%s6000_s5] ss:$16 sps:$4 sm:$0xff]  }
 0xc66   :  { %3821 = vrcp.f32 %v2585_v33 }
 0xc67   :  { %3823 = vrcp.f32 %v2592_v36  ;;  %v5726_v36 = vld [vmem:[%s6000_s5 + $0x28] ss:$16 sps:$4 sm:$0xff]  }
 0xc6f   :  { %v3820_v40 = vpop.eup %3819 }
 0xc70   :  { %v3822_v47 = vpop.eup %3821  ;;  %v2596_v14 = vmul.f32 %v3820_v40, %v3818_v52  ;;  %v5700_v52 = vld [vmem:[%s6000_s5 + $0x8] ss:$16 sps:$4 sm:$0xff]   ;;  %v5706_v40 = vld [vmem:[%s6000_s5 + $0x24] ss:$16 sps:$4 sm:$0xff]  }
 0xc71   :  { %v2595_v23 = vmul.f32 %v3822_v47, %v5562_v43  ;;  %v3824_v21 = vpop.eup %3823  ;;  %v5712_v47 = vld [vmem:[%s6000_s5 + $0x2c] ss:$16 sps:$4 sm:$0xff]  }
 0xc73   :  { %v2597_v1 = vadd.f32 %v2596_v14, %v2595_v23  ;;  %v5720_v14 = vld [vmem:[%s6000_s5 + $0x20] ss:$16 sps:$4 sm:$0xff]   ;;  %v5732_v23 = vld [vmem:[%s6000_s5 + $0x44] ss:$16 sps:$4 sm:$0xff]  }
 0xc75   :  { %3825 = vtanh.f32 %v2597_v1  ;;  %v5617_v48 = vsel %vm1109_vm12, %v2597_v1, %v5562_v43  ;;  %v5738_v1 = vld [vmem:[%s6000_s5 + $0x4c] ss:$16 sps:$4 sm:$0xff]  }
 0xc7f   :  { %v3826_v42 = vpop.eup %3825 }
 0xc80   :  { %v2599_v57 = vmul.f32 %v3826_v42, %v3824_v21  ;;  %v5756_v21 = vld [vmem:[%s6000_s5 + $0x64] ss:$16 sps:$4 sm:$0xff]   ;;  %v5762_v42 = vld [vmem:[%s6000_s5 + $0x6c] ss:$16 sps:$4 sm:$0xff]  }
 0xc82   :  { %v5622_v25 = vsel %vm1109_vm12, %v2599_v57, %v5567_v28  ;;  %v5768_v57 = vld [vmem:[%s6000_s5 + $0x60] ss:$16 sps:$4 sm:$0xff]  }
 0xc83   :  { %v2602_v49 = vpack.c.bf16 %v5622_v25, %v5622_v25 }
 0xc85   :  { %2636 = vmatmul.mubr.bf16.vlgmr.msra.gmra.mrb[80].mxu0 %v2602_v49  ;;  %2677 = vmatmul.mubr.bf16.vlgmr.msra.gmra.mrb[80].mxu1 %v2602_v49  ;;  %v5780_v49 = vld [vmem:[%s6000_s5 + $0x84] ss:$16 sps:$4 sm:$0xff]  }
 0xc86   :  { %2717 = vmatpush1.bf16.msra.mxu0 %v5126_v39  ;;  %2758 = vmatpush1.bf16.msra.mxu1 %v5131_v32  ;;  %v5661_v39 = vld [vmem:[%s6000_s5 + $0x4] ss:$16 sps:$4 sm:$0xff]   ;;  %v5667_v32 = vld [vmem:[%s6000_s5 + $0xc] ss:$16 sps:$4 sm:$0xff]  }
 0xc87   :  { %2718 = vmatprep.subr.bf16.mxu0 %v5139_v53  ;;  %2759 = vmatprep.subr.bf16.mxu1 %v5144_v56  ;;  %v6129_v53 = vld [vmem:[#allocation19_spill] sm:$0xff] }
 0xc88   :  { %2748 = vmatprep.mubr.bf16.mxu0 %v6057_v13  ;;  %2789 = vmatprep.mubr.bf16.mxu1 %v6057_v13  ;;  %v1895_v56 = vadd.f32 %v6129_v53, %v5421_v29  ;;  %v5786_v53 = vld [vmem:[%s6000_s5 + $0x8c] ss:$16 sps:$4 sm:$0xff]  }
 0xc8a   :  { %2719 = vmatpush1.bf16.msra.mxu0 %v5149_v58  ;;  %2760 = vmatpush1.bf16.msra.mxu1 %v5154_v59  ;;  %v6130_v58 = vld [vmem:[#allocation20_spill] sm:$0xff] }
 0xc8b   :  { %2720 = vmatprep.subr.bf16.mxu0 %v5163_v60  ;;  %2761 = vmatprep.subr.bf16.mxu1 %v5168_v61  ;;  %v1968_v59 = vadd.f32 %v6130_v58, %v5425_v45  ;;  %v6131_v60 = vld [vmem:[#allocation21_spill] sm:$0xff] }
 0xc8c   :  { %v1897_v61 = vadd.f32 %v6131_v60, %v5433_v37  ;;  %v5798_v58 = vld [vmem:[%s6000_s5 + $0x88] ss:$16 sps:$4 sm:$0xff]   ;;  %v5810_v60 = vld [vmem:[%s6000_s5 + $0xac] ss:$16 sps:$4 sm:$0xff]  }
 0xc8e   :  { %2721 = vmatpush1.bf16.msra.mxu0 %v5173_v63  ;;  %2762 = vmatpush1.bf16.msra.mxu1 %v5178_v0  ;;  %v6132_v63 = vld [vmem:[#allocation22_spill] sm:$0xff] }
 0xc8f   :  { %2722 = vmatprep.subr.bf16.mxu0 %v5185_v3  ;;  %2763 = vmatprep.subr.bf16.mxu1 %v5190_v4  ;;  %v1970_v0 = vadd.f32 %v6132_v63, %v5437_v15  ;;  %v5822_v63 = vld [vmem:[%s6000_s5 + $0xa8] ss:$16 sps:$4 sm:$0xff]  }
 0xc92   :  { %2723 = vmatpush1.bf16.msra.mxu0 %v5199_v46  ;;  %2764 = vmatpush1.bf16.msra.mxu1 %v5204_v17 }
 0xc93   :  { %2724 = vmatprep.subr.bf16.mxu0 %v5211_v5  ;;  %2765 = vmatprep.subr.bf16.mxu1 %v5216_v6 }
 0xc96   :  { %2725 = vmatpush1.bf16.msra.mxu0 %v5221_v7  ;;  %2766 = vmatpush1.bf16.msra.mxu1 %v5226_v10 }
 0xc97   :  { %2726 = vmatprep.subr.bf16.mxu0 %v5233_v19  ;;  %2767 = vmatprep.subr.bf16.mxu1 %v5238_v24 }
 0xc9a   :  { %2727 = vmatpush1.bf16.msra.mxu0 %v5247_v8  ;;  %2768 = vmatpush1.bf16.msra.mxu1 %v5252_v34 }
 0xc9b   :  { %2728 = vmatprep.subr.bf16.mxu0 %v5259_v9  ;;  %2769 = vmatprep.subr.bf16.mxu1 %v5264_v20 }
 0xc9e   :  { %2729 = vmatpush1.bf16.msra.mxu0 %v5269_v62  ;;  %2770 = vmatpush1.bf16.msra.mxu1 %v5274_v16 }
 0xc9f   :  { %2730 = vmatprep.subr.bf16.mxu0 %v5281_v12  ;;  %2771 = vmatprep.subr.bf16.mxu1 %v5286_v27 }
 0xca2   :  { %2731 = vmatpush1.bf16.msra.mxu0 %v5293_v41  ;;  %2772 = vmatpush1.bf16.msra.mxu1 %v5298_v2 }
 0xca3   :  { %2829 = vmatprep.subr.bf16.mxu0 %v5661_v39  ;;  %2870 = vmatprep.subr.bf16.mxu1 %v5667_v32 }
 0xd58   :  { %v2637_v3 = vpop.f32.mrb[80].mxu0  ;;  %v2678_v4 = vpop.f32.mrb[80].mxu1 }
 0xd59   :  { %v2685_v46 = vadd.f32 %v2637_v3, %v1895_v56  ;;  %v2687_v17 = vadd.f32 %v2678_v4, %v1968_v59  ;;  %v2639_v5 = vpop.f32.mrb[81].mxu0  ;;  %v2680_v6 = vpop.f32.mrb[81].mxu1  ;;  %v5792_v56 = vld [vmem:[%s6000_s5 + $0x80] ss:$16 sps:$4 sm:$0xff]   ;;  %v5804_v59 = vld [vmem:[%s6000_s5 + $0xa4] ss:$16 sps:$4 sm:$0xff]  }
 0xd5a   :  { %v2686_v7 = vadd.f32 %v2639_v5, %v1897_v61  ;;  %v2688_v10 = vadd.f32 %v2680_v6, %v1970_v0  ;;  %v2641_v19 = vpop.f32.mrb[82].mxu0  ;;  %v2682_v24 = vpop.f32.mrb[82].mxu1  ;;  %v5816_v61 = vld [vmem:[%s6000_s5 + $0xa0] ss:$16 sps:$4 sm:$0xff]   ;;  %v5828_v0 = vld [vmem:[%s6000_s5 + $0xc4] ss:$16 sps:$4 sm:$0xff]  }
 0xd5b   :  { %v3355_v8 = vmul.f32 -1.442695, %v2685_v46  ;;  %v2642_v34 = vpop.f32.mrb[83].mxu0  ;;  %v2683_v9 = vpop.f32.mrb[83].mxu1  ;;  %v5834_v3 = vld [vmem:[%s6000_s5 + $0xcc] ss:$16 sps:$4 sm:$0xff]  }
 0xd5c   :  { %v3356_v20 = vmul.f32 -1.442695, %v2686_v7  ;;  %v3357_v62 = vmul.f32 -1.442695, %v2688_v10  ;;  %v5840_v4 = vld [vmem:[%s6000_s5 + $0xc0] ss:$16 sps:$4 sm:$0xff]  }
 0xd5d   :  { %3827 = vpow2.f32 %v3355_v8  ;;  %v5846_v46 = vld [vmem:[%s6000_s5 + $0xc8] ss:$16 sps:$4 sm:$0xff]   ;;  %v5858_v5 = vld [vmem:[%s6000_s5 + $0xec] ss:$16 sps:$4 sm:$0xff]   ;;  %v5864_v6 = vld [vmem:[%s6000_s5 + $0xe0] ss:$16 sps:$4 sm:$0xff]  }
 0xd5e   :  { %3829 = vpow2.f32 %v3356_v20  ;;  %v5870_v7 = vld [vmem:[%s6000_s5 + $0xe8] ss:$16 sps:$4 sm:$0xff]   ;;  %v6135_v24 = vld [vmem:[#allocation24_spill] sm:$0xff]  ;;  %v6137_v20 = vld [vmem:[#allocation26_spill] sm:$0xff] }
 0xd5f   :  { %3831 = vpow2.f32 %v3357_v62  ;;  %v6134_v10 = vld [vmem:[#allocation23_spill] sm:$0xff]  ;;  %v1972_v8 = vadd.f32 %v6135_v24, %v5425_v45  ;;  %v6136_v34 = vld [vmem:[#allocation25_spill] sm:$0xff]  ;;  %v1974_v62 = vadd.f32 %v6137_v20, %v5437_v15 }
 0xd60   :  { %3833 = vtanh.f32 %v2687_v17  ;;  %v5852_v17 = vld [vmem:[%s6000_s5 + $0xe4] ss:$16 sps:$4 sm:$0xff]   ;;  %v1899_v19 = vadd.f32 %v6134_v10, %v5421_v29  ;;  %v1901_v9 = vadd.f32 %v6136_v34, %v5433_v37 }
 0xd67   :  { %v3828_v16 = vpop.eup %3827 }
 0xd68   :  { %v3830_v12 = vpop.eup %3829  ;;  %v2692_v27 = vadd.f32 1.0, %v3828_v16 }
 0xd69   :  { %v2698_v41 = vadd.f32 1.0, %v3830_v12  ;;  %v3832_v2 = vpop.eup %3831 }
 0xd6a   :  { %3835 = vrcp.f32 %v2692_v27  ;;  %v3834_v43 = vpop.eup %3833  ;;  %v2705_v22 = vadd.f32 1.0, %v3832_v2 }
 0xd6b   :  { %3837 = vrcp.f32 %v2698_v41 }
 0xd6c   :  { %3839 = vrcp.f32 %v2705_v22 }
 0xd74   :  { %v3836_v28 = vpop.eup %3835 }
 0xd75   :  { %v3838_v35 = vpop.eup %3837  ;;  %v2709_v50 = vmul.f32 %v3836_v28, %v3834_v43 }
 0xd76   :  { %v2708_v55 = vmul.f32 %v3838_v35, %v5617_v48  ;;  %v3840_v30 = vpop.eup %3839 }
 0xd78   :  { %v2710_v51 = vadd.f32 %v2709_v50, %v2708_v55 }
 0xd7a   :  { %3841 = vtanh.f32 %v2710_v51  ;;  %v5682_v18 = vsel %vm1228_vm13, %v2710_v51, %v5617_v48  ;;  %v5750_v48 = vld [vmem:[%s6000_s5 + $0x48] ss:$16 sps:$4 sm:$0xff]  }
 0xd84   :  { %v3842_v11 = vpop.eup %3841 }
 0xd85   :  { %v2712_v44 = vmul.f32 %v3842_v11, %v3840_v30 }
 0xd87   :  { %v5687_v31 = vsel %vm1228_vm13, %v2712_v44, %v5622_v25  ;;  %v5774_v25 = vld [vmem:[%s6000_s5 + $0x68] ss:$16 sps:$4 sm:$0xff]  }
 0xd88   :  { %v2715_v33 = vpack.c.bf16 %v5687_v31, %v5687_v31 }
 0xd8a   :  { %2749 = vmatmul.mubr.bf16.vlgmr.msra.gmra.mrb[84].mxu0 %v2715_v33  ;;  %2790 = vmatmul.mubr.bf16.vlgmr.msra.gmra.mrb[84].mxu1 %v2715_v33 }
 0xd8b   :  { %2830 = vmatpush1.bf16.msra.mxu0 %v5694_v38  ;;  %2871 = vmatpush1.bf16.msra.mxu1 %v5700_v52 }
 0xd8c   :  { %2831 = vmatprep.subr.bf16.mxu0 %v5706_v40  ;;  %2872 = vmatprep.subr.bf16.mxu1 %v5712_v47 }
 0xd8d   :  { %2861 = vmatprep.mubr.bf16.mxu0 %v6057_v13  ;;  %2902 = vmatprep.mubr.bf16.mxu1 %v6057_v13 }
 0xd8f   :  { %2832 = vmatpush1.bf16.msra.mxu0 %v5720_v14  ;;  %2873 = vmatpush1.bf16.msra.mxu1 %v5726_v36 }
 0xd90   :  { %2833 = vmatprep.subr.bf16.mxu0 %v5732_v23  ;;  %2874 = vmatprep.subr.bf16.mxu1 %v5738_v1 }
 0xd93   :  { %2834 = vmatpush1.bf16.msra.mxu0 %v5744_v54  ;;  %2875 = vmatpush1.bf16.msra.mxu1 %v5750_v48 }
 0xd94   :  { %2835 = vmatprep.subr.bf16.mxu0 %v5756_v21  ;;  %2876 = vmatprep.subr.bf16.mxu1 %v5762_v42 }
 0xd97   :  { %2836 = vmatpush1.bf16.msra.mxu0 %v5768_v57  ;;  %2877 = vmatpush1.bf16.msra.mxu1 %v5774_v25 }
 0xd98   :  { %2837 = vmatprep.subr.bf16.mxu0 %v5780_v49  ;;  %2878 = vmatprep.subr.bf16.mxu1 %v5786_v53 }
 0xd9b   :  { %2838 = vmatpush1.bf16.msra.mxu0 %v5792_v56  ;;  %2879 = vmatpush1.bf16.msra.mxu1 %v5798_v58 }
 0xd9c   :  { %2839 = vmatprep.subr.bf16.mxu0 %v5804_v59  ;;  %2880 = vmatprep.subr.bf16.mxu1 %v5810_v60 }
 0xd9f   :  { %2840 = vmatpush1.bf16.msra.mxu0 %v5816_v61  ;;  %2881 = vmatpush1.bf16.msra.mxu1 %v5822_v63 }
 0xda0   :  { %2841 = vmatprep.subr.bf16.mxu0 %v5828_v0  ;;  %2882 = vmatprep.subr.bf16.mxu1 %v5834_v3 }
 0xda3   :  { %2842 = vmatpush1.bf16.msra.mxu0 %v5840_v4  ;;  %2883 = vmatpush1.bf16.msra.mxu1 %v5846_v46 }
 0xda4   :  { %2843 = vmatprep.subr.bf16.mxu0 %v5852_v17  ;;  %2884 = vmatprep.subr.bf16.mxu1 %v5858_v5 }
 0xda7   :  { %2844 = vmatpush1.bf16.msra.mxu0 %v5864_v6  ;;  %2885 = vmatpush1.bf16.msra.mxu1 %v5870_v7 }
 0xda8   :  { %2942 = vmatprep.subr.bf16.mxu0 %v5661_v39  ;;  %2983 = vmatprep.subr.bf16.mxu1 %v5667_v32 }
 0xe5d   :  { %v2750_v16 = vpop.f32.mrb[84].mxu0  ;;  %v2791_v12 = vpop.f32.mrb[84].mxu1 }
 0xe5e   :  { %v2798_v27 = vadd.f32 %v2750_v16, %v1899_v19  ;;  %v2800_v41 = vadd.f32 %v2791_v12, %v1972_v8  ;;  %v2752_v2 = vpop.f32.mrb[85].mxu0  ;;  %v2793_v39 = vpop.f32.mrb[85].mxu1  ;;  %v6145_v16 = vld [vmem:[#allocation34_spill] sm:$0xff] }
 0xe5f   :  { %v2799_v43 = vadd.f32 %v2752_v2, %v1901_v9  ;;  %v2801_v32 = vadd.f32 %v2793_v39, %v1974_v62  ;;  %v2754_v28 = vpop.f32.mrb[86].mxu0  ;;  %v2795_v35 = vpop.f32.mrb[86].mxu1 }
 0xe60   :  { %v3358_v50 = vmul.f32 -1.442695, %v2798_v27  ;;  %v2755_v22 = vpop.f32.mrb[87].mxu0  ;;  %v2796_v55 = vpop.f32.mrb[87].mxu1 }
 0xe61   :  { %v3359_v51 = vmul.f32 -1.442695, %v2799_v43  ;;  %v3360_v26 = vmul.f32 -1.442695, %v2801_v32 }
 0xe62   :  { %3843 = vpow2.f32 %v3358_v50 }
 0xe63   :  { %3845 = vpow2.f32 %v3359_v51 }
 0xe64   :  { %3847 = vpow2.f32 %v3360_v26 }
 0xe65   :  { %3849 = vtanh.f32 %v2800_v41 }
 0xe6c   :  { %v3844_v30 = vpop.eup %3843 }
 0xe6d   :  { %v3846_v11 = vpop.eup %3845  ;;  %v2805_v44 = vadd.f32 1.0, %v3844_v30 }
 0xe6e   :  { %v2811_v33 = vadd.f32 1.0, %v3846_v11  ;;  %v3848_v10 = vpop.eup %3847  ;;  %v3627_v11 = vld [vmem:[%s6002_s8] sm:$0xff]  }
 0xe6f   :  { %3851 = vrcp.f32 %v2805_v44  ;;  %v3850_v19 = vpop.eup %3849  ;;  %v2818_v9 = vadd.f32 1.0, %v3848_v10  ;;  %v3962_v44 = vmov 0.0   ;;  %v3629_v10 = vld [vmem:[%s6002_s8 + $0x10] sm:$0xff]  }
 0xe70   :  { %3853 = vrcp.f32 %v2811_v33  ;;  %v3628_v33 = vld [vmem:[%s6002_s8 + $0x8] sm:$0xff]  }
 0xe71   :  { %3855 = vrcp.f32 %v2818_v9  ;;  %v3634_v9 = vld [vmem:[%s6002_s8 + $0x38] sm:$0xff]  }
 0xe79   :  { %v3852_v24 = vpop.eup %3851 }
 0xe7a   :  { %v3854_v8 = vpop.eup %3853  ;;  %v2822_v34 = vmul.f32 %v3852_v24, %v3850_v19  ;;  %v3630_v19 = vld [vmem:[%s6002_s8 + $0x18] sm:$0xff]   ;;  %v3631_v24 = vld [vmem:[%s6002_s8 + $0x20] sm:$0xff]  }
 0xe7b   :  { %v2821_v20 = vmul.f32 %v3854_v8, %v5682_v18  ;;  %v3856_v27 = vpop.eup %3855  ;;  %v3632_v8 = vld [vmem:[%s6002_s8 + $0x28] sm:$0xff]  }
 0xe7d   :  { %v2823_v62 = vadd.f32 %v2822_v34, %v2821_v20  ;;  %v3633_v34 = vld [vmem:[%s6002_s8 + $0x30] sm:$0xff]   ;;  %v6144_v20 = vld [vmem:[#allocation33_spill] sm:$0xff] }
 0xe7f   :  { %3857 = vtanh.f32 %v2823_v62  ;;  %v5887_v12 = vsel %vm1347_vm14, %v2823_v62, %v5682_v18  ;;  %v1909_v62 = vadd.f32 %v6144_v20, %v5421_v29 }
 0xe89   :  { %v3858_v41 = vpop.eup %3857 }
 0xe8a   :  { %v2825_v2 = vmul.f32 %v3858_v41, %v3856_v27  ;;  %v6146_v27 = vld [vmem:[#allocation4_spill] sm:$0xff] }
 0xe8b   :  { %v1911_v41 = vadd.f32 %v6146_v27, %v5433_v37 }
 0xe8c   :  { %v5892_v39 = vsel %vm1347_vm14, %v2825_v2, %v5687_v31  ;;  %v6140_v31 = vld [vmem:[#allocation30_spill] sm:$0xff]  ;;  %v6147_v2 = vld [vmem:[#allocation35_spill] sm:$0xff] }
 0xe8d   :  { %v2828_v43 = vpack.c.bf16 %v5892_v39, %v5892_v39 }
 0xe8f   :  { %2862 = vmatmul.mubr.bf16.vlgmr.msra.gmra.mrb[88].mxu0 %v2828_v43  ;;  %2903 = vmatmul.mubr.bf16.vlgmr.msra.gmra.mrb[88].mxu1 %v2828_v43 }
 0xe90   :  { %2943 = vmatpush1.bf16.msra.mxu0 %v5694_v38  ;;  %2984 = vmatpush1.bf16.msra.mxu1 %v5700_v52  ;;  %v1978_v38 = vadd.f32 %v6140_v31, %v5425_v45  ;;  %v6141_v52 = vld [vmem:[#allocation31_spill] sm:$0xff] }
 0xe91   :  { %2944 = vmatprep.subr.bf16.mxu0 %v5706_v40  ;;  %2985 = vmatprep.subr.bf16.mxu1 %v5712_v47  ;;  %v1907_v40 = vadd.f32 %v6141_v52, %v5433_v37  ;;  %v6142_v47 = vld [vmem:[#allocation32_spill] sm:$0xff] }
 0xe92   :  { %2974 = vmatprep.mubr.bf16.mxu0 %v6057_v13  ;;  %3015 = vmatprep.mubr.bf16.mxu1 %v6057_v13  ;;  %v6139_v13 = vld [vmem:[#allocation29_spill] sm:$0xff] }
 0xe93   :  { %v1905_v18 = vadd.f32 %v6139_v13, %v5421_v29 }
 0xe94   :  { %2945 = vmatpush1.bf16.msra.mxu0 %v5720_v14  ;;  %2986 = vmatpush1.bf16.msra.mxu1 %v5726_v36  ;;  %v1980_v14 = vadd.f32 %v6142_v47, %v5437_v15 }
 0xe95   :  { %2946 = vmatprep.subr.bf16.mxu0 %v5732_v23  ;;  %2987 = vmatprep.subr.bf16.mxu1 %v5738_v1 }
 0xe98   :  { %2947 = vmatpush1.bf16.msra.mxu0 %v5744_v54  ;;  %2988 = vmatpush1.bf16.msra.mxu1 %v5750_v48 }
 0xe99   :  { %2948 = vmatprep.subr.bf16.mxu0 %v5756_v21  ;;  %2989 = vmatprep.subr.bf16.mxu1 %v5762_v42 }
 0xe9c   :  { %2949 = vmatpush1.bf16.msra.mxu0 %v5768_v57  ;;  %2990 = vmatpush1.bf16.msra.mxu1 %v5774_v25 }
 0xe9d   :  { %2950 = vmatprep.subr.bf16.mxu0 %v5780_v49  ;;  %2991 = vmatprep.subr.bf16.mxu1 %v5786_v53 }
 0xea0   :  { %2951 = vmatpush1.bf16.msra.mxu0 %v5792_v56  ;;  %2992 = vmatpush1.bf16.msra.mxu1 %v5798_v58 }
 0xea1   :  { %2952 = vmatprep.subr.bf16.mxu0 %v5804_v59  ;;  %2993 = vmatprep.subr.bf16.mxu1 %v5810_v60 }
 0xea4   :  { %2953 = vmatpush1.bf16.msra.mxu0 %v5816_v61  ;;  %2994 = vmatpush1.bf16.msra.mxu1 %v5822_v63 }
 0xea5   :  { %2954 = vmatprep.subr.bf16.mxu0 %v5828_v0  ;;  %2995 = vmatprep.subr.bf16.mxu1 %v5834_v3 }
 0xea8   :  { %2955 = vmatpush1.bf16.msra.mxu0 %v5840_v4  ;;  %2996 = vmatpush1.bf16.msra.mxu1 %v5846_v46 }
 0xea9   :  { %2956 = vmatprep.subr.bf16.mxu0 %v5852_v17  ;;  %2997 = vmatprep.subr.bf16.mxu1 %v5858_v5 }
 0xeac   :  { %2957 = vmatpush1.bf16.msra.mxu0 %v5864_v6  ;;  %2998 = vmatpush1.bf16.msra.mxu1 %v5870_v7 }
 0xead   :  { %3404 = vmatprep.subr.bf16.mxu0 %v3962_v44 }
 0xf62   :  { %v2863_v36 = vpop.f32.mrb[88].mxu0  ;;  %v2904_v23 = vpop.f32.mrb[88].mxu1 }
 0xf63   :  { %v2911_v1 = vadd.f32 %v2863_v36, %v1905_v18  ;;  %v2913_v54 = vadd.f32 %v2904_v23, %v1978_v38  ;;  %v2865_v48 = vpop.f32.mrb[89].mxu0  ;;  %v2906_v21 = vpop.f32.mrb[89].mxu1 }
 0xf64   :  { %v2912_v42 = vadd.f32 %v2865_v48, %v1907_v40  ;;  %v2914_v57 = vadd.f32 %v2906_v21, %v1980_v14  ;;  %v2867_v25 = vpop.f32.mrb[90].mxu0  ;;  %v2908_v49 = vpop.f32.mrb[90].mxu1 }
 0xf65   :  { %v3361_v53 = vmul.f32 -1.442695, %v2911_v1  ;;  %v2868_v56 = vpop.f32.mrb[91].mxu0  ;;  %v2909_v58 = vpop.f32.mrb[91].mxu1 }
 0xf66   :  { %v3362_v59 = vmul.f32 -1.442695, %v2912_v42  ;;  %v3363_v60 = vmul.f32 -1.442695, %v2914_v57 }
 0xf67   :  { %3859 = vpow2.f32 %v3361_v53 }
 0xf68   :  { %3861 = vpow2.f32 %v3362_v59 }
 0xf69   :  { %3863 = vpow2.f32 %v3363_v60 }
 0xf6a   :  { %3865 = vtanh.f32 %v2913_v54 }
 0xf71   :  { %v3860_v61 = vpop.eup %3859 }
 0xf72   :  { %v3862_v63 = vpop.eup %3861  ;;  %v2918_v0 = vadd.f32 1.0, %v3860_v61 }
 0xf73   :  { %v2924_v3 = vadd.f32 1.0, %v3862_v63  ;;  %v3864_v4 = vpop.eup %3863 }
 0xf74   :  { %3867 = vrcp.f32 %v2918_v0  ;;  %v3866_v46 = vpop.eup %3865  ;;  %v2931_v7 = vadd.f32 1.0, %v3864_v4 }
 0xf75   :  { %3869 = vrcp.f32 %v2924_v3 }
 0xf76   :  { %3871 = vrcp.f32 %v2931_v7 }
 0xf7e   :  { %v3868_v17 = vpop.eup %3867 }
 0xf7f   :  { %v3870_v5 = vpop.eup %3869  ;;  %v2935_v6 = vmul.f32 %v3868_v17, %v3866_v46  ;;  %v3367_v46 = vld [vmem:[%s6004_s9] ss:$0 sm:$0xff] }
 0xf80   :  { %v2934_v32 = vmul.f32 %v3870_v5, %v5887_v12  ;;  %v3872_v22 = vpop.eup %3871 }
 0xf82   :  { %v2936_v28 = vadd.f32 %v2935_v6, %v2934_v32 }
 0xf84   :  { %3873 = vtanh.f32 %v2936_v28  ;;  %v5940_v50 = vsel %vm1466_vm15, %v2936_v28, %v5887_v12  ;;  %v1982_v12 = vadd.f32 %v6145_v16, %v5425_v45 }
 0xf8e   :  { %v3874_v55 = vpop.eup %3873 }
 0xf8f   :  { %v2938_v51 = vmul.f32 %v3874_v55, %v3872_v22 }
 0xf91   :  { %v5945_v26 = vsel %vm1466_vm15, %v2938_v51, %v5892_v39  ;;  %v1984_v39 = vadd.f32 %v6147_v2, %v5437_v15 }
 0xf92   :  { %v2941_v30 = vpack.c.bf16 %v5945_v26, %v5945_v26 }
 0xf94   :  { %2975 = vmatmul.mubr.bf16.vlgmr.msra.gmra.mrb[92].mxu0 %v2941_v30  ;;  %3016 = vmatmul.mubr.bf16.vlgmr.msra.gmra.mrb[92].mxu1 %v2941_v30 }
 0xf95   :  { %3405 = vmatpush3.bf16.msra.mxu0 %v3627_v11  ;;  %3420 = vmatprep.mubr.msk.bf16.mxu0 %vm3963_vm3, %v3962_v44 }
 0xf96   :  { %3406 = vmatprep.subr.bf16.mxu0 %v3962_v44 }
 0xf99   :  { %3407 = vmatpush3.bf16.msra.mxu0 %v3628_v33 }
 0xf9a   :  { %3408 = vmatprep.subr.bf16.mxu0 %v3962_v44 }
 0xf9d   :  { %3409 = vmatpush3.bf16.msra.mxu0 %v3629_v10 }
 0xf9e   :  { %3410 = vmatprep.subr.bf16.mxu0 %v3962_v44 }
 0xfa1   :  { %3411 = vmatpush3.bf16.msra.mxu0 %v3630_v19 }
 0xfa2   :  { %3412 = vmatprep.subr.bf16.mxu0 %v3962_v44 }
 0xfa5   :  { %3413 = vmatpush3.bf16.msra.mxu0 %v3631_v24 }
 0xfa6   :  { %3414 = vmatprep.subr.bf16.mxu0 %v3962_v44 }
 0xfa9   :  { %3415 = vmatpush3.bf16.msra.mxu0 %v3632_v8 }
 0xfaa   :  { %3416 = vmatprep.subr.bf16.mxu0 %v3962_v44 }
 0xfad   :  { %3417 = vmatpush3.bf16.msra.mxu0 %v3633_v34 }
 0xfae   :  { %3418 = vmatprep.subr.bf16.mxu0 %v3962_v44 }
 0xfb1   :  { %3419 = vmatpush3.bf16.msra.mxu0 %v3634_v9 }
0x1067   :  { %v2976_v43 = vpop.f32.mrb[92].mxu0  ;;  %v3017_v13 = vpop.f32.mrb[92].mxu1 }
0x1068   :  { %v3024_v18 = vadd.f32 %v2976_v43, %v1909_v62  ;;  %v3026_v31 = vadd.f32 %v3017_v13, %v1982_v12  ;;  %v2978_v38 = vpop.f32.mrb[93].mxu0  ;;  %v3019_v52 = vpop.f32.mrb[93].mxu1 }
0x1069   :  { %v3025_v40 = vadd.f32 %v2978_v38, %v1911_v41  ;;  %v3027_v47 = vadd.f32 %v3019_v52, %v1984_v39  ;;  %v2980_v14 = vpop.f32.mrb[94].mxu0  ;;  %v3021_v36 = vpop.f32.mrb[94].mxu1 }
0x106a   :  { %v3364_v29 = vmul.f32 -1.442695, %v3024_v18  ;;  %v2981_v23 = vpop.f32.mrb[95].mxu0  ;;  %v3022_v1 = vpop.f32.mrb[95].mxu1 }
0x106b   :  { %v3365_v45 = vmul.f32 -1.442695, %v3025_v40  ;;  %v3366_v37 = vmul.f32 -1.442695, %v3027_v47 }
0x106c   :  { %3875 = vpow2.f32 %v3364_v29 }
0x106d   :  { %3877 = vpow2.f32 %v3365_v45 }
0x106e   :  { %3879 = vpow2.f32 %v3366_v37 }
0x106f   :  { %3881 = vtanh.f32 %v3026_v31 }
0x1076   :  { %v3876_v54 = vpop.eup %3875 }
0x1077   :  { %v3878_v48 = vpop.eup %3877  ;;  %v3031_v15 = vadd.f32 1.0, %v3876_v54 }
0x1078   :  { %v3037_v21 = vadd.f32 1.0, %v3878_v48  ;;  %v3880_v42 = vpop.eup %3879 }
0x1079   :  { %3883 = vrcp.f32 %v3031_v15  ;;  %v3882_v57 = vpop.eup %3881  ;;  %v3044_v56 = vadd.f32 1.0, %v3880_v42 }
0x107a   :  { %3885 = vrcp.f32 %v3037_v21 }
0x107b   :  { %3887 = vrcp.f32 %v3044_v56 }
0x1083   :  { %v3884_v25 = vpop.eup %3883 }
0x1084   :  { %v3886_v49 = vpop.eup %3885  ;;  %v3048_v53 = vmul.f32 %v3884_v25, %v3882_v57 }
0x1085   :  { %v3047_v58 = vmul.f32 %v3886_v49, %v5940_v50  ;;  %v3888_v60 = vpop.eup %3887 }
0x1087   :  { %v3049_v59 = vadd.f32 %v3048_v53, %v3047_v58 }
0x1089   :  { %3889 = vtanh.f32 %v3049_v59 }
0x1093   :  { %v3890_v61 = vpop.eup %3889 }
0x1094   :  { %v3051_v63 = vmul.f32 %v3890_v61, %v3888_v60 }
0x1096   :  { %v3052_v3 = vsel %vm1585_vm2, %v3051_v63, %v5945_v26 }
0x1097   :  { %3059 = vst [vmem:[%s6003_s10] sm:$0xff] %v3052_v3  ;;  %v3060_v4 = vpack.c.bf16 %v3052_v3, %v3052_v3 }
0x1099   :  { %3421 = vmatmul.mubr.bf16.vlgmr.msra.gmra.mrb[96].mxu0 %v3060_v4 }
0x116c   :  { %v3166_v17 = vpop.f32.mrb[96].mxu0 }
0x116d   :  { %v3167_v5 = vadd.f32 %v3367_v46, %v3166_v17  ;;  %v3422_v6 = vpop.f32.mrb[97].mxu0 }
0x116e   :  { %v3169_v7 = vpop.f32.mrb[98].mxu0 }
0x116f   :  { %v3376_v32 = vmul.f32 -1.442695, %v3167_v5  ;;  %v3423_v28 = vpop.f32.mrb[99].mxu0 }
0x1171   :  { %3891 = vpow2.f32 %v3376_v32 }
0x117b   :  { %v3892_v35 = vpop.eup %3891 }
0x117c   :  { %v3175_v50 = vadd.f32 1.0, %v3892_v35 }
0x117e   :  { %3893 = vrcp.f32 %v3175_v50 }
0x1188   :  { %v3894_v22 = vpop.eup %3893 }
0x1189   :  { %3178 = vst [vmem:[%s6005_s11] sm:$0xff] %v3894_v22 }

// kernel: lstm_medfuse_forward.1
= control target key start
LH: loop header
LB: loop body
LE: loop exit
PB: predicated region body
PF: predicated region fallthrough
CT: control target
= control target key end

     0   :  { %v6012_v1 = vmov 0   ;;  %s5994_s1 = inlined_call_operand.vmem [shape: bf16[128,512], index: 1, kind: input, shape index: {}]   ;;  %s5995_s0 = inlined_call_operand.vmem [shape: bf16[64,128], index: 0, kind: input, shape index: {}]   ;;  %s5996_s2 = inlined_call_operand.vmem [shape: bf16[128,512], index: 2, kind: input, shape index: {}]   ;;  %s5997_s7 = inlined_call_operand.vmem [shape: s32[8,1], index: 7, kind: input, shape index: {}]   ;;  %s5998_s3 = inlined_call_operand.vmem [shape: f32[1,512], index: 3, kind: input, shape index: {}]   ;;  %s5999_s4 = inlined_call_operand.vmem [shape: bf16[128,512], index: 4, kind: input, shape index: {}]   ;;  %s6000_s5 = inlined_call_operand.vmem [shape: bf16[128,512], index: 5, kind: input, shape index: {}]   ;;  %s6001_s6 = inlined_call_operand.vmem [shape: f32[1,512], index: 6, kind: input, shape index: {}]   ;;  %s6002_s8 = inlined_call_operand.vmem [shape: bf16[128,128], index: 8, kind: input, shape index: {}]   ;;  %s6003_s10 = inlined_call_operand.vmem [shape: f32[8,128], index: 10, kind: output, shape index: {0}]   ;;  %s6004_s9 = inlined_call_operand.vmem [shape: f32[1,128], index: 9, kind: input, shape index: {}]   ;;  %s6005_s11 = inlined_call_operand.vmem [shape: f32[8,128], index: 11, kind: output, shape index: {1}]  }
   0x1   :  { %v3431_v0 = vld [vmem:[%s5994_s1 + $0x4] ss:$16 sps:$4 sm:$0xff]   ;;  %360 = vmatprep.mubr.bf16.mxu0 %v6012_v1  ;;  %433 = vmatprep.mubr.bf16.mxu1 %v6012_v1  ;;  %v3433_v2 = vld [vmem:[%s5994_s1 + $0xc] ss:$16 sps:$4 sm:$0xff]   ;;  %v3435_v3 = vld [vmem:[%s5994_s1] ss:$16 sps:$4 sm:$0xff]  }
   0x2   :  { %3429 = vset.pattern.permute.xlu0 %v6012_v1  ;;  %3430 = vset.pattern.permute.xlu1 %v6012_v1  ;;  %v3436_v4 = vld [vmem:[%s5994_s1 + $0x8] ss:$16 sps:$4 sm:$0xff]   ;;  %v3437_v5 = vld [vmem:[%s5994_s1 + $0x24] ss:$16 sps:$4 sm:$0xff]   ;;  %v3439_v6 = vld [vmem:[%s5994_s1 + $0x2c] ss:$16 sps:$4 sm:$0xff]  }
   0x3   :  { %328 = vmatprep.subr.bf16.mxu0 %v3431_v0  ;;  %401 = vmatprep.subr.bf16.mxu1 %v3433_v2  ;;  %v3441_v7 = vld [vmem:[%s5994_s1 + $0x20] ss:$16 sps:$4 sm:$0xff]   ;;  %v3442_v8 = vld [vmem:[%s5994_s1 + $0x28] ss:$16 sps:$4 sm:$0xff]   ;;  %v3443_v9 = vld [vmem:[%s5994_s1 + $0x44] ss:$16 sps:$4 sm:$0xff]  }
   0x4   :  { %329 = vmatpush1.bf16.msra.mxu0 %v3435_v3  ;;  %402 = vmatpush1.bf16.msra.mxu1 %v3436_v4  ;;  %v3445_v10 = vld [vmem:[%s5994_s1 + $0x4c] ss:$16 sps:$4 sm:$0xff]   ;;  %v3447_v11 = vld [vmem:[%s5994_s1 + $0x40] ss:$16 sps:$4 sm:$0xff]   ;;  %v3448_v12 = vld [vmem:[%s5994_s1 + $0x48] ss:$16 sps:$4 sm:$0xff]  }
   0x5   :  { %330 = vmatprep.subr.bf16.mxu0 %v3437_v5  ;;  %403 = vmatprep.subr.bf16.mxu1 %v3439_v6  ;;  %v3449_v13 = vld [vmem:[%s5994_s1 + $0x64] ss:$16 sps:$4 sm:$0xff]   ;;  %v3451_v14 = vld [vmem:[%s5994_s1 + $0x6c] ss:$16 sps:$4 sm:$0xff]   ;;  %v3453_v15 = vld [vmem:[%s5994_s1 + $0x60] ss:$16 sps:$4 sm:$0xff]  }
   0x6   :  { %v3454_v16 = vld [vmem:[%s5994_s1 + $0x68] ss:$16 sps:$4 sm:$0xff]   ;;  %v3455_v17 = vld [vmem:[%s5994_s1 + $0x84] ss:$16 sps:$4 sm:$0xff]   ;;  %v3457_v18 = vld [vmem:[%s5994_s1 + $0x8c] ss:$16 sps:$4 sm:$0xff]  }
   0x7   :  { %v3459_v19 = vld [vmem:[%s5994_s1 + $0x80] ss:$16 sps:$4 sm:$0xff]   ;;  %v3460_v20 = vld [vmem:[%s5994_s1 + $0x88] ss:$16 sps:$4 sm:$0xff]   ;;  %v3461_v21 = vld [vmem:[%s5994_s1 + $0xa4] ss:$16 sps:$4 sm:$0xff]  }
   0x8   :  { %331 = vmatpush1.bf16.msra.mxu0 %v3441_v7  ;;  %404 = vmatpush1.bf16.msra.mxu1 %v3442_v8  ;;  %v3463_v22 = vld [vmem:[%s5994_s1 + $0xac] ss:$16 sps:$4 sm:$0xff]   ;;  %v3465_v23 = vld [vmem:[%s5994_s1 + $0xa0] ss:$16 sps:$4 sm:$0xff]   ;;  %v3466_v24 = vld [vmem:[%s5994_s1 + $0xa8] ss:$16 sps:$4 sm:$0xff]  }
   0x9   :  { %332 = vmatprep.subr.bf16.mxu0 %v3443_v9  ;;  %405 = vmatprep.subr.bf16.mxu1 %v3445_v10  ;;  %v3467_v25 = vld [vmem:[%s5994_s1 + $0xc4] ss:$16 sps:$4 sm:$0xff]   ;;  %v3469_v26 = vld [vmem:[%s5994_s1 + $0xcc] ss:$16 sps:$4 sm:$0xff]   ;;  %v3471_v27 = vld [vmem:[%s5994_s1 + $0xc0] ss:$16 sps:$4 sm:$0xff]  }
   0xa   :  { %v3472_v28 = vld [vmem:[%s5994_s1 + $0xc8] ss:$16 sps:$4 sm:$0xff]   ;;  %v3473_v29 = vld [vmem:[%s5994_s1 + $0xe4] ss:$16 sps:$4 sm:$0xff]   ;;  %v3475_v30 = vld [vmem:[%s5994_s1 + $0xec] ss:$16 sps:$4 sm:$0xff]  }
   0xb   :  { %v3477_v31 = vld [vmem:[%s5994_s1 + $0xe0] ss:$16 sps:$4 sm:$0xff]   ;;  %v3478_v32 = vld [vmem:[%s5994_s1 + $0xe8] ss:$16 sps:$4 sm:$0xff]   ;;  %v4127_v33 = vld [vmem:[%s5996_s2 + $0x4] ss:$16 sps:$4 sm:$0xff]  }
   0xc   :  { %333 = vmatpush1.bf16.msra.mxu0 %v3447_v11  ;;  %406 = vmatpush1.bf16.msra.mxu1 %v3448_v12  ;;  %v4132_v34 = vld [vmem:[%s5996_s2 + $0xc] ss:$16 sps:$4 sm:$0xff]   ;;  %v3479_v35 = vld [vmem:[%s5995_s0] sm:$0xff]   ;;  %v4145_v37 = vld [vmem:[%s5996_s2 + $0x8] ss:$16 sps:$4 sm:$0xff]   ;;  %v6010_v11 = vmov 0.0|0.0   ;;  %v124_v12 = vlaneseq }
   0xd   :  { %334 = vmatprep.subr.bf16.mxu0 %v3449_v13  ;;  %407 = vmatprep.subr.bf16.mxu1 %v3451_v14  ;;  %v4140_v36 = vld [vmem:[%s5996_s2] ss:$16 sps:$4 sm:$0xff]   ;;  %v4152_v38 = vld [vmem:[%s5996_s2 + $0x24] ss:$16 sps:$4 sm:$0xff]   ;;  %v4157_v39 = vld [vmem:[%s5996_s2 + $0x2c] ss:$16 sps:$4 sm:$0xff]  }
   0xe   :  { %v4162_v40 = vld [vmem:[%s5996_s2 + $0x20] ss:$16 sps:$4 sm:$0xff]   ;;  %v4169_v41 = vld [vmem:[%s5996_s2 + $0x28] ss:$16 sps:$4 sm:$0xff]   ;;  %v4176_v42 = vld [vmem:[%s5996_s2 + $0x44] ss:$16 sps:$4 sm:$0xff]  }
   0xf   :  { %v4181_v43 = vld [vmem:[%s5996_s2 + $0x4c] ss:$16 sps:$4 sm:$0xff]   ;;  %v4191_v45 = vld [vmem:[%s5996_s2 + $0x40] ss:$16 sps:$4 sm:$0xff]   ;;  %v4196_v46 = vld [vmem:[%s5996_s2 + $0x48] ss:$16 sps:$4 sm:$0xff]  }
  0x10   :  { %335 = vmatpush1.bf16.msra.mxu0 %v3453_v15  ;;  %408 = vmatpush1.bf16.msra.mxu1 %v3454_v16  ;;  %v3492_v44 = vld [vmem:[%s5995_s0 + $0x8] sm:$0xff]   ;;  %v4203_v47 = vld [vmem:[%s5996_s2 + $0x64] ss:$16 sps:$4 sm:$0xff]   ;;  %v4215_v49 = vld [vmem:[%s5996_s2 + $0x60] ss:$16 sps:$4 sm:$0xff]   ;;  %v4387_v13 = vshrl.u32 %v124_v12, 7 }
  0x11   :  { %336 = vmatprep.subr.bf16.mxu0 %v3455_v17  ;;  %409 = vmatprep.subr.bf16.mxu1 %v3457_v18  ;;  %v4210_v48 = vld [vmem:[%s5996_s2 + $0x6c] ss:$16 sps:$4 sm:$0xff]   ;;  %v4220_v50 = vld [vmem:[%s5996_s2 + $0x68] ss:$16 sps:$4 sm:$0xff]   ;;  %v4227_v51 = vld [vmem:[%s5996_s2 + $0x84] ss:$16 sps:$4 sm:$0xff]  }
  0x12   :  { %v4234_v52 = vld [vmem:[%s5996_s2 + $0x8c] ss:$16 sps:$4 sm:$0xff]   ;;  %v4241_v53 = vld [vmem:[%s5997_s7] sm:$0xff]  ;;  %v3505_v54 = vld [vmem:[%s5995_s0 + $0x10] sm:$0xff]   ;;  %6031 = vst [vmem:[#allocation4_spill] sm:$0xff] %v4387_v13  ;;  %v6008_v14 = vsub.s32 2, %v4387_v13 }
  0x13   :  { %vm747_vm0 = vcmp.gt.s32.totalorder %v4241_v53, 0  ;;  %v4252_v55 = vld [vmem:[%s5996_s2 + $0x80] ss:$16 sps:$4 sm:$0xff]   ;;  %v4257_v56 = vld [vmem:[%s5996_s2 + $0x88] ss:$16 sps:$4 sm:$0xff]   ;;  %vm866_vm1 = vcmp.gt.s32.totalorder %v4241_v53, 1 }
  0x14   :  { %337 = vmatpush1.bf16.msra.mxu0 %v3459_v19  ;;  %410 = vmatpush1.bf16.msra.mxu1 %v3460_v20  ;;  %v748_v57 = vsel %vm747_vm0, 1, %v6012_v1  ;;  %v4265_v58 = vld [vmem:[%s5996_s2 + $0xa4] ss:$16 sps:$4 sm:$0xff]   ;;  %v4270_v59 = vld [vmem:[%s5996_s2 + $0xac] ss:$16 sps:$4 sm:$0xff]   ;;  %v867_v62 = vsel %vm866_vm1, 1, %v6012_v1 }
  0x15   :  { %338 = vmatprep.subr.bf16.mxu0 %v3461_v21  ;;  %411 = vmatprep.subr.bf16.mxu1 %v3463_v22  ;;  %v4278_v60 = vld [vmem:[%s5996_s2 + $0xa0] ss:$16 sps:$4 sm:$0xff]   ;;  %v4283_v61 = vld [vmem:[%s5996_s2 + $0xa8] ss:$16 sps:$4 sm:$0xff]   ;;  %v4291_v63 = vld [vmem:[%s5996_s2 + $0xc4] ss:$16 sps:$4 sm:$0xff]  }
  0x16   :  { %750 = vperm.xlu0 %3429, %v748_v57   ;;  %v4296_v0 = vld [vmem:[%s5996_s2 + $0xcc] ss:$16 sps:$4 sm:$0xff]   ;;  %v4308_v3 = vld [vmem:[%s5996_s2 + $0xc0] ss:$16 sps:$4 sm:$0xff]   ;;  %v4313_v4 = vld [vmem:[%s5996_s2 + $0xc8] ss:$16 sps:$4 sm:$0xff]  }
  0x17   :  { %v3518_v2 = vld [vmem:[%s5995_s0 + $0x18] sm:$0xff]   ;;  %v4320_v5 = vld [vmem:[%s5996_s2 + $0xe4] ss:$16 sps:$4 sm:$0xff]   ;;  %vm1223_vm2 = vcmp.gt.s32.totalorder %v4241_v53, 4  ;;  %v4333_v7 = vld [vmem:[%s5996_s2 + $0xe0] ss:$16 sps:$4 sm:$0xff]  }
  0x18   :  { %339 = vmatpush1.bf16.msra.mxu0 %v3465_v23  ;;  %412 = vmatpush1.bf16.msra.mxu1 %v3466_v24  ;;  %v4325_v6 = vld [vmem:[%s5996_s2 + $0xec] ss:$16 sps:$4 sm:$0xff]   ;;  %v4338_v8 = vld [vmem:[%s5996_s2 + $0xe8] ss:$16 sps:$4 sm:$0xff]   ;;  %v1224_v9 = vsel %vm1223_vm2, 1, %v6012_v1  ;;  %vm1461_vm3 = vcmp.gt.s32.totalorder %v4241_v53, 6 }
  0x19   :  { %340 = vmatprep.subr.bf16.mxu0 %v3467_v25  ;;  %413 = vmatprep.subr.bf16.mxu1 %v3469_v26  ;;  %v1462_v10 = vsel %vm1461_vm3, 1, %v6012_v1  ;;  %v6006_v15 = vsub.s32 3, %v4387_v13  ;;  %v6009_v16 = vsub.s32 0, %v4387_v13  ;;  %v122_v17 = vld [vmem:[%s5998_s3] sm:$0xf]  ;;  %v6007_v18 = vsub.s32 1, %v4387_v13 }
  0x1a   :  { %869 = vperm.xlu0 %3429, %v867_v62   ;;  %v4398_v19 = vrot.slane %v122_v17, %v6008_v14  ;;  %vm985_vm6 = vcmp.gt.s32.totalorder %v4241_v53, 2  ;;  %vm1104_vm7 = vcmp.gt.s32.totalorder %v4241_v53, 3  ;;  %vm1342_vm8 = vcmp.gt.s32.totalorder %v4241_v53, 5 }
  0x1b   :  { %v4406_v22 = vrot.slane %v122_v17, %v6006_v15  ;;  %v127_v23 = vrot.slane %v122_v17, %v6009_v16  ;;  %v131_v26 = vrot.slane %v122_v17, %v6007_v18  ;;  %vm1580_vm9 = vcmp.gt.s32.totalorder %v4241_v53, 7 }
  0x1c   :  { %341 = vmatpush1.bf16.msra.mxu0 %v3471_v27  ;;  %414 = vmatpush1.bf16.msra.mxu1 %v3472_v28  ;;  %vm3961_vm0 = vmmov 1   ;;  %vm3963_vm3 = vmmov 0  }
  0x1d   :  { %342 = vmatprep.subr.bf16.mxu0 %v3473_v29  ;;  %415 = vmatprep.subr.bf16.mxu1 %v3475_v30 }
  0x1e   :  { %1226 = vperm.xlu0 %3429, %v1224_v9  }
  0x20   :  { %343 = vmatpush1.bf16.msra.mxu0 %v3477_v31  ;;  %416 = vmatpush1.bf16.msra.mxu1 %v3478_v32 }
  0x21   :  { %637 = vmatprep.subr.bf16.mxu0 %v4127_v33  ;;  %678 = vmatprep.subr.bf16.mxu1 %v4132_v34 }
  0x22   :  { %1464 = vperm.xlu0 %3429, %v1462_v10  }
  0x23   :  { %361 = vmatmul.mubr.bf16.vlgmr.msra.gmra.mrb[0].mxu0 %v3479_v35  ;;  %434 = vmatmul.mubr.bf16.vlgmr.msra.gmra.mrb[0].mxu1 %v3479_v35 }
  0x24   :  { %638 = vmatpush1.bf16.msra.mxu0 %v4140_v36  ;;  %679 = vmatpush1.bf16.msra.mxu1 %v4145_v37 }
  0x25   :  { %639 = vmatprep.subr.bf16.mxu0 %v4152_v38  ;;  %680 = vmatprep.subr.bf16.mxu1 %v4157_v39 }
  0x26   :  { %370 = vmatprep.mubr.bf16.mxu0 %v6012_v1  ;;  %443 = vmatprep.mubr.bf16.mxu1 %v6012_v1 }
  0x28   :  { %640 = vmatpush1.bf16.msra.mxu0 %v4162_v40  ;;  %681 = vmatpush1.bf16.msra.mxu1 %v4169_v41 }
  0x29   :  { %641 = vmatprep.subr.bf16.mxu0 %v4176_v42  ;;  %682 = vmatprep.subr.bf16.mxu1 %v4181_v43 }
  0x2b   :  { %371 = vmatmul.mubr.bf16.gmra.mrb[4].mxu0 %v3492_v44  ;;  %444 = vmatmul.mubr.bf16.gmra.mrb[4].mxu1 %v3492_v44 }
  0x2c   :  { %642 = vmatpush1.bf16.msra.mxu0 %v4191_v45  ;;  %683 = vmatpush1.bf16.msra.mxu1 %v4196_v46 }
  0x2d   :  { %643 = vmatprep.subr.bf16.mxu0 %v4203_v47  ;;  %684 = vmatprep.subr.bf16.mxu1 %v4210_v48 }
  0x2e   :  { %380 = vmatprep.mubr.bf16.mxu0 %v6012_v1  ;;  %453 = vmatprep.mubr.bf16.mxu1 %v6012_v1 }
  0x30   :  { %644 = vmatpush1.bf16.msra.mxu0 %v4215_v49  ;;  %685 = vmatpush1.bf16.msra.mxu1 %v4220_v50 }
  0x31   :  { %645 = vmatprep.subr.bf16.mxu0 %v4227_v51  ;;  %686 = vmatprep.subr.bf16.mxu1 %v4234_v52 }
  0x33   :  { %381 = vmatmul.mubr.bf16.gmra.mrb[8].mxu0 %v3505_v54  ;;  %454 = vmatmul.mubr.bf16.gmra.mrb[8].mxu1 %v3505_v54 }
  0x34   :  { %646 = vmatpush1.bf16.msra.mxu0 %v4252_v55  ;;  %687 = vmatpush1.bf16.msra.mxu1 %v4257_v56 }
  0x35   :  { %647 = vmatprep.subr.bf16.mxu0 %v4265_v58  ;;  %688 = vmatprep.subr.bf16.mxu1 %v4270_v59 }
  0x36   :  { %390 = vmatprep.mubr.bf16.mxu0 %v6012_v1  ;;  %463 = vmatprep.mubr.bf16.mxu1 %v6012_v1 }
  0x38   :  { %648 = vmatpush1.bf16.msra.mxu0 %v4278_v60  ;;  %689 = vmatpush1.bf16.msra.mxu1 %v4283_v61 }
  0x39   :  { %649 = vmatprep.subr.bf16.mxu0 %v4291_v63  ;;  %690 = vmatprep.subr.bf16.mxu1 %v4296_v0 }
  0x3b   :  { %391 = vmatmul.mubr.bf16.gmra.mrb[12].mxu0 %v3518_v2  ;;  %464 = vmatmul.mubr.bf16.gmra.mrb[12].mxu1 %v3518_v2 }
  0x3c   :  { %650 = vmatpush1.bf16.msra.mxu0 %v4308_v3  ;;  %691 = vmatpush1.bf16.msra.mxu1 %v4313_v4 }
  0x3d   :  { %651 = vmatprep.subr.bf16.mxu0 %v4320_v5  ;;  %692 = vmatprep.subr.bf16.mxu1 %v4325_v6 }
  0x3e   :  { %669 = vmatprep.mubr.bf16.mxu0 %v6012_v1  ;;  %710 = vmatprep.mubr.bf16.mxu1 %v6012_v1 }
  0x40   :  { %652 = vmatpush1.bf16.msra.mxu0 %v4333_v7  ;;  %693 = vmatpush1.bf16.msra.mxu1 %v4338_v8 }
  0x41   :  { %756 = vmatprep.subr.bf16.mxu0 %v4127_v33  ;;  %797 = vmatprep.subr.bf16.mxu1 %v4132_v34 }
  0x43   :  { %670 = vmatmul.mubr.bf16.vlgmr.msra.gmra.mrb[16].mxu0 %v6010_v11  ;;  %711 = vmatmul.mubr.bf16.vlgmr.msra.gmra.mrb[16].mxu1 %v6010_v11 }
  0x44   :  { %757 = vmatpush1.bf16.msra.mxu0 %v4140_v36  ;;  %798 = vmatpush1.bf16.msra.mxu1 %v4145_v37 }
  0x45   :  { %758 = vmatprep.subr.bf16.mxu0 %v4152_v38  ;;  %799 = vmatprep.subr.bf16.mxu1 %v4157_v39 }
  0x46   :  { %788 = vmatprep.mubr.bf16.mxu0 %v6012_v1  ;;  %829 = vmatprep.mubr.bf16.mxu1 %v6012_v1 }
  0x48   :  { %759 = vmatpush1.bf16.msra.mxu0 %v4162_v40  ;;  %800 = vmatpush1.bf16.msra.mxu1 %v4169_v41 }
  0x49   :  { %760 = vmatprep.subr.bf16.mxu0 %v4176_v42  ;;  %801 = vmatprep.subr.bf16.mxu1 %v4181_v43 }
  0x4c   :  { %761 = vmatpush1.bf16.msra.mxu0 %v4191_v45  ;;  %802 = vmatpush1.bf16.msra.mxu1 %v4196_v46 }
  0x4d   :  { %762 = vmatprep.subr.bf16.mxu0 %v4203_v47  ;;  %803 = vmatprep.subr.bf16.mxu1 %v4210_v48 }
  0x50   :  { %763 = vmatpush1.bf16.msra.mxu0 %v4215_v49  ;;  %804 = vmatpush1.bf16.msra.mxu1 %v4220_v50 }
  0x51   :  { %764 = vmatprep.subr.bf16.mxu0 %v4227_v51  ;;  %805 = vmatprep.subr.bf16.mxu1 %v4234_v52 }
  0x54   :  { %765 = vmatpush1.bf16.msra.mxu0 %v4252_v55  ;;  %806 = vmatpush1.bf16.msra.mxu1 %v4257_v56 }
  0x55   :  { %766 = vmatprep.subr.bf16.mxu0 %v4265_v58  ;;  %807 = vmatprep.subr.bf16.mxu1 %v4270_v59 }
  0x58   :  { %767 = vmatpush1.bf16.msra.mxu0 %v4278_v60  ;;  %808 = vmatpush1.bf16.msra.mxu1 %v4283_v61 }
  0x59   :  { %768 = vmatprep.subr.bf16.mxu0 %v4291_v63  ;;  %809 = vmatprep.subr.bf16.mxu1 %v4296_v0 }
  0x5c   :  { %769 = vmatpush1.bf16.msra.mxu0 %v4308_v3  ;;  %810 = vmatpush1.bf16.msra.mxu1 %v4313_v4 }
  0x5d   :  { %770 = vmatprep.subr.bf16.mxu0 %v4320_v5  ;;  %811 = vmatprep.subr.bf16.mxu1 %v4325_v6 }
  0x60   :  { %771 = vmatpush1.bf16.msra.mxu0 %v4333_v7  ;;  %812 = vmatpush1.bf16.msra.mxu1 %v4338_v8 }
  0x61   :  { %875 = vmatprep.subr.bf16.mxu0 %v4127_v33  ;;  %916 = vmatprep.subr.bf16.mxu1 %v4132_v34 }
  0xf6   :  { %v4400_v20 = vpop.f32.mrb[0].mxu0  ;;  %v4402_v21 = vpop.f32.mrb[0].mxu1 }
  0xf7   :  { %v364_v24 = vpop.f32.mrb[1].mxu0  ;;  %v437_v25 = vpop.f32.mrb[1].mxu1 }
  0xf8   :  { %v366_v27 = vpop.f32.mrb[2].mxu0  ;;  %v439_v28 = vpop.f32.mrb[2].mxu1 }
  0xf9   :  { %v4412_v29 = vadd.f32 %v366_v27, %v127_v23  ;;  %v368_v30 = vpop.f32.mrb[3].mxu0  ;;  %v4415_v31 = vadd.f32 %v439_v28, %v4398_v19  ;;  %v441_v32 = vpop.f32.mrb[3].mxu1 }
  0xfa   :  { %v4417_v35 = vadd.f32 %v368_v30, %v131_v26  ;;  %v4420_v44 = vadd.f32 %v441_v32, %v4406_v22 }
  0xfe   :  { %v372_v54 = vpop.f32.mrb[4].mxu0  ;;  %v445_v57 = vpop.f32.mrb[4].mxu1 }
  0xff   :  { %v4422_v62 = vadd.f32 %v372_v54, %v127_v23  ;;  %v374_v2 = vpop.f32.mrb[5].mxu0  ;;  %v4425_v9 = vadd.f32 %v445_v57, %v4398_v19  ;;  %v447_v10 = vpop.f32.mrb[5].mxu1 }
 0x100   :  { %v4427_v12 = vadd.f32 %v374_v2, %v131_v26  ;;  %v376_v17 = vpop.f32.mrb[6].mxu0  ;;  %v4430_v27 = vadd.f32 %v447_v10, %v4406_v22  ;;  %v449_v28 = vpop.f32.mrb[6].mxu1 }
 0x101   :  { %v4432_v30 = vadd.f32 %v376_v17, %v127_v23  ;;  %v378_v32 = vpop.f32.mrb[7].mxu0  ;;  %v4435_v15 = vadd.f32 %v449_v28, %v4398_v19  ;;  %v451_v54 = vpop.f32.mrb[7].mxu1 }
 0x102   :  { %6032 = vst [vmem:[#allocation5_spill] sm:$0xff] %v4427_v12  ;;  %6033 = vst [vmem:[#allocation6_spill] sm:$0xff] %v4430_v27  ;;  %v4437_v18 = vadd.f32 %v378_v32, %v131_v26  ;;  %v4440_v57 = vadd.f32 %v451_v54, %v4406_v22 }
 0x103   :  { %6034 = vst [vmem:[#allocation7_spill] sm:$0xff] %v4432_v30  ;;  %6035 = vst [vmem:[#allocation8_spill] sm:$0xff] %v4435_v15 }
 0x104   :  { %6036 = vst [vmem:[#allocation9_spill] sm:$0xff] %v4437_v18  ;;  %6037 = vst [vmem:[#allocation10_spill] sm:$0xff] %v4440_v57 }
 0x106   :  { %v382_v14 = vpop.f32.mrb[8].mxu0  ;;  %v455_v2 = vpop.f32.mrb[8].mxu1 }
 0x107   :  { %v4442_v16 = vadd.f32 %v382_v14, %v127_v23  ;;  %v384_v11 = vpop.f32.mrb[9].mxu0  ;;  %v4445_v10 = vadd.f32 %v455_v2, %v4398_v19  ;;  %v457_v17 = vpop.f32.mrb[9].mxu1 }
 0x108   :  { %v4447_v1 = vadd.f32 %v384_v11, %v131_v26  ;;  %v386_v13 = vpop.f32.mrb[10].mxu0  ;;  %v4450_v28 = vadd.f32 %v457_v17, %v4406_v22  ;;  %v459_v32 = vpop.f32.mrb[10].mxu1 }
 0x109   :  { %6038 = vst [vmem:[#allocation11_spill] sm:$0xff] %v4442_v16  ;;  %6039 = vst [vmem:[#allocation12_spill] sm:$0xff] %v4445_v10  ;;  %v4452_v18 = vadd.f32 %v386_v13, %v127_v23  ;;  %v388_v54 = vpop.f32.mrb[11].mxu0  ;;  %v4455_v57 = vadd.f32 %v459_v32, %v4398_v19  ;;  %v461_v14 = vpop.f32.mrb[11].mxu1 }
 0x10a   :  { %6040 = vst [vmem:[#allocation13_spill] sm:$0xff] %v4447_v1  ;;  %6041 = vst [vmem:[#allocation14_spill] sm:$0xff] %v4450_v28  ;;  %v4457_v16 = vadd.f32 %v388_v54, %v131_v26  ;;  %v4460_v2 = vadd.f32 %v461_v14, %v4406_v22 }
 0x10b   :  { %6042 = vst [vmem:[#allocation15_spill] sm:$0xff] %v4452_v18  ;;  %6043 = vst [vmem:[#allocation16_spill] sm:$0xff] %v4455_v57 }
 0x10c   :  { %6044 = vst [vmem:[#allocation17_spill] sm:$0xff] %v4457_v16  ;;  %6045 = vst [vmem:[#allocation18_spill] sm:$0xff] %v4460_v2 }
 0x10e   :  { %v392_v10 = vpop.f32.mrb[12].mxu0  ;;  %v465_v11 = vpop.f32.mrb[12].mxu1 }
 0x10f   :  { %v4462_v1 = vadd.f32 %v392_v10, %v127_v23  ;;  %v394_v15 = vpop.f32.mrb[13].mxu0  ;;  %v4465_v17 = vadd.f32 %v465_v11, %v4398_v19  ;;  %v467_v13 = vpop.f32.mrb[13].mxu1 }
 0x110   :  { %v4467_v18 = vadd.f32 %v394_v15, %v131_v26  ;;  %v396_v28 = vpop.f32.mrb[14].mxu0  ;;  %v4470_v32 = vadd.f32 %v467_v13, %v4406_v22  ;;  %v469_v54 = vpop.f32.mrb[14].mxu1  ;;  %v363_v15 = vadd.f32 %v4400_v20, %v127_v23  ;;  %v365_v13 = vadd.f32 %v364_v24, %v131_v26 }
 0x111   :  { %6046 = vst [vmem:[#allocation19_spill] sm:$0xff] %v4462_v1  ;;  %6047 = vst [vmem:[#allocation20_spill] sm:$0xff] %v4465_v17  ;;  %v4472_v16 = vadd.f32 %v396_v28, %v127_v23  ;;  %v398_v14 = vpop.f32.mrb[15].mxu0  ;;  %v4475_v2 = vadd.f32 %v469_v54, %v4398_v19  ;;  %v471_v10 = vpop.f32.mrb[15].mxu1 }
 0x112   :  { %6048 = vst [vmem:[#allocation21_spill] sm:$0xff] %v4467_v18  ;;  %6049 = vst [vmem:[#allocation22_spill] sm:$0xff] %v4470_v32  ;;  %v4477_v1 = vadd.f32 %v398_v14, %v131_v26  ;;  %v4480_v11 = vadd.f32 %v471_v10, %v4406_v22  ;;  %v436_v18 = vadd.f32 %v4402_v21, %v4398_v19 }
 0x113   :  { %6050 = vst [vmem:[#allocation23_spill] sm:$0xff] %v4472_v16  ;;  %6051 = vst [vmem:[#allocation24_spill] sm:$0xff] %v4475_v2  ;;  %v438_v32 = vadd.f32 %v437_v25, %v4406_v22 }
 0x114   :  { %6052 = vst [vmem:[#allocation25_spill] sm:$0xff] %v4477_v1  ;;  %6053 = vst [vmem:[#allocation26_spill] sm:$0xff] %v4480_v11 }
 0x116   :  { %v671_v28 = vpop.f32.mrb[16].mxu0  ;;  %v712_v16 = vpop.f32.mrb[16].mxu1 }
 0x117   :  { %v719_v17 = vadd.f32 %v671_v28, %v363_v15  ;;  %v721_v57 = vadd.f32 %v712_v16, %v436_v18  ;;  %v673_v54 = vpop.f32.mrb[17].mxu0  ;;  %v714_v2 = vpop.f32.mrb[17].mxu1 }
 0x118   :  { %v720_v30 = vadd.f32 %v673_v54, %v365_v13  ;;  %v722_v14 = vadd.f32 %v714_v2, %v438_v32  ;;  %v675_v1 = vpop.f32.mrb[18].mxu0  ;;  %v716_v27 = vpop.f32.mrb[18].mxu1  ;;  %v6057_v13 = vmov 0  }
 0x119   :  { %v3255_v10 = vmul.f32 -1.442695, %v719_v17  ;;  %v676_v11 = vpop.f32.mrb[19].mxu0  ;;  %v717_v12 = vpop.f32.mrb[19].mxu1  ;;  %v986_v28 = vsel %vm985_vm6, 1, %v6057_v13  ;;  %v1105_v54 = vsel %vm1104_vm7, 1, %v6057_v13 }
 0x11a   :  { %v3256_v20 = vmul.f32 -1.442695, %v720_v30  ;;  %v3257_v19 = vmul.f32 -1.442695, %v722_v14  ;;  %v4489_v30 = vpop.permute.xlu0 %750  ;;  %988 = vperm.xlu1 %3430, %v986_v28   ;;  %v1343_v14 = vsel %vm1342_vm8, 1, %v6057_v13 }
 0x11b   :  { %3635 = vpow2.f32 %v3255_v10  ;;  %6054 = vst [vmem:[#allocation27_spill] sm:$0xff] %v4489_v30  ;;  %vm752_vm4 = vcmp.eq.s32.totalorder %v4489_v30, 1  ;;  %v1581_v10 = vsel %vm1580_vm9, 1, %v6057_v13 }
 0x11c   :  { %3637 = vpow2.f32 %v3256_v20  ;;  %vm4497_vm5 = vmpackc.low %vm752_vm4, %vm752_vm4 }
 0x11d   :  { %3639 = vpow2.f32 %v3257_v19  ;;  %vm3383_vm1 = vmpackc.low %vm3961_vm0, %vm752_vm4 }
 0x11e   :  { %3641 = vtanh.f32 %v721_v57  ;;  %1107 = vperm.xlu1 %3430, %v1105_v54  }
 0x122   :  { %1345 = vperm.xlu1 %3430, %v1343_v14  }
 0x125   :  { %v3636_v21 = vpop.eup %3635 }
 0x126   :  { %v3638_v23 = vpop.eup %3637  ;;  %v726_v22 = vadd.f32 1.0, %v3636_v21  ;;  %1583 = vperm.xlu1 %3430, %v1581_v10  }
 0x127   :  { %v732_v24 = vadd.f32 1.0, %v3638_v23  ;;  %v3640_v16 = vpop.eup %3639 }
 0x128   :  { %3643 = vrcp.f32 %v726_v22  ;;  %v3642_v18 = vpop.eup %3641  ;;  %v739_v27 = vadd.f32 1.0, %v3640_v16 }
 0x129   :  { %3645 = vrcp.f32 %v732_v24 }
 0x12a   :  { %3647 = vrcp.f32 %v739_v27 }
 0x132   :  { %v3644_v25 = vpop.eup %3643 }
 0x133   :  { %v3646_v1 = vpop.eup %3645  ;;  %v743_v26 = vmul.f32 %v3644_v25, %v3642_v18 }
 0x134   :  { %v742_v2 = vmul.f32 0.0, %v3646_v1  ;;  %v3648_v17 = vpop.eup %3647 }
 0x136   :  { %v4486_v12 = vadd.f32 %v743_v26, %v742_v2 }
 0x138   :  { %3649 = vtanh.f32 %v4486_v12  ;;  %v754_v14 = vsel %vm752_vm4, %v4486_v12, 0.0 }
 0x142   :  { %v3650_v32 = vpop.eup %3649 }
 0x143   :  { %v4491_v57 = vmul.f32 %v3650_v32, %v3648_v17 }
 0x145   :  { %v3378_v15 = vpack.c.bf16 %v4491_v57, %v4491_v57  ;;  %v753_v12 = vsel %vm752_vm4, %v4491_v57, 0.0 }
 0x147   :  { %3379 = vmatmul.mubr.msk.bf16.vlgmr.msra.gmra.mrb[20].mxu0 %vm4497_vm5, %v3378_v15  ;;  %3382 = vmatmul.mubr.msk.bf16.vlgmr.msra.gmra.mrb[20].mxu1 %vm4497_vm5, %v3378_v15 }
 0x148   :  { %876 = vmatpush1.bf16.msra.mxu0 %v4140_v36  ;;  %917 = vmatpush1.bf16.msra.mxu1 %v4145_v37 }
 0x149   :  { %877 = vmatprep.subr.bf16.mxu0 %v4152_v38  ;;  %918 = vmatprep.subr.bf16.mxu1 %v4157_v39 }
 0x14a   :  { %907 = vmatprep.mubr.bf16.mxu0 %v6057_v13  ;;  %948 = vmatprep.mubr.bf16.mxu1 %v6057_v13 }
 0x14c   :  { %878 = vmatpush1.bf16.msra.mxu0 %v4162_v40  ;;  %919 = vmatpush1.bf16.msra.mxu1 %v4169_v41 }
 0x14d   :  { %879 = vmatprep.subr.bf16.mxu0 %v4176_v42  ;;  %920 = vmatprep.subr.bf16.mxu1 %v4181_v43 }
 0x150   :  { %880 = vmatpush1.bf16.msra.mxu0 %v4191_v45  ;;  %921 = vmatpush1.bf16.msra.mxu1 %v4196_v46 }
 0x151   :  { %881 = vmatprep.subr.bf16.mxu0 %v4203_v47  ;;  %922 = vmatprep.subr.bf16.mxu1 %v4210_v48 }
 0x154   :  { %882 = vmatpush1.bf16.msra.mxu0 %v4215_v49  ;;  %923 = vmatpush1.bf16.msra.mxu1 %v4220_v50 }
 0x155   :  { %883 = vmatprep.subr.bf16.mxu0 %v4227_v51  ;;  %924 = vmatprep.subr.bf16.mxu1 %v4234_v52 }
 0x158   :  { %884 = vmatpush1.bf16.msra.mxu0 %v4252_v55  ;;  %925 = vmatpush1.bf16.msra.mxu1 %v4257_v56 }
 0x159   :  { %885 = vmatprep.subr.bf16.mxu0 %v4265_v58  ;;  %926 = vmatprep.subr.bf16.mxu1 %v4270_v59 }
 0x15c   :  { %886 = vmatpush1.bf16.msra.mxu0 %v4278_v60  ;;  %927 = vmatpush1.bf16.msra.mxu1 %v4283_v61 }
 0x15d   :  { %887 = vmatprep.subr.bf16.mxu0 %v4291_v63  ;;  %928 = vmatprep.subr.bf16.mxu1 %v4296_v0 }
 0x160   :  { %888 = vmatpush1.bf16.msra.mxu0 %v4308_v3  ;;  %929 = vmatpush1.bf16.msra.mxu1 %v4313_v4 }
 0x161   :  { %889 = vmatprep.subr.bf16.mxu0 %v4320_v5  ;;  %930 = vmatprep.subr.bf16.mxu1 %v4325_v6 }
 0x164   :  { %890 = vmatpush1.bf16.msra.mxu0 %v4333_v7  ;;  %931 = vmatpush1.bf16.msra.mxu1 %v4338_v8 }
 0x165   :  { %994 = vmatprep.subr.bf16.mxu0 %v4127_v33  ;;  %1035 = vmatprep.subr.bf16.mxu1 %v4132_v34 }
 0x21a   :  { %v790_v20 = vpop.f32.mrb[20].mxu0  ;;  %v831_v19 = vpop.f32.mrb[20].mxu1 }
 0x21b   :  { %v838_v21 = vadd.f32 %v790_v20, %v4412_v29  ;;  %v840_v23 = vadd.f32 %v831_v19, %v4415_v31  ;;  %v792_v22 = vpop.f32.mrb[21].mxu0  ;;  %v833_v24 = vpop.f32.mrb[21].mxu1 }
 0x21c   :  { %v839_v16 = vadd.f32 %v792_v22, %v4417_v35  ;;  %v841_v18 = vadd.f32 %v833_v24, %v4420_v44  ;;  %v794_v25 = vpop.f32.mrb[22].mxu0  ;;  %v835_v1 = vpop.f32.mrb[22].mxu1 }
 0x21d   :  { %v3258_v26 = vmul.f32 -1.442695, %v838_v21  ;;  %v795_v53 = vpop.f32.mrb[23].mxu0  ;;  %v836_v27 = vpop.f32.mrb[23].mxu1 }
 0x21e   :  { %v3259_v2 = vmul.f32 -1.442695, %v839_v16  ;;  %v3260_v17 = vmul.f32 -1.442695, %v841_v18  ;;  %v4556_v21 = vpop.permute.xlu0 %869 }
 0x21f   :  { %3651 = vpow2.f32 %v3258_v26  ;;  %6058 = vst [vmem:[#allocation28_spill] sm:$0xff] %v4556_v21  ;;  %vm871_vm10 = vcmp.eq.s32.totalorder %v4556_v21, 1 }
 0x220   :  { %3653 = vpow2.f32 %v3259_v2 }
 0x221   :  { %3655 = vpow2.f32 %v3260_v17 }
 0x222   :  { %3657 = vtanh.f32 %v840_v23 }
 0x229   :  { %v3652_v32 = vpop.eup %3651 }
 0x22a   :  { %v3654_v15 = vpop.eup %3653  ;;  %v845_v29 = vadd.f32 1.0, %v3652_v32 }
 0x22b   :  { %v851_v31 = vadd.f32 1.0, %v3654_v15  ;;  %v3656_v35 = vpop.eup %3655  ;;  %v6059_v15 = vld [vmem:[#allocation5_spill] sm:$0xff] }
 0x22c   :  { %3659 = vrcp.f32 %v845_v29  ;;  %v3658_v28 = vpop.eup %3657  ;;  %v858_v20 = vadd.f32 1.0, %v3656_v35 }
 0x22d   :  { %3661 = vrcp.f32 %v851_v31  ;;  %v6060_v31 = vld [vmem:[#allocation6_spill] sm:$0xff] }
 0x22e   :  { %3663 = vrcp.f32 %v858_v20 }
 0x236   :  { %v3660_v44 = vpop.eup %3659 }
 0x237   :  { %v3662_v54 = vpop.eup %3661  ;;  %v862_v10 = vmul.f32 %v3660_v44, %v3658_v28 }
 0x238   :  { %v861_v19 = vmul.f32 %v3662_v54, %v754_v14  ;;  %v3664_v24 = vpop.eup %3663 }
 0x23a   :  { %v863_v22 = vadd.f32 %v862_v10, %v861_v19 }
 0x23c   :  { %3665 = vtanh.f32 %v863_v22  ;;  %v4561_v23 = vsel %vm871_vm10, %v863_v22, %v754_v14 }
 0x246   :  { %v3666_v16 = vpop.eup %3665 }
 0x247   :  { %v865_v18 = vmul.f32 %v3666_v16, %v3664_v24 }
 0x249   :  { %v4568_v25 = vsel %vm871_vm10, %v865_v18, %v753_v12 }
 0x24a   :  { %v874_v1 = vpack.c.bf16 %v4568_v25, %v4568_v25 }
 0x24c   :  { %908 = vmatmul.mubr.bf16.vlgmr.msra.gmra.mrb[24].mxu0 %v874_v1  ;;  %949 = vmatmul.mubr.bf16.vlgmr.msra.gmra.mrb[24].mxu1 %v874_v1  ;;  %v4610_v1 = vpop.permute.xlu1 %988 }
 0x24d   :  { %995 = vmatpush1.bf16.msra.mxu0 %v4140_v36  ;;  %1036 = vmatpush1.bf16.msra.mxu1 %v4145_v37  ;;  %6061 = vst [vmem:[#allocation5_spill] sm:$0xff] %v4610_v1  ;;  %vm990_vm11 = vcmp.eq.s32.totalorder %v4610_v1, 1 }
 0x24e   :  { %996 = vmatprep.subr.bf16.mxu0 %v4152_v38  ;;  %1037 = vmatprep.subr.bf16.mxu1 %v4157_v39 }
 0x24f   :  { %1026 = vmatprep.mubr.bf16.mxu0 %v6057_v13  ;;  %1067 = vmatprep.mubr.bf16.mxu1 %v6057_v13 }
 0x251   :  { %997 = vmatpush1.bf16.msra.mxu0 %v4162_v40  ;;  %1038 = vmatpush1.bf16.msra.mxu1 %v4169_v41 }
 0x252   :  { %998 = vmatprep.subr.bf16.mxu0 %v4176_v42  ;;  %1039 = vmatprep.subr.bf16.mxu1 %v4181_v43 }
 0x255   :  { %999 = vmatpush1.bf16.msra.mxu0 %v4191_v45  ;;  %1040 = vmatpush1.bf16.msra.mxu1 %v4196_v46 }
 0x256   :  { %1000 = vmatprep.subr.bf16.mxu0 %v4203_v47  ;;  %1041 = vmatprep.subr.bf16.mxu1 %v4210_v48 }
 0x259   :  { %1001 = vmatpush1.bf16.msra.mxu0 %v4215_v49  ;;  %1042 = vmatpush1.bf16.msra.mxu1 %v4220_v50 }
 0x25a   :  { %1002 = vmatprep.subr.bf16.mxu0 %v4227_v51  ;;  %1043 = vmatprep.subr.bf16.mxu1 %v4234_v52 }
 0x25d   :  { %1003 = vmatpush1.bf16.msra.mxu0 %v4252_v55  ;;  %1044 = vmatpush1.bf16.msra.mxu1 %v4257_v56 }
 0x25e   :  { %1004 = vmatprep.subr.bf16.mxu0 %v4265_v58  ;;  %1045 = vmatprep.subr.bf16.mxu1 %v4270_v59 }
 0x261   :  { %1005 = vmatpush1.bf16.msra.mxu0 %v4278_v60  ;;  %1046 = vmatpush1.bf16.msra.mxu1 %v4283_v61 }
 0x262   :  { %1006 = vmatprep.subr.bf16.mxu0 %v4291_v63  ;;  %1047 = vmatprep.subr.bf16.mxu1 %v4296_v0 }
 0x265   :  { %1007 = vmatpush1.bf16.msra.mxu0 %v4308_v3  ;;  %1048 = vmatpush1.bf16.msra.mxu1 %v4313_v4 }
 0x266   :  { %1008 = vmatprep.subr.bf16.mxu0 %v4320_v5  ;;  %1049 = vmatprep.subr.bf16.mxu1 %v4325_v6 }
 0x269   :  { %1009 = vmatpush1.bf16.msra.mxu0 %v4333_v7  ;;  %1050 = vmatpush1.bf16.msra.mxu1 %v4338_v8 }
 0x26a   :  { %1113 = vmatprep.subr.bf16.mxu0 %v4127_v33  ;;  %1154 = vmatprep.subr.bf16.mxu1 %v4132_v34 }
 0x31f   :  { %v909_v26 = vpop.f32.mrb[24].mxu0  ;;  %v950_v53 = vpop.f32.mrb[24].mxu1 }
 0x320   :  { %v957_v27 = vadd.f32 %v909_v26, %v4422_v62  ;;  %v959_v2 = vadd.f32 %v950_v53, %v4425_v9  ;;  %v911_v17 = vpop.f32.mrb[25].mxu0  ;;  %v952_v32 = vpop.f32.mrb[25].mxu1 }
 0x321   :  { %v958_v29 = vadd.f32 %v911_v17, %v6059_v15  ;;  %v960_v35 = vadd.f32 %v952_v32, %v6060_v31  ;;  %v913_v28 = vpop.f32.mrb[26].mxu0  ;;  %v954_v44 = vpop.f32.mrb[26].mxu1 }
 0x322   :  { %v3261_v54 = vmul.f32 -1.442695, %v957_v27  ;;  %v914_v14 = vpop.f32.mrb[27].mxu0  ;;  %v955_v10 = vpop.f32.mrb[27].mxu1 }
 0x323   :  { %v3262_v20 = vmul.f32 -1.442695, %v958_v29  ;;  %v3263_v19 = vmul.f32 -1.442695, %v960_v35 }
 0x324   :  { %3667 = vpow2.f32 %v3261_v54  ;;  %v6065_v54 = vld [vmem:[#allocation10_spill] sm:$0xff] }
 0x325   :  { %3669 = vpow2.f32 %v3262_v20 }
 0x326   :  { %3671 = vpow2.f32 %v3263_v19 }
 0x327   :  { %3673 = vtanh.f32 %v959_v2 }
 0x32e   :  { %v3668_v22 = vpop.eup %3667 }
 0x32f   :  { %v3670_v24 = vpop.eup %3669  ;;  %v964_v62 = vadd.f32 1.0, %v3668_v22 }
 0x330   :  { %v970_v9 = vadd.f32 1.0, %v3670_v24  ;;  %v3672_v16 = vpop.eup %3671 }
 0x331   :  { %3675 = vrcp.f32 %v964_v62  ;;  %v3674_v18 = vpop.eup %3673  ;;  %v977_v53 = vadd.f32 1.0, %v3672_v16 }
 0x332   :  { %3677 = vrcp.f32 %v970_v9 }
 0x333   :  { %3679 = vrcp.f32 %v977_v53 }
 0x33b   :  { %v3676_v12 = vpop.eup %3675 }
 0x33c   :  { %v3678_v26 = vpop.eup %3677  ;;  %v981_v27 = vmul.f32 %v3676_v12, %v3674_v18 }
 0x33d   :  { %v980_v17 = vmul.f32 %v3678_v26, %v4561_v23  ;;  %v3680_v15 = vpop.eup %3679 }
 0x33f   :  { %v982_v32 = vadd.f32 %v981_v27, %v980_v17 }
 0x341   :  { %3681 = vtanh.f32 %v982_v32  ;;  %v4617_v2 = vsel %vm990_vm11, %v982_v32, %v4561_v23  ;;  %v6064_v23 = vld [vmem:[#allocation9_spill] sm:$0xff] }
 0x34b   :  { %v3682_v29 = vpop.eup %3681 }
 0x34c   :  { %v984_v31 = vmul.f32 %v3682_v29, %v3680_v15  ;;  %v4665_v29 = vpop.permute.xlu1 %1107 }
 0x34d   :  { %6066 = vst [vmem:[#allocation6_spill] sm:$0xff] %v4665_v29  ;;  %vm1109_vm12 = vcmp.eq.s32.totalorder %v4665_v29, 1 }
 0x34e   :  { %v4622_v35 = vsel %vm990_vm11, %v984_v31, %v4568_v25 }
 0x34f   :  { %v993_v28 = vpack.c.bf16 %v4622_v35, %v4622_v35 }
 0x351   :  { %1027 = vmatmul.mubr.bf16.vlgmr.msra.gmra.mrb[28].mxu0 %v993_v28  ;;  %1068 = vmatmul.mubr.bf16.vlgmr.msra.gmra.mrb[28].mxu1 %v993_v28 }
 0x352   :  { %1114 = vmatpush1.bf16.msra.mxu0 %v4140_v36  ;;  %1155 = vmatpush1.bf16.msra.mxu1 %v4145_v37 }
 0x353   :  { %1115 = vmatprep.subr.bf16.mxu0 %v4152_v38  ;;  %1156 = vmatprep.subr.bf16.mxu1 %v4157_v39  ;;  %v6062_v38 = vld [vmem:[#allocation7_spill] sm:$0xff] }
 0x354   :  { %1145 = vmatprep.mubr.bf16.mxu0 %v6057_v13  ;;  %1186 = vmatprep.mubr.bf16.mxu1 %v6057_v13 }
 0x356   :  { %1116 = vmatpush1.bf16.msra.mxu0 %v4162_v40  ;;  %1157 = vmatpush1.bf16.msra.mxu1 %v4169_v41  ;;  %v6063_v40 = vld [vmem:[#allocation8_spill] sm:$0xff] }
 0x357   :  { %1117 = vmatprep.subr.bf16.mxu0 %v4176_v42  ;;  %1158 = vmatprep.subr.bf16.mxu1 %v4181_v43 }
 0x35a   :  { %1118 = vmatpush1.bf16.msra.mxu0 %v4191_v45  ;;  %1159 = vmatpush1.bf16.msra.mxu1 %v4196_v46 }
 0x35b   :  { %1119 = vmatprep.subr.bf16.mxu0 %v4203_v47  ;;  %1160 = vmatprep.subr.bf16.mxu1 %v4210_v48 }
 0x35e   :  { %1120 = vmatpush1.bf16.msra.mxu0 %v4215_v49  ;;  %1161 = vmatpush1.bf16.msra.mxu1 %v4220_v50 }
 0x35f   :  { %1121 = vmatprep.subr.bf16.mxu0 %v4227_v51  ;;  %1162 = vmatprep.subr.bf16.mxu1 %v4234_v52 }
 0x362   :  { %1122 = vmatpush1.bf16.msra.mxu0 %v4252_v55  ;;  %1163 = vmatpush1.bf16.msra.mxu1 %v4257_v56 }
 0x363   :  { %1123 = vmatprep.subr.bf16.mxu0 %v4265_v58  ;;  %1164 = vmatprep.subr.bf16.mxu1 %v4270_v59 }
 0x366   :  { %1124 = vmatpush1.bf16.msra.mxu0 %v4278_v60  ;;  %1165 = vmatpush1.bf16.msra.mxu1 %v4283_v61 }
 0x367   :  { %1125 = vmatprep.subr.bf16.mxu0 %v4291_v63  ;;  %1166 = vmatprep.subr.bf16.mxu1 %v4296_v0 }
 0x36a   :  { %1126 = vmatpush1.bf16.msra.mxu0 %v4308_v3  ;;  %1167 = vmatpush1.bf16.msra.mxu1 %v4313_v4 }
 0x36b   :  { %1127 = vmatprep.subr.bf16.mxu0 %v4320_v5  ;;  %1168 = vmatprep.subr.bf16.mxu1 %v4325_v6 }
 0x36e   :  { %1128 = vmatpush1.bf16.msra.mxu0 %v4333_v7  ;;  %1169 = vmatpush1.bf16.msra.mxu1 %v4338_v8 }
 0x36f   :  { %1232 = vmatprep.subr.bf16.mxu0 %v4127_v33  ;;  %1273 = vmatprep.subr.bf16.mxu1 %v4132_v34 }
 0x424   :  { %v1028_v36 = vpop.f32.mrb[28].mxu0  ;;  %v1069_v37 = vpop.f32.mrb[28].mxu1 }
 0x425   :  { %v1076_v39 = vadd.f32 %v1028_v36, %v6062_v38  ;;  %v1078_v41 = vadd.f32 %v1069_v37, %v6063_v40  ;;  %v1030_v42 = vpop.f32.mrb[29].mxu0  ;;  %v1071_v43 = vpop.f32.mrb[29].mxu1 }
 0x426   :  { %v1077_v44 = vadd.f32 %v1030_v42, %v6064_v23  ;;  %v1079_v14 = vadd.f32 %v1071_v43, %v6065_v54  ;;  %v1032_v10 = vpop.f32.mrb[30].mxu0  ;;  %v1073_v20 = vpop.f32.mrb[30].mxu1  ;;  %v4695_v42 = vld [vmem:[%s5996_s2 + $0x24] ss:$16 sps:$4 sm:$0xff]   ;;  %v4701_v43 = vld [vmem:[%s5996_s2 + $0x2c] ss:$16 sps:$4 sm:$0xff]  }
 0x427   :  { %v3264_v19 = vmul.f32 -1.442695, %v1076_v39  ;;  %v1033_v22 = vpop.f32.mrb[31].mxu0  ;;  %v1074_v24 = vpop.f32.mrb[31].mxu1  ;;  %v4709_v23 = vld [vmem:[%s5996_s2 + $0x20] ss:$16 sps:$4 sm:$0xff]  }
 0x428   :  { %v3265_v33 = vmul.f32 -1.442695, %v1077_v44  ;;  %v3266_v34 = vmul.f32 -1.442695, %v1079_v14  ;;  %v4715_v44 = vld [vmem:[%s5996_s2 + $0x28] ss:$16 sps:$4 sm:$0xff]  }
 0x429   :  { %3683 = vpow2.f32 %v3264_v19  ;;  %v4721_v54 = vld [vmem:[%s5996_s2 + $0x44] ss:$16 sps:$4 sm:$0xff]   ;;  %v4727_v14 = vld [vmem:[%s5996_s2 + $0x4c] ss:$16 sps:$4 sm:$0xff]  }
 0x42a   :  { %3685 = vpow2.f32 %v3265_v33 }
 0x42b   :  { %3687 = vpow2.f32 %v3266_v34 }
 0x42c   :  { %3689 = vtanh.f32 %v1078_v41  ;;  %v4683_v41 = vld [vmem:[%s5996_s2] ss:$16 sps:$4 sm:$0xff]  }
 0x433   :  { %v3684_v62 = vpop.eup %3683 }
 0x434   :  { %v3686_v9 = vpop.eup %3685  ;;  %v1083_v16 = vadd.f32 1.0, %v3684_v62 }
 0x435   :  { %v1089_v18 = vadd.f32 1.0, %v3686_v9  ;;  %v3688_v12 = vpop.eup %3687 }
 0x436   :  { %3691 = vrcp.f32 %v1083_v16  ;;  %v3690_v26 = vpop.eup %3689  ;;  %v1096_v32 = vadd.f32 1.0, %v3688_v12 }
 0x437   :  { %3693 = vrcp.f32 %v1089_v18  ;;  %v4769_v18 = vpop.permute.xlu0 %1226 }
 0x438   :  { %3695 = vrcp.f32 %v1096_v32  ;;  %6071 = vst [vmem:[#allocation7_spill] sm:$0xff] %v4769_v18  ;;  %vm1228_vm13 = vcmp.eq.s32.totalorder %v4769_v18, 1 }
 0x440   :  { %v3692_v53 = vpop.eup %3691 }
 0x441   :  { %v3694_v27 = vpop.eup %3693  ;;  %v1100_v17 = vmul.f32 %v3692_v53, %v3690_v26 }
 0x442   :  { %v1099_v15 = vmul.f32 %v3694_v27, %v4617_v2  ;;  %v3696_v36 = vpop.eup %3695 }
 0x444   :  { %v1101_v31 = vadd.f32 %v1100_v17, %v1099_v15 }
 0x446   :  { %3697 = vtanh.f32 %v1101_v31  ;;  %v4671_v28 = vsel %vm1109_vm12, %v1101_v31, %v4617_v2  ;;  %v4689_v2 = vld [vmem:[%s5996_s2 + $0x8] ss:$16 sps:$4 sm:$0xff]   ;;  %v4797_v31 = vld [vmem:[%s5996_s2 + $0x40] ss:$16 sps:$4 sm:$0xff]  }
 0x450   :  { %v3698_v37 = vpop.eup %3697 }
 0x451   :  { %v1103_v38 = vmul.f32 %v3698_v37, %v3696_v36  ;;  %v4809_v36 = vld [vmem:[%s5996_s2 + $0x64] ss:$16 sps:$4 sm:$0xff]   ;;  %v4815_v37 = vld [vmem:[%s5996_s2 + $0x6c] ss:$16 sps:$4 sm:$0xff]  }
 0x453   :  { %v4676_v39 = vsel %vm1109_vm12, %v1103_v38, %v4622_v35  ;;  %v4821_v38 = vld [vmem:[%s5996_s2 + $0x60] ss:$16 sps:$4 sm:$0xff]  }
 0x454   :  { %v1112_v40 = vpack.c.bf16 %v4676_v39, %v4676_v39 }
 0x456   :  { %1146 = vmatmul.mubr.bf16.vlgmr.msra.gmra.mrb[32].mxu0 %v1112_v40  ;;  %1187 = vmatmul.mubr.bf16.vlgmr.msra.gmra.mrb[32].mxu1 %v1112_v40  ;;  %v4827_v40 = vld [vmem:[%s5996_s2 + $0x68] ss:$16 sps:$4 sm:$0xff]  }
 0x457   :  { %1233 = vmatpush1.bf16.msra.mxu0 %v4683_v41  ;;  %1274 = vmatpush1.bf16.msra.mxu1 %v4689_v2 }
 0x458   :  { %1234 = vmatprep.subr.bf16.mxu0 %v4695_v42  ;;  %1275 = vmatprep.subr.bf16.mxu1 %v4701_v43 }
 0x459   :  { %1264 = vmatprep.mubr.bf16.mxu0 %v6057_v13  ;;  %1305 = vmatprep.mubr.bf16.mxu1 %v6057_v13 }
 0x45b   :  { %1235 = vmatpush1.bf16.msra.mxu0 %v4709_v23  ;;  %1276 = vmatpush1.bf16.msra.mxu1 %v4715_v44 }
 0x45c   :  { %1236 = vmatprep.subr.bf16.mxu0 %v4721_v54  ;;  %1277 = vmatprep.subr.bf16.mxu1 %v4727_v14 }
 0x45f   :  { %1237 = vmatpush1.bf16.msra.mxu0 %v4191_v45  ;;  %1278 = vmatpush1.bf16.msra.mxu1 %v4196_v46  ;;  %v4755_v45 = vld [vmem:[%s5996_s2 + $0x4] ss:$16 sps:$4 sm:$0xff]   ;;  %v4761_v46 = vld [vmem:[%s5996_s2 + $0xc] ss:$16 sps:$4 sm:$0xff]  }
 0x460   :  { %1238 = vmatprep.subr.bf16.mxu0 %v4203_v47  ;;  %1279 = vmatprep.subr.bf16.mxu1 %v4210_v48 }
 0x463   :  { %1239 = vmatpush1.bf16.msra.mxu0 %v4215_v49  ;;  %1280 = vmatpush1.bf16.msra.mxu1 %v4220_v50  ;;  %v6067_v49 = vld [vmem:[#allocation11_spill] sm:$0xff] }
 0x464   :  { %1240 = vmatprep.subr.bf16.mxu0 %v4227_v51  ;;  %1281 = vmatprep.subr.bf16.mxu1 %v4234_v52  ;;  %v6068_v51 = vld [vmem:[#allocation12_spill] sm:$0xff] }
 0x467   :  { %1241 = vmatpush1.bf16.msra.mxu0 %v4252_v55  ;;  %1282 = vmatpush1.bf16.msra.mxu1 %v4257_v56 }
 0x468   :  { %1242 = vmatprep.subr.bf16.mxu0 %v4265_v58  ;;  %1283 = vmatprep.subr.bf16.mxu1 %v4270_v59  ;;  %v6069_v58 = vld [vmem:[#allocation13_spill] sm:$0xff] }
 0x46b   :  { %1243 = vmatpush1.bf16.msra.mxu0 %v4278_v60  ;;  %1284 = vmatpush1.bf16.msra.mxu1 %v4283_v61  ;;  %v6070_v60 = vld [vmem:[#allocation14_spill] sm:$0xff] }
 0x46c   :  { %1244 = vmatprep.subr.bf16.mxu0 %v4291_v63  ;;  %1285 = vmatprep.subr.bf16.mxu1 %v4296_v0 }
 0x46f   :  { %1245 = vmatpush1.bf16.msra.mxu0 %v4308_v3  ;;  %1286 = vmatpush1.bf16.msra.mxu1 %v4313_v4 }
 0x470   :  { %1246 = vmatprep.subr.bf16.mxu0 %v4320_v5  ;;  %1287 = vmatprep.subr.bf16.mxu1 %v4325_v6 }
 0x473   :  { %1247 = vmatpush1.bf16.msra.mxu0 %v4333_v7  ;;  %1288 = vmatpush1.bf16.msra.mxu1 %v4338_v8 }
 0x474   :  { %1351 = vmatprep.subr.bf16.mxu0 %v4755_v45  ;;  %1392 = vmatprep.subr.bf16.mxu1 %v4761_v46 }
 0x529   :  { %v1147_v47 = vpop.f32.mrb[32].mxu0  ;;  %v1188_v48 = vpop.f32.mrb[32].mxu1 }
 0x52a   :  { %v1195_v50 = vadd.f32 %v1147_v47, %v6067_v49  ;;  %v1197_v52 = vadd.f32 %v1188_v48, %v6068_v51  ;;  %v1149_v55 = vpop.f32.mrb[33].mxu0  ;;  %v1190_v56 = vpop.f32.mrb[33].mxu1  ;;  %v4833_v47 = vld [vmem:[%s5996_s2 + $0x84] ss:$16 sps:$4 sm:$0xff]   ;;  %v4839_v48 = vld [vmem:[%s5996_s2 + $0x8c] ss:$16 sps:$4 sm:$0xff]  }
 0x52b   :  { %v1196_v59 = vadd.f32 %v1149_v55, %v6069_v58  ;;  %v1198_v61 = vadd.f32 %v1190_v56, %v6070_v60  ;;  %v1151_v63 = vpop.f32.mrb[34].mxu0  ;;  %v1192_v0 = vpop.f32.mrb[34].mxu1  ;;  %v4845_v49 = vld [vmem:[%s5996_s2 + $0x80] ss:$16 sps:$4 sm:$0xff]   ;;  %v4857_v51 = vld [vmem:[%s5996_s2 + $0xa4] ss:$16 sps:$4 sm:$0xff]  }
 0x52c   :  { %v3267_v3 = vmul.f32 -1.442695, %v1195_v50  ;;  %v1152_v4 = vpop.f32.mrb[35].mxu0  ;;  %v1193_v5 = vpop.f32.mrb[35].mxu1  ;;  %v4851_v50 = vld [vmem:[%s5996_s2 + $0x88] ss:$16 sps:$4 sm:$0xff]  }
 0x52d   :  { %v3268_v6 = vmul.f32 -1.442695, %v1196_v59  ;;  %v3269_v7 = vmul.f32 -1.442695, %v1198_v61  ;;  %v4869_v55 = vld [vmem:[%s5996_s2 + $0xa0] ss:$16 sps:$4 sm:$0xff]  }
 0x52e   :  { %3699 = vpow2.f32 %v3267_v3  ;;  %v4875_v56 = vld [vmem:[%s5996_s2 + $0xa8] ss:$16 sps:$4 sm:$0xff]   ;;  %v4881_v58 = vld [vmem:[%s5996_s2 + $0xc4] ss:$16 sps:$4 sm:$0xff]   ;;  %v4887_v59 = vld [vmem:[%s5996_s2 + $0xcc] ss:$16 sps:$4 sm:$0xff]  }
 0x52f   :  { %3701 = vpow2.f32 %v3268_v6  ;;  %v4893_v60 = vld [vmem:[%s5996_s2 + $0xc0] ss:$16 sps:$4 sm:$0xff]   ;;  %v4899_v61 = vld [vmem:[%s5996_s2 + $0xc8] ss:$16 sps:$4 sm:$0xff]   ;;  %v4905_v63 = vld [vmem:[%s5996_s2 + $0xe4] ss:$16 sps:$4 sm:$0xff]  }
 0x530   :  { %3703 = vpow2.f32 %v3269_v7  ;;  %v4911_v0 = vld [vmem:[%s5996_s2 + $0xec] ss:$16 sps:$4 sm:$0xff]   ;;  %v4917_v3 = vld [vmem:[%s5996_s2 + $0xe0] ss:$16 sps:$4 sm:$0xff]   ;;  %v4923_v4 = vld [vmem:[%s5996_s2 + $0xe8] ss:$16 sps:$4 sm:$0xff]  }
 0x531   :  { %3705 = vtanh.f32 %v1197_v52  ;;  %v4863_v52 = vld [vmem:[%s5996_s2 + $0xac] ss:$16 sps:$4 sm:$0xff]  }
 0x532   :  { %v6072_v7 = vld [vmem:[#allocation15_spill] sm:$0xff] }
 0x538   :  { %v3700_v8 = vpop.eup %3699 }
 0x539   :  { %v3702_v10 = vpop.eup %3701  ;;  %v1202_v20 = vadd.f32 1.0, %v3700_v8 }
 0x53a   :  { %v1208_v19 = vadd.f32 1.0, %v3702_v10  ;;  %v3704_v22 = vpop.eup %3703  ;;  %v6073_v10 = vld [vmem:[#allocation16_spill] sm:$0xff] }
 0x53b   :  { %3707 = vrcp.f32 %v1202_v20  ;;  %v3706_v24 = vpop.eup %3705  ;;  %v1215_v9 = vadd.f32 1.0, %v3704_v22 }
 0x53c   :  { %3709 = vrcp.f32 %v1208_v19 }
 0x53d   :  { %3711 = vrcp.f32 %v1215_v9 }
 0x545   :  { %v3708_v33 = vpop.eup %3707 }
 0x546   :  { %v3710_v34 = vpop.eup %3709  ;;  %v1219_v62 = vmul.f32 %v3708_v33, %v3706_v24  ;;  %v6074_v24 = vld [vmem:[#allocation17_spill] sm:$0xff] }
 0x547   :  { %v1218_v16 = vmul.f32 %v3710_v34, %v4671_v28  ;;  %v3712_v53 = vpop.eup %3711  ;;  %v6075_v34 = vld [vmem:[#allocation18_spill] sm:$0xff] }
 0x549   :  { %v1220_v12 = vadd.f32 %v1219_v62, %v1218_v16 }
 0x54b   :  { %3713 = vtanh.f32 %v1220_v12  ;;  %v4775_v26 = vsel %vm1228_vm13, %v1220_v12, %v4671_v28  ;;  %v4803_v28 = vld [vmem:[%s5996_s2 + $0x48] ss:$16 sps:$4 sm:$0xff]  }
 0x555   :  { %v3714_v27 = vpop.eup %3713 }
 0x556   :  { %v1222_v17 = vmul.f32 %v3714_v27, %v3712_v53 }
 0x558   :  { %v4780_v32 = vsel %vm1228_vm13, %v1222_v17, %v4676_v39 }
 0x559   :  { %v1231_v15 = vpack.c.bf16 %v4780_v32, %v4780_v32 }
 0x55b   :  { %1265 = vmatmul.mubr.bf16.vlgmr.msra.gmra.mrb[36].mxu0 %v1231_v15  ;;  %1306 = vmatmul.mubr.bf16.vlgmr.msra.gmra.mrb[36].mxu1 %v1231_v15 }
 0x55c   :  { %1352 = vmatpush1.bf16.msra.mxu0 %v4683_v41  ;;  %1393 = vmatpush1.bf16.msra.mxu1 %v4689_v2 }
 0x55d   :  { %1353 = vmatprep.subr.bf16.mxu0 %v4695_v42  ;;  %1394 = vmatprep.subr.bf16.mxu1 %v4701_v43 }
 0x55e   :  { %1383 = vmatprep.mubr.bf16.mxu0 %v6057_v13  ;;  %1424 = vmatprep.mubr.bf16.mxu1 %v6057_v13 }
 0x560   :  { %1354 = vmatpush1.bf16.msra.mxu0 %v4709_v23  ;;  %1395 = vmatpush1.bf16.msra.mxu1 %v4715_v44 }
 0x561   :  { %1355 = vmatprep.subr.bf16.mxu0 %v4721_v54  ;;  %1396 = vmatprep.subr.bf16.mxu1 %v4727_v14 }
 0x564   :  { %1356 = vmatpush1.bf16.msra.mxu0 %v4797_v31  ;;  %1397 = vmatpush1.bf16.msra.mxu1 %v4803_v28 }
 0x565   :  { %1357 = vmatprep.subr.bf16.mxu0 %v4809_v36  ;;  %1398 = vmatprep.subr.bf16.mxu1 %v4815_v37 }
 0x568   :  { %1358 = vmatpush1.bf16.msra.mxu0 %v4821_v38  ;;  %1399 = vmatpush1.bf16.msra.mxu1 %v4827_v40 }
 0x569   :  { %1359 = vmatprep.subr.bf16.mxu0 %v4833_v47  ;;  %1400 = vmatprep.subr.bf16.mxu1 %v4839_v48 }
 0x56c   :  { %1360 = vmatpush1.bf16.msra.mxu0 %v4845_v49  ;;  %1401 = vmatpush1.bf16.msra.mxu1 %v4851_v50 }
 0x56d   :  { %1361 = vmatprep.subr.bf16.mxu0 %v4857_v51  ;;  %1402 = vmatprep.subr.bf16.mxu1 %v4863_v52 }
 0x570   :  { %1362 = vmatpush1.bf16.msra.mxu0 %v4869_v55  ;;  %1403 = vmatpush1.bf16.msra.mxu1 %v4875_v56 }
 0x571   :  { %1363 = vmatprep.subr.bf16.mxu0 %v4881_v58  ;;  %1404 = vmatprep.subr.bf16.mxu1 %v4887_v59 }
 0x574   :  { %1364 = vmatpush1.bf16.msra.mxu0 %v4893_v60  ;;  %1405 = vmatpush1.bf16.msra.mxu1 %v4899_v61 }
 0x575   :  { %1365 = vmatprep.subr.bf16.mxu0 %v4905_v63  ;;  %1406 = vmatprep.subr.bf16.mxu1 %v4911_v0 }
 0x578   :  { %1366 = vmatpush1.bf16.msra.mxu0 %v4917_v3  ;;  %1407 = vmatpush1.bf16.msra.mxu1 %v4923_v4 }
 0x579   :  { %1470 = vmatprep.subr.bf16.mxu0 %v4755_v45  ;;  %1511 = vmatprep.subr.bf16.mxu1 %v4761_v46 }
 0x62e   :  { %v1266_v5 = vpop.f32.mrb[36].mxu0  ;;  %v1307_v6 = vpop.f32.mrb[36].mxu1 }
 0x62f   :  { %v1314_v8 = vadd.f32 %v1266_v5, %v6072_v7  ;;  %v1316_v20 = vadd.f32 %v1307_v6, %v6073_v10  ;;  %v1268_v19 = vpop.f32.mrb[37].mxu0  ;;  %v1309_v22 = vpop.f32.mrb[37].mxu1 }
 0x630   :  { %v1315_v33 = vadd.f32 %v1268_v19, %v6074_v24  ;;  %v1317_v62 = vadd.f32 %v1309_v22, %v6075_v34  ;;  %v1270_v9 = vpop.f32.mrb[38].mxu0  ;;  %v1311_v16 = vpop.f32.mrb[38].mxu1 }
 0x631   :  { %v3270_v12 = vmul.f32 -1.442695, %v1314_v8  ;;  %v1271_v53 = vpop.f32.mrb[39].mxu0  ;;  %v1312_v27 = vpop.f32.mrb[39].mxu1 }
 0x632   :  { %v3271_v45 = vmul.f32 -1.442695, %v1315_v33  ;;  %v3272_v46 = vmul.f32 -1.442695, %v1317_v62  ;;  %v4933_v33 = vpop.permute.xlu1 %1345 }
 0x633   :  { %3715 = vpow2.f32 %v3270_v12  ;;  %6076 = vst [vmem:[#allocation8_spill] sm:$0xff] %v4933_v33  ;;  %vm1347_vm14 = vcmp.eq.s32.totalorder %v4933_v33, 1 }
 0x634   :  { %3717 = vpow2.f32 %v3271_v45  ;;  %v4990_v45 = vpop.permute.xlu0 %1464 }
 0x635   :  { %3719 = vpow2.f32 %v3272_v46  ;;  %6081 = vst [vmem:[#allocation9_spill] sm:$0xff] %v4990_v45  ;;  %vm1466_vm15 = vcmp.eq.s32.totalorder %v4990_v45, 1 }
 0x636   :  { %3721 = vtanh.f32 %v1316_v20 }
 0x63d   :  { %v3716_v17 = vpop.eup %3715 }
 0x63e   :  { %v3718_v15 = vpop.eup %3717  ;;  %v1321_v5 = vadd.f32 1.0, %v3716_v17 }
 0x63f   :  { %v1327_v6 = vadd.f32 1.0, %v3718_v15  ;;  %v3720_v7 = vpop.eup %3719 }
 0x640   :  { %3723 = vrcp.f32 %v1321_v5  ;;  %v3722_v10 = vpop.eup %3721  ;;  %v1334_v8 = vadd.f32 1.0, %v3720_v7 }
 0x641   :  { %3725 = vrcp.f32 %v1327_v6 }
 0x642   :  { %3727 = vrcp.f32 %v1334_v8  ;;  %v3539_v8 = vld [vmem:[%s5999_s4 + $0x24] ss:$16 sps:$4 sm:$0xff]  }
 0x64a   :  { %v3724_v19 = vpop.eup %3723 }
 0x64b   :  { %v3726_v22 = vpop.eup %3725  ;;  %v1338_v24 = vmul.f32 %v3724_v19, %v3722_v10  ;;  %v3531_v10 = vld [vmem:[%s5999_s4] ss:$16 sps:$4 sm:$0xff]   ;;  %v3534_v19 = vld [vmem:[%s5999_s4 + $0x8] ss:$16 sps:$4 sm:$0xff]  }
 0x64c   :  { %v1337_v34 = vmul.f32 %v3726_v22, %v4775_v26  ;;  %v3728_v62 = vpop.eup %3727 }
 0x64e   :  { %v1339_v9 = vadd.f32 %v1338_v24, %v1337_v34  ;;  %v3542_v34 = vld [vmem:[%s5999_s4 + $0x2c] ss:$16 sps:$4 sm:$0xff]  }
 0x650   :  { %3729 = vtanh.f32 %v1339_v9  ;;  %v4939_v20 = vsel %vm1347_vm14, %v1339_v9, %v4775_v26  ;;  %v3537_v9 = vld [vmem:[%s5999_s4 + $0x20] ss:$16 sps:$4 sm:$0xff]  }
 0x65a   :  { %v3730_v16 = vpop.eup %3729 }
 0x65b   :  { %v1341_v12 = vmul.f32 %v3730_v16, %v3728_v62  ;;  %v3545_v62 = vld [vmem:[%s5999_s4 + $0x44] ss:$16 sps:$4 sm:$0xff]   ;;  %v3548_v16 = vld [vmem:[%s5999_s4 + $0x4c] ss:$16 sps:$4 sm:$0xff]  }
 0x65d   :  { %v4944_v53 = vsel %vm1347_vm14, %v1341_v12, %v4780_v32  ;;  %v3543_v12 = vld [vmem:[%s5999_s4 + $0x40] ss:$16 sps:$4 sm:$0xff]  }
 0x65e   :  { %v1350_v27 = vpack.c.bf16 %v4944_v53, %v4944_v53 }
 0x660   :  { %1384 = vmatmul.mubr.bf16.vlgmr.msra.gmra.mrb[40].mxu0 %v1350_v27  ;;  %1425 = vmatmul.mubr.bf16.vlgmr.msra.gmra.mrb[40].mxu1 %v1350_v27  ;;  %v3546_v27 = vld [vmem:[%s5999_s4 + $0x48] ss:$16 sps:$4 sm:$0xff]  }
 0x661   :  { %1471 = vmatpush1.bf16.msra.mxu0 %v4683_v41  ;;  %1512 = vmatpush1.bf16.msra.mxu1 %v4689_v2  ;;  %v3533_v41 = vld [vmem:[%s5999_s4 + $0x4] ss:$16 sps:$4 sm:$0xff]   ;;  %v3536_v2 = vld [vmem:[%s5999_s4 + $0xc] ss:$16 sps:$4 sm:$0xff]  }
 0x662   :  { %1472 = vmatprep.subr.bf16.mxu0 %v4695_v42  ;;  %1513 = vmatprep.subr.bf16.mxu1 %v4701_v43 }
 0x663   :  { %1502 = vmatprep.mubr.bf16.mxu0 %v6057_v13  ;;  %1543 = vmatprep.mubr.bf16.mxu1 %v6057_v13 }
 0x665   :  { %1473 = vmatpush1.bf16.msra.mxu0 %v4709_v23  ;;  %1514 = vmatpush1.bf16.msra.mxu1 %v4715_v44  ;;  %v6077_v23 = vld [vmem:[#allocation19_spill] sm:$0xff] }
 0x666   :  { %1474 = vmatprep.subr.bf16.mxu0 %v4721_v54  ;;  %1515 = vmatprep.subr.bf16.mxu1 %v4727_v14  ;;  %v6078_v54 = vld [vmem:[#allocation20_spill] sm:$0xff] }
 0x669   :  { %1475 = vmatpush1.bf16.msra.mxu0 %v4797_v31  ;;  %1516 = vmatpush1.bf16.msra.mxu1 %v4803_v28  ;;  %v6079_v28 = vld [vmem:[#allocation21_spill] sm:$0xff] }
 0x66a   :  { %1476 = vmatprep.subr.bf16.mxu0 %v4809_v36  ;;  %1517 = vmatprep.subr.bf16.mxu1 %v4815_v37  ;;  %v6080_v37 = vld [vmem:[#allocation22_spill] sm:$0xff] }
 0x66d   :  { %1477 = vmatpush1.bf16.msra.mxu0 %v4821_v38  ;;  %1518 = vmatpush1.bf16.msra.mxu1 %v4827_v40 }
 0x66e   :  { %1478 = vmatprep.subr.bf16.mxu0 %v4833_v47  ;;  %1519 = vmatprep.subr.bf16.mxu1 %v4839_v48 }
 0x671   :  { %1479 = vmatpush1.bf16.msra.mxu0 %v4845_v49  ;;  %1520 = vmatpush1.bf16.msra.mxu1 %v4851_v50 }
 0x672   :  { %1480 = vmatprep.subr.bf16.mxu0 %v4857_v51  ;;  %1521 = vmatprep.subr.bf16.mxu1 %v4863_v52 }
 0x675   :  { %1481 = vmatpush1.bf16.msra.mxu0 %v4869_v55  ;;  %1522 = vmatpush1.bf16.msra.mxu1 %v4875_v56 }
 0x676   :  { %1482 = vmatprep.subr.bf16.mxu0 %v4881_v58  ;;  %1523 = vmatprep.subr.bf16.mxu1 %v4887_v59 }
 0x679   :  { %1483 = vmatpush1.bf16.msra.mxu0 %v4893_v60  ;;  %1524 = vmatpush1.bf16.msra.mxu1 %v4899_v61 }
 0x67a   :  { %1484 = vmatprep.subr.bf16.mxu0 %v4905_v63  ;;  %1525 = vmatprep.subr.bf16.mxu1 %v4911_v0 }
 0x67d   :  { %1485 = vmatpush1.bf16.msra.mxu0 %v4917_v3  ;;  %1526 = vmatpush1.bf16.msra.mxu1 %v4923_v4 }
 0x67e   :  { %1840 = vmatprep.subr.bf16.mxu0 %v3533_v41  ;;  %1913 = vmatprep.subr.bf16.mxu1 %v3536_v2  ;;  %v3551_v41 = vld [vmem:[%s5999_s4 + $0x64] ss:$16 sps:$4 sm:$0xff]   ;;  %v3554_v2 = vld [vmem:[%s5999_s4 + $0x6c] ss:$16 sps:$4 sm:$0xff]  }
 0x733   :  { %v1385_v42 = vpop.f32.mrb[40].mxu0  ;;  %v1426_v43 = vpop.f32.mrb[40].mxu1 }
 0x734   :  { %v1433_v44 = vadd.f32 %v1385_v42, %v6077_v23  ;;  %v1435_v14 = vadd.f32 %v1426_v43, %v6078_v54  ;;  %v1387_v26 = vpop.f32.mrb[41].mxu0  ;;  %v1428_v31 = vpop.f32.mrb[41].mxu1  ;;  %v3549_v42 = vld [vmem:[%s5999_s4 + $0x60] ss:$16 sps:$4 sm:$0xff]   ;;  %v3552_v43 = vld [vmem:[%s5999_s4 + $0x68] ss:$16 sps:$4 sm:$0xff]  }
 0x735   :  { %v1434_v36 = vadd.f32 %v1387_v26, %v6079_v28  ;;  %v1436_v38 = vadd.f32 %v1428_v31, %v6080_v37  ;;  %v1389_v40 = vpop.f32.mrb[42].mxu0  ;;  %v1430_v47 = vpop.f32.mrb[42].mxu1  ;;  %v3557_v23 = vld [vmem:[%s5999_s4 + $0x84] ss:$16 sps:$4 sm:$0xff]   ;;  %v3555_v54 = vld [vmem:[%s5999_s4 + $0x80] ss:$16 sps:$4 sm:$0xff]  }
 0x736   :  { %v3273_v48 = vmul.f32 -1.442695, %v1433_v44  ;;  %v1390_v49 = vpop.f32.mrb[43].mxu0  ;;  %v1431_v50 = vpop.f32.mrb[43].mxu1  ;;  %v3560_v44 = vld [vmem:[%s5999_s4 + $0x8c] ss:$16 sps:$4 sm:$0xff]  }
 0x737   :  { %v3274_v51 = vmul.f32 -1.442695, %v1434_v36  ;;  %v3275_v52 = vmul.f32 -1.442695, %v1436_v38  ;;  %v3563_v26 = vld [vmem:[%s5999_s4 + $0xa4] ss:$16 sps:$4 sm:$0xff]  }
 0x738   :  { %3731 = vpow2.f32 %v3273_v48  ;;  %v3566_v31 = vld [vmem:[%s5999_s4 + $0xac] ss:$16 sps:$4 sm:$0xff]   ;;  %v3561_v28 = vld [vmem:[%s5999_s4 + $0xa0] ss:$16 sps:$4 sm:$0xff]   ;;  %v3564_v36 = vld [vmem:[%s5999_s4 + $0xa8] ss:$16 sps:$4 sm:$0xff]  }
 0x739   :  { %3733 = vpow2.f32 %v3274_v51  ;;  %v3569_v37 = vld [vmem:[%s5999_s4 + $0xc4] ss:$16 sps:$4 sm:$0xff]   ;;  %v3572_v38 = vld [vmem:[%s5999_s4 + $0xcc] ss:$16 sps:$4 sm:$0xff]   ;;  %v3567_v40 = vld [vmem:[%s5999_s4 + $0xc0] ss:$16 sps:$4 sm:$0xff]  }
 0x73a   :  { %3735 = vpow2.f32 %v3275_v52  ;;  %v3570_v47 = vld [vmem:[%s5999_s4 + $0xc8] ss:$16 sps:$4 sm:$0xff]   ;;  %v3575_v48 = vld [vmem:[%s5999_s4 + $0xe4] ss:$16 sps:$4 sm:$0xff]   ;;  %v3578_v49 = vld [vmem:[%s5999_s4 + $0xec] ss:$16 sps:$4 sm:$0xff]   ;;  %v3384_v52 = vpack.c.bf16 %v4568_v25, %v4491_v57  ;;  %v1592_v57 = vpack.c.bf16 %v4944_v53, %v4780_v32 }
 0x73b   :  { %3737 = vtanh.f32 %v1435_v14  ;;  %v3558_v14 = vld [vmem:[%s5999_s4 + $0x88] ss:$16 sps:$4 sm:$0xff]   ;;  %v3573_v50 = vld [vmem:[%s5999_s4 + $0xe0] ss:$16 sps:$4 sm:$0xff]   ;;  %v5115_v25 = vld [vmem:[%s6000_s5 + $0x4] ss:$16 sps:$4 sm:$0xff]  }
 0x73c   :  { %v3576_v51 = vld [vmem:[%s5999_s4 + $0xe8] ss:$16 sps:$4 sm:$0xff]  }
 0x73d   :  { %v5131_v32 = vld [vmem:[%s6000_s5 + $0x8] ss:$16 sps:$4 sm:$0xff]  }
 0x742   :  { %v3732_v55 = vpop.eup %3731 }
 0x743   :  { %v3734_v56 = vpop.eup %3733  ;;  %v1440_v58 = vadd.f32 1.0, %v3732_v55  ;;  %v1591_v55 = vpack.c.bf16 %v4676_v39, %v4622_v35  ;;  %v5120_v35 = vld [vmem:[%s6000_s5 + $0xc] ss:$16 sps:$4 sm:$0xff]   ;;  %v5126_v39 = vld [vmem:[%s6000_s5] ss:$16 sps:$4 sm:$0xff]  }
 0x744   :  { %v1446_v59 = vadd.f32 1.0, %v3734_v56  ;;  %v3736_v60 = vpop.eup %3735  ;;  %v5144_v56 = vld [vmem:[%s6000_s5 + $0x2c] ss:$16 sps:$4 sm:$0xff]  }
 0x745   :  { %3739 = vrcp.f32 %v1440_v58  ;;  %v3738_v61 = vpop.eup %3737  ;;  %v1453_v4 = vadd.f32 1.0, %v3736_v60  ;;  %v5149_v58 = vld [vmem:[%s6000_s5 + $0x20] ss:$16 sps:$4 sm:$0xff]   ;;  %v5163_v60 = vld [vmem:[%s6000_s5 + $0x44] ss:$16 sps:$4 sm:$0xff]  }
 0x746   :  { %3741 = vrcp.f32 %v1446_v59  ;;  %v5154_v59 = vld [vmem:[%s6000_s5 + $0x28] ss:$16 sps:$4 sm:$0xff]  }
 0x747   :  { %3743 = vrcp.f32 %v1453_v4  ;;  %v5190_v4 = vld [vmem:[%s6000_s5 + $0x6c] ss:$16 sps:$4 sm:$0xff]  }
 0x74f   :  { %v3740_v63 = vpop.eup %3739 }
 0x750   :  { %v3742_v0 = vpop.eup %3741  ;;  %v1457_v3 = vmul.f32 %v3740_v63, %v3738_v61  ;;  %v5168_v61 = vld [vmem:[%s6000_s5 + $0x4c] ss:$16 sps:$4 sm:$0xff]   ;;  %v5173_v63 = vld [vmem:[%s6000_s5 + $0x40] ss:$16 sps:$4 sm:$0xff]  }
 0x751   :  { %v1456_v46 = vmul.f32 %v3742_v0, %v4939_v20  ;;  %v3744_v5 = vpop.eup %3743  ;;  %v5178_v0 = vld [vmem:[%s6000_s5 + $0x48] ss:$16 sps:$4 sm:$0xff]  }
 0x753   :  { %v1458_v17 = vadd.f32 %v1457_v3, %v1456_v46  ;;  %v5185_v3 = vld [vmem:[%s6000_s5 + $0x64] ss:$16 sps:$4 sm:$0xff]   ;;  %v5199_v46 = vld [vmem:[%s6000_s5 + $0x60] ss:$16 sps:$4 sm:$0xff]  }
 0x755   :  { %3745 = vtanh.f32 %v1458_v17  ;;  %v4997_v15 = vsel %vm1466_vm15, %v1458_v17, %v4939_v20  ;;  %v3540_v20 = vld [vmem:[%s5999_s4 + $0x28] ss:$16 sps:$4 sm:$0xff]  }
 0x756   :  { %v5204_v17 = vld [vmem:[%s6000_s5 + $0x68] ss:$16 sps:$4 sm:$0xff]  }
 0x75f   :  { %v3746_v6 = vpop.eup %3745 }
 0x760   :  { %v1460_v7 = vmul.f32 %v3746_v6, %v3744_v5  ;;  %v5211_v5 = vld [vmem:[%s6000_s5 + $0x84] ss:$16 sps:$4 sm:$0xff]   ;;  %v5216_v6 = vld [vmem:[%s6000_s5 + $0x8c] ss:$16 sps:$4 sm:$0xff]  }
 0x762   :  { %v5008_v22 = vsel %vm1466_vm15, %v1460_v7, %v4944_v53  ;;  %v5139_v53 = vld [vmem:[%s6000_s5 + $0x24] ss:$16 sps:$4 sm:$0xff]   ;;  %v5221_v7 = vld [vmem:[%s6000_s5 + $0x80] ss:$16 sps:$4 sm:$0xff]  }
 0x763   :  { %v1469_v24 = vpack.c.bf16 %v5008_v22, %v5008_v22 }
 0x765   :  { %1503 = vmatmul.mubr.bf16.vlgmr.msra.gmra.mrb[44].mxu0 %v1469_v24  ;;  %1544 = vmatmul.mubr.bf16.vlgmr.msra.gmra.mrb[44].mxu1 %v1469_v24  ;;  %v5238_v24 = vld [vmem:[%s6000_s5 + $0xac] ss:$16 sps:$4 sm:$0xff]  }
 0x766   :  { %1841 = vmatpush1.bf16.msra.mxu0 %v3531_v10  ;;  %1914 = vmatpush1.bf16.msra.mxu1 %v3534_v19  ;;  %v5226_v10 = vld [vmem:[%s6000_s5 + $0x88] ss:$16 sps:$4 sm:$0xff]   ;;  %v5233_v19 = vld [vmem:[%s6000_s5 + $0xa4] ss:$16 sps:$4 sm:$0xff]  }
 0x767   :  { %1842 = vmatprep.subr.bf16.mxu0 %v3539_v8  ;;  %1915 = vmatprep.subr.bf16.mxu1 %v3542_v34  ;;  %v5247_v8 = vld [vmem:[%s6000_s5 + $0xa0] ss:$16 sps:$4 sm:$0xff]   ;;  %v5252_v34 = vld [vmem:[%s6000_s5 + $0xa8] ss:$16 sps:$4 sm:$0xff]  }
 0x768   :  { %1872 = vmatprep.mubr.bf16.mxu0 %v6057_v13  ;;  %1945 = vmatprep.mubr.bf16.mxu1 %v6057_v13 }
 0x76a   :  { %1843 = vmatpush1.bf16.msra.mxu0 %v3537_v9  ;;  %1916 = vmatpush1.bf16.msra.mxu1 %v3540_v20  ;;  %v5259_v9 = vld [vmem:[%s6000_s5 + $0xc4] ss:$16 sps:$4 sm:$0xff]   ;;  %v5264_v20 = vld [vmem:[%s6000_s5 + $0xcc] ss:$16 sps:$4 sm:$0xff]  }
 0x76b   :  { %1844 = vmatprep.subr.bf16.mxu0 %v3545_v62  ;;  %1917 = vmatprep.subr.bf16.mxu1 %v3548_v16  ;;  %v5269_v62 = vld [vmem:[%s6000_s5 + $0xc0] ss:$16 sps:$4 sm:$0xff]   ;;  %v5274_v16 = vld [vmem:[%s6000_s5 + $0xc8] ss:$16 sps:$4 sm:$0xff]  }
 0x76e   :  { %1845 = vmatpush1.bf16.msra.mxu0 %v3543_v12  ;;  %1918 = vmatpush1.bf16.msra.mxu1 %v3546_v27  ;;  %v5281_v12 = vld [vmem:[%s6000_s5 + $0xe4] ss:$16 sps:$4 sm:$0xff]   ;;  %v5286_v27 = vld [vmem:[%s6000_s5 + $0xec] ss:$16 sps:$4 sm:$0xff]  }
 0x76f   :  { %1846 = vmatprep.subr.bf16.mxu0 %v3551_v41  ;;  %1919 = vmatprep.subr.bf16.mxu1 %v3554_v2  ;;  %v5293_v41 = vld [vmem:[%s6000_s5 + $0xe0] ss:$16 sps:$4 sm:$0xff]   ;;  %v5298_v2 = vld [vmem:[%s6000_s5 + $0xe8] ss:$16 sps:$4 sm:$0xff]  }
 0x772   :  { %1847 = vmatpush1.bf16.msra.mxu0 %v3549_v42  ;;  %1920 = vmatpush1.bf16.msra.mxu1 %v3552_v43 }
 0x773   :  { %1848 = vmatprep.subr.bf16.mxu0 %v3557_v23  ;;  %1921 = vmatprep.subr.bf16.mxu1 %v3560_v44  ;;  %v6082_v23 = vld [vmem:[#allocation23_spill] sm:$0xff] }
 0x776   :  { %1849 = vmatpush1.bf16.msra.mxu0 %v3555_v54  ;;  %1922 = vmatpush1.bf16.msra.mxu1 %v3558_v14  ;;  %v6083_v54 = vld [vmem:[#allocation24_spill] sm:$0xff] }
 0x777   :  { %1850 = vmatprep.subr.bf16.mxu0 %v3563_v26  ;;  %1923 = vmatprep.subr.bf16.mxu1 %v3566_v31 }
 0x77a   :  { %1851 = vmatpush1.bf16.msra.mxu0 %v3561_v28  ;;  %1924 = vmatpush1.bf16.msra.mxu1 %v3564_v36  ;;  %v6084_v28 = vld [vmem:[#allocation25_spill] sm:$0xff] }
 0x77b   :  { %1852 = vmatprep.subr.bf16.mxu0 %v3569_v37  ;;  %1925 = vmatprep.subr.bf16.mxu1 %v3572_v38  ;;  %v6085_v37 = vld [vmem:[#allocation26_spill] sm:$0xff] }
 0x77e   :  { %1853 = vmatpush1.bf16.msra.mxu0 %v3567_v40  ;;  %1926 = vmatpush1.bf16.msra.mxu1 %v3570_v47 }
 0x77f   :  { %1854 = vmatprep.subr.bf16.mxu0 %v3575_v48  ;;  %1927 = vmatprep.subr.bf16.mxu1 %v3578_v49 }
 0x782   :  { %1855 = vmatpush1.bf16.msra.mxu0 %v3573_v50  ;;  %1928 = vmatpush1.bf16.msra.mxu1 %v3576_v51 }
 0x783   :  { %2151 = vmatprep.subr.bf16.mxu0 %v5115_v25  ;;  %2192 = vmatprep.subr.bf16.mxu1 %v5120_v35 }
 0x785   :  { %3385 = vmatmul.mubr.msk.bf16.vlgmr.msra.gmra.mrb[48].mxu0 %vm3383_vm1, %v3384_v52  ;;  %3388 = vmatmul.mubr.msk.bf16.vlgmr.msra.gmra.mrb[48].mxu1 %vm3383_vm1, %v3384_v52 }
 0x786   :  { %1882 = vmatprep.mubr.bf16.mxu0 %v6057_v13  ;;  %1955 = vmatprep.mubr.bf16.mxu1 %v6057_v13 }
 0x787   :  { %2152 = vmatpush1.bf16.msra.mxu0 %v5126_v39  ;;  %2193 = vmatpush1.bf16.msra.mxu1 %v5131_v32 }
 0x788   :  { %2153 = vmatprep.subr.bf16.mxu0 %v5139_v53  ;;  %2194 = vmatprep.subr.bf16.mxu1 %v5144_v56 }
 0x78b   :  { %2154 = vmatpush1.bf16.msra.mxu0 %v5149_v58  ;;  %2195 = vmatpush1.bf16.msra.mxu1 %v5154_v59 }
 0x78c   :  { %2155 = vmatprep.subr.bf16.mxu0 %v5163_v60  ;;  %2196 = vmatprep.subr.bf16.mxu1 %v5168_v61 }
 0x78d   :  { %1883 = vmatmul.mubr.bf16.gmra.mrb[52].mxu0 %v1591_v55  ;;  %1956 = vmatmul.mubr.bf16.gmra.mrb[52].mxu1 %v1591_v55 }
 0x78e   :  { %1892 = vmatprep.mubr.bf16.mxu0 %v6057_v13  ;;  %1965 = vmatprep.mubr.bf16.mxu1 %v6057_v13 }
 0x78f   :  { %2156 = vmatpush1.bf16.msra.mxu0 %v5173_v63  ;;  %2197 = vmatpush1.bf16.msra.mxu1 %v5178_v0 }
 0x790   :  { %2157 = vmatprep.subr.bf16.mxu0 %v5185_v3  ;;  %2198 = vmatprep.subr.bf16.mxu1 %v5190_v4 }
 0x793   :  { %2158 = vmatpush1.bf16.msra.mxu0 %v5199_v46  ;;  %2199 = vmatpush1.bf16.msra.mxu1 %v5204_v17 }
 0x794   :  { %2159 = vmatprep.subr.bf16.mxu0 %v5211_v5  ;;  %2200 = vmatprep.subr.bf16.mxu1 %v5216_v6 }
 0x795   :  { %1893 = vmatmul.mubr.bf16.gmra.mrb[56].mxu0 %v1592_v57  ;;  %1966 = vmatmul.mubr.bf16.gmra.mrb[56].mxu1 %v1592_v57 }
 0x796   :  { %1902 = vmatprep.mubr.bf16.mxu0 %v6057_v13  ;;  %1975 = vmatprep.mubr.bf16.mxu1 %v6057_v13 }
 0x797   :  { %2160 = vmatpush1.bf16.msra.mxu0 %v5221_v7  ;;  %2201 = vmatpush1.bf16.msra.mxu1 %v5226_v10 }
 0x798   :  { %2161 = vmatprep.subr.bf16.mxu0 %v5233_v19  ;;  %2202 = vmatprep.subr.bf16.mxu1 %v5238_v24 }
 0x79b   :  { %2162 = vmatpush1.bf16.msra.mxu0 %v5247_v8  ;;  %2203 = vmatpush1.bf16.msra.mxu1 %v5252_v34 }
 0x79c   :  { %2163 = vmatprep.subr.bf16.mxu0 %v5259_v9  ;;  %2204 = vmatprep.subr.bf16.mxu1 %v5264_v20 }
 0x79f   :  { %2164 = vmatpush1.bf16.msra.mxu0 %v5269_v62  ;;  %2205 = vmatpush1.bf16.msra.mxu1 %v5274_v16 }
 0x7a0   :  { %2165 = vmatprep.subr.bf16.mxu0 %v5281_v12  ;;  %2206 = vmatprep.subr.bf16.mxu1 %v5286_v27 }
 0x7a3   :  { %2166 = vmatpush1.bf16.msra.mxu0 %v5293_v41  ;;  %2207 = vmatpush1.bf16.msra.mxu1 %v5298_v2 }
 0x7a4   :  { %2264 = vmatprep.subr.bf16.mxu0 %v5115_v25  ;;  %2305 = vmatprep.subr.bf16.mxu1 %v5120_v35 }
 0x838   :  { %v1504_v42 = vpop.f32.mrb[44].mxu0  ;;  %v1545_v43 = vpop.f32.mrb[44].mxu1 }
 0x839   :  { %v1552_v44 = vadd.f32 %v1504_v42, %v6082_v23  ;;  %v1554_v14 = vadd.f32 %v1545_v43, %v6083_v54  ;;  %v1506_v26 = vpop.f32.mrb[45].mxu0  ;;  %v1547_v31 = vpop.f32.mrb[45].mxu1 }
 0x83a   :  { %v1553_v36 = vadd.f32 %v1506_v26, %v6084_v28  ;;  %v1555_v38 = vadd.f32 %v1547_v31, %v6085_v37  ;;  %v1508_v40 = vpop.f32.mrb[46].mxu0  ;;  %v1549_v47 = vpop.f32.mrb[46].mxu1 }
 0x83b   :  { %v3276_v48 = vmul.f32 -1.442695, %v1552_v44  ;;  %v1509_v49 = vpop.f32.mrb[47].mxu0  ;;  %v1550_v50 = vpop.f32.mrb[47].mxu1 }
 0x83c   :  { %v3277_v51 = vmul.f32 -1.442695, %v1553_v36  ;;  %v3278_v52 = vmul.f32 -1.442695, %v1555_v38 }
 0x83d   :  { %3747 = vpow2.f32 %v3276_v48 }
 0x83e   :  { %3749 = vpow2.f32 %v3277_v51 }
 0x83f   :  { %3751 = vpow2.f32 %v3278_v52 }
 0x840   :  { %3753 = vtanh.f32 %v1554_v14 }
 0x847   :  { %v3748_v55 = vpop.eup %3747 }
 0x848   :  { %v3750_v57 = vpop.eup %3749  ;;  %v1559_v42 = vadd.f32 1.0, %v3748_v55 }
 0x849   :  { %v1565_v43 = vadd.f32 1.0, %v3750_v57  ;;  %v3752_v23 = vpop.eup %3751 }
 0x84a   :  { %3755 = vrcp.f32 %v1559_v42  ;;  %v3754_v54 = vpop.eup %3753  ;;  %v1572_v44 = vadd.f32 1.0, %v3752_v23 }
 0x84b   :  { %3757 = vrcp.f32 %v1565_v43 }
 0x84c   :  { %3759 = vrcp.f32 %v1572_v44 }
 0x854   :  { %v3756_v26 = vpop.eup %3755 }
 0x855   :  { %v3758_v31 = vpop.eup %3757  ;;  %v1576_v28 = vmul.f32 %v3756_v26, %v3754_v54 }
 0x856   :  { %v1575_v37 = vmul.f32 %v3758_v31, %v4997_v15  ;;  %v5327_v15 = vpop.permute.xlu1 %1583  ;;  %v3760_v54 = vpop.eup %3759 }
 0x857   :  { %6086 = vst [vmem:[#allocation10_spill] sm:$0xff] %v5327_v15  ;;  %vm1585_vm2 = vcmp.eq.s32.totalorder %v5327_v15, 1 }
 0x858   :  { %v1577_v36 = vadd.f32 %v1576_v28, %v1575_v37  ;;  %v5311_v40 = vpop.f32.mrb[48].mxu0  ;;  %v5313_v38 = vpop.f32.mrb[48].mxu1 }
 0x859   :  { %v5315_v47 = vpop.f32.mrb[49].mxu0  ;;  %v5317_v14 = vpop.f32.mrb[49].mxu1 }
 0x85a   :  { %3761 = vtanh.f32 %v1577_v36  ;;  %v5319_v48 = vpop.f32.mrb[50].mxu0  ;;  %v5321_v49 = vpop.f32.mrb[50].mxu1 }
 0x85b   :  { %v5323_v50 = vpop.f32.mrb[51].mxu0  ;;  %v5325_v51 = vpop.f32.mrb[51].mxu1 }
 0x860   :  { %v5329_v52 = vpop.f32.mrb[52].mxu0  ;;  %v5331_v55 = vpop.f32.mrb[52].mxu1 }
 0x861   :  { %6087 = vst [vmem:[#allocation11_spill] sm:$0xff] %v5329_v52  ;;  %6088 = vst [vmem:[#allocation12_spill] sm:$0xff] %v5331_v55  ;;  %v5333_v57 = vpop.f32.mrb[53].mxu0  ;;  %v5335_v42 = vpop.f32.mrb[53].mxu1 }
 0x862   :  { %6089 = vst [vmem:[#allocation13_spill] sm:$0xff] %v5333_v57  ;;  %6090 = vst [vmem:[#allocation14_spill] sm:$0xff] %v5335_v42  ;;  %v5337_v43 = vpop.f32.mrb[54].mxu0  ;;  %v5339_v23 = vpop.f32.mrb[54].mxu1 }
 0x863   :  { %6091 = vst [vmem:[#allocation15_spill] sm:$0xff] %v5337_v43  ;;  %6092 = vst [vmem:[#allocation16_spill] sm:$0xff] %v5339_v23  ;;  %v5341_v26 = vpop.f32.mrb[55].mxu0  ;;  %v5343_v31 = vpop.f32.mrb[55].mxu1 }
 0x864   :  { %6093 = vst [vmem:[#allocation17_spill] sm:$0xff] %v5341_v26  ;;  %6094 = vst [vmem:[#allocation18_spill] sm:$0xff] %v5343_v31  ;;  %v3762_v28 = vpop.eup %3761 }
 0x865   :  { %v1579_v44 = vmul.f32 %v3762_v28, %v3760_v54 }
 0x867   :  { %v1586_v37 = vsel %vm1585_vm2, %v1579_v44, %v5008_v22  ;;  %v6103_v44 = vmov 0.0|0.0  }
 0x868   :  { %v5349_v36 = vpop.f32.mrb[56].mxu0  ;;  %v5351_v45 = vpop.f32.mrb[56].mxu1  ;;  %v1593_v33 = vpack.c.bf16 %v1586_v37, %v5008_v22 }
 0x869   :  { %6095 = vst [vmem:[#allocation19_spill] sm:$0xff] %v5349_v36  ;;  %6096 = vst [vmem:[#allocation20_spill] sm:$0xff] %v5351_v45  ;;  %v5354_v18 = vpop.f32.mrb[57].mxu0  ;;  %v5356_v29 = vpop.f32.mrb[57].mxu1 }
 0x86a   :  { %6097 = vst [vmem:[#allocation21_spill] sm:$0xff] %v5354_v18  ;;  %6098 = vst [vmem:[#allocation22_spill] sm:$0xff] %v5356_v29  ;;  %v5358_v26 = vpop.f32.mrb[58].mxu0  ;;  %v5360_v31 = vpop.f32.mrb[58].mxu1  ;;  %1903 = vmatmul.mubr.bf16.gmra.mrb[60].mxu0 %v1593_v33  ;;  %1976 = vmatmul.mubr.bf16.gmra.mrb[60].mxu1 %v1593_v33  ;;  %v1658_v33 = vld [vmem:[%s6001_s6] sm:$0xf] }
 0x86b   :  { %6099 = vst [vmem:[#allocation23_spill] sm:$0xff] %v5358_v26  ;;  %6100 = vst [vmem:[#allocation24_spill] sm:$0xff] %v5360_v31  ;;  %v5362_v54 = vpop.f32.mrb[59].mxu0  ;;  %v5364_v28 = vpop.f32.mrb[59].mxu1  ;;  %2183 = vmatprep.mubr.bf16.mxu0 %v6057_v13  ;;  %2224 = vmatprep.mubr.bf16.mxu1 %v6057_v13  ;;  %v6110_v31 = vld [vmem:[#allocation4_spill] sm:$0xff] }
 0x86c   :  { %6101 = vst [vmem:[#allocation25_spill] sm:$0xff] %v5362_v54  ;;  %6102 = vst [vmem:[#allocation26_spill] sm:$0xff] %v5364_v28  ;;  %v6111_v26 = vsub.s32 0, %v6110_v31  ;;  %v6112_v18 = vsub.s32 2, %v6110_v31 }
 0x86e   :  { %v5421_v29 = vrot.slane %v1658_v33, %v6111_v26  ;;  %v5425_v45 = vrot.slane %v1658_v33, %v6112_v18 }
 0x870   :  { %v1875_v26 = vadd.f32 %v5311_v40, %v5421_v29  ;;  %v1879_v11 = vadd.f32 %v5319_v48, %v5421_v29 }
 0x872   :  { %2184 = vmatmul.mubr.bf16.vlgmr.msra.gmra.mrb[64].mxu0 %v6103_v44  ;;  %2225 = vmatmul.mubr.bf16.vlgmr.msra.gmra.mrb[64].mxu1 %v6103_v44 }
 0x873   :  { %2265 = vmatpush1.bf16.msra.mxu0 %v5126_v39  ;;  %2306 = vmatpush1.bf16.msra.mxu1 %v5131_v32 }
 0x874   :  { %2266 = vmatprep.subr.bf16.mxu0 %v5139_v53  ;;  %2307 = vmatprep.subr.bf16.mxu1 %v5144_v56 }
 0x875   :  { %2296 = vmatprep.mubr.bf16.mxu0 %v6057_v13  ;;  %2337 = vmatprep.mubr.bf16.mxu1 %v6057_v13 }
 0x877   :  { %2267 = vmatpush1.bf16.msra.mxu0 %v5149_v58  ;;  %2308 = vmatpush1.bf16.msra.mxu1 %v5154_v59 }
 0x878   :  { %2268 = vmatprep.subr.bf16.mxu0 %v5163_v60  ;;  %2309 = vmatprep.subr.bf16.mxu1 %v5168_v61 }
 0x87b   :  { %2269 = vmatpush1.bf16.msra.mxu0 %v5173_v63  ;;  %2310 = vmatpush1.bf16.msra.mxu1 %v5178_v0 }
 0x87c   :  { %2270 = vmatprep.subr.bf16.mxu0 %v5185_v3  ;;  %2311 = vmatprep.subr.bf16.mxu1 %v5190_v4 }
 0x87f   :  { %2271 = vmatpush1.bf16.msra.mxu0 %v5199_v46  ;;  %2312 = vmatpush1.bf16.msra.mxu1 %v5204_v17 }
 0x880   :  { %2272 = vmatprep.subr.bf16.mxu0 %v5211_v5  ;;  %2313 = vmatprep.subr.bf16.mxu1 %v5216_v6 }
 0x883   :  { %2273 = vmatpush1.bf16.msra.mxu0 %v5221_v7  ;;  %2314 = vmatpush1.bf16.msra.mxu1 %v5226_v10 }
 0x884   :  { %2274 = vmatprep.subr.bf16.mxu0 %v5233_v19  ;;  %2315 = vmatprep.subr.bf16.mxu1 %v5238_v24 }
 0x887   :  { %2275 = vmatpush1.bf16.msra.mxu0 %v5247_v8  ;;  %2316 = vmatpush1.bf16.msra.mxu1 %v5252_v34 }
 0x888   :  { %2276 = vmatprep.subr.bf16.mxu0 %v5259_v9  ;;  %2317 = vmatprep.subr.bf16.mxu1 %v5264_v20 }
 0x88b   :  { %2277 = vmatpush1.bf16.msra.mxu0 %v5269_v62  ;;  %2318 = vmatpush1.bf16.msra.mxu1 %v5274_v16 }
 0x88c   :  { %2278 = vmatprep.subr.bf16.mxu0 %v5281_v12  ;;  %2319 = vmatprep.subr.bf16.mxu1 %v5286_v27 }
 0x88f   :  { %2279 = vmatpush1.bf16.msra.mxu0 %v5293_v41  ;;  %2320 = vmatpush1.bf16.msra.mxu1 %v5298_v2 }
 0x890   :  { %2377 = vmatprep.subr.bf16.mxu0 %v5115_v25  ;;  %2418 = vmatprep.subr.bf16.mxu1 %v5120_v35 }
 0x93d   :  { %v5407_v22 = vpop.f32.mrb[60].mxu0  ;;  %v5409_v37 = vpop.f32.mrb[60].mxu1 }
 0x93e   :  { %6104 = vst [vmem:[#allocation29_spill] sm:$0xff] %v5407_v22  ;;  %6105 = vst [vmem:[#allocation30_spill] sm:$0xff] %v5409_v37  ;;  %v5411_v44 = vpop.f32.mrb[61].mxu0  ;;  %v5413_v15 = vpop.f32.mrb[61].mxu1 }
 0x93f   :  { %6106 = vst [vmem:[#allocation31_spill] sm:$0xff] %v5411_v44  ;;  %6107 = vst [vmem:[#allocation32_spill] sm:$0xff] %v5413_v15  ;;  %v5415_v28 = vpop.f32.mrb[62].mxu0  ;;  %v5417_v54 = vpop.f32.mrb[62].mxu1  ;;  %v6115_v44 = vsub.s32 1, %v6110_v31 }
 0x940   :  { %6108 = vst [vmem:[#allocation33_spill] sm:$0xff] %v5415_v28  ;;  %6109 = vst [vmem:[#allocation34_spill] sm:$0xff] %v5417_v54  ;;  %v5427_v36 = vpop.f32.mrb[63].mxu0  ;;  %v5429_v22 = vpop.f32.mrb[63].mxu1  ;;  %v6116_v28 = vsub.s32 3, %v6110_v31  ;;  %v1948_v54 = vadd.f32 %v5313_v38, %v5425_v45 }
 0x941   :  { %6113 = vst [vmem:[#allocation4_spill] sm:$0xff] %v5427_v36  ;;  %6114 = vst [vmem:[#allocation35_spill] sm:$0xff] %v5429_v22  ;;  %v5433_v37 = vrot.slane %v1658_v33, %v6115_v44 }
 0x942   :  { %v5437_v15 = vrot.slane %v1658_v33, %v6116_v28 }
 0x943   :  { %v1877_v18 = vadd.f32 %v5315_v47, %v5433_v37 }
 0x944   :  { %v1950_v22 = vadd.f32 %v5317_v14, %v5437_v15 }
 0x945   :  { %v2185_v36 = vpop.f32.mrb[64].mxu0  ;;  %v2226_v23 = vpop.f32.mrb[64].mxu1 }
 0x946   :  { %v2233_v44 = vadd.f32 %v2185_v36, %v1875_v26  ;;  %v2235_v43 = vadd.f32 %v2226_v23, %v1948_v54  ;;  %v2187_v1 = vpop.f32.mrb[65].mxu0  ;;  %v2228_v31 = vpop.f32.mrb[65].mxu1 }
 0x947   :  { %v2234_v28 = vadd.f32 %v2187_v1, %v1877_v18  ;;  %v2236_v33 = vadd.f32 %v2228_v31, %v1950_v22  ;;  %v2189_v42 = vpop.f32.mrb[66].mxu0  ;;  %v2230_v57 = vpop.f32.mrb[66].mxu1  ;;  %v1954_v31 = vadd.f32 %v5325_v51, %v5437_v15 }
 0x948   :  { %v3343_v40 = vmul.f32 -1.442695, %v2233_v44  ;;  %v2190_v55 = vpop.f32.mrb[67].mxu0  ;;  %v2231_v52 = vpop.f32.mrb[67].mxu1  ;;  %v1881_v44 = vadd.f32 %v5323_v50, %v5433_v37 }
 0x949   :  { %v3344_v38 = vmul.f32 -1.442695, %v2234_v28  ;;  %v3345_v47 = vmul.f32 -1.442695, %v2236_v33 }
 0x94a   :  { %3763 = vpow2.f32 %v3343_v40 }
 0x94b   :  { %3765 = vpow2.f32 %v3344_v38 }
 0x94c   :  { %3767 = vpow2.f32 %v3345_v47 }
 0x94d   :  { %3769 = vtanh.f32 %v2235_v43  ;;  %v1952_v43 = vadd.f32 %v5321_v49, %v5425_v45 }
 0x954   :  { %v3764_v21 = vpop.eup %3763 }
 0x955   :  { %v3766_v30 = vpop.eup %3765  ;;  %v2240_v14 = vadd.f32 1.0, %v3764_v21 }
 0x956   :  { %v2246_v36 = vadd.f32 1.0, %v3766_v30  ;;  %v3768_v23 = vpop.eup %3767 }
 0x957   :  { %3771 = vrcp.f32 %v2240_v14  ;;  %v3770_v1 = vpop.eup %3769  ;;  %v2253_v22 = vadd.f32 1.0, %v3768_v23 }
 0x958   :  { %3773 = vrcp.f32 %v2246_v36 }
 0x959   :  { %3775 = vrcp.f32 %v2253_v22 }
 0x961   :  { %v3772_v54 = vpop.eup %3771 }
 0x962   :  { %v3774_v42 = vpop.eup %3773  ;;  %v2257_v57 = vmul.f32 %v3772_v54, %v3770_v1 }
 0x963   :  { %v2256_v55 = vmul.f32 0.0, %v3774_v42  ;;  %v3776_v26 = vpop.eup %3775 }
 0x965   :  { %v5447_v52 = vadd.f32 %v2257_v57, %v2256_v55 }
 0x967   :  { %3777 = vtanh.f32 %v5447_v52 }
 0x971   :  { %v3778_v18 = vpop.eup %3777 }
 0x972   :  { %v5450_v21 = vmul.f32 %v3778_v18, %v3776_v26 }
 0x974   :  { %v3390_v30 = vpack.c.bf16 %v5450_v21, %v5450_v21 }
 0x976   :  { %3391 = vmatmul.mubr.msk.bf16.vlgmr.msra.gmra.mrb[68].mxu0 %vm4497_vm5, %v3390_v30  ;;  %3394 = vmatmul.mubr.msk.bf16.vlgmr.msra.gmra.mrb[68].mxu1 %vm4497_vm5, %v3390_v30 }
 0x977   :  { %2378 = vmatpush1.bf16.msra.mxu0 %v5126_v39  ;;  %2419 = vmatpush1.bf16.msra.mxu1 %v5131_v32 }
 0x978   :  { %2379 = vmatprep.subr.bf16.mxu0 %v5139_v53  ;;  %2420 = vmatprep.subr.bf16.mxu1 %v5144_v56 }
 0x979   :  { %2409 = vmatprep.mubr.bf16.mxu0 %v6057_v13  ;;  %2450 = vmatprep.mubr.bf16.mxu1 %v6057_v13 }
 0x97b   :  { %2380 = vmatpush1.bf16.msra.mxu0 %v5149_v58  ;;  %2421 = vmatpush1.bf16.msra.mxu1 %v5154_v59 }
 0x97c   :  { %2381 = vmatprep.subr.bf16.mxu0 %v5163_v60  ;;  %2422 = vmatprep.subr.bf16.mxu1 %v5168_v61 }
 0x97f   :  { %2382 = vmatpush1.bf16.msra.mxu0 %v5173_v63  ;;  %2423 = vmatpush1.bf16.msra.mxu1 %v5178_v0 }
 0x980   :  { %2383 = vmatprep.subr.bf16.mxu0 %v5185_v3  ;;  %2424 = vmatprep.subr.bf16.mxu1 %v5190_v4 }
 0x983   :  { %2384 = vmatpush1.bf16.msra.mxu0 %v5199_v46  ;;  %2425 = vmatpush1.bf16.msra.mxu1 %v5204_v17 }
 0x984   :  { %2385 = vmatprep.subr.bf16.mxu0 %v5211_v5  ;;  %2426 = vmatprep.subr.bf16.mxu1 %v5216_v6 }
 0x987   :  { %2386 = vmatpush1.bf16.msra.mxu0 %v5221_v7  ;;  %2427 = vmatpush1.bf16.msra.mxu1 %v5226_v10 }
 0x988   :  { %2387 = vmatprep.subr.bf16.mxu0 %v5233_v19  ;;  %2428 = vmatprep.subr.bf16.mxu1 %v5238_v24 }
 0x98b   :  { %2388 = vmatpush1.bf16.msra.mxu0 %v5247_v8  ;;  %2429 = vmatpush1.bf16.msra.mxu1 %v5252_v34 }
 0x98c   :  { %2389 = vmatprep.subr.bf16.mxu0 %v5259_v9  ;;  %2430 = vmatprep.subr.bf16.mxu1 %v5264_v20 }
 0x98f   :  { %2390 = vmatpush1.bf16.msra.mxu0 %v5269_v62  ;;  %2431 = vmatpush1.bf16.msra.mxu1 %v5274_v16 }
 0x990   :  { %2391 = vmatprep.subr.bf16.mxu0 %v5281_v12  ;;  %2432 = vmatprep.subr.bf16.mxu1 %v5286_v27 }
 0x993   :  { %2392 = vmatpush1.bf16.msra.mxu0 %v5293_v41  ;;  %2433 = vmatpush1.bf16.msra.mxu1 %v5298_v2 }
 0x994   :  { %2490 = vmatprep.subr.bf16.mxu0 %v5115_v25  ;;  %2531 = vmatprep.subr.bf16.mxu1 %v5120_v35 }
 0xa49   :  { %v2298_v28 = vpop.f32.mrb[68].mxu0  ;;  %v2339_v33 = vpop.f32.mrb[68].mxu1 }
 0xa4a   :  { %v2346_v40 = vadd.f32 %v2298_v28, %v1879_v11  ;;  %v2348_v38 = vadd.f32 %v2339_v33, %v1952_v43  ;;  %v2300_v47 = vpop.f32.mrb[69].mxu0  ;;  %v2341_v14 = vpop.f32.mrb[69].mxu1 }
 0xa4b   :  { %v2347_v36 = vadd.f32 %v2300_v47, %v1881_v44  ;;  %v2349_v23 = vadd.f32 %v2341_v14, %v1954_v31  ;;  %v2302_v1 = vpop.f32.mrb[70].mxu0  ;;  %v2343_v54 = vpop.f32.mrb[70].mxu1  ;;  %v2262_v31 = vsel %vm752_vm4, %v5447_v52, 0.0 }
 0xa4c   :  { %v3346_v48 = vmul.f32 -1.442695, %v2346_v40  ;;  %v2303_v42 = vpop.f32.mrb[71].mxu0  ;;  %v2344_v57 = vpop.f32.mrb[71].mxu1  ;;  %v2261_v54 = vsel %vm752_vm4, %v5450_v21, 0.0  ;;  %v6119_v21 = vld [vmem:[#allocation11_spill] sm:$0xff] }
 0xa4d   :  { %v3347_v49 = vmul.f32 -1.442695, %v2347_v36  ;;  %v3348_v50 = vmul.f32 -1.442695, %v2349_v23  ;;  %v1885_v42 = vadd.f32 %v6119_v21, %v5421_v29  ;;  %v6120_v57 = vld [vmem:[#allocation12_spill] sm:$0xff] }
 0xa4e   :  { %3779 = vpow2.f32 %v3346_v48 }
 0xa4f   :  { %3781 = vpow2.f32 %v3347_v49  ;;  %v1958_v49 = vadd.f32 %v6120_v57, %v5425_v45 }
 0xa50   :  { %3783 = vpow2.f32 %v3348_v50  ;;  %v6121_v50 = vld [vmem:[#allocation13_spill] sm:$0xff] }
 0xa51   :  { %3785 = vtanh.f32 %v2348_v38 }
 0xa58   :  { %v3780_v22 = vpop.eup %3779 }
 0xa59   :  { %v3782_v55 = vpop.eup %3781  ;;  %v2353_v51 = vadd.f32 1.0, %v3780_v22  ;;  %v1887_v22 = vadd.f32 %v6121_v50, %v5433_v37 }
 0xa5a   :  { %v2359_v26 = vadd.f32 1.0, %v3782_v55  ;;  %v3784_v18 = vpop.eup %3783  ;;  %v6122_v55 = vld [vmem:[#allocation14_spill] sm:$0xff] }
 0xa5b   :  { %3787 = vrcp.f32 %v2353_v51  ;;  %v3786_v30 = vpop.eup %3785  ;;  %v2366_v33 = vadd.f32 1.0, %v3784_v18  ;;  %v1960_v51 = vadd.f32 %v6122_v55, %v5437_v15 }
 0xa5c   :  { %3789 = vrcp.f32 %v2359_v26 }
 0xa5d   :  { %3791 = vrcp.f32 %v2366_v33 }
 0xa65   :  { %v3788_v11 = vpop.eup %3787 }
 0xa66   :  { %v3790_v43 = vpop.eup %3789  ;;  %v2370_v28 = vmul.f32 %v3788_v11, %v3786_v30 }
 0xa67   :  { %v2369_v40 = vmul.f32 %v3790_v43, %v2262_v31  ;;  %v3792_v36 = vpop.eup %3791 }
 0xa69   :  { %v2371_v47 = vadd.f32 %v2370_v28, %v2369_v40 }
 0xa6b   :  { %3793 = vtanh.f32 %v2371_v47  ;;  %v5505_v38 = vsel %vm871_vm10, %v2371_v47, %v2262_v31 }
 0xa75   :  { %v3794_v23 = vpop.eup %3793 }
 0xa76   :  { %v2373_v1 = vmul.f32 %v3794_v23, %v3792_v36 }
 0xa78   :  { %v5512_v52 = vsel %vm871_vm10, %v2373_v1, %v2261_v54 }
 0xa79   :  { %v2376_v48 = vpack.c.bf16 %v5512_v52, %v5512_v52 }
 0xa7b   :  { %2410 = vmatmul.mubr.bf16.vlgmr.msra.gmra.mrb[72].mxu0 %v2376_v48  ;;  %2451 = vmatmul.mubr.bf16.vlgmr.msra.gmra.mrb[72].mxu1 %v2376_v48 }
 0xa7c   :  { %2491 = vmatpush1.bf16.msra.mxu0 %v5126_v39  ;;  %2532 = vmatpush1.bf16.msra.mxu1 %v5131_v32 }
 0xa7d   :  { %2492 = vmatprep.subr.bf16.mxu0 %v5139_v53  ;;  %2533 = vmatprep.subr.bf16.mxu1 %v5144_v56 }
 0xa7e   :  { %2522 = vmatprep.mubr.bf16.mxu0 %v6057_v13  ;;  %2563 = vmatprep.mubr.bf16.mxu1 %v6057_v13 }
 0xa80   :  { %2493 = vmatpush1.bf16.msra.mxu0 %v5149_v58  ;;  %2534 = vmatpush1.bf16.msra.mxu1 %v5154_v59 }
 0xa81   :  { %2494 = vmatprep.subr.bf16.mxu0 %v5163_v60  ;;  %2535 = vmatprep.subr.bf16.mxu1 %v5168_v61 }
 0xa84   :  { %2495 = vmatpush1.bf16.msra.mxu0 %v5173_v63  ;;  %2536 = vmatpush1.bf16.msra.mxu1 %v5178_v0 }
 0xa85   :  { %2496 = vmatprep.subr.bf16.mxu0 %v5185_v3  ;;  %2537 = vmatprep.subr.bf16.mxu1 %v5190_v4 }
 0xa88   :  { %2497 = vmatpush1.bf16.msra.mxu0 %v5199_v46  ;;  %2538 = vmatpush1.bf16.msra.mxu1 %v5204_v17 }
 0xa89   :  { %2498 = vmatprep.subr.bf16.mxu0 %v5211_v5  ;;  %2539 = vmatprep.subr.bf16.mxu1 %v5216_v6 }
 0xa8c   :  { %2499 = vmatpush1.bf16.msra.mxu0 %v5221_v7  ;;  %2540 = vmatpush1.bf16.msra.mxu1 %v5226_v10 }
 0xa8d   :  { %2500 = vmatprep.subr.bf16.mxu0 %v5233_v19  ;;  %2541 = vmatprep.subr.bf16.mxu1 %v5238_v24 }
 0xa90   :  { %2501 = vmatpush1.bf16.msra.mxu0 %v5247_v8  ;;  %2542 = vmatpush1.bf16.msra.mxu1 %v5252_v34 }
 0xa91   :  { %2502 = vmatprep.subr.bf16.mxu0 %v5259_v9  ;;  %2543 = vmatprep.subr.bf16.mxu1 %v5264_v20 }
 0xa94   :  { %2503 = vmatpush1.bf16.msra.mxu0 %v5269_v62  ;;  %2544 = vmatpush1.bf16.msra.mxu1 %v5274_v16 }
 0xa95   :  { %2504 = vmatprep.subr.bf16.mxu0 %v5281_v12  ;;  %2545 = vmatprep.subr.bf16.mxu1 %v5286_v27 }
 0xa98   :  { %2505 = vmatpush1.bf16.msra.mxu0 %v5293_v41  ;;  %2546 = vmatpush1.bf16.msra.mxu1 %v5298_v2 }
 0xa99   :  { %2603 = vmatprep.subr.bf16.mxu0 %v5115_v25  ;;  %2644 = vmatprep.subr.bf16.mxu1 %v5120_v35 }
 0xb4e   :  { %v2411_v26 = vpop.f32.mrb[72].mxu0  ;;  %v2452_v18 = vpop.f32.mrb[72].mxu1 }
 0xb4f   :  { %v2459_v30 = vadd.f32 %v2411_v26, %v1885_v42  ;;  %v2461_v11 = vadd.f32 %v2452_v18, %v1958_v49  ;;  %v2413_v43 = vpop.f32.mrb[73].mxu0  ;;  %v2454_v44 = vpop.f32.mrb[73].mxu1 }
 0xb50   :  { %v2460_v31 = vadd.f32 %v2413_v43, %v1887_v22  ;;  %v2462_v28 = vadd.f32 %v2454_v44, %v1960_v51  ;;  %v2415_v33 = vpop.f32.mrb[74].mxu0  ;;  %v2456_v40 = vpop.f32.mrb[74].mxu1 }
 0xb51   :  { %v3349_v47 = vmul.f32 -1.442695, %v2459_v30  ;;  %v2416_v14 = vpop.f32.mrb[75].mxu0  ;;  %v2457_v36 = vpop.f32.mrb[75].mxu1  ;;  %v6125_v40 = vld [vmem:[#allocation16_spill] sm:$0xff] }
 0xb52   :  { %v3350_v23 = vmul.f32 -1.442695, %v2460_v31  ;;  %v3351_v1 = vmul.f32 -1.442695, %v2462_v28  ;;  %v6126_v14 = vld [vmem:[#allocation17_spill] sm:$0xff] }
 0xb53   :  { %3795 = vpow2.f32 %v3349_v47  ;;  %v1962_v47 = vadd.f32 %v6125_v40, %v5425_v45  ;;  %v1891_v36 = vadd.f32 %v6126_v14, %v5433_v37 }
 0xb54   :  { %3797 = vpow2.f32 %v3350_v23  ;;  %v6127_v23 = vld [vmem:[#allocation18_spill] sm:$0xff] }
 0xb55   :  { %3799 = vpow2.f32 %v3351_v1  ;;  %v1964_v1 = vadd.f32 %v6127_v23, %v5437_v15 }
 0xb56   :  { %3801 = vtanh.f32 %v2461_v11 }
 0xb5d   :  { %v3796_v54 = vpop.eup %3795 }
 0xb5e   :  { %v3798_v48 = vpop.eup %3797  ;;  %v2466_v21 = vadd.f32 1.0, %v3796_v54 }
 0xb5f   :  { %v2472_v42 = vadd.f32 1.0, %v3798_v48  ;;  %v3800_v57 = vpop.eup %3799 }
 0xb60   :  { %3803 = vrcp.f32 %v2466_v21  ;;  %v3802_v49 = vpop.eup %3801  ;;  %v2479_v51 = vadd.f32 1.0, %v3800_v57 }
 0xb61   :  { %3805 = vrcp.f32 %v2472_v42 }
 0xb62   :  { %3807 = vrcp.f32 %v2479_v51 }
 0xb6a   :  { %v3804_v50 = vpop.eup %3803 }
 0xb6b   :  { %v3806_v22 = vpop.eup %3805  ;;  %v2483_v55 = vmul.f32 %v3804_v50, %v3802_v49 }
 0xb6c   :  { %v2482_v26 = vmul.f32 %v3806_v22, %v5505_v38  ;;  %v3808_v11 = vpop.eup %3807 }
 0xb6e   :  { %v2484_v18 = vadd.f32 %v2483_v55, %v2482_v26 }
 0xb70   :  { %3809 = vtanh.f32 %v2484_v18  ;;  %v5562_v43 = vsel %vm990_vm11, %v2484_v18, %v5505_v38  ;;  %v6124_v38 = vld [vmem:[#allocation15_spill] sm:$0xff] }
 0xb7a   :  { %v3810_v44 = vpop.eup %3809 }
 0xb7b   :  { %v2486_v31 = vmul.f32 %v3810_v44, %v3808_v11 }
 0xb7d   :  { %v5567_v28 = vsel %vm990_vm11, %v2486_v31, %v5512_v52  ;;  %v1889_v52 = vadd.f32 %v6124_v38, %v5421_v29 }
 0xb7e   :  { %v2489_v33 = vpack.c.bf16 %v5567_v28, %v5567_v28 }
 0xb80   :  { %2523 = vmatmul.mubr.bf16.vlgmr.msra.gmra.mrb[76].mxu0 %v2489_v33  ;;  %2564 = vmatmul.mubr.bf16.vlgmr.msra.gmra.mrb[76].mxu1 %v2489_v33 }
 0xb81   :  { %2604 = vmatpush1.bf16.msra.mxu0 %v5126_v39  ;;  %2645 = vmatpush1.bf16.msra.mxu1 %v5131_v32 }
 0xb82   :  { %2605 = vmatprep.subr.bf16.mxu0 %v5139_v53  ;;  %2646 = vmatprep.subr.bf16.mxu1 %v5144_v56 }
 0xb83   :  { %2635 = vmatprep.mubr.bf16.mxu0 %v6057_v13  ;;  %2676 = vmatprep.mubr.bf16.mxu1 %v6057_v13 }
 0xb85   :  { %2606 = vmatpush1.bf16.msra.mxu0 %v5149_v58  ;;  %2647 = vmatpush1.bf16.msra.mxu1 %v5154_v59 }
 0xb86   :  { %2607 = vmatprep.subr.bf16.mxu0 %v5163_v60  ;;  %2648 = vmatprep.subr.bf16.mxu1 %v5168_v61 }
 0xb89   :  { %2608 = vmatpush1.bf16.msra.mxu0 %v5173_v63  ;;  %2649 = vmatpush1.bf16.msra.mxu1 %v5178_v0 }
 0xb8a   :  { %2609 = vmatprep.subr.bf16.mxu0 %v5185_v3  ;;  %2650 = vmatprep.subr.bf16.mxu1 %v5190_v4 }
 0xb8d   :  { %2610 = vmatpush1.bf16.msra.mxu0 %v5199_v46  ;;  %2651 = vmatpush1.bf16.msra.mxu1 %v5204_v17 }
 0xb8e   :  { %2611 = vmatprep.subr.bf16.mxu0 %v5211_v5  ;;  %2652 = vmatprep.subr.bf16.mxu1 %v5216_v6 }
 0xb91   :  { %2612 = vmatpush1.bf16.msra.mxu0 %v5221_v7  ;;  %2653 = vmatpush1.bf16.msra.mxu1 %v5226_v10 }
 0xb92   :  { %2613 = vmatprep.subr.bf16.mxu0 %v5233_v19  ;;  %2654 = vmatprep.subr.bf16.mxu1 %v5238_v24 }
 0xb95   :  { %2614 = vmatpush1.bf16.msra.mxu0 %v5247_v8  ;;  %2655 = vmatpush1.bf16.msra.mxu1 %v5252_v34 }
 0xb96   :  { %2615 = vmatprep.subr.bf16.mxu0 %v5259_v9  ;;  %2656 = vmatprep.subr.bf16.mxu1 %v5264_v20 }
 0xb99   :  { %2616 = vmatpush1.bf16.msra.mxu0 %v5269_v62  ;;  %2657 = vmatpush1.bf16.msra.mxu1 %v5274_v16 }
 0xb9a   :  { %2617 = vmatprep.subr.bf16.mxu0 %v5281_v12  ;;  %2658 = vmatprep.subr.bf16.mxu1 %v5286_v27 }
 0xb9d   :  { %2618 = vmatpush1.bf16.msra.mxu0 %v5293_v41  ;;  %2659 = vmatpush1.bf16.msra.mxu1 %v5298_v2 }
 0xb9e   :  { %2716 = vmatprep.subr.bf16.mxu0 %v5115_v25  ;;  %2757 = vmatprep.subr.bf16.mxu1 %v5120_v35 }
 0xc53   :  { %v2524_v54 = vpop.f32.mrb[76].mxu0  ;;  %v2565_v48 = vpop.f32.mrb[76].mxu1 }
 0xc54   :  { %v2572_v21 = vadd.f32 %v2524_v54, %v1889_v52  ;;  %v2574_v42 = vadd.f32 %v2565_v48, %v1962_v47  ;;  %v2526_v57 = vpop.f32.mrb[77].mxu0  ;;  %v2567_v25 = vpop.f32.mrb[77].mxu1  ;;  %v5744_v54 = vld [vmem:[%s6000_s5 + $0x40] ss:$16 sps:$4 sm:$0xff]  }
 0xc55   :  { %v2573_v49 = vadd.f32 %v2526_v57, %v1891_v36  ;;  %v2575_v35 = vadd.f32 %v2567_v25, %v1964_v1  ;;  %v2528_v50 = vpop.f32.mrb[78].mxu0  ;;  %v2569_v22 = vpop.f32.mrb[78].mxu1 }
 0xc56   :  { %v3352_v55 = vmul.f32 -1.442695, %v2572_v21  ;;  %v2529_v51 = vpop.f32.mrb[79].mxu0  ;;  %v2570_v26 = vpop.f32.mrb[79].mxu1 }
 0xc57   :  { %v3353_v18 = vmul.f32 -1.442695, %v2573_v49  ;;  %v3354_v30 = vmul.f32 -1.442695, %v2575_v35 }
 0xc58   :  { %3811 = vpow2.f32 %v3352_v55 }
 0xc59   :  { %3813 = vpow2.f32 %v3353_v18 }
 0xc5a   :  { %3815 = vpow2.f32 %v3354_v30 }
 0xc5b   :  { %3817 = vtanh.f32 %v2574_v42 }
 0xc62   :  { %v3812_v11 = vpop.eup %3811 }
 0xc63   :  { %v3814_v44 = vpop.eup %3813  ;;  %v2579_v31 = vadd.f32 1.0, %v3812_v11 }
 0xc64   :  { %v2585_v33 = vadd.f32 1.0, %v3814_v44  ;;  %v3816_v38 = vpop.eup %3815 }
 0xc65   :  { %3819 = vrcp.f32 %v2579_v31  ;;  %v3818_v52 = vpop.eup %3817  ;;  %v2592_v36 = vadd.f32 1.0, %v3816_v38  ;;  %v5694_v38 = vld [vmem:[%s6000_s5] ss:$16 sps:$4 sm:$0xff]  }
 0xc66   :  { %3821 = vrcp.f32 %v2585_v33 }
 0xc67   :  { %3823 = vrcp.f32 %v2592_v36  ;;  %v5726_v36 = vld [vmem:[%s6000_s5 + $0x28] ss:$16 sps:$4 sm:$0xff]  }
 0xc6f   :  { %v3820_v40 = vpop.eup %3819 }
 0xc70   :  { %v3822_v47 = vpop.eup %3821  ;;  %v2596_v14 = vmul.f32 %v3820_v40, %v3818_v52  ;;  %v5700_v52 = vld [vmem:[%s6000_s5 + $0x8] ss:$16 sps:$4 sm:$0xff]   ;;  %v5706_v40 = vld [vmem:[%s6000_s5 + $0x24] ss:$16 sps:$4 sm:$0xff]  }
 0xc71   :  { %v2595_v23 = vmul.f32 %v3822_v47, %v5562_v43  ;;  %v3824_v21 = vpop.eup %3823  ;;  %v5712_v47 = vld [vmem:[%s6000_s5 + $0x2c] ss:$16 sps:$4 sm:$0xff]  }
 0xc73   :  { %v2597_v1 = vadd.f32 %v2596_v14, %v2595_v23  ;;  %v5720_v14 = vld [vmem:[%s6000_s5 + $0x20] ss:$16 sps:$4 sm:$0xff]   ;;  %v5732_v23 = vld [vmem:[%s6000_s5 + $0x44] ss:$16 sps:$4 sm:$0xff]  }
 0xc75   :  { %3825 = vtanh.f32 %v2597_v1  ;;  %v5617_v48 = vsel %vm1109_vm12, %v2597_v1, %v5562_v43  ;;  %v5738_v1 = vld [vmem:[%s6000_s5 + $0x4c] ss:$16 sps:$4 sm:$0xff]  }
 0xc7f   :  { %v3826_v42 = vpop.eup %3825 }
 0xc80   :  { %v2599_v57 = vmul.f32 %v3826_v42, %v3824_v21  ;;  %v5756_v21 = vld [vmem:[%s6000_s5 + $0x64] ss:$16 sps:$4 sm:$0xff]   ;;  %v5762_v42 = vld [vmem:[%s6000_s5 + $0x6c] ss:$16 sps:$4 sm:$0xff]  }
 0xc82   :  { %v5622_v25 = vsel %vm1109_vm12, %v2599_v57, %v5567_v28  ;;  %v5768_v57 = vld [vmem:[%s6000_s5 + $0x60] ss:$16 sps:$4 sm:$0xff]  }
 0xc83   :  { %v2602_v49 = vpack.c.bf16 %v5622_v25, %v5622_v25 }
 0xc85   :  { %2636 = vmatmul.mubr.bf16.vlgmr.msra.gmra.mrb[80].mxu0 %v2602_v49  ;;  %2677 = vmatmul.mubr.bf16.vlgmr.msra.gmra.mrb[80].mxu1 %v2602_v49  ;;  %v5780_v49 = vld [vmem:[%s6000_s5 + $0x84] ss:$16 sps:$4 sm:$0xff]  }
 0xc86   :  { %2717 = vmatpush1.bf16.msra.mxu0 %v5126_v39  ;;  %2758 = vmatpush1.bf16.msra.mxu1 %v5131_v32  ;;  %v5661_v39 = vld [vmem:[%s6000_s5 + $0x4] ss:$16 sps:$4 sm:$0xff]   ;;  %v5667_v32 = vld [vmem:[%s6000_s5 + $0xc] ss:$16 sps:$4 sm:$0xff]  }
 0xc87   :  { %2718 = vmatprep.subr.bf16.mxu0 %v5139_v53  ;;  %2759 = vmatprep.subr.bf16.mxu1 %v5144_v56  ;;  %v6129_v53 = vld [vmem:[#allocation19_spill] sm:$0xff] }
 0xc88   :  { %2748 = vmatprep.mubr.bf16.mxu0 %v6057_v13  ;;  %2789 = vmatprep.mubr.bf16.mxu1 %v6057_v13  ;;  %v1895_v56 = vadd.f32 %v6129_v53, %v5421_v29  ;;  %v5786_v53 = vld [vmem:[%s6000_s5 + $0x8c] ss:$16 sps:$4 sm:$0xff]  }
 0xc8a   :  { %2719 = vmatpush1.bf16.msra.mxu0 %v5149_v58  ;;  %2760 = vmatpush1.bf16.msra.mxu1 %v5154_v59  ;;  %v6130_v58 = vld [vmem:[#allocation20_spill] sm:$0xff] }
 0xc8b   :  { %2720 = vmatprep.subr.bf16.mxu0 %v5163_v60  ;;  %2761 = vmatprep.subr.bf16.mxu1 %v5168_v61  ;;  %v1968_v59 = vadd.f32 %v6130_v58, %v5425_v45  ;;  %v6131_v60 = vld [vmem:[#allocation21_spill] sm:$0xff] }
 0xc8c   :  { %v1897_v61 = vadd.f32 %v6131_v60, %v5433_v37  ;;  %v5798_v58 = vld [vmem:[%s6000_s5 + $0x88] ss:$16 sps:$4 sm:$0xff]   ;;  %v5810_v60 = vld [vmem:[%s6000_s5 + $0xac] ss:$16 sps:$4 sm:$0xff]  }
 0xc8e   :  { %2721 = vmatpush1.bf16.msra.mxu0 %v5173_v63  ;;  %2762 = vmatpush1.bf16.msra.mxu1 %v5178_v0  ;;  %v6132_v63 = vld [vmem:[#allocation22_spill] sm:$0xff] }
 0xc8f   :  { %2722 = vmatprep.subr.bf16.mxu0 %v5185_v3  ;;  %2763 = vmatprep.subr.bf16.mxu1 %v5190_v4  ;;  %v1970_v0 = vadd.f32 %v6132_v63, %v5437_v15  ;;  %v5822_v63 = vld [vmem:[%s6000_s5 + $0xa8] ss:$16 sps:$4 sm:$0xff]  }
 0xc92   :  { %2723 = vmatpush1.bf16.msra.mxu0 %v5199_v46  ;;  %2764 = vmatpush1.bf16.msra.mxu1 %v5204_v17 }
 0xc93   :  { %2724 = vmatprep.subr.bf16.mxu0 %v5211_v5  ;;  %2765 = vmatprep.subr.bf16.mxu1 %v5216_v6 }
 0xc96   :  { %2725 = vmatpush1.bf16.msra.mxu0 %v5221_v7  ;;  %2766 = vmatpush1.bf16.msra.mxu1 %v5226_v10 }
 0xc97   :  { %2726 = vmatprep.subr.bf16.mxu0 %v5233_v19  ;;  %2767 = vmatprep.subr.bf16.mxu1 %v5238_v24 }
 0xc9a   :  { %2727 = vmatpush1.bf16.msra.mxu0 %v5247_v8  ;;  %2768 = vmatpush1.bf16.msra.mxu1 %v5252_v34 }
 0xc9b   :  { %2728 = vmatprep.subr.bf16.mxu0 %v5259_v9  ;;  %2769 = vmatprep.subr.bf16.mxu1 %v5264_v20 }
 0xc9e   :  { %2729 = vmatpush1.bf16.msra.mxu0 %v5269_v62  ;;  %2770 = vmatpush1.bf16.msra.mxu1 %v5274_v16 }
 0xc9f   :  { %2730 = vmatprep.subr.bf16.mxu0 %v5281_v12  ;;  %2771 = vmatprep.subr.bf16.mxu1 %v5286_v27 }
 0xca2   :  { %2731 = vmatpush1.bf16.msra.mxu0 %v5293_v41  ;;  %2772 = vmatpush1.bf16.msra.mxu1 %v5298_v2 }
 0xca3   :  { %2829 = vmatprep.subr.bf16.mxu0 %v5661_v39  ;;  %2870 = vmatprep.subr.bf16.mxu1 %v5667_v32 }
 0xd58   :  { %v2637_v3 = vpop.f32.mrb[80].mxu0  ;;  %v2678_v4 = vpop.f32.mrb[80].mxu1 }
 0xd59   :  { %v2685_v46 = vadd.f32 %v2637_v3, %v1895_v56  ;;  %v2687_v17 = vadd.f32 %v2678_v4, %v1968_v59  ;;  %v2639_v5 = vpop.f32.mrb[81].mxu0  ;;  %v2680_v6 = vpop.f32.mrb[81].mxu1  ;;  %v5792_v56 = vld [vmem:[%s6000_s5 + $0x80] ss:$16 sps:$4 sm:$0xff]   ;;  %v5804_v59 = vld [vmem:[%s6000_s5 + $0xa4] ss:$16 sps:$4 sm:$0xff]  }
 0xd5a   :  { %v2686_v7 = vadd.f32 %v2639_v5, %v1897_v61  ;;  %v2688_v10 = vadd.f32 %v2680_v6, %v1970_v0  ;;  %v2641_v19 = vpop.f32.mrb[82].mxu0  ;;  %v2682_v24 = vpop.f32.mrb[82].mxu1  ;;  %v5816_v61 = vld [vmem:[%s6000_s5 + $0xa0] ss:$16 sps:$4 sm:$0xff]   ;;  %v5828_v0 = vld [vmem:[%s6000_s5 + $0xc4] ss:$16 sps:$4 sm:$0xff]  }
 0xd5b   :  { %v3355_v8 = vmul.f32 -1.442695, %v2685_v46  ;;  %v2642_v34 = vpop.f32.mrb[83].mxu0  ;;  %v2683_v9 = vpop.f32.mrb[83].mxu1  ;;  %v5834_v3 = vld [vmem:[%s6000_s5 + $0xcc] ss:$16 sps:$4 sm:$0xff]  }
 0xd5c   :  { %v3356_v20 = vmul.f32 -1.442695, %v2686_v7  ;;  %v3357_v62 = vmul.f32 -1.442695, %v2688_v10  ;;  %v5840_v4 = vld [vmem:[%s6000_s5 + $0xc0] ss:$16 sps:$4 sm:$0xff]  }
 0xd5d   :  { %3827 = vpow2.f32 %v3355_v8  ;;  %v5846_v46 = vld [vmem:[%s6000_s5 + $0xc8] ss:$16 sps:$4 sm:$0xff]   ;;  %v5858_v5 = vld [vmem:[%s6000_s5 + $0xec] ss:$16 sps:$4 sm:$0xff]   ;;  %v5864_v6 = vld [vmem:[%s6000_s5 + $0xe0] ss:$16 sps:$4 sm:$0xff]  }
 0xd5e   :  { %3829 = vpow2.f32 %v3356_v20  ;;  %v5870_v7 = vld [vmem:[%s6000_s5 + $0xe8] ss:$16 sps:$4 sm:$0xff]   ;;  %v6135_v24 = vld [vmem:[#allocation24_spill] sm:$0xff]  ;;  %v6137_v20 = vld [vmem:[#allocation26_spill] sm:$0xff] }
 0xd5f   :  { %3831 = vpow2.f32 %v3357_v62  ;;  %v6134_v10 = vld [vmem:[#allocation23_spill] sm:$0xff]  ;;  %v1972_v8 = vadd.f32 %v6135_v24, %v5425_v45  ;;  %v6136_v34 = vld [vmem:[#allocation25_spill] sm:$0xff]  ;;  %v1974_v62 = vadd.f32 %v6137_v20, %v5437_v15 }
 0xd60   :  { %3833 = vtanh.f32 %v2687_v17  ;;  %v5852_v17 = vld [vmem:[%s6000_s5 + $0xe4] ss:$16 sps:$4 sm:$0xff]   ;;  %v1899_v19 = vadd.f32 %v6134_v10, %v5421_v29  ;;  %v1901_v9 = vadd.f32 %v6136_v34, %v5433_v37 }
 0xd67   :  { %v3828_v16 = vpop.eup %3827 }
 0xd68   :  { %v3830_v12 = vpop.eup %3829  ;;  %v2692_v27 = vadd.f32 1.0, %v3828_v16 }
 0xd69   :  { %v2698_v41 = vadd.f32 1.0, %v3830_v12  ;;  %v3832_v2 = vpop.eup %3831 }
 0xd6a   :  { %3835 = vrcp.f32 %v2692_v27  ;;  %v3834_v43 = vpop.eup %3833  ;;  %v2705_v22 = vadd.f32 1.0, %v3832_v2 }
 0xd6b   :  { %3837 = vrcp.f32 %v2698_v41 }
 0xd6c   :  { %3839 = vrcp.f32 %v2705_v22 }
 0xd74   :  { %v3836_v28 = vpop.eup %3835 }
 0xd75   :  { %v3838_v35 = vpop.eup %3837  ;;  %v2709_v50 = vmul.f32 %v3836_v28, %v3834_v43 }
 0xd76   :  { %v2708_v55 = vmul.f32 %v3838_v35, %v5617_v48  ;;  %v3840_v30 = vpop.eup %3839 }
 0xd78   :  { %v2710_v51 = vadd.f32 %v2709_v50, %v2708_v55 }
 0xd7a   :  { %3841 = vtanh.f32 %v2710_v51  ;;  %v5682_v18 = vsel %vm1228_vm13, %v2710_v51, %v5617_v48  ;;  %v5750_v48 = vld [vmem:[%s6000_s5 + $0x48] ss:$16 sps:$4 sm:$0xff]  }
 0xd84   :  { %v3842_v11 = vpop.eup %3841 }
 0xd85   :  { %v2712_v44 = vmul.f32 %v3842_v11, %v3840_v30 }
 0xd87   :  { %v5687_v31 = vsel %vm1228_vm13, %v2712_v44, %v5622_v25  ;;  %v5774_v25 = vld [vmem:[%s6000_s5 + $0x68] ss:$16 sps:$4 sm:$0xff]  }
 0xd88   :  { %v2715_v33 = vpack.c.bf16 %v5687_v31, %v5687_v31 }
 0xd8a   :  { %2749 = vmatmul.mubr.bf16.vlgmr.msra.gmra.mrb[84].mxu0 %v2715_v33  ;;  %2790 = vmatmul.mubr.bf16.vlgmr.msra.gmra.mrb[84].mxu1 %v2715_v33 }
 0xd8b   :  { %2830 = vmatpush1.bf16.msra.mxu0 %v5694_v38  ;;  %2871 = vmatpush1.bf16.msra.mxu1 %v5700_v52 }
 0xd8c   :  { %2831 = vmatprep.subr.bf16.mxu0 %v5706_v40  ;;  %2872 = vmatprep.subr.bf16.mxu1 %v5712_v47 }
 0xd8d   :  { %2861 = vmatprep.mubr.bf16.mxu0 %v6057_v13  ;;  %2902 = vmatprep.mubr.bf16.mxu1 %v6057_v13 }
 0xd8f   :  { %2832 = vmatpush1.bf16.msra.mxu0 %v5720_v14  ;;  %2873 = vmatpush1.bf16.msra.mxu1 %v5726_v36 }
 0xd90   :  { %2833 = vmatprep.subr.bf16.mxu0 %v5732_v23  ;;  %2874 = vmatprep.subr.bf16.mxu1 %v5738_v1 }
 0xd93   :  { %2834 = vmatpush1.bf16.msra.mxu0 %v5744_v54  ;;  %2875 = vmatpush1.bf16.msra.mxu1 %v5750_v48 }
 0xd94   :  { %2835 = vmatprep.subr.bf16.mxu0 %v5756_v21  ;;  %2876 = vmatprep.subr.bf16.mxu1 %v5762_v42 }
 0xd97   :  { %2836 = vmatpush1.bf16.msra.mxu0 %v5768_v57  ;;  %2877 = vmatpush1.bf16.msra.mxu1 %v5774_v25 }
 0xd98   :  { %2837 = vmatprep.subr.bf16.mxu0 %v5780_v49  ;;  %2878 = vmatprep.subr.bf16.mxu1 %v5786_v53 }
 0xd9b   :  { %2838 = vmatpush1.bf16.msra.mxu0 %v5792_v56  ;;  %2879 = vmatpush1.bf16.msra.mxu1 %v5798_v58 }
 0xd9c   :  { %2839 = vmatprep.subr.bf16.mxu0 %v5804_v59  ;;  %2880 = vmatprep.subr.bf16.mxu1 %v5810_v60 }
 0xd9f   :  { %2840 = vmatpush1.bf16.msra.mxu0 %v5816_v61  ;;  %2881 = vmatpush1.bf16.msra.mxu1 %v5822_v63 }
 0xda0   :  { %2841 = vmatprep.subr.bf16.mxu0 %v5828_v0  ;;  %2882 = vmatprep.subr.bf16.mxu1 %v5834_v3 }
 0xda3   :  { %2842 = vmatpush1.bf16.msra.mxu0 %v5840_v4  ;;  %2883 = vmatpush1.bf16.msra.mxu1 %v5846_v46 }
 0xda4   :  { %2843 = vmatprep.subr.bf16.mxu0 %v5852_v17  ;;  %2884 = vmatprep.subr.bf16.mxu1 %v5858_v5 }
 0xda7   :  { %2844 = vmatpush1.bf16.msra.mxu0 %v5864_v6  ;;  %2885 = vmatpush1.bf16.msra.mxu1 %v5870_v7 }
 0xda8   :  { %2942 = vmatprep.subr.bf16.mxu0 %v5661_v39  ;;  %2983 = vmatprep.subr.bf16.mxu1 %v5667_v32 }
 0xe5d   :  { %v2750_v16 = vpop.f32.mrb[84].mxu0  ;;  %v2791_v12 = vpop.f32.mrb[84].mxu1 }
 0xe5e   :  { %v2798_v27 = vadd.f32 %v2750_v16, %v1899_v19  ;;  %v2800_v41 = vadd.f32 %v2791_v12, %v1972_v8  ;;  %v2752_v2 = vpop.f32.mrb[85].mxu0  ;;  %v2793_v39 = vpop.f32.mrb[85].mxu1  ;;  %v6145_v16 = vld [vmem:[#allocation34_spill] sm:$0xff] }
 0xe5f   :  { %v2799_v43 = vadd.f32 %v2752_v2, %v1901_v9  ;;  %v2801_v32 = vadd.f32 %v2793_v39, %v1974_v62  ;;  %v2754_v28 = vpop.f32.mrb[86].mxu0  ;;  %v2795_v35 = vpop.f32.mrb[86].mxu1 }
 0xe60   :  { %v3358_v50 = vmul.f32 -1.442695, %v2798_v27  ;;  %v2755_v22 = vpop.f32.mrb[87].mxu0  ;;  %v2796_v55 = vpop.f32.mrb[87].mxu1 }
 0xe61   :  { %v3359_v51 = vmul.f32 -1.442695, %v2799_v43  ;;  %v3360_v26 = vmul.f32 -1.442695, %v2801_v32 }
 0xe62   :  { %3843 = vpow2.f32 %v3358_v50 }
 0xe63   :  { %3845 = vpow2.f32 %v3359_v51 }
 0xe64   :  { %3847 = vpow2.f32 %v3360_v26 }
 0xe65   :  { %3849 = vtanh.f32 %v2800_v41 }
 0xe6c   :  { %v3844_v30 = vpop.eup %3843 }
 0xe6d   :  { %v3846_v11 = vpop.eup %3845  ;;  %v2805_v44 = vadd.f32 1.0, %v3844_v30 }
 0xe6e   :  { %v2811_v33 = vadd.f32 1.0, %v3846_v11  ;;  %v3848_v10 = vpop.eup %3847  ;;  %v3627_v11 = vld [vmem:[%s6002_s8] sm:$0xff]  }
 0xe6f   :  { %3851 = vrcp.f32 %v2805_v44  ;;  %v3850_v19 = vpop.eup %3849  ;;  %v2818_v9 = vadd.f32 1.0, %v3848_v10  ;;  %v3962_v44 = vmov 0.0   ;;  %v3629_v10 = vld [vmem:[%s6002_s8 + $0x10] sm:$0xff]  }
 0xe70   :  { %3853 = vrcp.f32 %v2811_v33  ;;  %v3628_v33 = vld [vmem:[%s6002_s8 + $0x8] sm:$0xff]  }
 0xe71   :  { %3855 = vrcp.f32 %v2818_v9  ;;  %v3634_v9 = vld [vmem:[%s6002_s8 + $0x38] sm:$0xff]  }
 0xe79   :  { %v3852_v24 = vpop.eup %3851 }
 0xe7a   :  { %v3854_v8 = vpop.eup %3853  ;;  %v2822_v34 = vmul.f32 %v3852_v24, %v3850_v19  ;;  %v3630_v19 = vld [vmem:[%s6002_s8 + $0x18] sm:$0xff]   ;;  %v3631_v24 = vld [vmem:[%s6002_s8 + $0x20] sm:$0xff]  }
 0xe7b   :  { %v2821_v20 = vmul.f32 %v3854_v8, %v5682_v18  ;;  %v3856_v27 = vpop.eup %3855  ;;  %v3632_v8 = vld [vmem:[%s6002_s8 + $0x28] sm:$0xff]  }
 0xe7d   :  { %v2823_v62 = vadd.f32 %v2822_v34, %v2821_v20  ;;  %v3633_v34 = vld [vmem:[%s6002_s8 + $0x30] sm:$0xff]   ;;  %v6144_v20 = vld [vmem:[#allocation33_spill] sm:$0xff] }
 0xe7f   :  { %3857 = vtanh.f32 %v2823_v62  ;;  %v5887_v12 = vsel %vm1347_vm14, %v2823_v62, %v5682_v18  ;;  %v1909_v62 = vadd.f32 %v6144_v20, %v5421_v29 }
 0xe89   :  { %v3858_v41 = vpop.eup %3857 }
 0xe8a   :  { %v2825_v2 = vmul.f32 %v3858_v41, %v3856_v27  ;;  %v6146_v27 = vld [vmem:[#allocation4_spill] sm:$0xff] }
 0xe8b   :  { %v1911_v41 = vadd.f32 %v6146_v27, %v5433_v37 }
 0xe8c   :  { %v5892_v39 = vsel %vm1347_vm14, %v2825_v2, %v5687_v31  ;;  %v6140_v31 = vld [vmem:[#allocation30_spill] sm:$0xff]  ;;  %v6147_v2 = vld [vmem:[#allocation35_spill] sm:$0xff] }
 0xe8d   :  { %v2828_v43 = vpack.c.bf16 %v5892_v39, %v5892_v39 }
 0xe8f   :  { %2862 = vmatmul.mubr.bf16.vlgmr.msra.gmra.mrb[88].mxu0 %v2828_v43  ;;  %2903 = vmatmul.mubr.bf16.vlgmr.msra.gmra.mrb[88].mxu1 %v2828_v43 }
 0xe90   :  { %2943 = vmatpush1.bf16.msra.mxu0 %v5694_v38  ;;  %2984 = vmatpush1.bf16.msra.mxu1 %v5700_v52  ;;  %v1978_v38 = vadd.f32 %v6140_v31, %v5425_v45  ;;  %v6141_v52 = vld [vmem:[#allocation31_spill] sm:$0xff] }
 0xe91   :  { %2944 = vmatprep.subr.bf16.mxu0 %v5706_v40  ;;  %2985 = vmatprep.subr.bf16.mxu1 %v5712_v47  ;;  %v1907_v40 = vadd.f32 %v6141_v52, %v5433_v37  ;;  %v6142_v47 = vld [vmem:[#allocation32_spill] sm:$0xff] }
 0xe92   :  { %2974 = vmatprep.mubr.bf16.mxu0 %v6057_v13  ;;  %3015 = vmatprep.mubr.bf16.mxu1 %v6057_v13  ;;  %v6139_v13 = vld [vmem:[#allocation29_spill] sm:$0xff] }
 0xe93   :  { %v1905_v18 = vadd.f32 %v6139_v13, %v5421_v29 }
 0xe94   :  { %2945 = vmatpush1.bf16.msra.mxu0 %v5720_v14  ;;  %2986 = vmatpush1.bf16.msra.mxu1 %v5726_v36  ;;  %v1980_v14 = vadd.f32 %v6142_v47, %v5437_v15 }
 0xe95   :  { %2946 = vmatprep.subr.bf16.mxu0 %v5732_v23  ;;  %2987 = vmatprep.subr.bf16.mxu1 %v5738_v1 }
 0xe98   :  { %2947 = vmatpush1.bf16.msra.mxu0 %v5744_v54  ;;  %2988 = vmatpush1.bf16.msra.mxu1 %v5750_v48 }
 0xe99   :  { %2948 = vmatprep.subr.bf16.mxu0 %v5756_v21  ;;  %2989 = vmatprep.subr.bf16.mxu1 %v5762_v42 }
 0xe9c   :  { %2949 = vmatpush1.bf16.msra.mxu0 %v5768_v57  ;;  %2990 = vmatpush1.bf16.msra.mxu1 %v5774_v25 }
 0xe9d   :  { %2950 = vmatprep.subr.bf16.mxu0 %v5780_v49  ;;  %2991 = vmatprep.subr.bf16.mxu1 %v5786_v53 }
 0xea0   :  { %2951 = vmatpush1.bf16.msra.mxu0 %v5792_v56  ;;  %2992 = vmatpush1.bf16.msra.mxu1 %v5798_v58 }
 0xea1   :  { %2952 = vmatprep.subr.bf16.mxu0 %v5804_v59  ;;  %2993 = vmatprep.subr.bf16.mxu1 %v5810_v60 }
 0xea4   :  { %2953 = vmatpush1.bf16.msra.mxu0 %v5816_v61  ;;  %2994 = vmatpush1.bf16.msra.mxu1 %v5822_v63 }
 0xea5   :  { %2954 = vmatprep.subr.bf16.mxu0 %v5828_v0  ;;  %2995 = vmatprep.subr.bf16.mxu1 %v5834_v3 }
 0xea8   :  { %2955 = vmatpush1.bf16.msra.mxu0 %v5840_v4  ;;  %2996 = vmatpush1.bf16.msra.mxu1 %v5846_v46 }
 0xea9   :  { %2956 = vmatprep.subr.bf16.mxu0 %v5852_v17  ;;  %2997 = vmatprep.subr.bf16.mxu1 %v5858_v5 }
 0xeac   :  { %2957 = vmatpush1.bf16.msra.mxu0 %v5864_v6  ;;  %2998 = vmatpush1.bf16.msra.mxu1 %v5870_v7 }
 0xead   :  { %3404 = vmatprep.subr.bf16.mxu0 %v3962_v44 }
 0xf62   :  { %v2863_v36 = vpop.f32.mrb[88].mxu0  ;;  %v2904_v23 = vpop.f32.mrb[88].mxu1 }
 0xf63   :  { %v2911_v1 = vadd.f32 %v2863_v36, %v1905_v18  ;;  %v2913_v54 = vadd.f32 %v2904_v23, %v1978_v38  ;;  %v2865_v48 = vpop.f32.mrb[89].mxu0  ;;  %v2906_v21 = vpop.f32.mrb[89].mxu1 }
 0xf64   :  { %v2912_v42 = vadd.f32 %v2865_v48, %v1907_v40  ;;  %v2914_v57 = vadd.f32 %v2906_v21, %v1980_v14  ;;  %v2867_v25 = vpop.f32.mrb[90].mxu0  ;;  %v2908_v49 = vpop.f32.mrb[90].mxu1 }
 0xf65   :  { %v3361_v53 = vmul.f32 -1.442695, %v2911_v1  ;;  %v2868_v56 = vpop.f32.mrb[91].mxu0  ;;  %v2909_v58 = vpop.f32.mrb[91].mxu1 }
 0xf66   :  { %v3362_v59 = vmul.f32 -1.442695, %v2912_v42  ;;  %v3363_v60 = vmul.f32 -1.442695, %v2914_v57 }
 0xf67   :  { %3859 = vpow2.f32 %v3361_v53 }
 0xf68   :  { %3861 = vpow2.f32 %v3362_v59 }
 0xf69   :  { %3863 = vpow2.f32 %v3363_v60 }
 0xf6a   :  { %3865 = vtanh.f32 %v2913_v54 }
 0xf71   :  { %v3860_v61 = vpop.eup %3859 }
 0xf72   :  { %v3862_v63 = vpop.eup %3861  ;;  %v2918_v0 = vadd.f32 1.0, %v3860_v61 }
 0xf73   :  { %v2924_v3 = vadd.f32 1.0, %v3862_v63  ;;  %v3864_v4 = vpop.eup %3863 }
 0xf74   :  { %3867 = vrcp.f32 %v2918_v0  ;;  %v3866_v46 = vpop.eup %3865  ;;  %v2931_v7 = vadd.f32 1.0, %v3864_v4 }
 0xf75   :  { %3869 = vrcp.f32 %v2924_v3 }
 0xf76   :  { %3871 = vrcp.f32 %v2931_v7 }
 0xf7e   :  { %v3868_v17 = vpop.eup %3867 }
 0xf7f   :  { %v3870_v5 = vpop.eup %3869  ;;  %v2935_v6 = vmul.f32 %v3868_v17, %v3866_v46  ;;  %v3367_v46 = vld [vmem:[%s6004_s9] ss:$0 sm:$0xff] }
 0xf80   :  { %v2934_v32 = vmul.f32 %v3870_v5, %v5887_v12  ;;  %v3872_v22 = vpop.eup %3871 }
 0xf82   :  { %v2936_v28 = vadd.f32 %v2935_v6, %v2934_v32 }
 0xf84   :  { %3873 = vtanh.f32 %v2936_v28  ;;  %v5940_v50 = vsel %vm1466_vm15, %v2936_v28, %v5887_v12  ;;  %v1982_v12 = vadd.f32 %v6145_v16, %v5425_v45 }
 0xf8e   :  { %v3874_v55 = vpop.eup %3873 }
 0xf8f   :  { %v2938_v51 = vmul.f32 %v3874_v55, %v3872_v22 }
 0xf91   :  { %v5945_v26 = vsel %vm1466_vm15, %v2938_v51, %v5892_v39  ;;  %v1984_v39 = vadd.f32 %v6147_v2, %v5437_v15 }
 0xf92   :  { %v2941_v30 = vpack.c.bf16 %v5945_v26, %v5945_v26 }
 0xf94   :  { %2975 = vmatmul.mubr.bf16.vlgmr.msra.gmra.mrb[92].mxu0 %v2941_v30  ;;  %3016 = vmatmul.mubr.bf16.vlgmr.msra.gmra.mrb[92].mxu1 %v2941_v30 }
 0xf95   :  { %3405 = vmatpush3.bf16.msra.mxu0 %v3627_v11  ;;  %3420 = vmatprep.mubr.msk.bf16.mxu0 %vm3963_vm3, %v3962_v44 }
 0xf96   :  { %3406 = vmatprep.subr.bf16.mxu0 %v3962_v44 }
 0xf99   :  { %3407 = vmatpush3.bf16.msra.mxu0 %v3628_v33 }
 0xf9a   :  { %3408 = vmatprep.subr.bf16.mxu0 %v3962_v44 }
 0xf9d   :  { %3409 = vmatpush3.bf16.msra.mxu0 %v3629_v10 }
 0xf9e   :  { %3410 = vmatprep.subr.bf16.mxu0 %v3962_v44 }
 0xfa1   :  { %3411 = vmatpush3.bf16.msra.mxu0 %v3630_v19 }
 0xfa2   :  { %3412 = vmatprep.subr.bf16.mxu0 %v3962_v44 }
 0xfa5   :  { %3413 = vmatpush3.bf16.msra.mxu0 %v3631_v24 }
 0xfa6   :  { %3414 = vmatprep.subr.bf16.mxu0 %v3962_v44 }
 0xfa9   :  { %3415 = vmatpush3.bf16.msra.mxu0 %v3632_v8 }
 0xfaa   :  { %3416 = vmatprep.subr.bf16.mxu0 %v3962_v44 }
 0xfad   :  { %3417 = vmatpush3.bf16.msra.mxu0 %v3633_v34 }
 0xfae   :  { %3418 = vmatprep.subr.bf16.mxu0 %v3962_v44 }
 0xfb1   :  { %3419 = vmatpush3.bf16.msra.mxu0 %v3634_v9 }
0x1067   :  { %v2976_v43 = vpop.f32.mrb[92].mxu0  ;;  %v3017_v13 = vpop.f32.mrb[92].mxu1 }
0x1068   :  { %v3024_v18 = vadd.f32 %v2976_v43, %v1909_v62  ;;  %v3026_v31 = vadd.f32 %v3017_v13, %v1982_v12  ;;  %v2978_v38 = vpop.f32.mrb[93].mxu0  ;;  %v3019_v52 = vpop.f32.mrb[93].mxu1 }
0x1069   :  { %v3025_v40 = vadd.f32 %v2978_v38, %v1911_v41  ;;  %v3027_v47 = vadd.f32 %v3019_v52, %v1984_v39  ;;  %v2980_v14 = vpop.f32.mrb[94].mxu0  ;;  %v3021_v36 = vpop.f32.mrb[94].mxu1 }
0x106a   :  { %v3364_v29 = vmul.f32 -1.442695, %v3024_v18  ;;  %v2981_v23 = vpop.f32.mrb[95].mxu0  ;;  %v3022_v1 = vpop.f32.mrb[95].mxu1 }
0x106b   :  { %v3365_v45 = vmul.f32 -1.442695, %v3025_v40  ;;  %v3366_v37 = vmul.f32 -1.442695, %v3027_v47 }
0x106c   :  { %3875 = vpow2.f32 %v3364_v29 }
0x106d   :  { %3877 = vpow2.f32 %v3365_v45 }
0x106e   :  { %3879 = vpow2.f32 %v3366_v37 }
0x106f   :  { %3881 = vtanh.f32 %v3026_v31 }
0x1076   :  { %v3876_v54 = vpop.eup %3875 }
0x1077   :  { %v3878_v48 = vpop.eup %3877  ;;  %v3031_v15 = vadd.f32 1.0, %v3876_v54 }
0x1078   :  { %v3037_v21 = vadd.f32 1.0, %v3878_v48  ;;  %v3880_v42 = vpop.eup %3879 }
0x1079   :  { %3883 = vrcp.f32 %v3031_v15  ;;  %v3882_v57 = vpop.eup %3881  ;;  %v3044_v56 = vadd.f32 1.0, %v3880_v42 }
0x107a   :  { %3885 = vrcp.f32 %v3037_v21 }
0x107b   :  { %3887 = vrcp.f32 %v3044_v56 }
0x1083   :  { %v3884_v25 = vpop.eup %3883 }
0x1084   :  { %v3886_v49 = vpop.eup %3885  ;;  %v3048_v53 = vmul.f32 %v3884_v25, %v3882_v57 }
0x1085   :  { %v3047_v58 = vmul.f32 %v3886_v49, %v5940_v50  ;;  %v3888_v60 = vpop.eup %3887 }
0x1087   :  { %v3049_v59 = vadd.f32 %v3048_v53, %v3047_v58 }
0x1089   :  { %3889 = vtanh.f32 %v3049_v59 }
0x1093   :  { %v3890_v61 = vpop.eup %3889 }
0x1094   :  { %v3051_v63 = vmul.f32 %v3890_v61, %v3888_v60 }
0x1096   :  { %v3052_v3 = vsel %vm1585_vm2, %v3051_v63, %v5945_v26 }
0x1097   :  { %3059 = vst [vmem:[%s6003_s10] sm:$0xff] %v3052_v3  ;;  %v3060_v4 = vpack.c.bf16 %v3052_v3, %v3052_v3 }
0x1099   :  { %3421 = vmatmul.mubr.bf16.vlgmr.msra.gmra.mrb[96].mxu0 %v3060_v4 }
0x116c   :  { %v3166_v17 = vpop.f32.mrb[96].mxu0 }
0x116d   :  { %v3167_v5 = vadd.f32 %v3367_v46, %v3166_v17  ;;  %v3422_v6 = vpop.f32.mrb[97].mxu0 }
0x116e   :  { %v3169_v7 = vpop.f32.mrb[98].mxu0 }
0x116f   :  { %v3376_v32 = vmul.f32 -1.442695, %v3167_v5  ;;  %v3423_v28 = vpop.f32.mrb[99].mxu0 }
0x1171   :  { %3891 = vpow2.f32 %v3376_v32 }
0x117b   :  { %v3892_v35 = vpop.eup %3891 }
0x117c   :  { %v3175_v50 = vadd.f32 1.0, %v3892_v35 }
0x117e   :  { %3893 = vrcp.f32 %v3175_v50 }
0x1188   :  { %v3894_v22 = vpop.eup %3893 }
0x1189   :  { %3178 = vst [vmem:[%s6005_s11] sm:$0xff] %v3894_v22 }

</bundles_post_ra>
